<compile_context>
chip_gen: v7x
topology: tpu7x:2x2x1
jax: 0.10.0
libtpu: 0.0.40
codegen_flags: <defaults>
</compile_context>

<pallas_src>
import functools

import jax
import jax.numpy as jnp
from jax.experimental import pallas as pl
from jax.experimental.pallas import tpu as pltpu

H = 51            # true hidden size (from nn.LSTMCell(1, 51))
HP = 128          # lane-padded hidden size (one full vreg lane group per gate)
G4 = 4 * HP       # padded gate width, packed order [i | f | o | g]
_GATE_SLOT = (0, 1, 3, 2)   # PyTorch gate order i,f,g,o -> packed slot


# ----------------------------- Pallas kernel --------------------------------
def _gates_to_hc(gates, c):
    # Packed gate order is [i | f | o | g]; every slice is 128-lane aligned.
    sig = jax.nn.sigmoid(gates[:, :3 * HP])       # single contiguous EUP region
    i_g = sig[:, 0 * HP:1 * HP]
    f_g = sig[:, 1 * HP:2 * HP]
    o_g = sig[:, 2 * HP:3 * HP]
    g_g = jnp.tanh(gates[:, 3 * HP:4 * HP])
    c_new = f_g * c + i_g * g_g
    h_new = o_g * jnp.tanh(c_new)
    return h_new, c_new


def seq_kernel(x_ref, wih1_ref, b1_ref, whh1_ref,
               wih2_ref, whh2_ref, b2_ref, wfb_ref, b1fut_ref,
               h2out_ref, *, n_obs, n_future):
    B = x_ref.shape[1]

    # Hoisted, loop-invariant precompute: input gates (incl. bias) for ALL
    # observed steps in one vectorized VPU op: (T,B,1)*(1,G4)+(1,G4) -> (T,B,G4).
    xg1_all = x_ref[...] * wih1_ref[...] + b1_ref[...]

    # Hoisted bias broadcasts (kept off the per-step serial chain).
    b2_b = jnp.broadcast_to(b2_ref[...], (B, G4))
    b1fut_b = jnp.broadcast_to(b1fut_ref[...], (B, G4))

    whh1 = whh1_ref[...]
    wih2 = wih2_ref[...]
    whh2 = whh2_ref[...]
    wfb = wfb_ref[...]

    h1 = jnp.zeros((B, HP), jnp.float32)
    c1 = jnp.zeros((B, HP), jnp.float32)
    h2 = jnp.zeros((B, HP), jnp.float32)
    c2 = jnp.zeros((B, HP), jnp.float32)

    # pre2 = h2 @ whh2 + b2, issued as soon as h2 exists so the h2-half of the
    # lstm2 gates runs under the next step's lstm1 work (off the serial chain).
    pre2 = b2_b                                   # initial h2 == 0

    # ---- observed phase (fully unrolled: n_obs is a compile-time constant) ----
    for t in range(n_obs):
        gates1 = xg1_all[t] + jnp.dot(h1, whh1,
                                      preferred_element_type=jnp.float32)
        h1, c1 = _gates_to_hc(gates1, c1)
        gates2 = jnp.dot(h1, wih2, preferred_element_type=jnp.float32) + pre2
        h2, c2 = _gates_to_hc(gates2, c2)
        h2out_ref[t] = h2
        pre2 = jnp.dot(h2, whh2, preferred_element_type=jnp.float32) + b2_b

    # ---- future phase: Linear(51,1) feedback folded into a rank-1 matmul on h2.
    if n_future > 0:
        fb1 = jnp.dot(h2, wfb, preferred_element_type=jnp.float32) + b1fut_b
        for i in range(n_future):
            gates1 = jnp.dot(h1, whh1, preferred_element_type=jnp.float32) + fb1
            h1, c1 = _gates_to_hc(gates1, c1)
            gates2 = jnp.dot(h1, wih2, preferred_element_type=jnp.float32) + pre2
            h2, c2 = _gates_to_hc(gates2, c2)
            h2out_ref[n_obs + i] = h2
            # Pre-issue next step's h2-dependent partials (dead on last iter; DCE'd).
            pre2 = jnp.dot(h2, whh2, preferred_element_type=jnp.float32) + b2_b
            fb1 = jnp.dot(h2, wfb, preferred_element_type=jnp.float32) + b1fut_b


# ------------------------------ wrapper --------------------------------------
def _full_spec(shape):
    nd = len(shape)
    return pl.BlockSpec(shape, lambda i, _nd=nd: (0,) * _nd)


def sequence_forward(x, params, future=0):
    """x: (B, T) float32  ->  (B, T + future) float32."""
    B, T = x.shape
    total = T + future
    x_tb = jnp.transpose(x).reshape(T, B, 1).astype(jnp.float32)

    packed = pack_params(params)
    operands = (x_tb,) + packed

    kernel = functools.partial(seq_kernel, n_obs=T, n_future=future)
    h2_hist = pl.pallas_call(
        kernel,
        out_shape=jax.ShapeDtypeStruct((total, B, HP), jnp.float32),
        grid=(1,),
        in_specs=[_full_spec(a.shape) for a in operands],
        out_specs=_full_spec((total, B, HP)),
        compiler_params=pltpu.CompilerParams(
            dimension_semantics=("arbitrary",)),
    )(*operands)

    # Deferred output projection: one vectorized op, off the recurrence.
    y_tb = (jnp.tensordot(h2_hist[..., :H], params["w_lin"][0], axes=([2], [0]))
            + params["b_lin"][0])                                   # (total, B)
    return jnp.transpose(y_tb)                                      # (B, total)


# ------------------------- parameter construction ----------------------------
def init_params(key):
    """Deterministic init matching PyTorch's U(-1/sqrt(H), 1/sqrt(H))."""
    bound = 1.0 / float(jnp.sqrt(jnp.float32(H)))
    keys = jax.random.split(key, 10)

    def u(k_, shape):
        return jax.random.uniform(k_, shape, jnp.float32, -bound, bound)

    return dict(
        w_ih1=u(keys[0], (4 * H, 1)),
        w_hh1=u(keys[1], (4 * H, H)),
        b_ih1=u(keys[2], (4 * H,)),
        b_hh1=u(keys[3], (4 * H,)),
        w_ih2=u(keys[4], (4 * H, H)),
        w_hh2=u(keys[5], (4 * H, H)),
        b_ih2=u(keys[6], (4 * H,)),
        b_hh2=u(keys[7], (4 * H,)),
        w_lin=u(keys[8], (1, H)),
        b_lin=u(keys[9], (1,)),
    )


def _pad_gate_cols(w_t, in_dim_p):
    """w_t: (in_dim, 4*H) with PyTorch gate blocks [i|f|g|o].
    Pad each gate H->HP lanes, rows->in_dim_p; reorder gates to [i|f|o|g]."""
    in_dim = w_t.shape[0]
    out = jnp.zeros((in_dim_p, G4), jnp.float32)
    for g in range(4):
        s = _GATE_SLOT[g]
        out = out.at[:in_dim, s * HP:s * HP + H].set(w_t[:, g * H:(g + 1) * H])
    return out


def _pad_gate_bias(b):
    out = jnp.zeros((1, G4), jnp.float32)
    for g in range(4):
        s = _GATE_SLOT[g]
        out = out.at[0, s * HP:s * HP + H].set(b[g * H:(g + 1) * H])
    return out


def pack_params(p):
    wih1 = _pad_ate = _pad_gate_cols(p["w_ih1"].T, 1)            # (1,  G4)
    whh1 = _pad_gate_cols(p["w_hh1"].T, HP)                      # (HP, G4)
    b1 = _pad_gate_bias(p["b_ih1"] + p["b_hh1"])                 # (1,  G4)
    wih2 = _pad_gate_cols(p["w_ih2"].T, HP)                      # (HP, G4)
    whh2 = _pad_gate_cols(p["w_hh2"].T, HP)                      # (HP, G4)
    b2 = _pad_gate_bias(p["b_ih2"] + p["b_hh2"])                 # (1,  G4)

    # Future-phase feedback folded into a rank-1 matmul on h2:
    #   output = h2 @ wlin^T + b_lin  ->  gates1 += h2 @ (wlin^T @ wih1) + b_lin*wih1
    # (padded lanes of wlin are zero so no leakage from padded h2 lanes).
    wlin_p = jnp.zeros((1, HP), jnp.float32).at[0, :H].set(p["w_lin"][0])
    w_fb = wlin_p.T @ wih1                                       # (HP, G4), rank-1
    b1fut = b1 + p["b_lin"][0] * wih1                            # (1, G4)

    return wih1, b1, whh1, wih2, whh2, b2, w_fb, b1fut


# --------------------------- pure-JAX reference -------------------------------
def reference_forward(x, p, future=0):
    B, T = x.shape

    def cell(x_t, h, c, w_ih, w_hh, b_ih, b_hh):
        gates = x_t @ w_ih.T + b_ih + h @ w_hh.T + b_hh
        i_g, f_g, g_g, o_g = jnp.split(gates, 4, axis=1)
        i_g = jax.nn.sigmoid(i_g)
        f_g = jax.nn.sigmoid(f_g)
        g_g = jnp.tanh(g_g)
        o_g = jax.nn.sigmoid(o_g)
        c = f_g * c + i_g * g_g
        h = o_g * jnp.tanh(c)
        return h, c

    h1 = c1 = h2 = c2 = jnp.zeros((B, H), jnp.float32)
    outs = []
    out = None
    for t in range(T):
        x_t = x[:, t:t + 1]
        h1, c1 = cell(x_t, h1, c1, p["w_ih1"], p["w_hh1"], p["b_ih1"], p["b_hh1"])
        h2, c2 = cell(h1, h2, c2, p["w_ih2"], p["w_hh2"], p["b_ih2"], p["b_hh2"])
        out = h2 @ p["w_lin"].T + p["b_lin"]
        outs.append(out)
    for _ in range(future):
        h1, c1 = cell(out, h1, c1, p["w_ih1"], p["w_hh1"], p["b_ih1"], p["b_hh1"])
        h2, c2 = cell(h1, h2, c2, p["w_ih2"], p["w_hh2"], p["b_ih2"], p["b_hh2"])
        out = h2 @ p["w_lin"].T + p["b_lin"]
        outs.append(out)
    return jnp.concatenate(outs, axis=1)   # (B, T+future)


# --------------------------------- main ---------------------------------------
if __name__ == "__main__":
    key = jax.random.PRNGKey(0)
    kp, kx = jax.random.split(key)
    params = init_params(kp)

    B, T, FUT = 4, 8, 4
    x = jax.random.normal(kx, (B, T), jnp.float32)

    y = sequence_forward(x, params, future=FUT)
    y = jax.block_until_ready(y)
    assert y.shape == (B, T + FUT), y.shape

    y_ref = reference_forward(x, params, future=FUT)
    max_err = float(jnp.max(jnp.abs(y - y_ref)))
    if max_err > 2e-2:  # loose: MXU default-precision f32 matmuls vs XLA reference
        raise AssertionError(f"mismatch vs pure-JAX reference: max abs err {max_err}")

    print("KERNEL_OK")
</pallas_src>

<mosaic_0001>
module attributes {stable_mosaic.version = 11 : i64} {
  func.func @seq_kernel(%arg0: i32, %arg1: memref<8x4x1xf32, #tpu.memory_space<vmem>>, %arg2: memref<1x512xf32, #tpu.memory_space<vmem>>, %arg3: memref<1x512xf32, #tpu.memory_space<vmem>>, %arg4: memref<128x512xf32, #tpu.memory_space<vmem>>, %arg5: memref<128x512xf32, #tpu.memory_space<vmem>>, %arg6: memref<128x512xf32, #tpu.memory_space<vmem>>, %arg7: memref<1x512xf32, #tpu.memory_space<vmem>>, %arg8: memref<128x512xf32, #tpu.memory_space<vmem>>, %arg9: memref<1x512xf32, #tpu.memory_space<vmem>>, %arg10: memref<12x4x128xf32, #tpu.memory_space<vmem>>) attributes {dimension_semantics = [#tpu.dimension_semantics<arbitrary>], iteration_bounds = array<i64: 1>, scalar_prefetch = 0 : i64, scratch_operands = 0 : i64, tpu.core_type = #tpu.core_type<tc>, window_params = [{pipeline_mode = #tpu.pipeline_mode<synchronous>, transform_indices = @transform_0, window_bounds = array<i64: 8, 4, 1>}, {pipeline_mode = #tpu.pipeline_mode<synchronous>, transform_indices = @transform_1, window_bounds = array<i64: 1, 512>}, {pipeline_mode = #tpu.pipeline_mode<synchronous>, transform_indices = @transform_2, window_bounds = array<i64: 1, 512>}, {pipeline_mode = #tpu.pipeline_mode<synchronous>, transform_indices = @transform_3, window_bounds = array<i64: 128, 512>}, {pipeline_mode = #tpu.pipeline_mode<synchronous>, transform_indices = @transform_4, window_bounds = array<i64: 128, 512>}, {pipeline_mode = #tpu.pipeline_mode<synchronous>, transform_indices = @transform_5, window_bounds = array<i64: 128, 512>}, {pipeline_mode = #tpu.pipeline_mode<synchronous>, transform_indices = @transform_6, window_bounds = array<i64: 1, 512>}, {pipeline_mode = #tpu.pipeline_mode<synchronous>, transform_indices = @transform_7, window_bounds = array<i64: 128, 512>}, {pipeline_mode = #tpu.pipeline_mode<synchronous>, transform_indices = @transform_8, window_bounds = array<i64: 1, 512>}, {pipeline_mode = #tpu.pipeline_mode<synchronous>, transform_indices = @transform_9, window_bounds = array<i64: 12, 4, 128>}]} {
    %c0 = arith.constant 0 : index
    %c0_0 = arith.constant 0 : index
    %c0_1 = arith.constant 0 : index
    %0 = vector.load %arg1[%c0, %c0_0, %c0_1] : memref<8x4x1xf32, #tpu.memory_space<vmem>>, vector<8x4x1xf32>
    %c0_2 = arith.constant 0 : index
    %c0_3 = arith.constant 0 : index
    %1 = vector.load %arg2[%c0_2, %c0_3] : memref<1x512xf32, #tpu.memory_space<vmem>>, vector<1x512xf32>
    %2 = vector.shape_cast %1 : vector<1x512xf32> to vector<1x1x512xf32>
    %3 = vector.broadcast %0 : vector<8x4x1xf32> to vector<8x4x512xf32>
    %4 = vector.broadcast %2 : vector<1x1x512xf32> to vector<8x4x512xf32>
    %5 = arith.mulf %3, %4 : vector<8x4x512xf32>
    %c0_4 = arith.constant 0 : index
    %c0_5 = arith.constant 0 : index
    %6 = vector.load %arg3[%c0_4, %c0_5] : memref<1x512xf32, #tpu.memory_space<vmem>>, vector<1x512xf32>
    %7 = vector.shape_cast %6 : vector<1x512xf32> to vector<1x1x512xf32>
    %8 = vector.broadcast %7 : vector<1x1x512xf32> to vector<8x4x512xf32>
    %9 = arith.addf %5, %8 : vector<8x4x512xf32>
    %c0_6 = arith.constant 0 : index
    %c0_7 = arith.constant 0 : index
    %10 = vector.load %arg7[%c0_6, %c0_7] : memref<1x512xf32, #tpu.memory_space<vmem>>, vector<1x512xf32>
    %11 = vector.shape_cast %10 : vector<1x512xf32> to vector<1x512xf32>
    %12 = vector.broadcast %11 : vector<1x512xf32> to vector<4x512xf32>
    %c0_8 = arith.constant 0 : index
    %c0_9 = arith.constant 0 : index
    %13 = vector.load %arg9[%c0_8, %c0_9] : memref<1x512xf32, #tpu.memory_space<vmem>>, vector<1x512xf32>
    %14 = vector.shape_cast %13 : vector<1x512xf32> to vector<1x512xf32>
    %15 = vector.broadcast %14 : vector<1x512xf32> to vector<4x512xf32>
    %c0_10 = arith.constant 0 : index
    %c0_11 = arith.constant 0 : index
    %16 = vector.load %arg4[%c0_10, %c0_11] : memref<128x512xf32, #tpu.memory_space<vmem>>, vector<128x512xf32>
    %c0_12 = arith.constant 0 : index
    %c0_13 = arith.constant 0 : index
    %17 = vector.load %arg5[%c0_12, %c0_13] : memref<128x512xf32, #tpu.memory_space<vmem>>, vector<128x512xf32>
    %c0_14 = arith.constant 0 : index
    %c0_15 = arith.constant 0 : index
    %18 = vector.load %arg6[%c0_14, %c0_15] : memref<128x512xf32, #tpu.memory_space<vmem>>, vector<128x512xf32>
    %c0_16 = arith.constant 0 : index
    %c0_17 = arith.constant 0 : index
    %19 = vector.load %arg8[%c0_16, %c0_17] : memref<128x512xf32, #tpu.memory_space<vmem>>, vector<128x512xf32>
    %cst = arith.constant 0.000000e+00 : f32
    %20 = vector.broadcast %cst : f32 to vector<4x128xf32>
    %cst_18 = arith.constant 0.000000e+00 : f32
    %21 = vector.broadcast %cst_18 : f32 to vector<4x128xf32>
    %cst_19 = arith.constant 0.000000e+00 : f32
    %22 = vector.broadcast %cst_19 : f32 to vector<4x128xf32>
    %23 = vector.extract_strided_slice %9 {offsets = [0, 0, 0], sizes = [1, 4, 512], strides = [1, 1, 1]} : vector<8x4x512xf32> to vector<1x4x512xf32>
    %24 = vector.shape_cast %23 : vector<1x4x512xf32> to vector<4x512xf32>
    %cst_20 = arith.constant dense<0.000000e+00> : vector<4x512xf32>
    %25 = tpu.matmul %20, %16, %cst_20 {dimension_numbers = #tpu.dot_dimension_numbers<[1], [0], [0], [1], [0, 0, 1, 1], [], []>} : vector<4x128xf32>, vector<128x512xf32>, vector<4x512xf32> -> vector<4x512xf32>
    %26 = arith.addf %24, %25 : vector<4x512xf32>
    %27 = vector.extract_strided_slice %26 {offsets = [0, 0], sizes = [4, 384], strides = [1, 1]} : vector<4x512xf32> to vector<4x384xf32>
    %28 = arith.negf %27 : vector<4x384xf32>
    %29 = math.exp %28 : vector<4x384xf32>
    %cst_21 = arith.constant 1.000000e+00 : f32
    %30 = vector.broadcast %cst_21 : f32 to vector<4x384xf32>
    %31 = arith.addf %30, %29 : vector<4x384xf32>
    %32 = arith.divf %30, %31 : vector<4x384xf32>
    %33 = vector.extract_strided_slice %32 {offsets = [0, 0], sizes = [4, 128], strides = [1, 1]} : vector<4x384xf32> to vector<4x128xf32>
    %34 = vector.extract_strided_slice %32 {offsets = [0, 128], sizes = [4, 128], strides = [1, 1]} : vector<4x384xf32> to vector<4x128xf32>
    %35 = vector.extract_strided_slice %32 {offsets = [0, 256], sizes = [4, 128], strides = [1, 1]} : vector<4x384xf32> to vector<4x128xf32>
    %36 = vector.extract_strided_slice %26 {offsets = [0, 384], sizes = [4, 128], strides = [1, 1]} : vector<4x512xf32> to vector<4x128xf32>
    %37 = math.tanh %36 : vector<4x128xf32>
    %38 = arith.mulf %34, %21 : vector<4x128xf32>
    %39 = arith.mulf %33, %37 : vector<4x128xf32>
    %40 = arith.addf %38, %39 : vector<4x128xf32>
    %41 = math.tanh %40 : vector<4x128xf32>
    %42 = arith.mulf %35, %41 : vector<4x128xf32>
    %cst_22 = arith.constant dense<0.000000e+00> : vector<4x512xf32>
    %43 = tpu.matmul %42, %17, %cst_22 {dimension_numbers = #tpu.dot_dimension_numbers<[1], [0], [0], [1], [0, 0, 1, 1], [], []>} : vector<4x128xf32>, vector<128x512xf32>, vector<4x512xf32> -> vector<4x512xf32>
    %44 = arith.addf %43, %12 : vector<4x512xf32>
    %45 = vector.extract_strided_slice %44 {offsets = [0, 0], sizes = [4, 384], strides = [1, 1]} : vector<4x512xf32> to vector<4x384xf32>
    %46 = arith.negf %45 : vector<4x384xf32>
    %47 = math.exp %46 : vector<4x384xf32>
    %cst_23 = arith.constant 1.000000e+00 : f32
    %48 = vector.broadcast %cst_23 : f32 to vector<4x384xf32>
    %49 = arith.addf %48, %47 : vector<4x384xf32>
    %50 = arith.divf %48, %49 : vector<4x384xf32>
    %51 = vector.extract_strided_slice %50 {offsets = [0, 0], sizes = [4, 128], strides = [1, 1]} : vector<4x384xf32> to vector<4x128xf32>
    %52 = vector.extract_strided_slice %50 {offsets = [0, 128], sizes = [4, 128], strides = [1, 1]} : vector<4x384xf32> to vector<4x128xf32>
    %53 = vector.extract_strided_slice %50 {offsets = [0, 256], sizes = [4, 128], strides = [1, 1]} : vector<4x384xf32> to vector<4x128xf32>
    %54 = vector.extract_strided_slice %44 {offsets = [0, 384], sizes = [4, 128], strides = [1, 1]} : vector<4x512xf32> to vector<4x128xf32>
    %55 = math.tanh %54 : vector<4x128xf32>
    %56 = arith.mulf %52, %22 : vector<4x128xf32>
    %57 = arith.mulf %51, %55 : vector<4x128xf32>
    %58 = arith.addf %56, %57 : vector<4x128xf32>
    %59 = math.tanh %58 : vector<4x128xf32>
    %60 = arith.mulf %53, %59 : vector<4x128xf32>
    %c0_24 = arith.constant 0 : index
    %c0_25 = arith.constant 0 : index
    %c0_26 = arith.constant 0 : index
    %61 = vector.load %arg10[%c0_24, %c0_25, %c0_26] : memref<12x4x128xf32, #tpu.memory_space<vmem>>, vector<1x4x128xf32>
    %62 = vector.shape_cast %61 : vector<1x4x128xf32> to vector<4x128xf32>
    %63 = vector.shape_cast %60 : vector<4x128xf32> to vector<1x4x128xf32>
    tpu.vector_store %arg10[%c0_24, %c0_25, %c0_26], %63 {strides = array<i32>} : memref<12x4x128xf32, #tpu.memory_space<vmem>>, vector<1x4x128xf32>,
    %cst_27 = arith.constant dense<0.000000e+00> : vector<4x512xf32>
    %64 = tpu.matmul %60, %18, %cst_27 {dimension_numbers = #tpu.dot_dimension_numbers<[1], [0], [0], [1], [0, 0, 1, 1], [], []>} : vector<4x128xf32>, vector<128x512xf32>, vector<4x512xf32> -> vector<4x512xf32>
    %65 = arith.addf %64, %12 : vector<4x512xf32>
    %66 = vector.extract_strided_slice %9 {offsets = [1, 0, 0], sizes = [1, 4, 512], strides = [1, 1, 1]} : vector<8x4x512xf32> to vector<1x4x512xf32>
    %67 = vector.shape_cast %66 : vector<1x4x512xf32> to vector<4x512xf32>
    %cst_28 = arith.constant dense<0.000000e+00> : vector<4x512xf32>
    %68 = tpu.matmul %42, %16, %cst_28 {dimension_numbers = #tpu.dot_dimension_numbers<[1], [0], [0], [1], [0, 0, 1, 1], [], []>} : vector<4x128xf32>, vector<128x512xf32>, vector<4x512xf32> -> vector<4x512xf32>
    %69 = arith.addf %67, %68 : vector<4x512xf32>
    %70 = vector.extract_strided_slice %69 {offsets = [0, 0], sizes = [4, 384], strides = [1, 1]} : vector<4x512xf32> to vector<4x384xf32>
    %71 = arith.negf %70 : vector<4x384xf32>
    %72 = math.exp %71 : vector<4x384xf32>
    %cst_29 = arith.constant 1.000000e+00 : f32
    %73 = vector.broadcast %cst_29 : f32 to vector<4x384xf32>
    %74 = arith.addf %73, %72 : vector<4x384xf32>
    %75 = arith.divf %73, %74 : vector<4x384xf32>
    %76 = vector.extract_strided_slice %75 {offsets = [0, 0], sizes = [4, 128], strides = [1, 1]} : vector<4x384xf32> to vector<4x128xf32>
    %77 = vector.extract_strided_slice %75 {offsets = [0, 128], sizes = [4, 128], strides = [1, 1]} : vector<4x384xf32> to vector<4x128xf32>
    %78 = vector.extract_strided_slice %75 {offsets = [0, 256], sizes = [4, 128], strides = [1, 1]} : vector<4x384xf32> to vector<4x128xf32>
    %79 = vector.extract_strided_slice %69 {offsets = [0, 384], sizes = [4, 128], strides = [1, 1]} : vector<4x512xf32> to vector<4x128xf32>
    %80 = math.tanh %79 : vector<4x128xf32>
    %81 = arith.mulf %77, %40 : vector<4x128xf32>
    %82 = arith.mulf %76, %80 : vector<4x128xf32>
    %83 = arith.addf %81, %82 : vector<4x128xf32>
    %84 = math.tanh %83 : vector<4x128xf32>
    %85 = arith.mulf %78, %84 : vector<4x128xf32>
    %cst_30 = arith.constant dense<0.000000e+00> : vector<4x512xf32>
    %86 = tpu.matmul %85, %17, %cst_30 {dimension_numbers = #tpu.dot_dimension_numbers<[1], [0], [0], [1], [0, 0, 1, 1], [], []>} : vector<4x128xf32>, vector<128x512xf32>, vector<4x512xf32> -> vector<4x512xf32>
    %87 = arith.addf %86, %65 : vector<4x512xf32>
    %88 = vector.extract_strided_slice %87 {offsets = [0, 0], sizes = [4, 384], strides = [1, 1]} : vector<4x512xf32> to vector<4x384xf32>
    %89 = arith.negf %88 : vector<4x384xf32>
    %90 = math.exp %89 : vector<4x384xf32>
    %cst_31 = arith.constant 1.000000e+00 : f32
    %91 = vector.broadcast %cst_31 : f32 to vector<4x384xf32>
    %92 = arith.addf %91, %90 : vector<4x384xf32>
    %93 = arith.divf %91, %92 : vector<4x384xf32>
    %94 = vector.extract_strided_slice %93 {offsets = [0, 0], sizes = [4, 128], strides = [1, 1]} : vector<4x384xf32> to vector<4x128xf32>
    %95 = vector.extract_strided_slice %93 {offsets = [0, 128], sizes = [4, 128], strides = [1, 1]} : vector<4x384xf32> to vector<4x128xf32>
    %96 = vector.extract_strided_slice %93 {offsets = [0, 256], sizes = [4, 128], strides = [1, 1]} : vector<4x384xf32> to vector<4x128xf32>
    %97 = vector.extract_strided_slice %87 {offsets = [0, 384], sizes = [4, 128], strides = [1, 1]} : vector<4x512xf32> to vector<4x128xf32>
    %98 = math.tanh %97 : vector<4x128xf32>
    %99 = arith.mulf %95, %58 : vector<4x128xf32>
    %100 = arith.mulf %94, %98 : vector<4x128xf32>
    %101 = arith.addf %99, %100 : vector<4x128xf32>
    %102 = math.tanh %101 : vector<4x128xf32>
    %103 = arith.mulf %96, %102 : vector<4x128xf32>
    %c1 = arith.constant 1 : index
    %c0_32 = arith.constant 0 : index
    %c0_33 = arith.constant 0 : index
    %104 = vector.load %arg10[%c1, %c0_32, %c0_33] : memref<12x4x128xf32, #tpu.memory_space<vmem>>, vector<1x4x128xf32>
    %105 = vector.shape_cast %104 : vector<1x4x128xf32> to vector<4x128xf32>
    %106 = vector.shape_cast %103 : vector<4x128xf32> to vector<1x4x128xf32>
    tpu.vector_store %arg10[%c1, %c0_32, %c0_33], %106 {strides = array<i32>} : memref<12x4x128xf32, #tpu.memory_space<vmem>>, vector<1x4x128xf32>,
    %cst_34 = arith.constant dense<0.000000e+00> : vector<4x512xf32>
    %107 = tpu.matmul %103, %18, %cst_34 {dimension_numbers = #tpu.dot_dimension_numbers<[1], [0], [0], [1], [0, 0, 1, 1], [], []>} : vector<4x128xf32>, vector<128x512xf32>, vector<4x512xf32> -> vector<4x512xf32>
    %108 = arith.addf %107, %12 : vector<4x512xf32>
    %109 = vector.extract_strided_slice %9 {offsets = [2, 0, 0], sizes = [1, 4, 512], strides = [1, 1, 1]} : vector<8x4x512xf32> to vector<1x4x512xf32>
    %110 = vector.shape_cast %109 : vector<1x4x512xf32> to vector<4x512xf32>
    %cst_35 = arith.constant dense<0.000000e+00> : vector<4x512xf32>
    %111 = tpu.matmul %85, %16, %cst_35 {dimension_numbers = #tpu.dot_dimension_numbers<[1], [0], [0], [1], [0, 0, 1, 1], [], []>} : vector<4x128xf32>, vector<128x512xf32>, vector<4x512xf32> -> vector<4x512xf32>
    %112 = arith.addf %110, %111 : vector<4x512xf32>
    %113 = vector.extract_strided_slice %112 {offsets = [0, 0], sizes = [4, 384], strides = [1, 1]} : vector<4x512xf32> to vector<4x384xf32>
    %114 = arith.negf %113 : vector<4x384xf32>
    %115 = math.exp %114 : vector<4x384xf32>
    %cst_36 = arith.constant 1.000000e+00 : f32
    %116 = vector.broadcast %cst_36 : f32 to vector<4x384xf32>
    %117 = arith.addf %116, %115 : vector<4x384xf32>
    %118 = arith.divf %116, %117 : vector<4x384xf32>
    %119 = vector.extract_strided_slice %118 {offsets = [0, 0], sizes = [4, 128], strides = [1, 1]} : vector<4x384xf32> to vector<4x128xf32>
    %120 = vector.extract_strided_slice %118 {offsets = [0, 128], sizes = [4, 128], strides = [1, 1]} : vector<4x384xf32> to vector<4x128xf32>
    %121 = vector.extract_strided_slice %118 {offsets = [0, 256], sizes = [4, 128], strides = [1, 1]} : vector<4x384xf32> to vector<4x128xf32>
    %122 = vector.extract_strided_slice %112 {offsets = [0, 384], sizes = [4, 128], strides = [1, 1]} : vector<4x512xf32> to vector<4x128xf32>
    %123 = math.tanh %122 : vector<4x128xf32>
    %124 = arith.mulf %120, %83 : vector<4x128xf32>
    %125 = arith.mulf %119, %123 : vector<4x128xf32>
    %126 = arith.addf %124, %125 : vector<4x128xf32>
    %127 = math.tanh %126 : vector<4x128xf32>
    %128 = arith.mulf %121, %127 : vector<4x128xf32>
    %cst_37 = arith.constant dense<0.000000e+00> : vector<4x512xf32>
    %129 = tpu.matmul %128, %17, %cst_37 {dimension_numbers = #tpu.dot_dimension_numbers<[1], [0], [0], [1], [0, 0, 1, 1], [], []>} : vector<4x128xf32>, vector<128x512xf32>, vector<4x512xf32> -> vector<4x512xf32>
    %130 = arith.addf %129, %108 : vector<4x512xf32>
    %131 = vector.extract_strided_slice %130 {offsets = [0, 0], sizes = [4, 384], strides = [1, 1]} : vector<4x512xf32> to vector<4x384xf32>
    %132 = arith.negf %131 : vector<4x384xf32>
    %133 = math.exp %132 : vector<4x384xf32>
    %cst_38 = arith.constant 1.000000e+00 : f32
    %134 = vector.broadcast %cst_38 : f32 to vector<4x384xf32>
    %135 = arith.addf %134, %133 : vector<4x384xf32>
    %136 = arith.divf %134, %135 : vector<4x384xf32>
    %137 = vector.extract_strided_slice %136 {offsets = [0, 0], sizes = [4, 128], strides = [1, 1]} : vector<4x384xf32> to vector<4x128xf32>
    %138 = vector.extract_strided_slice %136 {offsets = [0, 128], sizes = [4, 128], strides = [1, 1]} : vector<4x384xf32> to vector<4x128xf32>
    %139 = vector.extract_strided_slice %136 {offsets = [0, 256], sizes = [4, 128], strides = [1, 1]} : vector<4x384xf32> to vector<4x128xf32>
    %140 = vector.extract_strided_slice %130 {offsets = [0, 384], sizes = [4, 128], strides = [1, 1]} : vector<4x512xf32> to vector<4x128xf32>
    %141 = math.tanh %140 : vector<4x128xf32>
    %142 = arith.mulf %138, %101 : vector<4x128xf32>
    %143 = arith.mulf %137, %141 : vector<4x128xf32>
    %144 = arith.addf %142, %143 : vector<4x128xf32>
    %145 = math.tanh %144 : vector<4x128xf32>
    %146 = arith.mulf %139, %145 : vector<4x128xf32>
    %c2 = arith.constant 2 : index
    %c0_39 = arith.constant 0 : index
    %c0_40 = arith.constant 0 : index
    %147 = vector.load %arg10[%c2, %c0_39, %c0_40] : memref<12x4x128xf32, #tpu.memory_space<vmem>>, vector<1x4x128xf32>
    %148 = vector.shape_cast %147 : vector<1x4x128xf32> to vector<4x128xf32>
    %149 = vector.shape_cast %146 : vector<4x128xf32> to vector<1x4x128xf32>
    tpu.vector_store %arg10[%c2, %c0_39, %c0_40], %149 {strides = array<i32>} : memref<12x4x128xf32, #tpu.memory_space<vmem>>, vector<1x4x128xf32>,
    %cst_41 = arith.constant dense<0.000000e+00> : vector<4x512xf32>
    %150 = tpu.matmul %146, %18, %cst_41 {dimension_numbers = #tpu.dot_dimension_numbers<[1], [0], [0], [1], [0, 0, 1, 1], [], []>} : vector<4x128xf32>, vector<128x512xf32>, vector<4x512xf32> -> vector<4x512xf32>
    %151 = arith.addf %150, %12 : vector<4x512xf32>
    %152 = vector.extract_strided_slice %9 {offsets = [3, 0, 0], sizes = [1, 4, 512], strides = [1, 1, 1]} : vector<8x4x512xf32> to vector<1x4x512xf32>
    %153 = vector.shape_cast %152 : vector<1x4x512xf32> to vector<4x512xf32>
    %cst_42 = arith.constant dense<0.000000e+00> : vector<4x512xf32>
    %154 = tpu.matmul %128, %16, %cst_42 {dimension_numbers = #tpu.dot_dimension_numbers<[1], [0], [0], [1], [0, 0, 1, 1], [], []>} : vector<4x128xf32>, vector<128x512xf32>, vector<4x512xf32> -> vector<4x512xf32>
    %155 = arith.addf %153, %154 : vector<4x512xf32>
    %156 = vector.extract_strided_slice %155 {offsets = [0, 0], sizes = [4, 384], strides = [1, 1]} : vector<4x512xf32> to vector<4x384xf32>
    %157 = arith.negf %156 : vector<4x384xf32>
    %158 = math.exp %157 : vector<4x384xf32>
    %cst_43 = arith.constant 1.000000e+00 : f32
    %159 = vector.broadcast %cst_43 : f32 to vector<4x384xf32>
    %160 = arith.addf %159, %158 : vector<4x384xf32>
    %161 = arith.divf %159, %160 : vector<4x384xf32>
    %162 = vector.extract_strided_slice %161 {offsets = [0, 0], sizes = [4, 128], strides = [1, 1]} : vector<4x384xf32> to vector<4x128xf32>
    %163 = vector.extract_strided_slice %161 {offsets = [0, 128], sizes = [4, 128], strides = [1, 1]} : vector<4x384xf32> to vector<4x128xf32>
    %164 = vector.extract_strided_slice %161 {offsets = [0, 256], sizes = [4, 128], strides = [1, 1]} : vector<4x384xf32> to vector<4x128xf32>
    %165 = vector.extract_strided_slice %155 {offsets = [0, 384], sizes = [4, 128], strides = [1, 1]} : vector<4x512xf32> to vector<4x128xf32>
    %166 = math.tanh %165 : vector<4x128xf32>
    %167 = arith.mulf %163, %126 : vector<4x128xf32>
    %168 = arith.mulf %162, %166 : vector<4x128xf32>
    %169 = arith.addf %167, %168 : vector<4x128xf32>
    %170 = math.tanh %169 : vector<4x128xf32>
    %171 = arith.mulf %164, %170 : vector<4x128xf32>
    %cst_44 = arith.constant dense<0.000000e+00> : vector<4x512xf32>
    %172 = tpu.matmul %171, %17, %cst_44 {dimension_numbers = #tpu.dot_dimension_numbers<[1], [0], [0], [1], [0, 0, 1, 1], [], []>} : vector<4x128xf32>, vector<128x512xf32>, vector<4x512xf32> -> vector<4x512xf32>
    %173 = arith.addf %172, %151 : vector<4x512xf32>
    %174 = vector.extract_strided_slice %173 {offsets = [0, 0], sizes = [4, 384], strides = [1, 1]} : vector<4x512xf32> to vector<4x384xf32>
    %175 = arith.negf %174 : vector<4x384xf32>
    %176 = math.exp %175 : vector<4x384xf32>
    %cst_45 = arith.constant 1.000000e+00 : f32
    %177 = vector.broadcast %cst_45 : f32 to vector<4x384xf32>
    %178 = arith.addf %177, %176 : vector<4x384xf32>
    %179 = arith.divf %177, %178 : vector<4x384xf32>
    %180 = vector.extract_strided_slice %179 {offsets = [0, 0], sizes = [4, 128], strides = [1, 1]} : vector<4x384xf32> to vector<4x128xf32>
    %181 = vector.extract_strided_slice %179 {offsets = [0, 128], sizes = [4, 128], strides = [1, 1]} : vector<4x384xf32> to vector<4x128xf32>
    %182 = vector.extract_strided_slice %179 {offsets = [0, 256], sizes = [4, 128], strides = [1, 1]} : vector<4x384xf32> to vector<4x128xf32>
    %183 = vector.extract_strided_slice %173 {offsets = [0, 384], sizes = [4, 128], strides = [1, 1]} : vector<4x512xf32> to vector<4x128xf32>
    %184 = math.tanh %183 : vector<4x128xf32>
    %185 = arith.mulf %181, %144 : vector<4x128xf32>
    %186 = arith.mulf %180, %184 : vector<4x128xf32>
    %187 = arith.addf %185, %186 : vector<4x128xf32>
    %188 = math.tanh %187 : vector<4x128xf32>
    %189 = arith.mulf %182, %188 : vector<4x128xf32>
    %c3 = arith.constant 3 : index
    %c0_46 = arith.constant 0 : index
    %c0_47 = arith.constant 0 : index
    %190 = vector.load %arg10[%c3, %c0_46, %c0_47] : memref<12x4x128xf32, #tpu.memory_space<vmem>>, vector<1x4x128xf32>
    %191 = vector.shape_cast %190 : vector<1x4x128xf32> to vector<4x128xf32>
    %192 = vector.shape_cast %189 : vector<4x128xf32> to vector<1x4x128xf32>
    tpu.vector_store %arg10[%c3, %c0_46, %c0_47], %192 {strides = array<i32>} : memref<12x4x128xf32, #tpu.memory_space<vmem>>, vector<1x4x128xf32>,
    %cst_48 = arith.constant dense<0.000000e+00> : vector<4x512xf32>
    %193 = tpu.matmul %189, %18, %cst_48 {dimension_numbers = #tpu.dot_dimension_numbers<[1], [0], [0], [1], [0, 0, 1, 1], [], []>} : vector<4x128xf32>, vector<128x512xf32>, vector<4x512xf32> -> vector<4x512xf32>
    %194 = arith.addf %193, %12 : vector<4x512xf32>
    %195 = vector.extract_strided_slice %9 {offsets = [4, 0, 0], sizes = [1, 4, 512], strides = [1, 1, 1]} : vector<8x4x512xf32> to vector<1x4x512xf32>
    %196 = vector.shape_cast %195 : vector<1x4x512xf32> to vector<4x512xf32>
    %cst_49 = arith.constant dense<0.000000e+00> : vector<4x512xf32>
    %197 = tpu.matmul %171, %16, %cst_49 {dimension_numbers = #tpu.dot_dimension_numbers<[1], [0], [0], [1], [0, 0, 1, 1], [], []>} : vector<4x128xf32>, vector<128x512xf32>, vector<4x512xf32> -> vector<4x512xf32>
    %198 = arith.addf %196, %197 : vector<4x512xf32>
    %199 = vector.extract_strided_slice %198 {offsets = [0, 0], sizes = [4, 384], strides = [1, 1]} : vector<4x512xf32> to vector<4x384xf32>
    %200 = arith.negf %199 : vector<4x384xf32>
    %201 = math.exp %200 : vector<4x384xf32>
    %cst_50 = arith.constant 1.000000e+00 : f32
    %202 = vector.broadcast %cst_50 : f32 to vector<4x384xf32>
    %203 = arith.addf %202, %201 : vector<4x384xf32>
    %204 = arith.divf %202, %203 : vector<4x384xf32>
    %205 = vector.extract_strided_slice %204 {offsets = [0, 0], sizes = [4, 128], strides = [1, 1]} : vector<4x384xf32> to vector<4x128xf32>
    %206 = vector.extract_strided_slice %204 {offsets = [0, 128], sizes = [4, 128], strides = [1, 1]} : vector<4x384xf32> to vector<4x128xf32>
    %207 = vector.extract_strided_slice %204 {offsets = [0, 256], sizes = [4, 128], strides = [1, 1]} : vector<4x384xf32> to vector<4x128xf32>
    %208 = vector.extract_strided_slice %198 {offsets = [0, 384], sizes = [4, 128], strides = [1, 1]} : vector<4x512xf32> to vector<4x128xf32>
    %209 = math.tanh %208 : vector<4x128xf32>
    %210 = arith.mulf %206, %169 : vector<4x128xf32>
    %211 = arith.mulf %205, %209 : vector<4x128xf32>
    %212 = arith.addf %210, %211 : vector<4x128xf32>
    %213 = math.tanh %212 : vector<4x128xf32>
    %214 = arith.mulf %207, %213 : vector<4x128xf32>
    %cst_51 = arith.constant dense<0.000000e+00> : vector<4x512xf32>
    %215 = tpu.matmul %214, %17, %cst_51 {dimension_numbers = #tpu.dot_dimension_numbers<[1], [0], [0], [1], [0, 0, 1, 1], [], []>} : vector<4x128xf32>, vector<128x512xf32>, vector<4x512xf32> -> vector<4x512xf32>
    %216 = arith.addf %215, %194 : vector<4x512xf32>
    %217 = vector.extract_strided_slice %216 {offsets = [0, 0], sizes = [4, 384], strides = [1, 1]} : vector<4x512xf32> to vector<4x384xf32>
    %218 = arith.negf %217 : vector<4x384xf32>
    %219 = math.exp %218 : vector<4x384xf32>
    %cst_52 = arith.constant 1.000000e+00 : f32
    %220 = vector.broadcast %cst_52 : f32 to vector<4x384xf32>
    %221 = arith.addf %220, %219 : vector<4x384xf32>
    %222 = arith.divf %220, %221 : vector<4x384xf32>
    %223 = vector.extract_strided_slice %222 {offsets = [0, 0], sizes = [4, 128], strides = [1, 1]} : vector<4x384xf32> to vector<4x128xf32>
    %224 = vector.extract_strided_slice %222 {offsets = [0, 128], sizes = [4, 128], strides = [1, 1]} : vector<4x384xf32> to vector<4x128xf32>
    %225 = vector.extract_strided_slice %222 {offsets = [0, 256], sizes = [4, 128], strides = [1, 1]} : vector<4x384xf32> to vector<4x128xf32>
    %226 = vector.extract_strided_slice %216 {offsets = [0, 384], sizes = [4, 128], strides = [1, 1]} : vector<4x512xf32> to vector<4x128xf32>
    %227 = math.tanh %226 : vector<4x128xf32>
    %228 = arith.mulf %224, %187 : vector<4x128xf32>
    %229 = arith.mulf %223, %227 : vector<4x128xf32>
    %230 = arith.addf %228, %229 : vector<4x128xf32>
    %231 = math.tanh %230 : vector<4x128xf32>
    %232 = arith.mulf %225, %231 : vector<4x128xf32>
    %c4 = arith.constant 4 : index
    %c0_53 = arith.constant 0 : index
    %c0_54 = arith.constant 0 : index
    %233 = vector.load %arg10[%c4, %c0_53, %c0_54] : memref<12x4x128xf32, #tpu.memory_space<vmem>>, vector<1x4x128xf32>
    %234 = vector.shape_cast %233 : vector<1x4x128xf32> to vector<4x128xf32>
    %235 = vector.shape_cast %232 : vector<4x128xf32> to vector<1x4x128xf32>
    tpu.vector_store %arg10[%c4, %c0_53, %c0_54], %235 {strides = array<i32>} : memref<12x4x128xf32, #tpu.memory_space<vmem>>, vector<1x4x128xf32>,
    %cst_55 = arith.constant dense<0.000000e+00> : vector<4x512xf32>
    %236 = tpu.matmul %232, %18, %cst_55 {dimension_numbers = #tpu.dot_dimension_numbers<[1], [0], [0], [1], [0, 0, 1, 1], [], []>} : vector<4x128xf32>, vector<128x512xf32>, vector<4x512xf32> -> vector<4x512xf32>
    %237 = arith.addf %236, %12 : vector<4x512xf32>
    %238 = vector.extract_strided_slice %9 {offsets = [5, 0, 0], sizes = [1, 4, 512], strides = [1, 1, 1]} : vector<8x4x512xf32> to vector<1x4x512xf32>
    %239 = vector.shape_cast %238 : vector<1x4x512xf32> to vector<4x512xf32>
    %cst_56 = arith.constant dense<0.000000e+00> : vector<4x512xf32>
    %240 = tpu.matmul %214, %16, %cst_56 {dimension_numbers = #tpu.dot_dimension_numbers<[1], [0], [0], [1], [0, 0, 1, 1], [], []>} : vector<4x128xf32>, vector<128x512xf32>, vector<4x512xf32> -> vector<4x512xf32>
    %241 = arith.addf %239, %240 : vector<4x512xf32>
    %242 = vector.extract_strided_slice %241 {offsets = [0, 0], sizes = [4, 384], strides = [1, 1]} : vector<4x512xf32> to vector<4x384xf32>
    %243 = arith.negf %242 : vector<4x384xf32>
    %244 = math.exp %243 : vector<4x384xf32>
    %cst_57 = arith.constant 1.000000e+00 : f32
    %245 = vector.broadcast %cst_57 : f32 to vector<4x384xf32>
    %246 = arith.addf %245, %244 : vector<4x384xf32>
    %247 = arith.divf %245, %246 : vector<4x384xf32>
    %248 = vector.extract_strided_slice %247 {offsets = [0, 0], sizes = [4, 128], strides = [1, 1]} : vector<4x384xf32> to vector<4x128xf32>
    %249 = vector.extract_strided_slice %247 {offsets = [0, 128], sizes = [4, 128], strides = [1, 1]} : vector<4x384xf32> to vector<4x128xf32>
    %250 = vector.extract_strided_slice %247 {offsets = [0, 256], sizes = [4, 128], strides = [1, 1]} : vector<4x384xf32> to vector<4x128xf32>
    %251 = vector.extract_strided_slice %241 {offsets = [0, 384], sizes = [4, 128], strides = [1, 1]} : vector<4x512xf32> to vector<4x128xf32>
    %252 = math.tanh %251 : vector<4x128xf32>
    %253 = arith.mulf %249, %212 : vector<4x128xf32>
    %254 = arith.mulf %248, %252 : vector<4x128xf32>
    %255 = arith.addf %253, %254 : vector<4x128xf32>
    %256 = math.tanh %255 : vector<4x128xf32>
    %257 = arith.mulf %250, %256 : vector<4x128xf32>
    %cst_58 = arith.constant dense<0.000000e+00> : vector<4x512xf32>
    %258 = tpu.matmul %257, %17, %cst_58 {dimension_numbers = #tpu.dot_dimension_numbers<[1], [0], [0], [1], [0, 0, 1, 1], [], []>} : vector<4x128xf32>, vector<128x512xf32>, vector<4x512xf32> -> vector<4x512xf32>
    %259 = arith.addf %258, %237 : vector<4x512xf32>
    %260 = vector.extract_strided_slice %259 {offsets = [0, 0], sizes = [4, 384], strides = [1, 1]} : vector<4x512xf32> to vector<4x384xf32>
    %261 = arith.negf %260 : vector<4x384xf32>
    %262 = math.exp %261 : vector<4x384xf32>
    %cst_59 = arith.constant 1.000000e+00 : f32
    %263 = vector.broadcast %cst_59 : f32 to vector<4x384xf32>
    %264 = arith.addf %263, %262 : vector<4x384xf32>
    %265 = arith.divf %263, %264 : vector<4x384xf32>
    %266 = vector.extract_strided_slice %265 {offsets = [0, 0], sizes = [4, 128], strides = [1, 1]} : vector<4x384xf32> to vector<4x128xf32>
    %267 = vector.extract_strided_slice %265 {offsets = [0, 128], sizes = [4, 128], strides = [1, 1]} : vector<4x384xf32> to vector<4x128xf32>
    %268 = vector.extract_strided_slice %265 {offsets = [0, 256], sizes = [4, 128], strides = [1, 1]} : vector<4x384xf32> to vector<4x128xf32>
    %269 = vector.extract_strided_slice %259 {offsets = [0, 384], sizes = [4, 128], strides = [1, 1]} : vector<4x512xf32> to vector<4x128xf32>
    %270 = math.tanh %269 : vector<4x128xf32>
    %271 = arith.mulf %267, %230 : vector<4x128xf32>
    %272 = arith.mulf %266, %270 : vector<4x128xf32>
    %273 = arith.addf %271, %272 : vector<4x128xf32>
    %274 = math.tanh %273 : vector<4x128xf32>
    %275 = arith.mulf %268, %274 : vector<4x128xf32>
    %c5 = arith.constant 5 : index
    %c0_60 = arith.constant 0 : index
    %c0_61 = arith.constant 0 : index
    %276 = vector.load %arg10[%c5, %c0_60, %c0_61] : memref<12x4x128xf32, #tpu.memory_space<vmem>>, vector<1x4x128xf32>
    %277 = vector.shape_cast %276 : vector<1x4x128xf32> to vector<4x128xf32>
    %278 = vector.shape_cast %275 : vector<4x128xf32> to vector<1x4x128xf32>
    tpu.vector_store %arg10[%c5, %c0_60, %c0_61], %278 {strides = array<i32>} : memref<12x4x128xf32, #tpu.memory_space<vmem>>, vector<1x4x128xf32>,
    %cst_62 = arith.constant dense<0.000000e+00> : vector<4x512xf32>
    %279 = tpu.matmul %275, %18, %cst_62 {dimension_numbers = #tpu.dot_dimension_numbers<[1], [0], [0], [1], [0, 0, 1, 1], [], []>} : vector<4x128xf32>, vector<128x512xf32>, vector<4x512xf32> -> vector<4x512xf32>
    %280 = arith.addf %279, %12 : vector<4x512xf32>
    %281 = vector.extract_strided_slice %9 {offsets = [6, 0, 0], sizes = [1, 4, 512], strides = [1, 1, 1]} : vector<8x4x512xf32> to vector<1x4x512xf32>
    %282 = vector.shape_cast %281 : vector<1x4x512xf32> to vector<4x512xf32>
    %cst_63 = arith.constant dense<0.000000e+00> : vector<4x512xf32>
    %283 = tpu.matmul %257, %16, %cst_63 {dimension_numbers = #tpu.dot_dimension_numbers<[1], [0], [0], [1], [0, 0, 1, 1], [], []>} : vector<4x128xf32>, vector<128x512xf32>, vector<4x512xf32> -> vector<4x512xf32>
    %284 = arith.addf %282, %283 : vector<4x512xf32>
    %285 = vector.extract_strided_slice %284 {offsets = [0, 0], sizes = [4, 384], strides = [1, 1]} : vector<4x512xf32> to vector<4x384xf32>
    %286 = arith.negf %285 : vector<4x384xf32>
    %287 = math.exp %286 : vector<4x384xf32>
    %cst_64 = arith.constant 1.000000e+00 : f32
    %288 = vector.broadcast %cst_64 : f32 to vector<4x384xf32>
    %289 = arith.addf %288, %287 : vector<4x384xf32>
    %290 = arith.divf %288, %289 : vector<4x384xf32>
    %291 = vector.extract_strided_slice %290 {offsets = [0, 0], sizes = [4, 128], strides = [1, 1]} : vector<4x384xf32> to vector<4x128xf32>
    %292 = vector.extract_strided_slice %290 {offsets = [0, 128], sizes = [4, 128], strides = [1, 1]} : vector<4x384xf32> to vector<4x128xf32>
    %293 = vector.extract_strided_slice %290 {offsets = [0, 256], sizes = [4, 128], strides = [1, 1]} : vector<4x384xf32> to vector<4x128xf32>
    %294 = vector.extract_strided_slice %284 {offsets = [0, 384], sizes = [4, 128], strides = [1, 1]} : vector<4x512xf32> to vector<4x128xf32>
    %295 = math.tanh %294 : vector<4x128xf32>
    %296 = arith.mulf %292, %255 : vector<4x128xf32>
    %297 = arith.mulf %291, %295 : vector<4x128xf32>
    %298 = arith.addf %296, %297 : vector<4x128xf32>
    %299 = math.tanh %298 : vector<4x128xf32>
    %300 = arith.mulf %293, %299 : vector<4x128xf32>
    %cst_65 = arith.constant dense<0.000000e+00> : vector<4x512xf32>
    %301 = tpu.matmul %300, %17, %cst_65 {dimension_numbers = #tpu.dot_dimension_numbers<[1], [0], [0], [1], [0, 0, 1, 1], [], []>} : vector<4x128xf32>, vector<128x512xf32>, vector<4x512xf32> -> vector<4x512xf32>
    %302 = arith.addf %301, %280 : vector<4x512xf32>
    %303 = vector.extract_strided_slice %302 {offsets = [0, 0], sizes = [4, 384], strides = [1, 1]} : vector<4x512xf32> to vector<4x384xf32>
    %304 = arith.negf %303 : vector<4x384xf32>
    %305 = math.exp %304 : vector<4x384xf32>
    %cst_66 = arith.constant 1.000000e+00 : f32
    %306 = vector.broadcast %cst_66 : f32 to vector<4x384xf32>
    %307 = arith.addf %306, %305 : vector<4x384xf32>
    %308 = arith.divf %306, %307 : vector<4x384xf32>
    %309 = vector.extract_strided_slice %308 {offsets = [0, 0], sizes = [4, 128], strides = [1, 1]} : vector<4x384xf32> to vector<4x128xf32>
    %310 = vector.extract_strided_slice %308 {offsets = [0, 128], sizes = [4, 128], strides = [1, 1]} : vector<4x384xf32> to vector<4x128xf32>
    %311 = vector.extract_strided_slice %308 {offsets = [0, 256], sizes = [4, 128], strides = [1, 1]} : vector<4x384xf32> to vector<4x128xf32>
    %312 = vector.extract_strided_slice %302 {offsets = [0, 384], sizes = [4, 128], strides = [1, 1]} : vector<4x512xf32> to vector<4x128xf32>
    %313 = math.tanh %312 : vector<4x128xf32>
    %314 = arith.mulf %310, %273 : vector<4x128xf32>
    %315 = arith.mulf %309, %313 : vector<4x128xf32>
    %316 = arith.addf %314, %315 : vector<4x128xf32>
    %317 = math.tanh %316 : vector<4x128xf32>
    %318 = arith.mulf %311, %317 : vector<4x128xf32>
    %c6 = arith.constant 6 : index
    %c0_67 = arith.constant 0 : index
    %c0_68 = arith.constant 0 : index
    %319 = vector.load %arg10[%c6, %c0_67, %c0_68] : memref<12x4x128xf32, #tpu.memory_space<vmem>>, vector<1x4x128xf32>
    %320 = vector.shape_cast %319 : vector<1x4x128xf32> to vector<4x128xf32>
    %321 = vector.shape_cast %318 : vector<4x128xf32> to vector<1x4x128xf32>
    tpu.vector_store %arg10[%c6, %c0_67, %c0_68], %321 {strides = array<i32>} : memref<12x4x128xf32, #tpu.memory_space<vmem>>, vector<1x4x128xf32>,
    %cst_69 = arith.constant dense<0.000000e+00> : vector<4x512xf32>
    %322 = tpu.matmul %318, %18, %cst_69 {dimension_numbers = #tpu.dot_dimension_numbers<[1], [0], [0], [1], [0, 0, 1, 1], [], []>} : vector<4x128xf32>, vector<128x512xf32>, vector<4x512xf32> -> vector<4x512xf32>
    %323 = arith.addf %322, %12 : vector<4x512xf32>
    %324 = vector.extract_strided_slice %9 {offsets = [7, 0, 0], sizes = [1, 4, 512], strides = [1, 1, 1]} : vector<8x4x512xf32> to vector<1x4x512xf32>
    %325 = vector.shape_cast %324 : vector<1x4x512xf32> to vector<4x512xf32>
    %cst_70 = arith.constant dense<0.000000e+00> : vector<4x512xf32>
    %326 = tpu.matmul %300, %16, %cst_70 {dimension_numbers = #tpu.dot_dimension_numbers<[1], [0], [0], [1], [0, 0, 1, 1], [], []>} : vector<4x128xf32>, vector<128x512xf32>, vector<4x512xf32> -> vector<4x512xf32>
    %327 = arith.addf %325, %326 : vector<4x512xf32>
    %328 = vector.extract_strided_slice %327 {offsets = [0, 0], sizes = [4, 384], strides = [1, 1]} : vector<4x512xf32> to vector<4x384xf32>
    %329 = arith.negf %328 : vector<4x384xf32>
    %330 = math.exp %329 : vector<4x384xf32>
    %cst_71 = arith.constant 1.000000e+00 : f32
    %331 = vector.broadcast %cst_71 : f32 to vector<4x384xf32>
    %332 = arith.addf %331, %330 : vector<4x384xf32>
    %333 = arith.divf %331, %332 : vector<4x384xf32>
    %334 = vector.extract_strided_slice %333 {offsets = [0, 0], sizes = [4, 128], strides = [1, 1]} : vector<4x384xf32> to vector<4x128xf32>
    %335 = vector.extract_strided_slice %333 {offsets = [0, 128], sizes = [4, 128], strides = [1, 1]} : vector<4x384xf32> to vector<4x128xf32>
    %336 = vector.extract_strided_slice %333 {offsets = [0, 256], sizes = [4, 128], strides = [1, 1]} : vector<4x384xf32> to vector<4x128xf32>
    %337 = vector.extract_strided_slice %327 {offsets = [0, 384], sizes = [4, 128], strides = [1, 1]} : vector<4x512xf32> to vector<4x128xf32>
    %338 = math.tanh %337 : vector<4x128xf32>
    %339 = arith.mulf %335, %298 : vector<4x128xf32>
    %340 = arith.mulf %334, %338 : vector<4x128xf32>
    %341 = arith.addf %339, %340 : vector<4x128xf32>
    %342 = math.tanh %341 : vector<4x128xf32>
    %343 = arith.mulf %336, %342 : vector<4x128xf32>
    %cst_72 = arith.constant dense<0.000000e+00> : vector<4x512xf32>
    %344 = tpu.matmul %343, %17, %cst_72 {dimension_numbers = #tpu.dot_dimension_numbers<[1], [0], [0], [1], [0, 0, 1, 1], [], []>} : vector<4x128xf32>, vector<128x512xf32>, vector<4x512xf32> -> vector<4x512xf32>
    %345 = arith.addf %344, %323 : vector<4x512xf32>
    %346 = vector.extract_strided_slice %345 {offsets = [0, 0], sizes = [4, 384], strides = [1, 1]} : vector<4x512xf32> to vector<4x384xf32>
    %347 = arith.negf %346 : vector<4x384xf32>
    %348 = math.exp %347 : vector<4x384xf32>
    %cst_73 = arith.constant 1.000000e+00 : f32
    %349 = vector.broadcast %cst_73 : f32 to vector<4x384xf32>
    %350 = arith.addf %349, %348 : vector<4x384xf32>
    %351 = arith.divf %349, %350 : vector<4x384xf32>
    %352 = vector.extract_strided_slice %351 {offsets = [0, 0], sizes = [4, 128], strides = [1, 1]} : vector<4x384xf32> to vector<4x128xf32>
    %353 = vector.extract_strided_slice %351 {offsets = [0, 128], sizes = [4, 128], strides = [1, 1]} : vector<4x384xf32> to vector<4x128xf32>
    %354 = vector.extract_strided_slice %351 {offsets = [0, 256], sizes = [4, 128], strides = [1, 1]} : vector<4x384xf32> to vector<4x128xf32>
    %355 = vector.extract_strided_slice %345 {offsets = [0, 384], sizes = [4, 128], strides = [1, 1]} : vector<4x512xf32> to vector<4x128xf32>
    %356 = math.tanh %355 : vector<4x128xf32>
    %357 = arith.mulf %353, %316 : vector<4x128xf32>
    %358 = arith.mulf %352, %356 : vector<4x128xf32>
    %359 = arith.addf %357, %358 : vector<4x128xf32>
    %360 = math.tanh %359 : vector<4x128xf32>
    %361 = arith.mulf %354, %360 : vector<4x128xf32>
    %c7 = arith.constant 7 : index
    %c0_74 = arith.constant 0 : index
    %c0_75 = arith.constant 0 : index
    %362 = vector.load %arg10[%c7, %c0_74, %c0_75] : memref<12x4x128xf32, #tpu.memory_space<vmem>>, vector<1x4x128xf32>
    %363 = vector.shape_cast %362 : vector<1x4x128xf32> to vector<4x128xf32>
    %364 = vector.shape_cast %361 : vector<4x128xf32> to vector<1x4x128xf32>
    tpu.vector_store %arg10[%c7, %c0_74, %c0_75], %364 {strides = array<i32>} : memref<12x4x128xf32, #tpu.memory_space<vmem>>, vector<1x4x128xf32>,
    %cst_76 = arith.constant dense<0.000000e+00> : vector<4x512xf32>
    %365 = tpu.matmul %361, %18, %cst_76 {dimension_numbers = #tpu.dot_dimension_numbers<[1], [0], [0], [1], [0, 0, 1, 1], [], []>} : vector<4x128xf32>, vector<128x512xf32>, vector<4x512xf32> -> vector<4x512xf32>
    %366 = arith.addf %365, %12 : vector<4x512xf32>
    %cst_77 = arith.constant dense<0.000000e+00> : vector<4x512xf32>
    %367 = tpu.matmul %361, %19, %cst_77 {dimension_numbers = #tpu.dot_dimension_numbers<[1], [0], [0], [1], [0, 0, 1, 1], [], []>} : vector<4x128xf32>, vector<128x512xf32>, vector<4x512xf32> -> vector<4x512xf32>
    %368 = arith.addf %367, %15 : vector<4x512xf32>
    %cst_78 = arith.constant dense<0.000000e+00> : vector<4x512xf32>
    %369 = tpu.matmul %343, %16, %cst_78 {dimension_numbers = #tpu.dot_dimension_numbers<[1], [0], [0], [1], [0, 0, 1, 1], [], []>} : vector<4x128xf32>, vector<128x512xf32>, vector<4x512xf32> -> vector<4x512xf32>
    %370 = arith.addf %369, %368 : vector<4x512xf32>
    %371 = vector.extract_strided_slice %370 {offsets = [0, 0], sizes = [4, 384], strides = [1, 1]} : vector<4x512xf32> to vector<4x384xf32>
    %372 = arith.negf %371 : vector<4x384xf32>
    %373 = math.exp %372 : vector<4x384xf32>
    %cst_79 = arith.constant 1.000000e+00 : f32
    %374 = vector.broadcast %cst_79 : f32 to vector<4x384xf32>
    %375 = arith.addf %374, %373 : vector<4x384xf32>
    %376 = arith.divf %374, %375 : vector<4x384xf32>
    %377 = vector.extract_strided_slice %376 {offsets = [0, 0], sizes = [4, 128], strides = [1, 1]} : vector<4x384xf32> to vector<4x128xf32>
    %378 = vector.extract_strided_slice %376 {offsets = [0, 128], sizes = [4, 128], strides = [1, 1]} : vector<4x384xf32> to vector<4x128xf32>
    %379 = vector.extract_strided_slice %376 {offsets = [0, 256], sizes = [4, 128], strides = [1, 1]} : vector<4x384xf32> to vector<4x128xf32>
    %380 = vector.extract_strided_slice %370 {offsets = [0, 384], sizes = [4, 128], strides = [1, 1]} : vector<4x512xf32> to vector<4x128xf32>
    %381 = math.tanh %380 : vector<4x128xf32>
    %382 = arith.mulf %378, %341 : vector<4x128xf32>
    %383 = arith.mulf %377, %381 : vector<4x128xf32>
    %384 = arith.addf %382, %383 : vector<4x128xf32>
    %385 = math.tanh %384 : vector<4x128xf32>
    %386 = arith.mulf %379, %385 : vector<4x128xf32>
    %cst_80 = arith.constant dense<0.000000e+00> : vector<4x512xf32>
    %387 = tpu.matmul %386, %17, %cst_80 {dimension_numbers = #tpu.dot_dimension_numbers<[1], [0], [0], [1], [0, 0, 1, 1], [], []>} : vector<4x128xf32>, vector<128x512xf32>, vector<4x512xf32> -> vector<4x512xf32>
    %388 = arith.addf %387, %366 : vector<4x512xf32>
    %389 = vector.extract_strided_slice %388 {offsets = [0, 0], sizes = [4, 384], strides = [1, 1]} : vector<4x512xf32> to vector<4x384xf32>
    %390 = arith.negf %389 : vector<4x384xf32>
    %391 = math.exp %390 : vector<4x384xf32>
    %cst_81 = arith.constant 1.000000e+00 : f32
    %392 = vector.broadcast %cst_81 : f32 to vector<4x384xf32>
    %393 = arith.addf %392, %391 : vector<4x384xf32>
    %394 = arith.divf %392, %393 : vector<4x384xf32>
    %395 = vector.extract_strided_slice %394 {offsets = [0, 0], sizes = [4, 128], strides = [1, 1]} : vector<4x384xf32> to vector<4x128xf32>
    %396 = vector.extract_strided_slice %394 {offsets = [0, 128], sizes = [4, 128], strides = [1, 1]} : vector<4x384xf32> to vector<4x128xf32>
    %397 = vector.extract_strided_slice %394 {offsets = [0, 256], sizes = [4, 128], strides = [1, 1]} : vector<4x384xf32> to vector<4x128xf32>
    %398 = vector.extract_strided_slice %388 {offsets = [0, 384], sizes = [4, 128], strides = [1, 1]} : vector<4x512xf32> to vector<4x128xf32>
    %399 = math.tanh %398 : vector<4x128xf32>
    %400 = arith.mulf %396, %359 : vector<4x128xf32>
    %401 = arith.mulf %395, %399 : vector<4x128xf32>
    %402 = arith.addf %400, %401 : vector<4x128xf32>
    %403 = math.tanh %402 : vector<4x128xf32>
    %404 = arith.mulf %397, %403 : vector<4x128xf32>
    %c8 = arith.constant 8 : index
    %c0_82 = arith.constant 0 : index
    %c0_83 = arith.constant 0 : index
    %405 = vector.load %arg10[%c8, %c0_82, %c0_83] : memref<12x4x128xf32, #tpu.memory_space<vmem>>, vector<1x4x128xf32>
    %406 = vector.shape_cast %405 : vector<1x4x128xf32> to vector<4x128xf32>
    %407 = vector.shape_cast %404 : vector<4x128xf32> to vector<1x4x128xf32>
    tpu.vector_store %arg10[%c8, %c0_82, %c0_83], %407 {strides = array<i32>} : memref<12x4x128xf32, #tpu.memory_space<vmem>>, vector<1x4x128xf32>,
    %cst_84 = arith.constant dense<0.000000e+00> : vector<4x512xf32>
    %408 = tpu.matmul %404, %18, %cst_84 {dimension_numbers = #tpu.dot_dimension_numbers<[1], [0], [0], [1], [0, 0, 1, 1], [], []>} : vector<4x128xf32>, vector<128x512xf32>, vector<4x512xf32> -> vector<4x512xf32>
    %409 = arith.addf %408, %12 : vector<4x512xf32>
    %cst_85 = arith.constant dense<0.000000e+00> : vector<4x512xf32>
    %410 = tpu.matmul %404, %19, %cst_85 {dimension_numbers = #tpu.dot_dimension_numbers<[1], [0], [0], [1], [0, 0, 1, 1], [], []>} : vector<4x128xf32>, vector<128x512xf32>, vector<4x512xf32> -> vector<4x512xf32>
    %411 = arith.addf %410, %15 : vector<4x512xf32>
    %cst_86 = arith.constant dense<0.000000e+00> : vector<4x512xf32>
    %412 = tpu.matmul %386, %16, %cst_86 {dimension_numbers = #tpu.dot_dimension_numbers<[1], [0], [0], [1], [0, 0, 1, 1], [], []>} : vector<4x128xf32>, vector<128x512xf32>, vector<4x512xf32> -> vector<4x512xf32>
    %413 = arith.addf %412, %411 : vector<4x512xf32>
    %414 = vector.extract_strided_slice %413 {offsets = [0, 0], sizes = [4, 384], strides = [1, 1]} : vector<4x512xf32> to vector<4x384xf32>
    %415 = arith.negf %414 : vector<4x384xf32>
    %416 = math.exp %415 : vector<4x384xf32>
    %cst_87 = arith.constant 1.000000e+00 : f32
    %417 = vector.broadcast %cst_87 : f32 to vector<4x384xf32>
    %418 = arith.addf %417, %416 : vector<4x384xf32>
    %419 = arith.divf %417, %418 : vector<4x384xf32>
    %420 = vector.extract_strided_slice %419 {offsets = [0, 0], sizes = [4, 128], strides = [1, 1]} : vector<4x384xf32> to vector<4x128xf32>
    %421 = vector.extract_strided_slice %419 {offsets = [0, 128], sizes = [4, 128], strides = [1, 1]} : vector<4x384xf32> to vector<4x128xf32>
    %422 = vector.extract_strided_slice %419 {offsets = [0, 256], sizes = [4, 128], strides = [1, 1]} : vector<4x384xf32> to vector<4x128xf32>
    %423 = vector.extract_strided_slice %413 {offsets = [0, 384], sizes = [4, 128], strides = [1, 1]} : vector<4x512xf32> to vector<4x128xf32>
    %424 = math.tanh %423 : vector<4x128xf32>
    %425 = arith.mulf %421, %384 : vector<4x128xf32>
    %426 = arith.mulf %420, %424 : vector<4x128xf32>
    %427 = arith.addf %425, %426 : vector<4x128xf32>
    %428 = math.tanh %427 : vector<4x128xf32>
    %429 = arith.mulf %422, %428 : vector<4x128xf32>
    %cst_88 = arith.constant dense<0.000000e+00> : vector<4x512xf32>
    %430 = tpu.matmul %429, %17, %cst_88 {dimension_numbers = #tpu.dot_dimension_numbers<[1], [0], [0], [1], [0, 0, 1, 1], [], []>} : vector<4x128xf32>, vector<128x512xf32>, vector<4x512xf32> -> vector<4x512xf32>
    %431 = arith.addf %430, %409 : vector<4x512xf32>
    %432 = vector.extract_strided_slice %431 {offsets = [0, 0], sizes = [4, 384], strides = [1, 1]} : vector<4x512xf32> to vector<4x384xf32>
    %433 = arith.negf %432 : vector<4x384xf32>
    %434 = math.exp %433 : vector<4x384xf32>
    %cst_89 = arith.constant 1.000000e+00 : f32
    %435 = vector.broadcast %cst_89 : f32 to vector<4x384xf32>
    %436 = arith.addf %435, %434 : vector<4x384xf32>
    %437 = arith.divf %435, %436 : vector<4x384xf32>
    %438 = vector.extract_strided_slice %437 {offsets = [0, 0], sizes = [4, 128], strides = [1, 1]} : vector<4x384xf32> to vector<4x128xf32>
    %439 = vector.extract_strided_slice %437 {offsets = [0, 128], sizes = [4, 128], strides = [1, 1]} : vector<4x384xf32> to vector<4x128xf32>
    %440 = vector.extract_strided_slice %437 {offsets = [0, 256], sizes = [4, 128], strides = [1, 1]} : vector<4x384xf32> to vector<4x128xf32>
    %441 = vector.extract_strided_slice %431 {offsets = [0, 384], sizes = [4, 128], strides = [1, 1]} : vector<4x512xf32> to vector<4x128xf32>
    %442 = math.tanh %441 : vector<4x128xf32>
    %443 = arith.mulf %439, %402 : vector<4x128xf32>
    %444 = arith.mulf %438, %442 : vector<4x128xf32>
    %445 = arith.addf %443, %444 : vector<4x128xf32>
    %446 = math.tanh %445 : vector<4x128xf32>
    %447 = arith.mulf %440, %446 : vector<4x128xf32>
    %c9 = arith.constant 9 : index
    %c0_90 = arith.constant 0 : index
    %c0_91 = arith.constant 0 : index
    %448 = vector.load %arg10[%c9, %c0_90, %c0_91] : memref<12x4x128xf32, #tpu.memory_space<vmem>>, vector<1x4x128xf32>
    %449 = vector.shape_cast %448 : vector<1x4x128xf32> to vector<4x128xf32>
    %450 = vector.shape_cast %447 : vector<4x128xf32> to vector<1x4x128xf32>
    tpu.vector_store %arg10[%c9, %c0_90, %c0_91], %450 {strides = array<i32>} : memref<12x4x128xf32, #tpu.memory_space<vmem>>, vector<1x4x128xf32>,
    %cst_92 = arith.constant dense<0.000000e+00> : vector<4x512xf32>
    %451 = tpu.matmul %447, %18, %cst_92 {dimension_numbers = #tpu.dot_dimension_numbers<[1], [0], [0], [1], [0, 0, 1, 1], [], []>} : vector<4x128xf32>, vector<128x512xf32>, vector<4x512xf32> -> vector<4x512xf32>
    %452 = arith.addf %451, %12 : vector<4x512xf32>
    %cst_93 = arith.constant dense<0.000000e+00> : vector<4x512xf32>
    %453 = tpu.matmul %447, %19, %cst_93 {dimension_numbers = #tpu.dot_dimension_numbers<[1], [0], [0], [1], [0, 0, 1, 1], [], []>} : vector<4x128xf32>, vector<128x512xf32>, vector<4x512xf32> -> vector<4x512xf32>
    %454 = arith.addf %453, %15 : vector<4x512xf32>
    %cst_94 = arith.constant dense<0.000000e+00> : vector<4x512xf32>
    %455 = tpu.matmul %429, %16, %cst_94 {dimension_numbers = #tpu.dot_dimension_numbers<[1], [0], [0], [1], [0, 0, 1, 1], [], []>} : vector<4x128xf32>, vector<128x512xf32>, vector<4x512xf32> -> vector<4x512xf32>
    %456 = arith.addf %455, %454 : vector<4x512xf32>
    %457 = vector.extract_strided_slice %456 {offsets = [0, 0], sizes = [4, 384], strides = [1, 1]} : vector<4x512xf32> to vector<4x384xf32>
    %458 = arith.negf %457 : vector<4x384xf32>
    %459 = math.exp %458 : vector<4x384xf32>
    %cst_95 = arith.constant 1.000000e+00 : f32
    %460 = vector.broadcast %cst_95 : f32 to vector<4x384xf32>
    %461 = arith.addf %460, %459 : vector<4x384xf32>
    %462 = arith.divf %460, %461 : vector<4x384xf32>
    %463 = vector.extract_strided_slice %462 {offsets = [0, 0], sizes = [4, 128], strides = [1, 1]} : vector<4x384xf32> to vector<4x128xf32>
    %464 = vector.extract_strided_slice %462 {offsets = [0, 128], sizes = [4, 128], strides = [1, 1]} : vector<4x384xf32> to vector<4x128xf32>
    %465 = vector.extract_strided_slice %462 {offsets = [0, 256], sizes = [4, 128], strides = [1, 1]} : vector<4x384xf32> to vector<4x128xf32>
    %466 = vector.extract_strided_slice %456 {offsets = [0, 384], sizes = [4, 128], strides = [1, 1]} : vector<4x512xf32> to vector<4x128xf32>
    %467 = math.tanh %466 : vector<4x128xf32>
    %468 = arith.mulf %464, %427 : vector<4x128xf32>
    %469 = arith.mulf %463, %467 : vector<4x128xf32>
    %470 = arith.addf %468, %469 : vector<4x128xf32>
    %471 = math.tanh %470 : vector<4x128xf32>
    %472 = arith.mulf %465, %471 : vector<4x128xf32>
    %cst_96 = arith.constant dense<0.000000e+00> : vector<4x512xf32>
    %473 = tpu.matmul %472, %17, %cst_96 {dimension_numbers = #tpu.dot_dimension_numbers<[1], [0], [0], [1], [0, 0, 1, 1], [], []>} : vector<4x128xf32>, vector<128x512xf32>, vector<4x512xf32> -> vector<4x512xf32>
    %474 = arith.addf %473, %452 : vector<4x512xf32>
    %475 = vector.extract_strided_slice %474 {offsets = [0, 0], sizes = [4, 384], strides = [1, 1]} : vector<4x512xf32> to vector<4x384xf32>
    %476 = arith.negf %475 : vector<4x384xf32>
    %477 = math.exp %476 : vector<4x384xf32>
    %cst_97 = arith.constant 1.000000e+00 : f32
    %478 = vector.broadcast %cst_97 : f32 to vector<4x384xf32>
    %479 = arith.addf %478, %477 : vector<4x384xf32>
    %480 = arith.divf %478, %479 : vector<4x384xf32>
    %481 = vector.extract_strided_slice %480 {offsets = [0, 0], sizes = [4, 128], strides = [1, 1]} : vector<4x384xf32> to vector<4x128xf32>
    %482 = vector.extract_strided_slice %480 {offsets = [0, 128], sizes = [4, 128], strides = [1, 1]} : vector<4x384xf32> to vector<4x128xf32>
    %483 = vector.extract_strided_slice %480 {offsets = [0, 256], sizes = [4, 128], strides = [1, 1]} : vector<4x384xf32> to vector<4x128xf32>
    %484 = vector.extract_strided_slice %474 {offsets = [0, 384], sizes = [4, 128], strides = [1, 1]} : vector<4x512xf32> to vector<4x128xf32>
    %485 = math.tanh %484 : vector<4x128xf32>
    %486 = arith.mulf %482, %445 : vector<4x128xf32>
    %487 = arith.mulf %481, %485 : vector<4x128xf32>
    %488 = arith.addf %486, %487 : vector<4x128xf32>
    %489 = math.tanh %488 : vector<4x128xf32>
    %490 = arith.mulf %483, %489 : vector<4x128xf32>
    %c10 = arith.constant 10 : index
    %c0_98 = arith.constant 0 : index
    %c0_99 = arith.constant 0 : index
    %491 = vector.load %arg10[%c10, %c0_98, %c0_99] : memref<12x4x128xf32, #tpu.memory_space<vmem>>, vector<1x4x128xf32>
    %492 = vector.shape_cast %491 : vector<1x4x128xf32> to vector<4x128xf32>
    %493 = vector.shape_cast %490 : vector<4x128xf32> to vector<1x4x128xf32>
    tpu.vector_store %arg10[%c10, %c0_98, %c0_99], %493 {strides = array<i32>} : memref<12x4x128xf32, #tpu.memory_space<vmem>>, vector<1x4x128xf32>,
    %cst_100 = arith.constant dense<0.000000e+00> : vector<4x512xf32>
    %494 = tpu.matmul %490, %18, %cst_100 {dimension_numbers = #tpu.dot_dimension_numbers<[1], [0], [0], [1], [0, 0, 1, 1], [], []>} : vector<4x128xf32>, vector<128x512xf32>, vector<4x512xf32> -> vector<4x512xf32>
    %495 = arith.addf %494, %12 : vector<4x512xf32>
    %cst_101 = arith.constant dense<0.000000e+00> : vector<4x512xf32>
    %496 = tpu.matmul %490, %19, %cst_101 {dimension_numbers = #tpu.dot_dimension_numbers<[1], [0], [0], [1], [0, 0, 1, 1], [], []>} : vector<4x128xf32>, vector<128x512xf32>, vector<4x512xf32> -> vector<4x512xf32>
    %497 = arith.addf %496, %15 : vector<4x512xf32>
    %cst_102 = arith.constant dense<0.000000e+00> : vector<4x512xf32>
    %498 = tpu.matmul %472, %16, %cst_102 {dimension_numbers = #tpu.dot_dimension_numbers<[1], [0], [0], [1], [0, 0, 1, 1], [], []>} : vector<4x128xf32>, vector<128x512xf32>, vector<4x512xf32> -> vector<4x512xf32>
    %499 = arith.addf %498, %497 : vector<4x512xf32>
    %500 = vector.extract_strided_slice %499 {offsets = [0, 0], sizes = [4, 384], strides = [1, 1]} : vector<4x512xf32> to vector<4x384xf32>
    %501 = arith.negf %500 : vector<4x384xf32>
    %502 = math.exp %501 : vector<4x384xf32>
    %cst_103 = arith.constant 1.000000e+00 : f32
    %503 = vector.broadcast %cst_103 : f32 to vector<4x384xf32>
    %504 = arith.addf %503, %502 : vector<4x384xf32>
    %505 = arith.divf %503, %504 : vector<4x384xf32>
    %506 = vector.extract_strided_slice %505 {offsets = [0, 0], sizes = [4, 128], strides = [1, 1]} : vector<4x384xf32> to vector<4x128xf32>
    %507 = vector.extract_strided_slice %505 {offsets = [0, 128], sizes = [4, 128], strides = [1, 1]} : vector<4x384xf32> to vector<4x128xf32>
    %508 = vector.extract_strided_slice %505 {offsets = [0, 256], sizes = [4, 128], strides = [1, 1]} : vector<4x384xf32> to vector<4x128xf32>
    %509 = vector.extract_strided_slice %499 {offsets = [0, 384], sizes = [4, 128], strides = [1, 1]} : vector<4x512xf32> to vector<4x128xf32>
    %510 = math.tanh %509 : vector<4x128xf32>
    %511 = arith.mulf %507, %470 : vector<4x128xf32>
    %512 = arith.mulf %506, %510 : vector<4x128xf32>
    %513 = arith.addf %511, %512 : vector<4x128xf32>
    %514 = math.tanh %513 : vector<4x128xf32>
    %515 = arith.mulf %508, %514 : vector<4x128xf32>
    %cst_104 = arith.constant dense<0.000000e+00> : vector<4x512xf32>
    %516 = tpu.matmul %515, %17, %cst_104 {dimension_numbers = #tpu.dot_dimension_numbers<[1], [0], [0], [1], [0, 0, 1, 1], [], []>} : vector<4x128xf32>, vector<128x512xf32>, vector<4x512xf32> -> vector<4x512xf32>
    %517 = arith.addf %516, %495 : vector<4x512xf32>
    %518 = vector.extract_strided_slice %517 {offsets = [0, 0], sizes = [4, 384], strides = [1, 1]} : vector<4x512xf32> to vector<4x384xf32>
    %519 = arith.negf %518 : vector<4x384xf32>
    %520 = math.exp %519 : vector<4x384xf32>
    %cst_105 = arith.constant 1.000000e+00 : f32
    %521 = vector.broadcast %cst_105 : f32 to vector<4x384xf32>
    %522 = arith.addf %521, %520 : vector<4x384xf32>
    %523 = arith.divf %521, %522 : vector<4x384xf32>
    %524 = vector.extract_strided_slice %523 {offsets = [0, 0], sizes = [4, 128], strides = [1, 1]} : vector<4x384xf32> to vector<4x128xf32>
    %525 = vector.extract_strided_slice %523 {offsets = [0, 128], sizes = [4, 128], strides = [1, 1]} : vector<4x384xf32> to vector<4x128xf32>
    %526 = vector.extract_strided_slice %523 {offsets = [0, 256], sizes = [4, 128], strides = [1, 1]} : vector<4x384xf32> to vector<4x128xf32>
    %527 = vector.extract_strided_slice %517 {offsets = [0, 384], sizes = [4, 128], strides = [1, 1]} : vector<4x512xf32> to vector<4x128xf32>
    %528 = math.tanh %527 : vector<4x128xf32>
    %529 = arith.mulf %525, %488 : vector<4x128xf32>
    %530 = arith.mulf %524, %528 : vector<4x128xf32>
    %531 = arith.addf %529, %530 : vector<4x128xf32>
    %532 = math.tanh %531 : vector<4x128xf32>
    %533 = arith.mulf %526, %532 : vector<4x128xf32>
    %c11 = arith.constant 11 : index
    %c0_106 = arith.constant 0 : index
    %c0_107 = arith.constant 0 : index
    %534 = vector.load %arg10[%c11, %c0_106, %c0_107] : memref<12x4x128xf32, #tpu.memory_space<vmem>>, vector<1x4x128xf32>
    %535 = vector.shape_cast %534 : vector<1x4x128xf32> to vector<4x128xf32>
    %536 = vector.shape_cast %533 : vector<4x128xf32> to vector<1x4x128xf32>
    tpu.vector_store %arg10[%c11, %c0_106, %c0_107], %536 {strides = array<i32>} : memref<12x4x128xf32, #tpu.memory_space<vmem>>, vector<1x4x128xf32>,
    return
  }
  func.func @transform_0(%arg0: i32) -> (i32, i32, i32) {
    %c0_i32 = arith.constant 0 : i32
    %c0_i32_0 = arith.constant 0 : i32
    %c0_i32_1 = arith.constant 0 : i32
    %c0_i32_2 = arith.constant 0 : i32
    return %c0_i32, %c0_i32_0, %c0_i32_1 : i32, i32, i32
  }
  func.func @transform_1(%arg0: i32) -> (i32, i32) {
    %c0_i32 = arith.constant 0 : i32
    %c0_i32_0 = arith.constant 0 : i32
    %c0_i32_1 = arith.constant 0 : i32
    return %c0_i32, %c0_i32_0 : i32, i32
  }
  func.func @transform_2(%arg0: i32) -> (i32, i32) {
    %c0_i32 = arith.constant 0 : i32
    %c0_i32_0 = arith.constant 0 : i32
    %c0_i32_1 = arith.constant 0 : i32
    return %c0_i32, %c0_i32_0 : i32, i32
  }
  func.func @transform_3(%arg0: i32) -> (i32, i32) {
    %c0_i32 = arith.constant 0 : i32
    %c0_i32_0 = arith.constant 0 : i32
    %c0_i32_1 = arith.constant 0 : i32
    return %c0_i32, %c0_i32_0 : i32, i32
  }
  func.func @transform_4(%arg0: i32) -> (i32, i32) {
    %c0_i32 = arith.constant 0 : i32
    %c0_i32_0 = arith.constant 0 : i32
    %c0_i32_1 = arith.constant 0 : i32
    return %c0_i32, %c0_i32_0 : i32, i32
  }
  func.func @transform_5(%arg0: i32) -> (i32, i32) {
    %c0_i32 = arith.constant 0 : i32
    %c0_i32_0 = arith.constant 0 : i32
    %c0_i32_1 = arith.constant 0 : i32
    return %c0_i32, %c0_i32_0 : i32, i32
  }
  func.func @transform_6(%arg0: i32) -> (i32, i32) {
    %c0_i32 = arith.constant 0 : i32
    %c0_i32_0 = arith.constant 0 : i32
    %c0_i32_1 = arith.constant 0 : i32
    return %c0_i32, %c0_i32_0 : i32, i32
  }
  func.func @transform_7(%arg0: i32) -> (i32, i32) {
    %c0_i32 = arith.constant 0 : i32
    %c0_i32_0 = arith.constant 0 : i32
    %c0_i32_1 = arith.constant 0 : i32
    return %c0_i32, %c0_i32_0 : i32, i32
  }
  func.func @transform_8(%arg0: i32) -> (i32, i32) {
    %c0_i32 = arith.constant 0 : i32
    %c0_i32_0 = arith.constant 0 : i32
    %c0_i32_1 = arith.constant 0 : i32
    return %c0_i32, %c0_i32_0 : i32, i32
  }
  func.func @transform_9(%arg0: i32) -> (i32, i32, i32) {
    %c0_i32 = arith.constant 0 : i32
    %c0_i32_0 = arith.constant 0 : i32
    %c0_i32_1 = arith.constant 0 : i32
    %c0_i32_2 = arith.constant 0 : i32
    return %c0_i32, %c0_i32_0, %c0_i32_1 : i32, i32, i32
  }
}

</mosaic_0001>

<bundles_post_ra>
// kernel: tpu_custom_call.1
= control target key start
LH: loop header
LB: loop body
LE: loop exit
PB: predicated region body
PF: predicated region fallthrough
CT: control target
= control target key end

     0   :  { %14 = vsyncpa [#allocation3], 0  ;;  %s12047_s0 = inlined_call_operand.vmem [shape: f32[8,4,1], index: 0, kind: input, shape index: {}]   ;;  %s12048_s1 = inlined_call_operand.vmem [shape: f32[1,512], index: 1, kind: input, shape index: {}]   ;;  %s12049_s2 = inlined_call_operand.vmem [shape: f32[1,512], index: 2, kind: input, shape index: {}]   ;;  %s12050_s3 = inlined_call_operand.hbm [shape: f32[128,512], index: 3, kind: input, shape index: {}]   ;;  %s12051_s4 = inlined_call_operand.hbm [shape: f32[128,512], index: 4, kind: input, shape index: {}]   ;;  %s12052_s5 = inlined_call_operand.hbm [shape: f32[128,512], index: 5, kind: input, shape index: {}]   ;;  %s12053_s6 = inlined_call_operand.vmem [shape: f32[1,512], index: 6, kind: input, shape index: {}]   ;;  %s12054_s7 = inlined_call_operand.hbm [shape: f32[128,512], index: 7, kind: input, shape index: {}]   ;;  %s12055_s8 = inlined_call_operand.vmem [shape: f32[1,512], index: 8, kind: input, shape index: {}]   ;;  %s12056_s9 = inlined_call_operand.hbm [shape: f32[12,4,128], index: 9, kind: output, shape index: {}]  }
   0x1   :  { %15 = vsyncpa [#allocation6], 0 }
   0x2   :  { %16 = vsyncpa [#allocation9], 0 }
   0x3   :  { %17 = vsyncpa [#allocation4], 0  ;;  %s9935_s30 = smov [#allocation5]   ;;  %s9936_s11 = smov [#allocation2]  }
   0x4   :  { %s41_s10 = sshll.u32 %s9935_s30, 4  ;;  %s29_s12 = sshll.u32 %s9936_s11, 4  ;;  %s42_s10 = int_to_ptr.vmem [resolvable:$true] %s41_s10  ;;  %s9996_s12 = int_to_ptr.vmem [resolvable:$true] %s29_s12 }
   0x5   :  { %s9817_s15 = scalar_lea.hbm %s12051_s4, 8192 }
   0x6   :  { %p9818_p0 = scmp.ne.s32.totalorder %s12051_s4, %s9817_s15  ;;  %p9821_p1 = scmp.lt.u32.totalorder %s9817_s15, %s12051_s4 }
   0x8   :  { %p9823_p2 = pnand %p9821_p1, %p9818_p0 }
   0xa   :  { %9826 = shalt.err (!%p9823_p2)
}
   0xb   :  { %s9827_s20 = scalar_lea.vmem %s42_s10, 8192  ;;  %p9832_p4 = scmp.lt.s32.totalorder %s42_s10, %s42_s10 }
   0xc   :  { %p9828_p3 = scmp.ne.s32.totalorder %s42_s10, %s9827_s20  ;;  %p9833_p5 = scmp.lt.s32.totalorder %s9827_s20, %s9827_s20 }
   0xe   :  { %p9834_p6 = por %p9833_p5, %p9832_p4 }
  0x10   :  { %p9835_p7 = pnand %p9834_p6, %p9828_p3 }
  0x12   :  { %9838 = shalt.err (!%p9835_p7)
}
  0x13   :  { %s9937_s21 = smov 512   ;;  %s9938_s22 = smov 32  }
  0x14   :  { %47 = dma.hbm_to_vmem [thread:$0]  %s12051_s4, 8192, %s42_s10, [#allocation6], %s9937_s21, %s9937_s21, %s9938_s22  }
  0x15   :  { %s9839_s27 = scalar_lea.hbm %s12050_s3, 8192 }
  0x16   :  { %p9840_p8 = scmp.ne.s32.totalorder %s12050_s3, %s9839_s27  ;;  %p9843_p9 = scmp.lt.u32.totalorder %s9839_s27, %s12050_s3 }
  0x18   :  { %p9845_p10 = pnand %p9843_p9, %p9840_p8 }
  0x1a   :  { %9848 = shalt.err (!%p9845_p10)
}
  0x1b   :  { %s9849_s13 = scalar_lea.vmem %s9996_s12, 8192  ;;  %p9854_p12 = scmp.lt.s32.totalorder %s9996_s12, %s9996_s12 }
  0x1c   :  { %p9850_p11 = scmp.ne.s32.totalorder %s9996_s12, %s9849_s13  ;;  %p9855_p13 = scmp.lt.s32.totalorder %s9849_s13, %s9849_s13 }
  0x1e   :  { %p9856_p0 = por %p9855_p13, %p9854_p12 }
  0x20   :  { %p9857_p1 = pnand %p9856_p0, %p9850_p11 }
  0x22   :  { %9860 = shalt.err (!%p9857_p1)
}
  0x23   :  { %35 = dma.hbm_to_vmem [thread:$0]  %s12050_s3, 8192, %s9996_s12, [#allocation3], %s9937_s21, %s9937_s21, %s9938_s22  }
  0x24   :  { %s9939_s14 = smov [#allocation7]   ;;  %s9940_s16 = smov [#allocation8]  }
  0x25   :  { %s53_s15 = sshll.u32 %s9939_s14, 4  ;;  %s67_s17 = sshll.u32 %s9940_s16, 4  ;;  %s54_s15 = int_to_ptr.vmem [resolvable:$true] %s53_s15  ;;  %s10033_s17 = int_to_ptr.vmem [resolvable:$true] %s67_s17 }
  0x26   :  { %s9861_s20 = scalar_lea.hbm %s12052_s5, 8192 }
  0x27   :  { %p9862_p2 = scmp.ne.s32.totalorder %s12052_s5, %s9861_s20  ;;  %p9865_p3 = scmp.lt.u32.totalorder %s9861_s20, %s12052_s5 }
  0x29   :  { %p9867_p4 = pnand %p9865_p3, %p9862_p2 }
  0x2b   :  { %9870 = shalt.err (!%p9867_p4)
}
  0x2c   :  { %s9871_s3 = scalar_lea.vmem %s54_s15, 8192  ;;  %p9876_p6 = scmp.lt.s32.totalorder %s54_s15, %s54_s15 }
  0x2d   :  { %p9872_p5 = scmp.ne.s32.totalorder %s54_s15, %s9871_s3  ;;  %p9877_p7 = scmp.lt.s32.totalorder %s9871_s3, %s9871_s3 }
  0x2f   :  { %p9878_p8 = por %p9877_p7, %p9876_p6 }
  0x31   :  { %p9879_p9 = pnand %p9878_p8, %p9872_p5 }
  0x33   :  { %9882 = shalt.err (!%p9879_p9)
}
  0x34   :  { %59 = dma.hbm_to_vmem [thread:$0]  %s12052_s5, 8192, %s54_s15, [#allocation6], %s9937_s21, %s9937_s21, %s9938_s22  }
  0x35   :  { %s9883_s30 = scalar_lea.hbm %s12054_s7, 8192 }
  0x36   :  { %p9884_p10 = scmp.ne.s32.totalorder %s12054_s7, %s9883_s30  ;;  %p9887_p11 = scmp.lt.u32.totalorder %s9883_s30, %s12054_s7 }
  0x38   :  { %p9889_p12 = pnand %p9887_p11, %p9884_p10 }
  0x3a   :  { %9892 = shalt.err (!%p9889_p12)
}
  0x3b   :  { %s9893_s14 = scalar_lea.vmem %s10033_s17, 8192  ;;  %p9898_p0 = scmp.lt.s32.totalorder %s10033_s17, %s10033_s17 }
  0x3c   :  { %p9894_p13 = scmp.ne.s32.totalorder %s10033_s17, %s9893_s14  ;;  %p9899_p1 = scmp.lt.s32.totalorder %s9893_s14, %s9893_s14 }
  0x3e   :  { %p9900_p2 = por %p9899_p1, %p9898_p0 }
  0x40   :  { %p9901_p3 = pnand %p9900_p2, %p9894_p13 }
  0x42   :  { %9904 = shalt.err (!%p9901_p3)
}
  0x43   :  { %73 = dma.hbm_to_vmem [thread:$0]  %s12054_s7, 8192, %s10033_s17, [#allocation9], %s9937_s21, %s9937_s21, %s9938_s22  }
  0x44   :  { %9927 = dma.done.wait [#allocation3], 8192  }
  0x45   :  { %9928 = vsyncadd [#allocation3], 4294959104 }
  0x46   :  { %9929 = dma.done.wait [#allocation6], 16384  }
  0x47   :  { %9930 = vsyncadd [#allocation6], 4294950912 }
  0x48   :  { %9931 = dma.done.wait [#allocation9], 8192  }
  0x49   :  { %9932 = vsyncadd [#allocation9], 4294959104  ;;  %v12057_v0 = vmov 0.0   ;;  %v9942_v1 = vmov 0   ;;  %v289_v2 = vld [vmem:[#allocation2 + $0x8] sm:$0xff]  ;;  %v291_v4 = vld [vmem:[#allocation2 + $0x18] sm:$0xff] }
  0x4a   :  { %608 = vmatprep.mubr.f32.mxu0 %v12057_v0  ;;  %679 = vmatprep.mubr.f32.mxu1 %v12057_v0  ;;  %v293_v3 = vld [vmem:[#allocation2 + $0x28] sm:$0xff]  ;;  %v295_v6 = vld [vmem:[#allocation2 + $0x38] sm:$0xff]  ;;  %v288_v7 = vld [vmem:[#allocation2] sm:$0xff] }
  0x4b   :  { %9431 = vset.pattern.permute.xlu0 %v9942_v1  ;;  %9432 = vset.pattern.permute.xlu1 %v9942_v1  ;;  %v10072_v5 = vpack.c.bf16 %v293_v3, %v289_v2  ;;  %v292_v8 = vld [vmem:[#allocation2 + $0x20] sm:$0xff]  ;;  %v10074_v9 = vpack.c.bf16 %v295_v6, %v291_v4  ;;  %v290_v11 = vld [vmem:[#allocation2 + $0x10] sm:$0xff]  ;;  %v297_v13 = vld [vmem:[#allocation2 + $0x48] sm:$0xff] }
  0x4c   :  { %v10076_v10 = vpack.c.bf16 %v292_v8, %v288_v7  ;;  %v294_v12 = vld [vmem:[#allocation2 + $0x30] sm:$0xff]  ;;  %v301_v15 = vld [vmem:[#allocation2 + $0x68] sm:$0xff]  ;;  %v299_v16 = vld [vmem:[#allocation2 + $0x58] sm:$0xff] }
  0x4d   :  { %12335 = vst [vmem:[#allocation15_spill] sm:$0xff] %v10072_v5  ;;  %12336 = vst [vmem:[#allocation16_spill] sm:$0xff] %v10074_v9  ;;  %6805 = vmatprep.subr.bf16.mxu0 %v10072_v5  ;;  %v10079_v14 = vpack.c.bf16 %v294_v12, %v290_v11  ;;  %v303_v17 = vld [vmem:[#allocation2 + $0x78] sm:$0xff]  ;;  %6837 = vmatprep.subr.bf16.mxu1 %v10074_v9  ;;  %v10083_v18 = vpack.c.bf16 %v301_v15, %v297_v13  ;;  %v296_v20 = vld [vmem:[#allocation2 + $0x40] sm:$0xff] }
  0x4e   :  { %12337 = vst [vmem:[#allocation17_spill] sm:$0xff] %v10076_v10  ;;  %6807 = vmatpush1.bf16.msra.mxu0 %v10076_v10  ;;  %v10085_v19 = vpack.c.bf16 %v303_v17, %v299_v16  ;;  %v300_v21 = vld [vmem:[#allocation2 + $0x60] sm:$0xff]  ;;  %v298_v22 = vld [vmem:[#allocation2 + $0x50] sm:$0xff]  ;;  %v305_v25 = vld [vmem:[#allocation2 + $0x88] sm:$0xff] }
  0x4f   :  { %12338 = vst [vmem:[#allocation18_spill] sm:$0xff] %v10079_v14  ;;  %12339 = vst [vmem:[#allocation19_spill] sm:$0xff] %v10083_v18  ;;  %6839 = vmatpush1.bf16.msra.mxu1 %v10079_v14  ;;  %v10088_v23 = vpack.c.bf16 %v300_v21, %v296_v20  ;;  %v302_v24 = vld [vmem:[#allocation2 + $0x70] sm:$0xff]  ;;  %v309_v26 = vld [vmem:[#allocation2 + $0xa8] sm:$0xff]  ;;  %6809 = vmatprep.subr.bf16.mxu0 %v10083_v18 }
  0x50   :  { %12340 = vst [vmem:[#allocation20_spill] sm:$0xff] %v10085_v19  ;;  %6841 = vmatprep.subr.bf16.mxu1 %v10085_v19  ;;  %v10092_v27 = vpack.c.bf16 %v302_v24, %v298_v22  ;;  %v10094_v28 = vpack.c.bf16 %v309_v26, %v305_v25  ;;  %v307_v29 = vld [vmem:[#allocation2 + $0x98] sm:$0xff]  ;;  %v304_v31 = vld [vmem:[#allocation2 + $0x80] sm:$0xff]  ;;  %v306_v34 = vld [vmem:[#allocation2 + $0x90] sm:$0xff] }
  0x51   :  { %12341 = vst [vmem:[#allocation21_spill] sm:$0xff] %v10088_v23  ;;  %v311_v30 = vld [vmem:[#allocation2 + $0xb8] sm:$0xff]  ;;  %v308_v33 = vld [vmem:[#allocation2 + $0xa0] sm:$0xff]  ;;  %v310_v35 = vld [vmem:[#allocation2 + $0xb0] sm:$0xff] }
  0x52   :  { %12342 = vst [vmem:[#allocation22_spill] sm:$0xff] %v10092_v27  ;;  %12343 = vst [vmem:[#allocation23_spill] sm:$0xff] %v10094_v28  ;;  %v10096_v32 = vpack.c.bf16 %v311_v30, %v307_v29  ;;  %6811 = vmatpush1.bf16.msra.mxu0 %v10088_v23  ;;  %v10099_v36 = vpack.c.bf16 %v308_v33, %v304_v31  ;;  %v313_v37 = vld [vmem:[#allocation2 + $0xc8] sm:$0xff]  ;;  %v315_v39 = vld [vmem:[#allocation2 + $0xd8] sm:$0xff]  ;;  %v10103_v40 = vpack.c.bf16 %v310_v35, %v306_v34 }
  0x53   :  { %v317_v38 = vld [vmem:[#allocation2 + $0xe8] sm:$0xff]  ;;  %6843 = vmatpush1.bf16.msra.mxu1 %v10092_v27  ;;  %6813 = vmatprep.subr.bf16.mxu0 %v10094_v28  ;;  %v319_v42 = vld [vmem:[#allocation2 + $0xf8] sm:$0xff]  ;;  %v312_v43 = vld [vmem:[#allocation2 + $0xc0] sm:$0xff] }
  0x54   :  { %12344 = vst [vmem:[#allocation24_spill] sm:$0xff] %v10096_v32  ;;  %12345 = vst [vmem:[#allocation25_spill] sm:$0xff] %v10099_v36  ;;  %v10105_v41 = vpack.c.bf16 %v317_v38, %v313_v37  ;;  %v316_v44 = vld [vmem:[#allocation2 + $0xe0] sm:$0xff]  ;;  %6845 = vmatprep.subr.bf16.mxu1 %v10096_v32  ;;  %v10108_v45 = vpack.c.bf16 %v319_v42, %v315_v39  ;;  %v314_v46 = vld [vmem:[#allocation2 + $0xd0] sm:$0xff] }
  0x55   :  { %12346 = vst [vmem:[#allocation26_spill] sm:$0xff] %v10103_v40  ;;  %v318_v47 = vld [vmem:[#allocation2 + $0xf0] sm:$0xff]  ;;  %v321_v48 = vld [vmem:[#allocation2 + $0x108] sm:$0xff]  ;;  %v323_v50 = vld [vmem:[#allocation2 + $0x118] sm:$0xff]  ;;  %v10111_v52 = vpack.c.bf16 %v316_v44, %v312_v43 }
  0x56   :  { %12347 = vst [vmem:[#allocation27_spill] sm:$0xff] %v10105_v41  ;;  %12348 = vst [vmem:[#allocation28_spill] sm:$0xff] %v10108_v45  ;;  %v325_v49 = vld [vmem:[#allocation2 + $0x128] sm:$0xff]  ;;  %v327_v51 = vld [vmem:[#allocation2 + $0x138] sm:$0xff]  ;;  %6815 = vmatpush1.bf16.msra.mxu0 %v10099_v36  ;;  %v10115_v53 = vpack.c.bf16 %v318_v47, %v314_v46 }
  0x57   :  { %12349 = vst [vmem:[#allocation29_spill] sm:$0xff] %v10111_v52  ;;  %6847 = vmatpush1.bf16.msra.mxu1 %v10103_v40  ;;  %6817 = vmatprep.subr.bf16.mxu0 %v10105_v41  ;;  %v10117_v54 = vpack.c.bf16 %v325_v49, %v321_v48  ;;  %v320_v55 = vld [vmem:[#allocation2 + $0x100] sm:$0xff]  ;;  %v322_v57 = vld [vmem:[#allocation2 + $0x110] sm:$0xff]  ;;  %v10120_v58 = vpack.c.bf16 %v327_v51, %v323_v50  ;;  %v329_v60 = vld [vmem:[#allocation2 + $0x148] sm:$0xff] }
  0x58   :  { %12350 = vst [vmem:[#allocation30_spill] sm:$0xff] %v10115_v53  ;;  %v324_v56 = vld [vmem:[#allocation2 + $0x120] sm:$0xff]  ;;  %6849 = vmatprep.subr.bf16.mxu1 %v10108_v45  ;;  %v326_v59 = vld [vmem:[#allocation2 + $0x130] sm:$0xff]  ;;  %v333_v61 = vld [vmem:[#allocation2 + $0x168] sm:$0xff] }
  0x59   :  { %12351 = vst [vmem:[#allocation31_spill] sm:$0xff] %v10117_v54  ;;  %12352 = vst [vmem:[#allocation32_spill] sm:$0xff] %v10120_v58  ;;  %v331_v62 = vld [vmem:[#allocation2 + $0x158] sm:$0xff]  ;;  %v10123_v1 = vpack.c.bf16 %v324_v56, %v320_v55  ;;  %v10127_v2 = vpack.c.bf16 %v326_v59, %v322_v57  ;;  %v10129_v3 = vpack.c.bf16 %v333_v61, %v329_v60  ;;  %v328_v4 = vld [vmem:[#allocation2 + $0x140] sm:$0xff] }
  0x5a   :  { %v335_v63 = vld [vmem:[#allocation2 + $0x178] sm:$0xff]  ;;  %6819 = vmatpush1.bf16.msra.mxu0 %v10111_v52  ;;  %v332_v6 = vld [vmem:[#allocation2 + $0x160] sm:$0xff]  ;;  %v330_v7 = vld [vmem:[#allocation2 + $0x150] sm:$0xff] }
  0x5b   :  { %12353 = vst [vmem:[#allocation33_spill] sm:$0xff] %v10123_v1  ;;  %6851 = vmatpush1.bf16.msra.mxu1 %v10115_v53  ;;  %6821 = vmatprep.subr.bf16.mxu0 %v10117_v54  ;;  %12354 = vst [vmem:[#allocation34_spill] sm:$0xff] %v10127_v2  ;;  %v10132_v8 = vpack.c.bf16 %v335_v63, %v331_v62  ;;  %v334_v11 = vld [vmem:[#allocation2 + $0x170] sm:$0xff]  ;;  %v337_v12 = vld [vmem:[#allocation2 + $0x188] sm:$0xff]  ;;  %v10135_v17 = vpack.c.bf16 %v332_v6, %v328_v4 }
  0x5c   :  { %12355 = vst [vmem:[#allocation35_spill] sm:$0xff] %v10129_v3  ;;  %6853 = vmatprep.subr.bf16.mxu1 %v10120_v58  ;;  %v341_v13 = vld [vmem:[#allocation2 + $0x1a8] sm:$0xff]  ;;  %v339_v15 = vld [vmem:[#allocation2 + $0x198] sm:$0xff]  ;;  %v336_v20 = vld [vmem:[#allocation2 + $0x180] sm:$0xff]  ;;  %v10139_v21 = vpack.c.bf16 %v334_v11, %v330_v7 }
  0x5d   :  { %12356 = vst [vmem:[#allocation36_spill] sm:$0xff] %v10132_v8  ;;  %v343_v16 = vld [vmem:[#allocation2 + $0x1b8] sm:$0xff]  ;;  %12357 = vst [vmem:[#allocation37_spill] sm:$0xff] %v10135_v17  ;;  %v10141_v22 = vpack.c.bf16 %v341_v13, %v337_v12  ;;  %v340_v24 = vld [vmem:[#allocation2 + $0x1a0] sm:$0xff] }
  0x5e   :  { %6823 = vmatpush1.bf16.msra.mxu0 %v10123_v1  ;;  %12358 = vst [vmem:[#allocation38_spill] sm:$0xff] %v10139_v21  ;;  %v338_v25 = vld [vmem:[#allocation2 + $0x190] sm:$0xff]  ;;  %v88_v26 = vld [vmem:[%s12047_s0] sm:$0xf]  ;;  %v10147_v29 = vpack.c.bf16 %v343_v16, %v339_v15  ;;  %v345_v31 = vld [vmem:[#allocation2 + $0x1c8] sm:$0xff]  ;;  %v10153_v38 = vpack.c.bf16 %v340_v24, %v336_v20 }
  0x5f   :  { %6855 = vmatpush1.bf16.msra.mxu1 %v10127_v2  ;;  %6825 = vmatprep.subr.bf16.mxu0 %v10129_v3  ;;  %12359 = vst [vmem:[#allocation39_spill] sm:$0xff] %v10141_v22  ;;  %v342_v30 = vld [vmem:[#allocation2 + $0x1b0] sm:$0xff]  ;;  %v349_v33 = vld [vmem:[#allocation2 + $0x1e8] sm:$0xff]  ;;  %v347_v34 = vld [vmem:[#allocation2 + $0x1d8] sm:$0xff] }
  0x60   :  { %6857 = vmatprep.subr.bf16.mxu1 %v10132_v8  ;;  %12360 = vst [vmem:[#allocation40_spill] sm:$0xff] %v10147_v29  ;;  %99 = vperm.xlu0 %9431, %v88_v26   ;;  %v351_v35 = vld [vmem:[#allocation2 + $0x1f8] sm:$0xff]  ;;  %v89_v37 = vld [vmem:[%s12047_s0 + $0x4] sm:$0xf]  ;;  %12361 = vst [vmem:[#allocation41_spill] sm:$0xff] %v10153_v38  ;;  %v10157_v39 = vpack.c.bf16 %v342_v30, %v338_v25  ;;  %v10159_v42 = vpack.c.bf16 %v349_v33, %v345_v31 }
  0x61   :  { %v344_v43 = vld [vmem:[#allocation2 + $0x1c0] sm:$0xff]  ;;  %v10162_v46 = vpack.c.bf16 %v351_v35, %v347_v34  ;;  %v346_v47 = vld [vmem:[#allocation2 + $0x1d0] sm:$0xff]  ;;  %v94_v55 = vld [vmem:[%s12047_s0 + $0x18] sm:$0xf] }
  0x62   :  { %6827 = vmatpush1.bf16.msra.mxu0 %v10135_v17  ;;  %12362 = vst [vmem:[#allocation42_spill] sm:$0xff] %v10157_v39  ;;  %12363 = vst [vmem:[#allocation43_spill] sm:$0xff] %v10159_v42  ;;  %v348_v44 = vld [vmem:[#allocation2 + $0x1e0] sm:$0xff]  ;;  %v350_v48 = vld [vmem:[#allocation2 + $0x1f0] sm:$0xff] }
  0x63   :  { %6859 = vmatpush1.bf16.msra.mxu1 %v10139_v21  ;;  %6829 = vmatprep.subr.bf16.mxu0 %v10141_v22  ;;  %12364 = vst [vmem:[#allocation44_spill] sm:$0xff] %v10162_v46  ;;  %v92_v49 = vld [vmem:[%s12047_s0 + $0x10] sm:$0xf]  ;;  %v10168_v50 = vpack.c.bf16 %v348_v44, %v344_v43  ;;  %v10172_v51 = vpack.c.bf16 %v350_v48, %v346_v47  ;;  %v353_v56 = vld [vmem:[#allocation5 + $0x8] sm:$0xff]  ;;  %v355_v59 = vld [vmem:[#allocation5 + $0x18] sm:$0xff] }
  0x64   :  { %6861 = vmatprep.subr.bf16.mxu1 %v10147_v29  ;;  %104 = vperm.xlu0 %9431, %v89_v37   ;;  %v357_v57 = vld [vmem:[#allocation5 + $0x28] sm:$0xff]  ;;  %v359_v61 = vld [vmem:[#allocation5 + $0x38] sm:$0xff]  ;;  %v352_v62 = vld [vmem:[#allocation5] sm:$0xff] }
  0x65   :  { %12365 = vst [vmem:[#allocation45_spill] sm:$0xff] %v10168_v50  ;;  %12366 = vst [vmem:[#allocation46_spill] sm:$0xff] %v10172_v51  ;;  %v10184_v60 = vpack.c.bf16 %v357_v57, %v353_v56  ;;  %v356_v63 = vld [vmem:[#allocation5 + $0x20] sm:$0xff]  ;;  %v10186_v4 = vpack.c.bf16 %v359_v61, %v355_v59  ;;  %v354_v7 = vld [vmem:[#allocation5 + $0x10] sm:$0xff] }
  0x66   :  { %6831 = vmatpush1.bf16.msra.mxu0 %v10153_v38  ;;  %v10188_v6 = vpack.c.bf16 %v356_v63, %v352_v62  ;;  %v358_v11 = vld [vmem:[#allocation5 + $0x30] sm:$0xff]  ;;  %v361_v13 = vld [vmem:[#allocation5 + $0x48] sm:$0xff]  ;;  %v363_v16 = vld [vmem:[#allocation5 + $0x58] sm:$0xff] }
  0x67   :  { %6863 = vmatpush1.bf16.msra.mxu1 %v10157_v39  ;;  %6833 = vmatprep.subr.bf16.mxu0 %v10159_v42  ;;  %12367 = vst [vmem:[#allocation47_spill] sm:$0xff] %v10184_v60  ;;  %12368 = vst [vmem:[#allocation48_spill] sm:$0xff] %v10186_v4  ;;  %v10191_v12 = vpack.c.bf16 %v358_v11, %v354_v7  ;;  %v365_v15 = vld [vmem:[#allocation5 + $0x68] sm:$0xff]  ;;  %v367_v24 = vld [vmem:[#allocation5 + $0x78] sm:$0xff] }
  0x68   :  { %6865 = vmatprep.subr.bf16.mxu1 %v10162_v46  ;;  %119 = vperm.xlu0 %9431, %v92_v49   ;;  %12369 = vst [vmem:[#allocation49_spill] sm:$0xff] %v10188_v6  ;;  %v10196_v20 = vpack.c.bf16 %v365_v15, %v361_v13  ;;  %v360_v25 = vld [vmem:[#allocation5 + $0x40] sm:$0xff]  ;;  %v10198_v30 = vpack.c.bf16 %v367_v24, %v363_v16  ;;  %v362_v33 = vld [vmem:[#allocation5 + $0x50] sm:$0xff]  ;;  %v369_v37 = vld [vmem:[#allocation5 + $0x88] sm:$0xff] }
  0x69   :  { %12370 = vst [vmem:[#allocation50_spill] sm:$0xff] %v10191_v12  ;;  %v364_v26 = vld [vmem:[#allocation5 + $0x60] sm:$0xff]  ;;  %v366_v34 = vld [vmem:[#allocation5 + $0x70] sm:$0xff]  ;;  %v373_v43 = vld [vmem:[#allocation5 + $0xa8] sm:$0xff] }
  0x6a   :  { %6835 = vmatpush1.bf16.msra.mxu0 %v10168_v50  ;;  %12371 = vst [vmem:[#allocation51_spill] sm:$0xff] %v10196_v20  ;;  %12372 = vst [vmem:[#allocation52_spill] sm:$0xff] %v10198_v30  ;;  %v10200_v31 = vpack.c.bf16 %v364_v26, %v360_v25  ;;  %v10203_v35 = vpack.c.bf16 %v366_v34, %v362_v33  ;;  %v371_v44 = vld [vmem:[#allocation5 + $0x98] sm:$0xff]  ;;  %v10208_v47 = vpack.c.bf16 %v373_v43, %v369_v37  ;;  %v368_v49 = vld [vmem:[#allocation5 + $0x80] sm:$0xff] }
  0x6b   :  { %6867 = vmatpush1.bf16.msra.mxu1 %v10172_v51  ;;  %6869 = vmatprep.subr.bf16.mxu0 %v10184_v60  ;;  %v375_v48 = vld [vmem:[#allocation5 + $0xb8] sm:$0xff]  ;;  %v370_v59 = vld [vmem:[#allocation5 + $0x90] sm:$0xff]  ;;  %v377_v63 = vld [vmem:[#allocation5 + $0xc8] sm:$0xff] }
  0x6c   :  { %129 = vperm.xlu0 %9431, %v94_v55   ;;  %6901 = vmatprep.subr.bf16.mxu1 %v10186_v4  ;;  %12373 = vst [vmem:[#allocation53_spill] sm:$0xff] %v10200_v31  ;;  %12374 = vst [vmem:[#allocation54_spill] sm:$0xff] %v10203_v35  ;;  %v372_v55 = vld [vmem:[#allocation5 + $0xa0] sm:$0xff]  ;;  %v10210_v56 = vpack.c.bf16 %v375_v48, %v371_v44  ;;  %v374_v61 = vld [vmem:[#allocation5 + $0xb0] sm:$0xff] }
  0x6d   :  { %609 = vmatmul.mubr.f32.vlgmr.msra.gmra.mrb[0].mxu0 %v12057_v0  ;;  %12375 = vst [vmem:[#allocation55_spill] sm:$0xff] %v10208_v47  ;;  %v10212_v57 = vpack.c.bf16 %v372_v55, %v368_v49  ;;  %v10215_v62 = vpack.c.bf16 %v374_v61, %v370_v59  ;;  %v381_v7 = vld [vmem:[#allocation5 + $0xe8] sm:$0xff]  ;;  %v379_v11 = vld [vmem:[#allocation5 + $0xd8] sm:$0xff]  ;;  %v376_v16 = vld [vmem:[#allocation5 + $0xc0] sm:$0xff] }
  0x6e   :  { %680 = vmatmul.mubr.f32.vlgmr.msra.gmra.mrb[0].mxu1 %v12057_v0  ;;  %778 = vmatprep.mubr.f32.mxu0 %v12057_v0  ;;  %12376 = vst [vmem:[#allocation56_spill] sm:$0xff] %v10210_v56  ;;  %v10220_v13 = vpack.c.bf16 %v381_v7, %v377_v63  ;;  %v383_v15 = vld [vmem:[#allocation5 + $0xf8] sm:$0xff]  ;;  %v380_v24 = vld [vmem:[#allocation5 + $0xe0] sm:$0xff]  ;;  %v378_v33 = vld [vmem:[#allocation5 + $0xd0] sm:$0xff] }
  0x6f   :  { %849 = vmatprep.mubr.f32.mxu1 %v12057_v0  ;;  %6871 = vmatpush1.bf16.msra.mxu0 %v10188_v6  ;;  %12377 = vst [vmem:[#allocation57_spill] sm:$0xff] %v10212_v57  ;;  %12378 = vst [vmem:[#allocation58_spill] sm:$0xff] %v10215_v62  ;;  %v10222_v25 = vpack.c.bf16 %v383_v15, %v379_v11  ;;  %v10224_v26 = vpack.c.bf16 %v380_v24, %v376_v16  ;;  %v382_v34 = vld [vmem:[#allocation5 + $0xf0] sm:$0xff]  ;;  %v385_v43 = vld [vmem:[#allocation5 + $0x108] sm:$0xff] }
  0x70   :  { %6903 = vmatpush1.bf16.msra.mxu1 %v10191_v12  ;;  %6873 = vmatprep.subr.bf16.mxu0 %v10196_v20  ;;  %12379 = vst [vmem:[#allocation59_spill] sm:$0xff] %v10220_v13  ;;  %v10227_v37 = vpack.c.bf16 %v382_v34, %v378_v33  ;;  %v389_v44 = vld [vmem:[#allocation5 + $0x128] sm:$0xff]  ;;  %v387_v48 = vld [vmem:[#allocation5 + $0x118] sm:$0xff]  ;;  %v384_v59 = vld [vmem:[#allocation5 + $0x100] sm:$0xff] }
  0x71   :  { %6905 = vmatprep.subr.bf16.mxu1 %v10198_v30  ;;  %12380 = vst [vmem:[#allocation60_spill] sm:$0xff] %v10222_v25  ;;  %12381 = vst [vmem:[#allocation61_spill] sm:$0xff] %v10224_v26  ;;  %v10232_v49 = vpack.c.bf16 %v389_v44, %v385_v43  ;;  %v391_v55 = vld [vmem:[#allocation5 + $0x138] sm:$0xff]  ;;  %v388_v61 = vld [vmem:[#allocation5 + $0x120] sm:$0xff] }
  0x72   :  { %12382 = vst [vmem:[#allocation62_spill] sm:$0xff] %v10227_v37  ;;  %v386_v63 = vld [vmem:[#allocation5 + $0x110] sm:$0xff]  ;;  %v10235_v11 = vpack.c.bf16 %v391_v55, %v387_v48  ;;  %v10237_v15 = vpack.c.bf16 %v388_v61, %v384_v59  ;;  %v393_v24 = vld [vmem:[#allocation5 + $0x148] sm:$0xff]  ;;  %v395_v34 = vld [vmem:[#allocation5 + $0x158] sm:$0xff] }
  0x73   :  { %6875 = vmatpush1.bf16.msra.mxu0 %v10200_v31  ;;  %12383 = vst [vmem:[#allocation63_spill] sm:$0xff] %v10232_v49  ;;  %v390_v7 = vld [vmem:[#allocation5 + $0x130] sm:$0xff]  ;;  %v397_v33 = vld [vmem:[#allocation5 + $0x168] sm:$0xff]  ;;  %v399_v43 = vld [vmem:[#allocation5 + $0x178] sm:$0xff] }
  0x74   :  { %6907 = vmatpush1.bf16.msra.mxu1 %v10203_v35  ;;  %6877 = vmatprep.subr.bf16.mxu0 %v10208_v47  ;;  %12384 = vst [vmem:[#allocation64_spill] sm:$0xff] %v10235_v11  ;;  %12385 = vst [vmem:[#allocation65_spill] sm:$0xff] %v10237_v15  ;;  %v10239_v16 = vpack.c.bf16 %v390_v7, %v386_v63  ;;  %v10241_v0 = vpack.c.bf16 %v397_v33, %v393_v24  ;;  %v392_v44 = vld [vmem:[#allocation5 + $0x140] sm:$0xff]  ;;  %v394_v55 = vld [vmem:[#allocation5 + $0x150] sm:$0xff] }
  0x75   :  { %6909 = vmatprep.subr.bf16.mxu1 %v10210_v56  ;;  %v398_v59 = vld [vmem:[#allocation5 + $0x170] sm:$0xff]  ;;  %v401_v61 = vld [vmem:[#allocation5 + $0x188] sm:$0xff]  ;;  %v403_v24 = vld [vmem:[#allocation5 + $0x198] sm:$0xff] }
  0x76   :  { %12386 = vst [vmem:[#allocation66_spill] sm:$0xff] %v10239_v16  ;;  %12387 = vst [vmem:[#allocation67_spill] sm:$0xff] %v10241_v0  ;;  %v10251_v63 = vpack.c.bf16 %v398_v59, %v394_v55  ;;  %v405_v7 = vld [vmem:[#allocation5 + $0x1a8] sm:$0xff]  ;;  %v407_v33 = vld [vmem:[#allocation5 + $0x1b8] sm:$0xff] }
  0x77   :  { %6879 = vmatpush1.bf16.msra.mxu0 %v10212_v57  ;;  %v411_v55 = vld [vmem:[#allocation5 + $0x1d8] sm:$0xff] }
  0x78   :  { %6911 = vmatpush1.bf16.msra.mxu1 %v10215_v62  ;;  %6881 = vmatprep.subr.bf16.mxu0 %v10220_v13  ;;  %12390 = vst [vmem:[#allocation70_spill] sm:$0xff] %v10251_v63  ;;  %v415_v59 = vld [vmem:[#allocation5 + $0x1f8] sm:$0xff] }
  0x79   :  { %6913 = vmatprep.subr.bf16.mxu1 %v10222_v25  ;;  %v413_v25 = vld [vmem:[#allocation5 + $0x1e8] sm:$0xff] }
  0x7b   :  { %6883 = vmatpush1.bf16.msra.mxu0 %v10224_v26  ;;  %v10245_v26 = vpack.c.bf16 %v399_v43, %v395_v34  ;;  %v10256_v34 = vpack.c.bf16 %v407_v33, %v403_v24  ;;  %v404_v43 = vld [vmem:[#allocation5 + $0x1a0] sm:$0xff] }
  0x7c   :  { %6915 = vmatpush1.bf16.msra.mxu1 %v10227_v37  ;;  %6885 = vmatprep.subr.bf16.mxu0 %v10232_v49  ;;  %v396_v37 = vld [vmem:[#allocation5 + $0x160] sm:$0xff]  ;;  %v409_v49 = vld [vmem:[#allocation5 + $0x1c8] sm:$0xff] }
  0x7d   :  { %6917 = vmatprep.subr.bf16.mxu1 %v10235_v11  ;;  %12388 = vst [vmem:[#allocation68_spill] sm:$0xff] %v10245_v26  ;;  %v10247_v48 = vpack.c.bf16 %v396_v37, %v392_v44  ;;  %v10254_v11 = vpack.c.bf16 %v405_v7, %v401_v61  ;;  %12392 = vst [vmem:[#allocation72_spill] sm:$0xff] %v10256_v34  ;;  %v400_v37 = vld [vmem:[#allocation5 + $0x180] sm:$0xff]  ;;  %v402_v44 = vld [vmem:[#allocation5 + $0x190] sm:$0xff]  ;;  %v10265_v7 = vpack.c.bf16 %v413_v25, %v409_v49  ;;  %v138_v25 = vlaneseq }
  0x7e   :  { %v408_v24 = vld [vmem:[#allocation5 + $0x1c0] sm:$0xff] }
  0x7f   :  { %6887 = vmatpush1.bf16.msra.mxu0 %v10237_v15  ;;  %12389 = vst [vmem:[#allocation69_spill] sm:$0xff] %v10247_v48  ;;  %12391 = vst [vmem:[#allocation71_spill] sm:$0xff] %v10254_v11  ;;  %v406_v15 = vld [vmem:[#allocation5 + $0x1b0] sm:$0xff]  ;;  %v412_v33 = vld [vmem:[#allocation5 + $0x1e0] sm:$0xff]  ;;  %v139_v49 = vshrl.u32 %v138_v25, 7 }
  0x80   :  { %6919 = vmatpush1.bf16.msra.mxu1 %v10239_v16  ;;  %6889 = vmatprep.subr.bf16.mxu0 %v10241_v0  ;;  %v10259_v0 = vpack.c.bf16 %v404_v43, %v400_v37  ;;  %v10263_v61 = vpack.c.bf16 %v406_v15, %v402_v44  ;;  %12395 = vst [vmem:[#allocation75_spill] sm:$0xff] %v10265_v7  ;;  %v410_v16 = vld [vmem:[#allocation5 + $0x1d0] sm:$0xff]  ;;  %v96_v44 = vld [vmem:[%s12048_s1] sm:$0xf] }
  0x81   :  { %6921 = vmatprep.subr.bf16.mxu1 %v10245_v26  ;;  %v10268_v26 = vpack.c.bf16 %v415_v59, %v411_v55  ;;  %v10271_v37 = vpack.c.bf16 %v412_v33, %v408_v24  ;;  %v10280_v43 = vsub.s32 0, %v139_v49  ;;  %v10285_v55 = vsub.s32 1, %v139_v49 }
  0x82   :  { %12393 = vst [vmem:[#allocation73_spill] sm:$0xff] %v10259_v0  ;;  %12394 = vst [vmem:[#allocation74_spill] sm:$0xff] %v10263_v61  ;;  %v10296_v33 = vsub.s32 2, %v139_v49 }
  0x83   :  { %6891 = vmatpush1.bf16.msra.mxu0 %v10247_v48  ;;  %12396 = vst [vmem:[#allocation76_spill] sm:$0xff] %v10268_v26  ;;  %v414_v48 = vld [vmem:[#allocation5 + $0x1f0] sm:$0xff]  ;;  %12397 = vst [vmem:[#allocation77_spill] sm:$0xff] %v10271_v37  ;;  %v10288_v59 = vrot.slane %v96_v44, %v10280_v43 }
  0x84   :  { %6923 = vmatpush1.bf16.msra.mxu1 %v10251_v63  ;;  %6893 = vmatprep.subr.bf16.mxu0 %v10254_v11  ;;  %v10275_v15 = vpack.c.bf16 %v414_v48, %v410_v16  ;;  %12399 = vst [vmem:[#allocation79_spill] sm:$0xff] %v10280_v43  ;;  %12400 = vst [vmem:[#allocation80_spill] sm:$0xff] %v10285_v55  ;;  %v10291_v16 = vrot.slane %v96_v44, %v10285_v55  ;;  %v190_v48 = vld [vmem:[%s12049_s2] sm:$0xf] }
  0x85   :  { %6925 = vmatprep.subr.bf16.mxu1 %v10256_v34  ;;  %12401 = vst [vmem:[#allocation81_spill] sm:$0xff] %v10288_v59  ;;  %12403 = vst [vmem:[#allocation83_spill] sm:$0xff] %v10296_v33  ;;  %v10315_v63 = vrot.slane %v190_v48, %v10296_v33 }
  0x86   :  { %12398 = vst [vmem:[#allocation78_spill] sm:$0xff] %v10275_v15  ;;  %12402 = vst [vmem:[#allocation82_spill] sm:$0xff] %v10291_v16 }
  0x87   :  { %6895 = vmatpush1.bf16.msra.mxu0 %v10259_v0  ;;  %12408 = vst [vmem:[#allocation88_spill] sm:$0xff] %v10315_v63 }
  0x88   :  { %6927 = vmatpush1.bf16.msra.mxu1 %v10263_v61  ;;  %6897 = vmatprep.subr.bf16.mxu0 %v10265_v7  ;;  %v10307_v7 = vrot.slane %v96_v44, %v10296_v33  ;;  %v10309_v61 = vsub.s32 3, %v139_v49 }
  0x89   :  { %6929 = vmatprep.subr.bf16.mxu1 %v10268_v26  ;;  %v10304_v26 = vrot.slane %v190_v48, %v10285_v55 }
  0x8a   :  { %12406 = vst [vmem:[#allocation86_spill] sm:$0xff] %v10307_v7  ;;  %12407 = vst [vmem:[#allocation87_spill] sm:$0xff] %v10309_v61 }
  0x8b   :  { %6899 = vmatpush1.bf16.msra.mxu0 %v10271_v37  ;;  %12405 = vst [vmem:[#allocation85_spill] sm:$0xff] %v10304_v26 }
  0x8c   :  { %6931 = vmatpush1.bf16.msra.mxu1 %v10275_v15  ;;  %v10300_v15 = vrot.slane %v190_v48, %v10280_v43 }
  0x8e   :  { %12404 = vst [vmem:[#allocation84_spill] sm:$0xff] %v10300_v15 }
  0xdf   :  { %v100_v24 = vpop.permute.xlu0 %99 }
  0xe0   :  { %v158_v25 = vmul.f32 %v10288_v59, %v100_v24  ;;  %v159_v37 = vmul.f32 %v10291_v16, %v100_v24  ;;  %v160_v59 = vmul.f32 %v10307_v7, %v100_v24  ;;  %v10318_v16 = vrot.slane %v96_v44, %v10309_v61 }
  0xe1   :  { %v10323_v7 = vrot.slane %v190_v48, %v10309_v61 }
  0xe2   :  { %v212_v0 = vadd.f32 %v10300_v15, %v158_v25  ;;  %v213_v34 = vadd.f32 %v10304_v26, %v159_v37  ;;  %v214_v35 = vadd.f32 %v10315_v63, %v160_v59  ;;  %v161_v37 = vmul.f32 %v10318_v16, %v100_v24  ;;  %v471_v63 = vld [vmem:[#allocation7 + $0x1b8] sm:$0xff] }
  0xe3   :  { %12409 = vst [vmem:[#allocation89_spill] sm:$0xff] %v10323_v7 }
  0xe4   :  { %v215_v44 = vadd.f32 %v10323_v7, %v161_v37  ;;  %v421_v37 = vld [vmem:[#allocation7 + $0x28] sm:$0xff]  ;;  %v467_v7 = vld [vmem:[#allocation7 + $0x198] sm:$0xff] }
 0x140   :  { %v610_v11 = vpop.f32.mrb[0].mxu0 }
 0x141   :  { %v686_v13 = vadd.f32 %v610_v11, %v212_v0  ;;  %v681_v62 = vpop.f32.mrb[0].mxu1  ;;  %v612_v57 = vpop.f32.mrb[1].mxu0 }
 0x142   :  { %v687_v56 = vadd.f32 %v612_v57, %v213_v34  ;;  %v683_v47 = vpop.f32.mrb[1].mxu1  ;;  %v688_v26 = vadd.f32 %v681_v62, %v214_v35 }
 0x143   :  { %v6732_v49 = vmul.f32 -1.442695, %v686_v13  ;;  %v689_v0 = vadd.f32 %v683_v47, %v215_v44  ;;  %v419_v44 = vld [vmem:[#allocation7 + $0x18] sm:$0xff] }
 0x144   :  { %v6733_v25 = vmul.f32 -1.442695, %v687_v56  ;;  %v6734_v15 = vmul.f32 -1.442695, %v688_v26 }
 0x145   :  { %9433 = vpow2.f32 %v6732_v49 }
 0x146   :  { %9435 = vpow2.f32 %v6733_v25 }
 0x147   :  { %9437 = vpow2.f32 %v6734_v15  ;;  %v417_v15 = vld [vmem:[#allocation7 + $0x8] sm:$0xff] }
 0x148   :  { %9439 = vtanh.f32 %v689_v0  ;;  %v10335_v0 = vpack.c.bf16 %v421_v37, %v417_v15  ;;  %v431_v15 = vld [vmem:[#allocation7 + $0x78] sm:$0xff]  ;;  %v424_v37 = vld [vmem:[#allocation7 + $0x40] sm:$0xff] }
 0x14a   :  { %12412 = vst [vmem:[#allocation91_spill] sm:$0xff] %v10335_v0  ;;  %6933 = vmatprep.subr.bf16.mxu0 %v10335_v0 }
 0x14f   :  { %v9434_v11 = vpop.eup %9433 }
 0x150   :  { %v699_v31 = vadd.f32 1.0, %v9434_v11  ;;  %v9436_v57 = vpop.eup %9435  ;;  %v423_v11 = vld [vmem:[#allocation7 + $0x38] sm:$0xff] }
 0x151   :  { %v700_v13 = vadd.f32 1.0, %v9436_v57  ;;  %v9438_v56 = vpop.eup %9437  ;;  %v416_v57 = vld [vmem:[#allocation7] sm:$0xff] }
 0x152   :  { %9441 = vrcp.f32 %v699_v31  ;;  %v9440_v34 = vpop.eup %9439  ;;  %v701_v49 = vadd.f32 1.0, %v9438_v56  ;;  %v12411_v31 = vmov 0.0   ;;  %v10337_v56 = vpack.c.bf16 %v423_v11, %v419_v44  ;;  %v428_v44 = vld [vmem:[#allocation7 + $0x60] sm:$0xff] }
 0x153   :  { %9443 = vrcp.f32 %v700_v13  ;;  %v420_v13 = vld [vmem:[#allocation7 + $0x20] sm:$0xff] }
 0x154   :  { %9445 = vrcp.f32 %v701_v49  ;;  %12413 = vst [vmem:[#allocation92_spill] sm:$0xff] %v10337_v56  ;;  %6965 = vmatprep.subr.bf16.mxu1 %v10337_v56  ;;  %v425_v49 = vld [vmem:[#allocation7 + $0x48] sm:$0xff] }
 0x15c   :  { %v9442_v59 = vpop.eup %9441 }
 0x15d   :  { %v710_v24 = vmul.f32 %v9442_v59, %v9440_v34  ;;  %v9444_v48 = vpop.eup %9443  ;;  %v10339_v34 = vpack.c.bf16 %v420_v13, %v416_v57  ;;  %v418_v59 = vld [vmem:[#allocation7 + $0x10] sm:$0xff]  ;;  %v10351_v57 = vpack.c.bf16 %v428_v44, %v424_v37  ;;  %v436_v37 = vld [vmem:[#allocation7 + $0xa0] sm:$0xff] }
 0x15e   :  { %v709_v25 = vmul.f32 0.0, %v9444_v48  ;;  %v9446_v47 = vpop.eup %9445  ;;  %v426_v13 = vld [vmem:[#allocation7 + $0x50] sm:$0xff] }
 0x15f   :  { %12414 = vst [vmem:[#allocation93_spill] sm:$0xff] %v10339_v34  ;;  %12418 = vst [vmem:[#allocation97_spill] sm:$0xff] %v10351_v57 }
 0x160   :  { %v10326_v35 = vadd.f32 %v710_v24, %v709_v25  ;;  %v422_v24 = vld [vmem:[#allocation7 + $0x30] sm:$0xff]  ;;  %v429_v25 = vld [vmem:[#allocation7 + $0x68] sm:$0xff] }
 0x161   :  { %v10342_v48 = vpack.c.bf16 %v422_v24, %v418_v59  ;;  %v430_v59 = vld [vmem:[#allocation7 + $0x70] sm:$0xff] }
 0x162   :  { %12410 = vst [vmem:[#allocation90_spill] sm:$0xff] %v10326_v35  ;;  %9447 = vtanh.f32 %v10326_v35  ;;  %v10354_v24 = vpack.c.bf16 %v430_v59, %v426_v13  ;;  %v434_v13 = vld [vmem:[#allocation7 + $0x90] sm:$0xff] }
 0x163   :  { %12415 = vst [vmem:[#allocation94_spill] sm:$0xff] %v10342_v48  ;;  %v438_v59 = vld [vmem:[#allocation7 + $0xb0] sm:$0xff] }
 0x164   :  { %12419 = vst [vmem:[#allocation98_spill] sm:$0xff] %v10354_v24 }
 0x16c   :  { %v9448_v62 = vpop.eup %9447 }
 0x16d   :  { %v10329_v26 = vmul.f32 %v9448_v62, %v9446_v47  ;;  %v427_v47 = vld [vmem:[#allocation7 + $0x58] sm:$0xff]  ;;  %v10347_v62 = vpack.c.bf16 %v429_v25, %v425_v49  ;;  %v437_v49 = vld [vmem:[#allocation7 + $0xa8] sm:$0xff] }
 0x16e   :  { %v10349_v11 = vpack.c.bf16 %v431_v15, %v427_v47  ;;  %v435_v25 = vld [vmem:[#allocation7 + $0x98] sm:$0xff]  ;;  %v432_v15 = vld [vmem:[#allocation7 + $0x80] sm:$0xff] }
 0x16f   :  { %779 = vmatmul.mubr.f32.vlgmr.msra.gmra.mrb[2].mxu0 %v10329_v26  ;;  %850 = vmatmul.mubr.f32.vlgmr.msra.gmra.mrb[2].mxu1 %v10329_v26  ;;  %12416 = vst [vmem:[#allocation95_spill] sm:$0xff] %v10347_v62  ;;  %v439_v47 = vld [vmem:[#allocation7 + $0xb8] sm:$0xff]  ;;  %v10363_v35 = vpack.c.bf16 %v436_v37, %v432_v15  ;;  %v444_v15 = vld [vmem:[#allocation7 + $0xe0] sm:$0xff] }
 0x170   :  { %945 = vmatprep.mubr.f32.mxu0 %v12411_v31  ;;  %1016 = vmatprep.mubr.f32.mxu1 %v12411_v31  ;;  %12417 = vst [vmem:[#allocation96_spill] sm:$0xff] %v10349_v11  ;;  %v10361_v44 = vpack.c.bf16 %v439_v47, %v435_v25  ;;  %v447_v25 = vld [vmem:[#allocation7 + $0xf8] sm:$0xff]  ;;  %v440_v47 = vld [vmem:[#allocation7 + $0xc0] sm:$0xff] }
 0x171   :  { %6935 = vmatpush1.bf16.msra.mxu0 %v10339_v34  ;;  %6967 = vmatpush1.bf16.msra.mxu1 %v10342_v48  ;;  %v433_v48 = vld [vmem:[#allocation7 + $0x88] sm:$0xff]  ;;  %12422 = vst [vmem:[#allocation101_spill] sm:$0xff] %v10363_v35 }
 0x172   :  { %6937 = vmatprep.subr.bf16.mxu0 %v10347_v62  ;;  %6969 = vmatprep.subr.bf16.mxu1 %v10349_v11  ;;  %v10359_v34 = vpack.c.bf16 %v437_v49, %v433_v48  ;;  %12421 = vst [vmem:[#allocation100_spill] sm:$0xff] %v10361_v44  ;;  %v10366_v11 = vpack.c.bf16 %v438_v59, %v434_v13  ;;  %v445_v48 = vld [vmem:[#allocation7 + $0xe8] sm:$0xff]  ;;  %v443_v49 = vld [vmem:[#allocation7 + $0xd8] sm:$0xff]  ;;  %v442_v13 = vld [vmem:[#allocation7 + $0xd0] sm:$0xff] }
 0x173   :  { %v10373_v37 = vpack.c.bf16 %v447_v25, %v443_v49  ;;  %v10375_v62 = vpack.c.bf16 %v444_v15, %v440_v47  ;;  %v446_v59 = vld [vmem:[#allocation7 + $0xf0] sm:$0xff]  ;;  %v455_v49 = vld [vmem:[#allocation7 + $0x138] sm:$0xff]  ;;  %v448_v25 = vld [vmem:[#allocation7 + $0x100] sm:$0xff] }
 0x174   :  { %12420 = vst [vmem:[#allocation99_spill] sm:$0xff] %v10359_v34  ;;  %12423 = vst [vmem:[#allocation102_spill] sm:$0xff] %v10366_v11  ;;  %v452_v47 = vld [vmem:[#allocation7 + $0x120] sm:$0xff] }
 0x175   :  { %6939 = vmatpush1.bf16.msra.mxu0 %v10351_v57  ;;  %6971 = vmatpush1.bf16.msra.mxu1 %v10354_v24  ;;  %v441_v24 = vld [vmem:[#allocation7 + $0xc8] sm:$0xff]  ;;  %12425 = vst [vmem:[#allocation104_spill] sm:$0xff] %v10373_v37  ;;  %12426 = vst [vmem:[#allocation105_spill] sm:$0xff] %v10375_v62 }
 0x176   :  { %6941 = vmatprep.subr.bf16.mxu0 %v10359_v34  ;;  %6973 = vmatprep.subr.bf16.mxu1 %v10361_v44  ;;  %v10371_v57 = vpack.c.bf16 %v445_v48, %v441_v24  ;;  %v10378_v44 = vpack.c.bf16 %v446_v59, %v442_v13  ;;  %v453_v24 = vld [vmem:[#allocation7 + $0x128] sm:$0xff]  ;;  %v451_v48 = vld [vmem:[#allocation7 + $0x118] sm:$0xff]  ;;  %v10387_v34 = vpack.c.bf16 %v452_v47, %v448_v25  ;;  %v450_v13 = vld [vmem:[#allocation7 + $0x110] sm:$0xff] }
 0x177   :  { %v10385_v15 = vpack.c.bf16 %v455_v49, %v451_v48  ;;  %v454_v59 = vld [vmem:[#allocation7 + $0x130] sm:$0xff]  ;;  %v463_v48 = vld [vmem:[#allocation7 + $0x178] sm:$0xff]  ;;  %v456_v49 = vld [vmem:[#allocation7 + $0x140] sm:$0xff] }
 0x178   :  { %12424 = vst [vmem:[#allocation103_spill] sm:$0xff] %v10371_v57  ;;  %12427 = vst [vmem:[#allocation106_spill] sm:$0xff] %v10378_v44  ;;  %v460_v25 = vld [vmem:[#allocation7 + $0x160] sm:$0xff] }
 0x179   :  { %6943 = vmatpush1.bf16.msra.mxu0 %v10363_v35  ;;  %6975 = vmatpush1.bf16.msra.mxu1 %v10366_v11  ;;  %v449_v11 = vld [vmem:[#allocation7 + $0x108] sm:$0xff]  ;;  %12429 = vst [vmem:[#allocation108_spill] sm:$0xff] %v10385_v15  ;;  %12430 = vst [vmem:[#allocation109_spill] sm:$0xff] %v10387_v34 }
 0x17a   :  { %6945 = vmatprep.subr.bf16.mxu0 %v10371_v57  ;;  %6977 = vmatprep.subr.bf16.mxu1 %v10373_v37  ;;  %v10383_v35 = vpack.c.bf16 %v453_v24, %v449_v11  ;;  %v10390_v37 = vpack.c.bf16 %v454_v59, %v450_v13  ;;  %v461_v11 = vld [vmem:[#allocation7 + $0x168] sm:$0xff]  ;;  %v459_v24 = vld [vmem:[#allocation7 + $0x158] sm:$0xff]  ;;  %v10399_v57 = vpack.c.bf16 %v460_v25, %v456_v49  ;;  %v458_v13 = vld [vmem:[#allocation7 + $0x150] sm:$0xff] }
 0x17b   :  { %v10397_v47 = vpack.c.bf16 %v463_v48, %v459_v24  ;;  %v462_v59 = vld [vmem:[#allocation7 + $0x170] sm:$0xff]  ;;  %v464_v24 = vld [vmem:[#allocation7 + $0x180] sm:$0xff] }
 0x17c   :  { %12428 = vst [vmem:[#allocation107_spill] sm:$0xff] %v10383_v35  ;;  %12431 = vst [vmem:[#allocation110_spill] sm:$0xff] %v10390_v37  ;;  %v468_v48 = vld [vmem:[#allocation7 + $0x1a0] sm:$0xff]  ;;  %v466_v49 = vld [vmem:[#allocation7 + $0x190] sm:$0xff] }
 0x17d   :  { %6947 = vmatpush1.bf16.msra.mxu0 %v10375_v62  ;;  %6979 = vmatpush1.bf16.msra.mxu1 %v10378_v44  ;;  %v457_v44 = vld [vmem:[#allocation7 + $0x148] sm:$0xff]  ;;  %12433 = vst [vmem:[#allocation112_spill] sm:$0xff] %v10397_v47  ;;  %12434 = vst [vmem:[#allocation113_spill] sm:$0xff] %v10399_v57  ;;  %v10411_v25 = vpack.c.bf16 %v468_v48, %v464_v24  ;;  %v478_v24 = vld [vmem:[#allocation7 + $0x1f0] sm:$0xff] }
 0x17e   :  { %6949 = vmatprep.subr.bf16.mxu0 %v10383_v35  ;;  %6981 = vmatprep.subr.bf16.mxu1 %v10385_v15  ;;  %v10395_v62 = vpack.c.bf16 %v461_v11, %v457_v44  ;;  %v465_v35 = vld [vmem:[#allocation7 + $0x188] sm:$0xff]  ;;  %v10408_v11 = vpack.c.bf16 %v471_v63, %v467_v7  ;;  %v475_v63 = vld [vmem:[#allocation7 + $0x1d8] sm:$0xff] }
 0x17f   :  { %v469_v15 = vld [vmem:[#allocation7 + $0x1a8] sm:$0xff]  ;;  %12438 = vst [vmem:[#allocation117_spill] sm:$0xff] %v10411_v25  ;;  %v479_v7 = vld [vmem:[#allocation7 + $0x1f8] sm:$0xff] }
 0x180   :  { %12432 = vst [vmem:[#allocation111_spill] sm:$0xff] %v10395_v62  ;;  %v10406_v44 = vpack.c.bf16 %v469_v15, %v465_v35  ;;  %12437 = vst [vmem:[#allocation116_spill] sm:$0xff] %v10408_v11  ;;  %v472_v15 = vld [vmem:[#allocation7 + $0x1c0] sm:$0xff] }
 0x181   :  { %6951 = vmatpush1.bf16.msra.mxu0 %v10387_v34  ;;  %6983 = vmatpush1.bf16.msra.mxu1 %v10390_v37  ;;  %v10402_v34 = vpack.c.bf16 %v462_v59, %v458_v13  ;;  %v470_v13 = vld [vmem:[#allocation7 + $0x1b0] sm:$0xff]  ;;  %v473_v59 = vld [vmem:[#allocation7 + $0x1c8] sm:$0xff]  ;;  %v476_v37 = vld [vmem:[#allocation7 + $0x1e0] sm:$0xff] }
 0x182   :  { %6953 = vmatprep.subr.bf16.mxu0 %v10395_v62  ;;  %6985 = vmatprep.subr.bf16.mxu1 %v10397_v47  ;;  %12436 = vst [vmem:[#allocation115_spill] sm:$0xff] %v10406_v44  ;;  %v477_v62 = vld [vmem:[#allocation7 + $0x1e8] sm:$0xff]  ;;  %v10415_v47 = vpack.c.bf16 %v470_v13, %v466_v49  ;;  %v10422_v48 = vpack.c.bf16 %v476_v37, %v472_v15 }
 0x183   :  { %12435 = vst [vmem:[#allocation114_spill] sm:$0xff] %v10402_v34  ;;  %v10417_v35 = vpack.c.bf16 %v477_v62, %v473_v59  ;;  %v244_v62 = vld [vmem:[%s12053_s6] sm:$0xf] }
 0x184   :  { %12439 = vst [vmem:[#allocation118_spill] sm:$0xff] %v10415_v47  ;;  %12442 = vst [vmem:[#allocation121_spill] sm:$0xff] %v10422_v48  ;;  %v10437_v37 = vrot.slane %v244_v62, %v10280_v43  ;;  %v10448_v43 = vrot.slane %v244_v62, %v10309_v61 }
 0x185   :  { %6955 = vmatpush1.bf16.msra.mxu0 %v10399_v57  ;;  %6987 = vmatpush1.bf16.msra.mxu1 %v10402_v34  ;;  %12440 = vst [vmem:[#allocation119_spill] sm:$0xff] %v10417_v35  ;;  %v10419_v57 = vpack.c.bf16 %v479_v7, %v475_v63  ;;  %v474_v34 = vld [vmem:[#allocation7 + $0x1d0] sm:$0xff] }
 0x186   :  { %6957 = vmatprep.subr.bf16.mxu0 %v10406_v44  ;;  %6989 = vmatprep.subr.bf16.mxu1 %v10408_v11  ;;  %v10426_v49 = vpack.c.bf16 %v478_v24, %v474_v34  ;;  %12444 = vst [vmem:[#allocation123_spill] sm:$0xff] %v10437_v37  ;;  %v10440_v34 = vrot.slane %v244_v62, %v10285_v55  ;;  %12447 = vst [vmem:[#allocation126_spill] sm:$0xff] %v10448_v43 }
 0x187   :  { %12441 = vst [vmem:[#allocation120_spill] sm:$0xff] %v10419_v57 }
 0x188   :  { %12443 = vst [vmem:[#allocation122_spill] sm:$0xff] %v10426_v49  ;;  %12445 = vst [vmem:[#allocation124_spill] sm:$0xff] %v10440_v34 }
 0x189   :  { %6959 = vmatpush1.bf16.msra.mxu0 %v10411_v25  ;;  %6991 = vmatpush1.bf16.msra.mxu1 %v10415_v47 }
 0x18a   :  { %6961 = vmatprep.subr.bf16.mxu0 %v10417_v35  ;;  %6993 = vmatprep.subr.bf16.mxu1 %v10419_v57 }
 0x18d   :  { %6963 = vmatpush1.bf16.msra.mxu0 %v10422_v48  ;;  %6995 = vmatpush1.bf16.msra.mxu1 %v10426_v49  ;;  %v10445_v49 = vrot.slane %v244_v62, %v10296_v33 }
 0x18e   :  { %6997 = vmatprep.subr.bf16.mxu0 %v10072_v5  ;;  %7029 = vmatprep.subr.bf16.mxu1 %v10074_v9 }
 0x18f   :  { %12446 = vst [vmem:[#allocation125_spill] sm:$0xff] %v10445_v49 }
 0x242   :  { %v780_v13 = vpop.f32.mrb[2].mxu0  ;;  %v851_v59 = vpop.f32.mrb[2].mxu1 }
 0x243   :  { %v781_v63 = vadd.f32 %v780_v13, %v10437_v37  ;;  %v782_v7 = vpop.f32.mrb[3].mxu0  ;;  %v853_v15 = vpop.f32.mrb[3].mxu1  ;;  %v852_v55 = vadd.f32 %v851_v59, %v10445_v49 }
 0x244   :  { %v783_v24 = vadd.f32 %v782_v7, %v10440_v34  ;;  %v854_v48 = vadd.f32 %v853_v15, %v10448_v43  ;;  %v12454_v15 = vld [vmem:[#allocation59_spill] sm:$0xff] }
 0x245   :  { %v6735_v5 = vmul.f32 -1.442695, %v781_v63  ;;  %v6737_v57 = vmul.f32 -1.442695, %v852_v55 }
 0x246   :  { %v6736_v9 = vmul.f32 -1.442695, %v783_v24 }
 0x247   :  { %9449 = vpow2.f32 %v6735_v5 }
 0x248   :  { %9451 = vpow2.f32 %v6736_v9 }
 0x249   :  { %9453 = vtanh.f32 %v854_v48 }
 0x24a   :  { %9455 = vpow2.f32 %v6737_v57  ;;  %v12450_v57 = vld [vmem:[#allocation55_spill] sm:$0xff] }
 0x251   :  { %v9450_v13 = vpop.eup %9449 }
 0x252   :  { %v865_v37 = vadd.f32 1.0, %v9450_v13  ;;  %v9452_v35 = vpop.eup %9451  ;;  %v12455_v13 = vld [vmem:[#allocation60_spill] sm:$0xff] }
 0x253   :  { %v866_v63 = vadd.f32 1.0, %v9452_v35  ;;  %v9454_v7 = vpop.eup %9453  ;;  %v12451_v35 = vld [vmem:[#allocation56_spill] sm:$0xff] }
 0x254   :  { %9457 = vrcp.f32 %v865_v37  ;;  %v9456_v24 = vpop.eup %9455  ;;  %v12453_v37 = vld [vmem:[#allocation58_spill] sm:$0xff] }
 0x255   :  { %9459 = vrcp.f32 %v866_v63  ;;  %v867_v62 = vadd.f32 1.0, %v9456_v24  ;;  %v12456_v63 = vld [vmem:[#allocation61_spill] sm:$0xff]  ;;  %v12458_v24 = vld [vmem:[#allocation63_spill] sm:$0xff] }
 0x257   :  { %9461 = vrcp.f32 %v867_v62  ;;  %v12461_v62 = vld [vmem:[#allocation66_spill] sm:$0xff] }
 0x25e   :  { %v9458_v5 = vpop.eup %9457 }
 0x25f   :  { %v876_v9 = vmul.f32 %v9458_v5, %v9454_v7  ;;  %v9460_v33 = vpop.eup %9459  ;;  %v12457_v7 = vld [vmem:[#allocation62_spill] sm:$0xff]  ;;  %v12459_v5 = vld [vmem:[#allocation64_spill] sm:$0xff] }
 0x260   :  { %v875_v61 = vmul.f32 0.0, %v9460_v33  ;;  %v12449_v33 = vld [vmem:[#allocation54_spill] sm:$0xff] }
 0x261   :  { %v9462_v55 = vpop.eup %9461 }
 0x262   :  { %v10452_v34 = vadd.f32 %v876_v9, %v875_v61  ;;  %v12448_v61 = vld [vmem:[#allocation53_spill] sm:$0xff] }
 0x263   :  { %v12460_v9 = vld [vmem:[#allocation65_spill] sm:$0xff] }
 0x264   :  { %9463 = vtanh.f32 %v10452_v34 }
 0x26e   :  { %v9464_v59 = vpop.eup %9463 }
 0x26f   :  { %v879_v48 = vmul.f32 %v9464_v59, %v9462_v55  ;;  %v12462_v55 = vld [vmem:[#allocation67_spill] sm:$0xff]  ;;  %v12463_v59 = vld [vmem:[#allocation68_spill] sm:$0xff] }
 0x271   :  { %880 = vst [vmem:[#allocation10] sm:$0xf] %v879_v48  ;;  %946 = vmatmul.mubr.f32.vlgmr.msra.gmra.mrb[4].mxu0 %v879_v48  ;;  %1017 = vmatmul.mubr.f32.vlgmr.msra.gmra.mrb[4].mxu1 %v879_v48  ;;  %v12464_v48 = vld [vmem:[#allocation69_spill] sm:$0xff] }
 0x272   :  { %6999 = vmatpush1.bf16.msra.mxu0 %v10076_v10  ;;  %7031 = vmatpush1.bf16.msra.mxu1 %v10079_v14 }
 0x273   :  { %7001 = vmatprep.subr.bf16.mxu0 %v10083_v18  ;;  %7033 = vmatprep.subr.bf16.mxu1 %v10085_v19 }
 0x274   :  { %1087 = vmatprep.mubr.f32.mxu0 %v12411_v31  ;;  %1158 = vmatprep.mubr.f32.mxu1 %v12411_v31 }
 0x276   :  { %7003 = vmatpush1.bf16.msra.mxu0 %v10088_v23  ;;  %7035 = vmatpush1.bf16.msra.mxu1 %v10092_v27 }
 0x277   :  { %7005 = vmatprep.subr.bf16.mxu0 %v10094_v28  ;;  %7037 = vmatprep.subr.bf16.mxu1 %v10096_v32 }
 0x27a   :  { %7007 = vmatpush1.bf16.msra.mxu0 %v10099_v36  ;;  %7039 = vmatpush1.bf16.msra.mxu1 %v10103_v40 }
 0x27b   :  { %7009 = vmatprep.subr.bf16.mxu0 %v10105_v41  ;;  %7041 = vmatprep.subr.bf16.mxu1 %v10108_v45 }
 0x27e   :  { %7011 = vmatpush1.bf16.msra.mxu0 %v10111_v52  ;;  %7043 = vmatpush1.bf16.msra.mxu1 %v10115_v53 }
 0x27f   :  { %7013 = vmatprep.subr.bf16.mxu0 %v10117_v54  ;;  %7045 = vmatprep.subr.bf16.mxu1 %v10120_v58 }
 0x282   :  { %7015 = vmatpush1.bf16.msra.mxu0 %v10123_v1  ;;  %7047 = vmatpush1.bf16.msra.mxu1 %v10127_v2 }
 0x283   :  { %7017 = vmatprep.subr.bf16.mxu0 %v10129_v3  ;;  %7049 = vmatprep.subr.bf16.mxu1 %v10132_v8 }
 0x286   :  { %7019 = vmatpush1.bf16.msra.mxu0 %v10135_v17  ;;  %7051 = vmatpush1.bf16.msra.mxu1 %v10139_v21 }
 0x287   :  { %7021 = vmatprep.subr.bf16.mxu0 %v10141_v22  ;;  %7053 = vmatprep.subr.bf16.mxu1 %v10147_v29 }
 0x28a   :  { %7023 = vmatpush1.bf16.msra.mxu0 %v10153_v38  ;;  %7055 = vmatpush1.bf16.msra.mxu1 %v10157_v39 }
 0x28b   :  { %7025 = vmatprep.subr.bf16.mxu0 %v10159_v42  ;;  %7057 = vmatprep.subr.bf16.mxu1 %v10162_v46 }
 0x28e   :  { %7027 = vmatpush1.bf16.msra.mxu0 %v10168_v50  ;;  %7059 = vmatpush1.bf16.msra.mxu1 %v10172_v51 }
 0x28f   :  { %7061 = vmatprep.subr.bf16.mxu0 %v10184_v60  ;;  %7093 = vmatprep.subr.bf16.mxu1 %v10186_v4 }
 0x291   :  { %1088 = vmatmul.mubr.f32.vlgmr.msra.gmra.mrb[6].mxu0 %v10329_v26  ;;  %1159 = vmatmul.mubr.f32.vlgmr.msra.gmra.mrb[6].mxu1 %v10329_v26  ;;  %v12452_v26 = vld [vmem:[#allocation57_spill] sm:$0xff] }
 0x292   :  { %7063 = vmatpush1.bf16.msra.mxu0 %v10188_v6  ;;  %7095 = vmatpush1.bf16.msra.mxu1 %v10191_v12 }
 0x293   :  { %7065 = vmatprep.subr.bf16.mxu0 %v10196_v20  ;;  %7097 = vmatprep.subr.bf16.mxu1 %v10198_v30 }
 0x294   :  { %1257 = vmatprep.mubr.f32.mxu0 %v12411_v31  ;;  %1328 = vmatprep.mubr.f32.mxu1 %v12411_v31 }
 0x296   :  { %7067 = vmatpush1.bf16.msra.mxu0 %v12448_v61  ;;  %7099 = vmatpush1.bf16.msra.mxu1 %v12449_v33  ;;  %v12478_v61 = vld [vmem:[#allocation86_spill] sm:$0xff] }
 0x297   :  { %7069 = vmatprep.subr.bf16.mxu0 %v12450_v57  ;;  %7101 = vmatprep.subr.bf16.mxu1 %v12451_v35 }
 0x29a   :  { %7071 = vmatpush1.bf16.msra.mxu0 %v12452_v26  ;;  %7103 = vmatpush1.bf16.msra.mxu1 %v12453_v37 }
 0x29b   :  { %7073 = vmatprep.subr.bf16.mxu0 %v12454_v15  ;;  %7105 = vmatprep.subr.bf16.mxu1 %v12455_v13  ;;  %v12465_v15 = vld [vmem:[#allocation70_spill] sm:$0xff]  ;;  %v12466_v13 = vld [vmem:[#allocation71_spill] sm:$0xff] }
 0x29e   :  { %7075 = vmatpush1.bf16.msra.mxu0 %v12456_v63  ;;  %7107 = vmatpush1.bf16.msra.mxu1 %v12457_v7  ;;  %v12467_v63 = vld [vmem:[#allocation72_spill] sm:$0xff]  ;;  %v12468_v7 = vld [vmem:[#allocation73_spill] sm:$0xff] }
 0x29f   :  { %7077 = vmatprep.subr.bf16.mxu0 %v12458_v24  ;;  %7109 = vmatprep.subr.bf16.mxu1 %v12459_v5  ;;  %v12469_v24 = vld [vmem:[#allocation74_spill] sm:$0xff]  ;;  %v12470_v5 = vld [vmem:[#allocation75_spill] sm:$0xff] }
 0x2a2   :  { %7079 = vmatpush1.bf16.msra.mxu0 %v12460_v9  ;;  %7111 = vmatpush1.bf16.msra.mxu1 %v12461_v62  ;;  %v12471_v9 = vld [vmem:[#allocation76_spill] sm:$0xff]  ;;  %v12472_v62 = vld [vmem:[#allocation77_spill] sm:$0xff] }
 0x2a3   :  { %7081 = vmatprep.subr.bf16.mxu0 %v12462_v55  ;;  %7113 = vmatprep.subr.bf16.mxu1 %v12463_v59  ;;  %v12473_v55 = vld [vmem:[#allocation78_spill] sm:$0xff] }
 0x2a6   :  { %7083 = vmatpush1.bf16.msra.mxu0 %v12464_v48  ;;  %7115 = vmatpush1.bf16.msra.mxu1 %v12465_v15  ;;  %v105_v15 = vpop.permute.xlu0 %104 }
 0x2a7   :  { %7085 = vmatprep.subr.bf16.mxu0 %v12466_v13  ;;  %7117 = vmatprep.subr.bf16.mxu1 %v12467_v63  ;;  %v12474_v13 = vld [vmem:[#allocation81_spill] sm:$0xff]  ;;  %v12475_v63 = vld [vmem:[#allocation82_spill] sm:$0xff] }
 0x2a8   :  { %v162_v48 = vmul.f32 %v12474_v13, %v105_v15  ;;  %v163_v59 = vmul.f32 %v12475_v63, %v105_v15  ;;  %v12479_v13 = vld [vmem:[#allocation88_spill] sm:$0xff] }
 0x2aa   :  { %7087 = vmatpush1.bf16.msra.mxu0 %v12468_v7  ;;  %7119 = vmatpush1.bf16.msra.mxu1 %v12469_v24  ;;  %v12476_v7 = vld [vmem:[#allocation84_spill] sm:$0xff] }
 0x2ab   :  { %7089 = vmatprep.subr.bf16.mxu0 %v12470_v5  ;;  %7121 = vmatprep.subr.bf16.mxu1 %v12471_v9  ;;  %v216_v37 = vadd.f32 %v12476_v7, %v162_v48  ;;  %v12477_v5 = vld [vmem:[#allocation85_spill] sm:$0xff] }
 0x2ac   :  { %v217_v35 = vadd.f32 %v12477_v5, %v163_v59  ;;  %v12480_v48 = vld [vmem:[#allocation89_spill] sm:$0xff] }
 0x2ae   :  { %7091 = vmatpush1.bf16.msra.mxu0 %v12472_v62  ;;  %7123 = vmatpush1.bf16.msra.mxu1 %v12473_v55 }
 0x2af   :  { %7125 = vmatprep.subr.bf16.mxu0 %v10335_v0  ;;  %7157 = vmatprep.subr.bf16.mxu1 %v10337_v56  ;;  %v164_v0 = vmul.f32 %v12478_v61, %v105_v15  ;;  %v165_v56 = vmul.f32 %v10318_v16, %v105_v15 }
 0x2b1   :  { %v218_v20 = vadd.f32 %v12479_v13, %v164_v0  ;;  %v219_v7 = vadd.f32 %v12480_v48, %v165_v56 }
 0x364   :  { %v1089_v24 = vpop.f32.mrb[6].mxu0  ;;  %v1160_v26 = vpop.f32.mrb[6].mxu1 }
 0x365   :  { %v1165_v9 = vadd.f32 %v1089_v24, %v216_v37  ;;  %v1091_v57 = vpop.f32.mrb[7].mxu0  ;;  %v1162_v62 = vpop.f32.mrb[7].mxu1  ;;  %v1167_v63 = vadd.f32 %v1160_v26, %v218_v20 }
 0x366   :  { %v1166_v33 = vadd.f32 %v1091_v57, %v217_v35  ;;  %v1168_v12 = vadd.f32 %v1162_v62, %v219_v7  ;;  %v12483_v7 = vld [vmem:[#allocation94_spill] sm:$0xff]  ;;  %v12484_v62 = vld [vmem:[#allocation95_spill] sm:$0xff] }
 0x367   :  { %v6738_v55 = vmul.f32 -1.442695, %v1165_v9  ;;  %v6740_v6 = vmul.f32 -1.442695, %v1167_v63 }
 0x368   :  { %v6739_v30 = vmul.f32 -1.442695, %v1166_v33 }
 0x369   :  { %9465 = vpow2.f32 %v6738_v55 }
 0x36a   :  { %9467 = vpow2.f32 %v6739_v30  ;;  %v12481_v30 = vld [vmem:[#allocation90_spill] sm:$0xff] }
 0x36b   :  { %9469 = vtanh.f32 %v1168_v12 }
 0x36c   :  { %9471 = vpow2.f32 %v6740_v6  ;;  %v12482_v6 = vld [vmem:[#allocation93_spill] sm:$0xff] }
 0x373   :  { %v9466_v59 = vpop.eup %9465 }
 0x374   :  { %v1178_v37 = vadd.f32 1.0, %v9466_v59  ;;  %v9468_v24 = vpop.eup %9467  ;;  %v12485_v59 = vld [vmem:[#allocation96_spill] sm:$0xff] }
 0x375   :  { %v1179_v57 = vadd.f32 1.0, %v9468_v24  ;;  %v9470_v33 = vpop.eup %9469  ;;  %v12487_v24 = vld [vmem:[#allocation98_spill] sm:$0xff] }
 0x376   :  { %9473 = vrcp.f32 %v1178_v37  ;;  %v9472_v35 = vpop.eup %9471  ;;  %v12486_v37 = vld [vmem:[#allocation97_spill] sm:$0xff] }
 0x377   :  { %9475 = vrcp.f32 %v1179_v57  ;;  %v1180_v0 = vadd.f32 1.0, %v9472_v35  ;;  %v12488_v57 = vld [vmem:[#allocation99_spill] sm:$0xff]  ;;  %v12490_v35 = vld [vmem:[#allocation101_spill] sm:$0xff] }
 0x379   :  { %9477 = vrcp.f32 %v1180_v0  ;;  %v12494_v0 = vld [vmem:[#allocation105_spill] sm:$0xff] }
 0x380   :  { %v9474_v9 = vpop.eup %9473 }
 0x381   :  { %v1189_v15 = vmul.f32 %v9474_v9, %v9470_v33  ;;  %v9476_v55 = vpop.eup %9475  ;;  %v12489_v33 = vld [vmem:[#allocation100_spill] sm:$0xff]  ;;  %v12491_v9 = vld [vmem:[#allocation102_spill] sm:$0xff] }
 0x382   :  { %v1188_v20 = vmul.f32 %v9476_v55, %v12481_v30  ;;  %v12493_v55 = vld [vmem:[#allocation104_spill] sm:$0xff]  ;;  %v12495_v30 = vld [vmem:[#allocation106_spill] sm:$0xff] }
 0x383   :  { %v9478_v56 = vpop.eup %9477 }
 0x384   :  { %v10534_v26 = vadd.f32 %v1189_v15, %v1188_v20  ;;  %v12492_v15 = vld [vmem:[#allocation103_spill] sm:$0xff] }
 0x385   :  { %v12496_v20 = vld [vmem:[#allocation107_spill] sm:$0xff] }
 0x386   :  { %9479 = vtanh.f32 %v10534_v26 }
 0x390   :  { %v9480_v12 = vpop.eup %9479 }
 0x391   :  { %v10537_v63 = vmul.f32 %v9480_v12, %v9478_v56  ;;  %v12497_v56 = vld [vmem:[#allocation108_spill] sm:$0xff]  ;;  %v12498_v12 = vld [vmem:[#allocation109_spill] sm:$0xff] }
 0x393   :  { %1258 = vmatmul.mubr.f32.vlgmr.msra.gmra.mrb[4].mxu0 %v10537_v63  ;;  %1329 = vmatmul.mubr.f32.vlgmr.msra.gmra.mrb[4].mxu1 %v10537_v63 }
 0x394   :  { %7127 = vmatpush1.bf16.msra.mxu0 %v12482_v6  ;;  %7159 = vmatpush1.bf16.msra.mxu1 %v12483_v7 }
 0x395   :  { %7129 = vmatprep.subr.bf16.mxu0 %v12484_v62  ;;  %7161 = vmatprep.subr.bf16.mxu1 %v12485_v59 }
 0x396   :  { %1425 = vmatprep.mubr.f32.mxu0 %v12411_v31  ;;  %1496 = vmatprep.mubr.f32.mxu1 %v12411_v31 }
 0x398   :  { %7131 = vmatpush1.bf16.msra.mxu0 %v12486_v37  ;;  %7163 = vmatpush1.bf16.msra.mxu1 %v12487_v24 }
 0x399   :  { %7133 = vmatprep.subr.bf16.mxu0 %v12488_v57  ;;  %7165 = vmatprep.subr.bf16.mxu1 %v12489_v33  ;;  %v12499_v57 = vld [vmem:[#allocation110_spill] sm:$0xff]  ;;  %v12500_v33 = vld [vmem:[#allocation111_spill] sm:$0xff] }
 0x39c   :  { %7135 = vmatpush1.bf16.msra.mxu0 %v12490_v35  ;;  %7167 = vmatpush1.bf16.msra.mxu1 %v12491_v9  ;;  %v12501_v35 = vld [vmem:[#allocation112_spill] sm:$0xff]  ;;  %v12502_v9 = vld [vmem:[#allocation113_spill] sm:$0xff] }
 0x39d   :  { %7137 = vmatprep.subr.bf16.mxu0 %v12492_v15  ;;  %7169 = vmatprep.subr.bf16.mxu1 %v12493_v55  ;;  %v12503_v15 = vld [vmem:[#allocation114_spill] sm:$0xff] }
 0x3a0   :  { %7139 = vmatpush1.bf16.msra.mxu0 %v12494_v0  ;;  %7171 = vmatpush1.bf16.msra.mxu1 %v12495_v30 }
 0x3a1   :  { %7141 = vmatprep.subr.bf16.mxu0 %v12496_v20  ;;  %7173 = vmatprep.subr.bf16.mxu1 %v12497_v56  ;;  %v12504_v56 = vld [vmem:[#allocation119_spill] sm:$0xff] }
 0x3a4   :  { %7143 = vmatpush1.bf16.msra.mxu0 %v12498_v12  ;;  %7175 = vmatpush1.bf16.msra.mxu1 %v12499_v57  ;;  %v12505_v12 = vld [vmem:[#allocation120_spill] sm:$0xff]  ;;  %v12506_v57 = vld [vmem:[#allocation121_spill] sm:$0xff] }
 0x3a5   :  { %7145 = vmatprep.subr.bf16.mxu0 %v12500_v33  ;;  %7177 = vmatprep.subr.bf16.mxu1 %v12501_v35  ;;  %v12507_v33 = vld [vmem:[#allocation122_spill] sm:$0xff]  ;;  %v12508_v35 = vld [vmem:[#allocation15_spill] sm:$0xff] }
 0x3a8   :  { %7147 = vmatpush1.bf16.msra.mxu0 %v12502_v9  ;;  %7179 = vmatpush1.bf16.msra.mxu1 %v12503_v15  ;;  %v12509_v9 = vld [vmem:[#allocation16_spill] sm:$0xff] }
 0x3a9   :  { %7149 = vmatprep.subr.bf16.mxu0 %v10406_v44  ;;  %7181 = vmatprep.subr.bf16.mxu1 %v10408_v11  ;;  %v90_v11 = vld [vmem:[%s12047_s0 + $0x8] sm:$0xf]  ;;  %v12511_v44 = vld [vmem:[#allocation124_spill] sm:$0xff] }
 0x3aa   :  { %109 = vperm.xlu1 %9432, %v90_v11  }
 0x3ac   :  { %7151 = vmatpush1.bf16.msra.mxu0 %v10411_v25  ;;  %7183 = vmatpush1.bf16.msra.mxu1 %v10415_v47  ;;  %v91_v47 = vld [vmem:[%s12047_s0 + $0xc] sm:$0xf] }
 0x3ad   :  { %7153 = vmatprep.subr.bf16.mxu0 %v12504_v56  ;;  %7185 = vmatprep.subr.bf16.mxu1 %v12505_v12  ;;  %v12510_v12 = vld [vmem:[#allocation123_spill] sm:$0xff] }
 0x3ae   :  { %114 = vperm.xlu1 %9432, %v91_v47  }
 0x3b0   :  { %7155 = vmatpush1.bf16.msra.mxu0 %v12506_v57  ;;  %7187 = vmatpush1.bf16.msra.mxu1 %v12507_v33  ;;  %v93_v57 = vld [vmem:[%s12047_s0 + $0x14] sm:$0xf] }
 0x3b1   :  { %7189 = vmatprep.subr.bf16.mxu0 %v12508_v35  ;;  %7221 = vmatprep.subr.bf16.mxu1 %v12509_v9  ;;  %v95_v35 = vld [vmem:[%s12047_s0 + $0x1c] sm:$0xf] }
 0x3b2   :  { %124 = vperm.xlu1 %9432, %v93_v57  }
 0x3b6   :  { %134 = vperm.xlu1 %9432, %v95_v35  }
 0x466   :  { %v1259_v9 = vpop.f32.mrb[4].mxu0  ;;  %v1330_v33 = vpop.f32.mrb[4].mxu1 }
 0x467   :  { %v9300_v56 = vadd.f32 %v1259_v9, %v12510_v12  ;;  %v1261_v11 = vpop.f32.mrb[5].mxu0  ;;  %v1332_v25 = vpop.f32.mrb[5].mxu1  ;;  %v9302_v30 = vadd.f32 %v1330_v33, %v10445_v49 }
 0x468   :  { %v9301_v15 = vadd.f32 %v1261_v11, %v12511_v44  ;;  %v9303_v57 = vadd.f32 %v1332_v25, %v10448_v43 }
 0x469   :  { %v6741_v20 = vmul.f32 -1.442695, %v9300_v56  ;;  %v6743_v0 = vmul.f32 -1.442695, %v9302_v30 }
 0x46a   :  { %v6742_v47 = vmul.f32 -1.442695, %v9301_v15 }
 0x46b   :  { %9481 = vpow2.f32 %v6741_v20 }
 0x46c   :  { %9483 = vpow2.f32 %v6742_v47 }
 0x46d   :  { %9485 = vtanh.f32 %v9303_v57  ;;  %v12517_v57 = vld [vmem:[#allocation54_spill] sm:$0xff] }
 0x46e   :  { %9487 = vpow2.f32 %v6743_v0  ;;  %v12515_v0 = vld [vmem:[#allocation52_spill] sm:$0xff] }
 0x475   :  { %v9482_v55 = vpop.eup %9481 }
 0x476   :  { %v1344_v24 = vadd.f32 1.0, %v9482_v55  ;;  %v9484_v35 = vpop.eup %9483 }
 0x477   :  { %v1345_v9 = vadd.f32 1.0, %v9484_v35  ;;  %v9486_v12 = vpop.eup %9485  ;;  %v12518_v35 = vld [vmem:[#allocation55_spill] sm:$0xff] }
 0x478   :  { %9489 = vrcp.f32 %v1344_v24  ;;  %v9488_v37 = vpop.eup %9487  ;;  %v12514_v24 = vld [vmem:[#allocation51_spill] sm:$0xff] }
 0x479   :  { %9491 = vrcp.f32 %v1345_v9  ;;  %v1346_v20 = vadd.f32 1.0, %v9488_v37  ;;  %v12513_v37 = vld [vmem:[#allocation50_spill] sm:$0xff]  ;;  %v12519_v9 = vld [vmem:[#allocation56_spill] sm:$0xff] }
 0x47b   :  { %9493 = vrcp.f32 %v1346_v20  ;;  %v12524_v20 = vld [vmem:[#allocation61_spill] sm:$0xff] }
 0x482   :  { %v9490_v11 = vpop.eup %9489 }
 0x483   :  { %v1355_v56 = vmul.f32 %v9490_v11, %v9486_v12  ;;  %v9492_v15 = vpop.eup %9491  ;;  %v12516_v12 = vld [vmem:[#allocation53_spill] sm:$0xff]  ;;  %v12521_v11 = vld [vmem:[#allocation58_spill] sm:$0xff] }
 0x484   :  { %v1354_v47 = vmul.f32 %v9492_v15, %v10452_v34  ;;  %v12512_v34 = vld [vmem:[#allocation49_spill] sm:$0xff]  ;;  %v12523_v15 = vld [vmem:[#allocation60_spill] sm:$0xff] }
 0x485   :  { %v9494_v25 = vpop.eup %9493 }
 0x486   :  { %v10592_v33 = vadd.f32 %v1355_v56, %v1354_v47  ;;  %v12522_v56 = vld [vmem:[#allocation59_spill] sm:$0xff]  ;;  %v12525_v47 = vld [vmem:[#allocation62_spill] sm:$0xff] }
 0x488   :  { %9495 = vtanh.f32 %v10592_v33 }
 0x492   :  { %v9496_v55 = vpop.eup %9495 }
 0x493   :  { %v1358_v30 = vmul.f32 %v9496_v55, %v9494_v25  ;;  %v12526_v25 = vld [vmem:[#allocation63_spill] sm:$0xff]  ;;  %v12527_v55 = vld [vmem:[#allocation64_spill] sm:$0xff] }
 0x495   :  { %1360 = vst [vmem:[#allocation10 + $0x4] sm:$0xf] %v1358_v30  ;;  %1426 = vmatmul.mubr.f32.vlgmr.msra.gmra.mrb[8].mxu0 %v1358_v30  ;;  %1497 = vmatmul.mubr.f32.vlgmr.msra.gmra.mrb[8].mxu1 %v1358_v30  ;;  %v12528_v30 = vld [vmem:[#allocation65_spill] sm:$0xff] }
 0x496   :  { %7191 = vmatpush1.bf16.msra.mxu0 %v10076_v10  ;;  %7223 = vmatpush1.bf16.msra.mxu1 %v10079_v14 }
 0x497   :  { %7193 = vmatprep.subr.bf16.mxu0 %v10083_v18  ;;  %7225 = vmatprep.subr.bf16.mxu1 %v10085_v19 }
 0x498   :  { %1567 = vmatprep.mubr.f32.mxu0 %v12411_v31  ;;  %1638 = vmatprep.mubr.f32.mxu1 %v12411_v31 }
 0x49a   :  { %7195 = vmatpush1.bf16.msra.mxu0 %v10088_v23  ;;  %7227 = vmatpush1.bf16.msra.mxu1 %v10092_v27 }
 0x49b   :  { %7197 = vmatprep.subr.bf16.mxu0 %v10094_v28  ;;  %7229 = vmatprep.subr.bf16.mxu1 %v10096_v32 }
 0x49e   :  { %7199 = vmatpush1.bf16.msra.mxu0 %v10099_v36  ;;  %7231 = vmatpush1.bf16.msra.mxu1 %v10103_v40 }
 0x49f   :  { %7201 = vmatprep.subr.bf16.mxu0 %v10105_v41  ;;  %7233 = vmatprep.subr.bf16.mxu1 %v10108_v45 }
 0x4a2   :  { %7203 = vmatpush1.bf16.msra.mxu0 %v10111_v52  ;;  %7235 = vmatpush1.bf16.msra.mxu1 %v10115_v53 }
 0x4a3   :  { %7205 = vmatprep.subr.bf16.mxu0 %v10117_v54  ;;  %7237 = vmatprep.subr.bf16.mxu1 %v10120_v58 }
 0x4a6   :  { %7207 = vmatpush1.bf16.msra.mxu0 %v10123_v1  ;;  %7239 = vmatpush1.bf16.msra.mxu1 %v10127_v2 }
 0x4a7   :  { %7209 = vmatprep.subr.bf16.mxu0 %v10129_v3  ;;  %7241 = vmatprep.subr.bf16.mxu1 %v10132_v8 }
 0x4aa   :  { %7211 = vmatpush1.bf16.msra.mxu0 %v10135_v17  ;;  %7243 = vmatpush1.bf16.msra.mxu1 %v10139_v21 }
 0x4ab   :  { %7213 = vmatprep.subr.bf16.mxu0 %v10141_v22  ;;  %7245 = vmatprep.subr.bf16.mxu1 %v10147_v29 }
 0x4ae   :  { %7215 = vmatpush1.bf16.msra.mxu0 %v10153_v38  ;;  %7247 = vmatpush1.bf16.msra.mxu1 %v10157_v39 }
 0x4af   :  { %7217 = vmatprep.subr.bf16.mxu0 %v10159_v42  ;;  %7249 = vmatprep.subr.bf16.mxu1 %v10162_v46 }
 0x4b2   :  { %7219 = vmatpush1.bf16.msra.mxu0 %v10168_v50  ;;  %7251 = vmatpush1.bf16.msra.mxu1 %v10172_v51 }
 0x4b3   :  { %7253 = vmatprep.subr.bf16.mxu0 %v10184_v60  ;;  %7285 = vmatprep.subr.bf16.mxu1 %v10186_v4 }
 0x4b5   :  { %1568 = vmatmul.mubr.f32.vlgmr.msra.gmra.mrb[10].mxu0 %v10537_v63  ;;  %1639 = vmatmul.mubr.f32.vlgmr.msra.gmra.mrb[10].mxu1 %v10537_v63  ;;  %v12520_v63 = vld [vmem:[#allocation57_spill] sm:$0xff] }
 0x4b6   :  { %7255 = vmatpush1.bf16.msra.mxu0 %v12512_v34  ;;  %7287 = vmatpush1.bf16.msra.mxu1 %v12513_v37 }
 0x4b7   :  { %7257 = vmatprep.subr.bf16.mxu0 %v12514_v24  ;;  %7289 = vmatprep.subr.bf16.mxu1 %v12515_v0 }
 0x4b8   :  { %1737 = vmatprep.mubr.f32.mxu0 %v12411_v31  ;;  %1808 = vmatprep.mubr.f32.mxu1 %v12411_v31 }
 0x4ba   :  { %7259 = vmatpush1.bf16.msra.mxu0 %v12516_v12  ;;  %7291 = vmatpush1.bf16.msra.mxu1 %v12517_v57 }
 0x4bb   :  { %7261 = vmatprep.subr.bf16.mxu0 %v12518_v35  ;;  %7293 = vmatprep.subr.bf16.mxu1 %v12519_v9  ;;  %v12529_v35 = vld [vmem:[#allocation66_spill] sm:$0xff]  ;;  %v12530_v9 = vld [vmem:[#allocation67_spill] sm:$0xff] }
 0x4be   :  { %7263 = vmatpush1.bf16.msra.mxu0 %v12520_v63  ;;  %7295 = vmatpush1.bf16.msra.mxu1 %v12521_v11  ;;  %v12531_v63 = vld [vmem:[#allocation68_spill] sm:$0xff]  ;;  %v12532_v11 = vld [vmem:[#allocation69_spill] sm:$0xff] }
 0x4bf   :  { %7265 = vmatprep.subr.bf16.mxu0 %v12522_v56  ;;  %7297 = vmatprep.subr.bf16.mxu1 %v12523_v15  ;;  %v12533_v56 = vld [vmem:[#allocation70_spill] sm:$0xff]  ;;  %v12534_v15 = vld [vmem:[#allocation71_spill] sm:$0xff] }
 0x4c2   :  { %7267 = vmatpush1.bf16.msra.mxu0 %v12524_v20  ;;  %7299 = vmatpush1.bf16.msra.mxu1 %v12525_v47  ;;  %v12535_v20 = vld [vmem:[#allocation72_spill] sm:$0xff]  ;;  %v12536_v47 = vld [vmem:[#allocation73_spill] sm:$0xff] }
 0x4c3   :  { %7269 = vmatprep.subr.bf16.mxu0 %v12526_v25  ;;  %7301 = vmatprep.subr.bf16.mxu1 %v12527_v55  ;;  %v12537_v25 = vld [vmem:[#allocation74_spill] sm:$0xff]  ;;  %v12538_v55 = vld [vmem:[#allocation75_spill] sm:$0xff] }
 0x4c6   :  { %7271 = vmatpush1.bf16.msra.mxu0 %v12528_v30  ;;  %7303 = vmatpush1.bf16.msra.mxu1 %v12529_v35  ;;  %v12539_v30 = vld [vmem:[#allocation76_spill] sm:$0xff]  ;;  %v12540_v35 = vld [vmem:[#allocation77_spill] sm:$0xff] }
 0x4c7   :  { %7273 = vmatprep.subr.bf16.mxu0 %v12530_v9  ;;  %7305 = vmatprep.subr.bf16.mxu1 %v12531_v63  ;;  %v12541_v9 = vld [vmem:[#allocation78_spill] sm:$0xff]  ;;  %v12542_v63 = vld [vmem:[#allocation91_spill] sm:$0xff] }
 0x4ca   :  { %7275 = vmatpush1.bf16.msra.mxu0 %v12532_v11  ;;  %7307 = vmatpush1.bf16.msra.mxu1 %v12533_v56  ;;  %v12543_v11 = vld [vmem:[#allocation92_spill] sm:$0xff]  ;;  %v110_v56 = vpop.permute.xlu1 %109 }
 0x4cb   :  { %7277 = vmatprep.subr.bf16.mxu0 %v12534_v15  ;;  %7309 = vmatprep.subr.bf16.mxu1 %v12535_v20  ;;  %v12544_v15 = vld [vmem:[#allocation81_spill] sm:$0xff]  ;;  %v12545_v20 = vld [vmem:[#allocation82_spill] sm:$0xff] }
 0x4cc   :  { %v166_v57 = vmul.f32 %v12544_v15, %v110_v56  ;;  %v167_v12 = vmul.f32 %v12545_v20, %v110_v56 }
 0x4ce   :  { %7279 = vmatpush1.bf16.msra.mxu0 %v12536_v47  ;;  %7311 = vmatpush1.bf16.msra.mxu1 %v12537_v25  ;;  %v12546_v47 = vld [vmem:[#allocation84_spill] sm:$0xff]  ;;  %v221_v25 = vadd.f32 %v12477_v5, %v167_v12 }
 0x4cf   :  { %7281 = vmatprep.subr.bf16.mxu0 %v12538_v55  ;;  %7313 = vmatprep.subr.bf16.mxu1 %v12539_v30  ;;  %v220_v0 = vadd.f32 %v12546_v47, %v166_v57 }
 0x4d2   :  { %7283 = vmatpush1.bf16.msra.mxu0 %v12540_v35  ;;  %7315 = vmatpush1.bf16.msra.mxu1 %v12541_v9  ;;  %v168_v35 = vmul.f32 %v12478_v61, %v110_v56 }
 0x4d3   :  { %7317 = vmatprep.subr.bf16.mxu0 %v12542_v63  ;;  %7349 = vmatprep.subr.bf16.mxu1 %v12543_v11  ;;  %v169_v11 = vmul.f32 %v10318_v16, %v110_v56 }
 0x4d4   :  { %v222_v15 = vadd.f32 %v12479_v13, %v168_v35 }
 0x4d5   :  { %v223_v57 = vadd.f32 %v12480_v48, %v169_v11 }
 0x588   :  { %v1569_v55 = vpop.f32.mrb[10].mxu0  ;;  %v1640_v24 = vpop.f32.mrb[10].mxu1 }
 0x589   :  { %v1645_v30 = vadd.f32 %v1569_v55, %v220_v0  ;;  %v1571_v37 = vpop.f32.mrb[11].mxu0  ;;  %v1642_v9 = vpop.f32.mrb[11].mxu1  ;;  %v1647_v47 = vadd.f32 %v1640_v24, %v222_v15 }
 0x58a   :  { %v1646_v34 = vadd.f32 %v1571_v37, %v221_v25  ;;  %v1648_v12 = vadd.f32 %v1642_v9, %v223_v57  ;;  %v12551_v57 = vld [vmem:[#allocation101_spill] sm:$0xff] }
 0x58b   :  { %v6744_v63 = vmul.f32 -1.442695, %v1645_v30  ;;  %v6746_v5 = vmul.f32 -1.442695, %v1647_v47  ;;  %v12550_v47 = vld [vmem:[#allocation100_spill] sm:$0xff] }
 0x58c   :  { %v6745_v4 = vmul.f32 -1.442695, %v1646_v34 }
 0x58d   :  { %9497 = vpow2.f32 %v6744_v63 }
 0x58e   :  { %9499 = vpow2.f32 %v6745_v4 }
 0x58f   :  { %9501 = vtanh.f32 %v1648_v12  ;;  %v12552_v12 = vld [vmem:[#allocation102_spill] sm:$0xff] }
 0x590   :  { %9503 = vpow2.f32 %v6746_v5  ;;  %v12547_v5 = vld [vmem:[#allocation97_spill] sm:$0xff] }
 0x597   :  { %v9498_v20 = vpop.eup %9497 }
 0x598   :  { %v1658_v0 = vadd.f32 1.0, %v9498_v20  ;;  %v9500_v55 = vpop.eup %9499  ;;  %v12549_v20 = vld [vmem:[#allocation99_spill] sm:$0xff] }
 0x599   :  { %v1659_v37 = vadd.f32 1.0, %v9500_v55  ;;  %v9502_v34 = vpop.eup %9501  ;;  %v12554_v55 = vld [vmem:[#allocation104_spill] sm:$0xff] }
 0x59a   :  { %9505 = vrcp.f32 %v1658_v0  ;;  %v9504_v25 = vpop.eup %9503  ;;  %v12553_v0 = vld [vmem:[#allocation103_spill] sm:$0xff] }
 0x59b   :  { %9507 = vrcp.f32 %v1659_v37  ;;  %v1660_v35 = vadd.f32 1.0, %v9504_v25  ;;  %v12555_v37 = vld [vmem:[#allocation105_spill] sm:$0xff]  ;;  %v12557_v25 = vld [vmem:[#allocation107_spill] sm:$0xff] }
 0x59d   :  { %9509 = vrcp.f32 %v1660_v35  ;;  %v12561_v35 = vld [vmem:[#allocation111_spill] sm:$0xff] }
 0x5a4   :  { %v9506_v56 = vpop.eup %9505 }
 0x5a5   :  { %v1669_v63 = vmul.f32 %v9506_v56, %v9502_v34  ;;  %v9508_v30 = vpop.eup %9507  ;;  %v12556_v34 = vld [vmem:[#allocation106_spill] sm:$0xff]  ;;  %v12558_v56 = vld [vmem:[#allocation108_spill] sm:$0xff] }
 0x5a6   :  { %v1668_v4 = vmul.f32 %v9508_v30, %v10534_v26  ;;  %v12548_v26 = vld [vmem:[#allocation98_spill] sm:$0xff] }
 0x5a7   :  { %v9510_v24 = vpop.eup %9509  ;;  %v12560_v30 = vld [vmem:[#allocation110_spill] sm:$0xff] }
 0x5a8   :  { %v10674_v11 = vadd.f32 %v1669_v63, %v1668_v4  ;;  %v12559_v63 = vld [vmem:[#allocation109_spill] sm:$0xff]  ;;  %v12562_v4 = vld [vmem:[#allocation112_spill] sm:$0xff] }
 0x5aa   :  { %9511 = vtanh.f32 %v10674_v11 }
 0x5b4   :  { %v9512_v9 = vpop.eup %9511 }
 0x5b5   :  { %v10677_v15 = vmul.f32 %v9512_v9, %v9510_v24  ;;  %v12563_v24 = vld [vmem:[#allocation113_spill] sm:$0xff]  ;;  %v12564_v9 = vld [vmem:[#allocation114_spill] sm:$0xff] }
 0x5b7   :  { %1738 = vmatmul.mubr.f32.vlgmr.msra.gmra.mrb[8].mxu0 %v10677_v15  ;;  %1809 = vmatmul.mubr.f32.vlgmr.msra.gmra.mrb[8].mxu1 %v10677_v15 }
 0x5b8   :  { %7319 = vmatpush1.bf16.msra.mxu0 %v12482_v6  ;;  %7351 = vmatpush1.bf16.msra.mxu1 %v12483_v7 }
 0x5b9   :  { %7321 = vmatprep.subr.bf16.mxu0 %v12484_v62  ;;  %7353 = vmatprep.subr.bf16.mxu1 %v12485_v59 }
 0x5ba   :  { %1905 = vmatprep.mubr.f32.mxu0 %v12411_v31  ;;  %1976 = vmatprep.mubr.f32.mxu1 %v12411_v31 }
 0x5bc   :  { %7323 = vmatpush1.bf16.msra.mxu0 %v12547_v5  ;;  %7355 = vmatpush1.bf16.msra.mxu1 %v12548_v26 }
 0x5bd   :  { %7325 = vmatprep.subr.bf16.mxu0 %v12549_v20  ;;  %7357 = vmatprep.subr.bf16.mxu1 %v12550_v47 }
 0x5c0   :  { %7327 = vmatpush1.bf16.msra.mxu0 %v12551_v57  ;;  %7359 = vmatpush1.bf16.msra.mxu1 %v12552_v12 }
 0x5c1   :  { %7329 = vmatprep.subr.bf16.mxu0 %v12553_v0  ;;  %7361 = vmatprep.subr.bf16.mxu1 %v12554_v55  ;;  %v12565_v55 = vld [vmem:[#allocation115_spill] sm:$0xff] }
 0x5c2   :  { %v12575_v0 = vld [vmem:[#allocation123_spill] sm:$0xff] }
 0x5c4   :  { %7331 = vmatpush1.bf16.msra.mxu0 %v12555_v37  ;;  %7363 = vmatpush1.bf16.msra.mxu1 %v12556_v34  ;;  %v12566_v37 = vld [vmem:[#allocation116_spill] sm:$0xff]  ;;  %v12567_v34 = vld [vmem:[#allocation117_spill] sm:$0xff] }
 0x5c5   :  { %7333 = vmatprep.subr.bf16.mxu0 %v12557_v25  ;;  %7365 = vmatprep.subr.bf16.mxu1 %v12558_v56  ;;  %v12568_v25 = vld [vmem:[#allocation118_spill] sm:$0xff]  ;;  %v12569_v56 = vld [vmem:[#allocation119_spill] sm:$0xff] }
 0x5c8   :  { %7335 = vmatpush1.bf16.msra.mxu0 %v12559_v63  ;;  %7367 = vmatpush1.bf16.msra.mxu1 %v12560_v30  ;;  %v12570_v63 = vld [vmem:[#allocation120_spill] sm:$0xff]  ;;  %v12571_v30 = vld [vmem:[#allocation121_spill] sm:$0xff] }
 0x5c9   :  { %7337 = vmatprep.subr.bf16.mxu0 %v12561_v35  ;;  %7369 = vmatprep.subr.bf16.mxu1 %v12562_v4  ;;  %v12572_v35 = vld [vmem:[#allocation122_spill] sm:$0xff]  ;;  %v12573_v4 = vld [vmem:[#allocation15_spill] sm:$0xff] }
 0x5cc   :  { %7339 = vmatpush1.bf16.msra.mxu0 %v12563_v24  ;;  %7371 = vmatpush1.bf16.msra.mxu1 %v12564_v9  ;;  %v12574_v24 = vld [vmem:[#allocation16_spill] sm:$0xff] }
 0x5cd   :  { %7341 = vmatprep.subr.bf16.mxu0 %v12565_v55  ;;  %7373 = vmatprep.subr.bf16.mxu1 %v12566_v37 }
 0x5d0   :  { %7343 = vmatpush1.bf16.msra.mxu0 %v12567_v34  ;;  %7375 = vmatpush1.bf16.msra.mxu1 %v12568_v25 }
 0x5d1   :  { %7345 = vmatprep.subr.bf16.mxu0 %v12569_v56  ;;  %7377 = vmatprep.subr.bf16.mxu1 %v12570_v63 }
 0x5d4   :  { %7347 = vmatpush1.bf16.msra.mxu0 %v12571_v30  ;;  %7379 = vmatpush1.bf16.msra.mxu1 %v12572_v35 }
 0x5d5   :  { %7381 = vmatprep.subr.bf16.mxu0 %v12573_v4  ;;  %7413 = vmatprep.subr.bf16.mxu1 %v12574_v24 }
 0x68a   :  { %v1739_v9 = vpop.f32.mrb[8].mxu0  ;;  %v1810_v55 = vpop.f32.mrb[8].mxu1 }
 0x68b   :  { %v9304_v37 = vadd.f32 %v1739_v9, %v12575_v0  ;;  %v1741_v12 = vpop.f32.mrb[9].mxu0  ;;  %v1812_v34 = vpop.f32.mrb[9].mxu1  ;;  %v9306_v30 = vadd.f32 %v1810_v55, %v10445_v49 }
 0x68c   :  { %v9305_v25 = vadd.f32 %v1741_v12, %v12511_v44  ;;  %v9307_v35 = vadd.f32 %v1812_v34, %v10448_v43 }
 0x68d   :  { %v6747_v57 = vmul.f32 -1.442695, %v9304_v37  ;;  %v6749_v63 = vmul.f32 -1.442695, %v9306_v30 }
 0x68e   :  { %v6748_v56 = vmul.f32 -1.442695, %v9305_v25 }
 0x68f   :  { %9513 = vpow2.f32 %v6747_v57 }
 0x690   :  { %9515 = vpow2.f32 %v6748_v56 }
 0x691   :  { %9517 = vtanh.f32 %v9307_v35 }
 0x692   :  { %9519 = vpow2.f32 %v6749_v63  ;;  %v12580_v63 = vld [vmem:[#allocation52_spill] sm:$0xff] }
 0x699   :  { %v9514_v4 = vpop.eup %9513 }
 0x69a   :  { %v1824_v47 = vadd.f32 1.0, %v9514_v4  ;;  %v9516_v24 = vpop.eup %9515  ;;  %v12581_v4 = vld [vmem:[#allocation53_spill] sm:$0xff] }
 0x69b   :  { %v1825_v9 = vadd.f32 1.0, %v9516_v24  ;;  %v9518_v0 = vpop.eup %9517  ;;  %v12582_v24 = vld [vmem:[#allocation54_spill] sm:$0xff] }
 0x69c   :  { %9521 = vrcp.f32 %v1824_v47  ;;  %v9520_v20 = vpop.eup %9519  ;;  %v12578_v47 = vld [vmem:[#allocation50_spill] sm:$0xff] }
 0x69d   :  { %9523 = vrcp.f32 %v1825_v9  ;;  %v1826_v57 = vadd.f32 1.0, %v9520_v20  ;;  %v12577_v20 = vld [vmem:[#allocation49_spill] sm:$0xff]  ;;  %v12583_v9 = vld [vmem:[#allocation55_spill] sm:$0xff] }
 0x69f   :  { %9525 = vrcp.f32 %v1826_v57  ;;  %v12588_v57 = vld [vmem:[#allocation60_spill] sm:$0xff] }
 0x6a6   :  { %v9522_v12 = vpop.eup %9521 }
 0x6a7   :  { %v1835_v37 = vmul.f32 %v9522_v12, %v9518_v0  ;;  %v9524_v25 = vpop.eup %9523  ;;  %v12579_v0 = vld [vmem:[#allocation51_spill] sm:$0xff]  ;;  %v12584_v12 = vld [vmem:[#allocation56_spill] sm:$0xff] }
 0x6a8   :  { %v1834_v56 = vmul.f32 %v9524_v25, %v10592_v33  ;;  %v12576_v33 = vld [vmem:[#allocation48_spill] sm:$0xff]  ;;  %v12587_v25 = vld [vmem:[#allocation59_spill] sm:$0xff] }
 0x6a9   :  { %v9526_v34 = vpop.eup %9525 }
 0x6aa   :  { %v10720_v55 = vadd.f32 %v1835_v37, %v1834_v56  ;;  %v12586_v37 = vld [vmem:[#allocation58_spill] sm:$0xff]  ;;  %v12589_v56 = vld [vmem:[#allocation61_spill] sm:$0xff] }
 0x6ac   :  { %9527 = vtanh.f32 %v10720_v55 }
 0x6b6   :  { %v9528_v30 = vpop.eup %9527 }
 0x6b7   :  { %v1838_v35 = vmul.f32 %v9528_v30, %v9526_v34  ;;  %v12590_v34 = vld [vmem:[#allocation62_spill] sm:$0xff]  ;;  %v12591_v30 = vld [vmem:[#allocation63_spill] sm:$0xff] }
 0x6b9   :  { %1840 = vst [vmem:[#allocation10 + $0x8] sm:$0xf] %v1838_v35  ;;  %1906 = vmatmul.mubr.f32.vlgmr.msra.gmra.mrb[12].mxu0 %v1838_v35  ;;  %1977 = vmatmul.mubr.f32.vlgmr.msra.gmra.mrb[12].mxu1 %v1838_v35  ;;  %v12592_v35 = vld [vmem:[#allocation64_spill] sm:$0xff] }
 0x6ba   :  { %7383 = vmatpush1.bf16.msra.mxu0 %v10076_v10  ;;  %7415 = vmatpush1.bf16.msra.mxu1 %v10079_v14 }
 0x6bb   :  { %7385 = vmatprep.subr.bf16.mxu0 %v10083_v18  ;;  %7417 = vmatprep.subr.bf16.mxu1 %v10085_v19 }
 0x6bc   :  { %2047 = vmatprep.mubr.f32.mxu0 %v12411_v31  ;;  %2118 = vmatprep.mubr.f32.mxu1 %v12411_v31 }
 0x6be   :  { %7387 = vmatpush1.bf16.msra.mxu0 %v10088_v23  ;;  %7419 = vmatpush1.bf16.msra.mxu1 %v10092_v27 }
 0x6bf   :  { %7389 = vmatprep.subr.bf16.mxu0 %v10094_v28  ;;  %7421 = vmatprep.subr.bf16.mxu1 %v10096_v32 }
 0x6c2   :  { %7391 = vmatpush1.bf16.msra.mxu0 %v10099_v36  ;;  %7423 = vmatpush1.bf16.msra.mxu1 %v10103_v40 }
 0x6c3   :  { %7393 = vmatprep.subr.bf16.mxu0 %v10105_v41  ;;  %7425 = vmatprep.subr.bf16.mxu1 %v10108_v45 }
 0x6c6   :  { %7395 = vmatpush1.bf16.msra.mxu0 %v10111_v52  ;;  %7427 = vmatpush1.bf16.msra.mxu1 %v10115_v53 }
 0x6c7   :  { %7397 = vmatprep.subr.bf16.mxu0 %v10117_v54  ;;  %7429 = vmatprep.subr.bf16.mxu1 %v10120_v58 }
 0x6ca   :  { %7399 = vmatpush1.bf16.msra.mxu0 %v10123_v1  ;;  %7431 = vmatpush1.bf16.msra.mxu1 %v10127_v2 }
 0x6cb   :  { %7401 = vmatprep.subr.bf16.mxu0 %v10129_v3  ;;  %7433 = vmatprep.subr.bf16.mxu1 %v10132_v8 }
 0x6ce   :  { %7403 = vmatpush1.bf16.msra.mxu0 %v10135_v17  ;;  %7435 = vmatpush1.bf16.msra.mxu1 %v10139_v21 }
 0x6cf   :  { %7405 = vmatprep.subr.bf16.mxu0 %v10141_v22  ;;  %7437 = vmatprep.subr.bf16.mxu1 %v10147_v29 }
 0x6d2   :  { %7407 = vmatpush1.bf16.msra.mxu0 %v10153_v38  ;;  %7439 = vmatpush1.bf16.msra.mxu1 %v10157_v39 }
 0x6d3   :  { %7409 = vmatprep.subr.bf16.mxu0 %v10159_v42  ;;  %7441 = vmatprep.subr.bf16.mxu1 %v10162_v46 }
 0x6d6   :  { %7411 = vmatpush1.bf16.msra.mxu0 %v10168_v50  ;;  %7443 = vmatpush1.bf16.msra.mxu1 %v10172_v51 }
 0x6d7   :  { %7445 = vmatprep.subr.bf16.mxu0 %v10184_v60  ;;  %7477 = vmatprep.subr.bf16.mxu1 %v12576_v33 }
 0x6d9   :  { %2048 = vmatmul.mubr.f32.vlgmr.msra.gmra.mrb[14].mxu0 %v10677_v15  ;;  %2119 = vmatmul.mubr.f32.vlgmr.msra.gmra.mrb[14].mxu1 %v10677_v15  ;;  %v12585_v15 = vld [vmem:[#allocation57_spill] sm:$0xff] }
 0x6da   :  { %7447 = vmatpush1.bf16.msra.mxu0 %v12577_v20  ;;  %7479 = vmatpush1.bf16.msra.mxu1 %v12578_v47 }
 0x6db   :  { %7449 = vmatprep.subr.bf16.mxu0 %v12579_v0  ;;  %7481 = vmatprep.subr.bf16.mxu1 %v12580_v63 }
 0x6dc   :  { %2217 = vmatprep.mubr.f32.mxu0 %v12411_v31  ;;  %2288 = vmatprep.mubr.f32.mxu1 %v12411_v31 }
 0x6de   :  { %7451 = vmatpush1.bf16.msra.mxu0 %v12581_v4  ;;  %7483 = vmatpush1.bf16.msra.mxu1 %v12582_v24  ;;  %v12593_v24 = vld [vmem:[#allocation65_spill] sm:$0xff] }
 0x6df   :  { %7453 = vmatprep.subr.bf16.mxu0 %v12583_v9  ;;  %7485 = vmatprep.subr.bf16.mxu1 %v12584_v12  ;;  %v12594_v9 = vld [vmem:[#allocation66_spill] sm:$0xff]  ;;  %v12595_v12 = vld [vmem:[#allocation67_spill] sm:$0xff] }
 0x6e2   :  { %7455 = vmatpush1.bf16.msra.mxu0 %v12585_v15  ;;  %7487 = vmatpush1.bf16.msra.mxu1 %v12586_v37  ;;  %v12596_v15 = vld [vmem:[#allocation68_spill] sm:$0xff]  ;;  %v12597_v37 = vld [vmem:[#allocation69_spill] sm:$0xff] }
 0x6e3   :  { %7457 = vmatprep.subr.bf16.mxu0 %v12587_v25  ;;  %7489 = vmatprep.subr.bf16.mxu1 %v12588_v57  ;;  %v12598_v25 = vld [vmem:[#allocation70_spill] sm:$0xff]  ;;  %v12599_v57 = vld [vmem:[#allocation71_spill] sm:$0xff] }
 0x6e6   :  { %7459 = vmatpush1.bf16.msra.mxu0 %v12589_v56  ;;  %7491 = vmatpush1.bf16.msra.mxu1 %v12590_v34  ;;  %v12600_v56 = vld [vmem:[#allocation72_spill] sm:$0xff]  ;;  %v12601_v34 = vld [vmem:[#allocation73_spill] sm:$0xff] }
 0x6e7   :  { %7461 = vmatprep.subr.bf16.mxu0 %v12591_v30  ;;  %7493 = vmatprep.subr.bf16.mxu1 %v12592_v35  ;;  %v12602_v30 = vld [vmem:[#allocation74_spill] sm:$0xff]  ;;  %v12603_v35 = vld [vmem:[#allocation75_spill] sm:$0xff] }
 0x6ea   :  { %7463 = vmatpush1.bf16.msra.mxu0 %v12593_v24  ;;  %7495 = vmatpush1.bf16.msra.mxu1 %v12594_v9  ;;  %v12604_v24 = vld [vmem:[#allocation76_spill] sm:$0xff]  ;;  %v12605_v9 = vld [vmem:[#allocation77_spill] sm:$0xff] }
 0x6eb   :  { %7465 = vmatprep.subr.bf16.mxu0 %v12595_v12  ;;  %7497 = vmatprep.subr.bf16.mxu1 %v12596_v15  ;;  %v12606_v12 = vld [vmem:[#allocation78_spill] sm:$0xff]  ;;  %v12607_v15 = vld [vmem:[#allocation91_spill] sm:$0xff] }
 0x6ee   :  { %7467 = vmatpush1.bf16.msra.mxu0 %v12597_v37  ;;  %7499 = vmatpush1.bf16.msra.mxu1 %v12598_v25  ;;  %v12608_v37 = vld [vmem:[#allocation92_spill] sm:$0xff]  ;;  %v115_v25 = vpop.permute.xlu1 %114 }
 0x6ef   :  { %7469 = vmatprep.subr.bf16.mxu0 %v12599_v57  ;;  %7501 = vmatprep.subr.bf16.mxu1 %v12600_v56  ;;  %v12609_v57 = vld [vmem:[#allocation81_spill] sm:$0xff]  ;;  %v12610_v56 = vld [vmem:[#allocation82_spill] sm:$0xff] }
 0x6f0   :  { %v170_v4 = vmul.f32 %v12609_v57, %v115_v25  ;;  %v171_v63 = vmul.f32 %v12610_v56, %v115_v25 }
 0x6f2   :  { %7471 = vmatpush1.bf16.msra.mxu0 %v12601_v34  ;;  %7503 = vmatpush1.bf16.msra.mxu1 %v12602_v30  ;;  %v12611_v34 = vld [vmem:[#allocation84_spill] sm:$0xff] }
 0x6f3   :  { %7473 = vmatprep.subr.bf16.mxu0 %v12603_v35  ;;  %7505 = vmatprep.subr.bf16.mxu1 %v12604_v24  ;;  %v224_v0 = vadd.f32 %v12611_v34, %v170_v4  ;;  %v12612_v35 = vld [vmem:[#allocation85_spill] sm:$0xff] }
 0x6f4   :  { %v225_v20 = vadd.f32 %v12612_v35, %v171_v63 }
 0x6f6   :  { %7475 = vmatpush1.bf16.msra.mxu0 %v12605_v9  ;;  %7507 = vmatpush1.bf16.msra.mxu1 %v12606_v12 }
 0x6f7   :  { %7509 = vmatprep.subr.bf16.mxu0 %v12607_v15  ;;  %7541 = vmatprep.subr.bf16.mxu1 %v12608_v37  ;;  %v172_v15 = vmul.f32 %v12478_v61, %v115_v25  ;;  %v173_v37 = vmul.f32 %v10318_v16, %v115_v25 }
 0x6f9   :  { %v226_v57 = vadd.f32 %v12479_v13, %v172_v15  ;;  %v227_v4 = vadd.f32 %v12480_v48, %v173_v37 }
 0x7ac   :  { %v2049_v30 = vpop.f32.mrb[14].mxu0  ;;  %v2120_v47 = vpop.f32.mrb[14].mxu1 }
 0x7ad   :  { %v2125_v24 = vadd.f32 %v2049_v30, %v224_v0  ;;  %v2051_v33 = vpop.f32.mrb[15].mxu0  ;;  %v2122_v9 = vpop.f32.mrb[15].mxu1  ;;  %v2127_v56 = vadd.f32 %v2120_v47, %v226_v57 }
 0x7ae   :  { %v2126_v60 = vadd.f32 %v2051_v33, %v225_v20  ;;  %v2128_v34 = vadd.f32 %v2122_v9, %v227_v4  ;;  %v12617_v4 = vld [vmem:[#allocation103_spill] sm:$0xff] }
 0x7af   :  { %v6750_v12 = vmul.f32 -1.442695, %v2125_v24  ;;  %v6752_v50 = vmul.f32 -1.442695, %v2127_v56  ;;  %v12615_v56 = vld [vmem:[#allocation101_spill] sm:$0xff] }
 0x7b0   :  { %v6751_v51 = vmul.f32 -1.442695, %v2126_v60 }
 0x7b1   :  { %9529 = vpow2.f32 %v6750_v12 }
 0x7b2   :  { %9531 = vpow2.f32 %v6751_v51 }
 0x7b3   :  { %9533 = vtanh.f32 %v2128_v34  ;;  %v12616_v34 = vld [vmem:[#allocation102_spill] sm:$0xff] }
 0x7b4   :  { %9535 = vpow2.f32 %v6752_v50  ;;  %v12613_v50 = vld [vmem:[#allocation99_spill] sm:$0xff] }
 0x7bb   :  { %v9530_v63 = vpop.eup %9529 }
 0x7bc   :  { %v2138_v0 = vadd.f32 1.0, %v9530_v63  ;;  %v9532_v30 = vpop.eup %9531  ;;  %v12618_v63 = vld [vmem:[#allocation104_spill] sm:$0xff] }
 0x7bd   :  { %v2139_v33 = vadd.f32 1.0, %v9532_v30  ;;  %v9534_v60 = vpop.eup %9533  ;;  %v12620_v30 = vld [vmem:[#allocation106_spill] sm:$0xff] }
 0x7be   :  { %9537 = vrcp.f32 %v2138_v0  ;;  %v9536_v20 = vpop.eup %9535  ;;  %v12619_v0 = vld [vmem:[#allocation105_spill] sm:$0xff] }
 0x7bf   :  { %9539 = vrcp.f32 %v2139_v33  ;;  %v2140_v15 = vadd.f32 1.0, %v9536_v20  ;;  %v12621_v33 = vld [vmem:[#allocation107_spill] sm:$0xff]  ;;  %v12623_v20 = vld [vmem:[#allocation109_spill] sm:$0xff] }
 0x7c1   :  { %9541 = vrcp.f32 %v2140_v15  ;;  %v12627_v15 = vld [vmem:[#allocation113_spill] sm:$0xff] }
 0x7c8   :  { %v9538_v24 = vpop.eup %9537 }
 0x7c9   :  { %v2149_v12 = vmul.f32 %v9538_v24, %v9534_v60  ;;  %v9540_v25 = vpop.eup %9539  ;;  %v12622_v60 = vld [vmem:[#allocation108_spill] sm:$0xff]  ;;  %v12624_v24 = vld [vmem:[#allocation110_spill] sm:$0xff] }
 0x7ca   :  { %v2148_v51 = vmul.f32 %v9540_v25, %v10674_v11  ;;  %v12614_v11 = vld [vmem:[#allocation100_spill] sm:$0xff] }
 0x7cb   :  { %v9542_v9 = vpop.eup %9541  ;;  %v12626_v25 = vld [vmem:[#allocation112_spill] sm:$0xff] }
 0x7cc   :  { %v10802_v47 = vadd.f32 %v2149_v12, %v2148_v51  ;;  %v12625_v12 = vld [vmem:[#allocation111_spill] sm:$0xff]  ;;  %v12628_v51 = vld [vmem:[#allocation114_spill] sm:$0xff] }
 0x7ce   :  { %9543 = vtanh.f32 %v10802_v47 }
 0x7d8   :  { %v9544_v37 = vpop.eup %9543 }
 0x7d9   :  { %v10805_v57 = vmul.f32 %v9544_v37, %v9542_v9  ;;  %v12629_v9 = vld [vmem:[#allocation115_spill] sm:$0xff]  ;;  %v12630_v37 = vld [vmem:[#allocation116_spill] sm:$0xff] }
 0x7db   :  { %2218 = vmatmul.mubr.f32.vlgmr.msra.gmra.mrb[12].mxu0 %v10805_v57  ;;  %2289 = vmatmul.mubr.f32.vlgmr.msra.gmra.mrb[12].mxu1 %v10805_v57 }
 0x7dc   :  { %7511 = vmatpush1.bf16.msra.mxu0 %v12482_v6  ;;  %7543 = vmatpush1.bf16.msra.mxu1 %v12483_v7 }
 0x7dd   :  { %7513 = vmatprep.subr.bf16.mxu0 %v12484_v62  ;;  %7545 = vmatprep.subr.bf16.mxu1 %v12485_v59 }
 0x7de   :  { %2385 = vmatprep.mubr.f32.mxu0 %v12411_v31  ;;  %2456 = vmatprep.mubr.f32.mxu1 %v12411_v31 }
 0x7e0   :  { %7515 = vmatpush1.bf16.msra.mxu0 %v12547_v5  ;;  %7547 = vmatpush1.bf16.msra.mxu1 %v12548_v26 }
 0x7e1   :  { %7517 = vmatprep.subr.bf16.mxu0 %v12613_v50  ;;  %7549 = vmatprep.subr.bf16.mxu1 %v12614_v11 }
 0x7e4   :  { %7519 = vmatpush1.bf16.msra.mxu0 %v12615_v56  ;;  %7551 = vmatpush1.bf16.msra.mxu1 %v12616_v34 }
 0x7e5   :  { %7521 = vmatprep.subr.bf16.mxu0 %v12617_v4  ;;  %7553 = vmatprep.subr.bf16.mxu1 %v12618_v63 }
 0x7e8   :  { %7523 = vmatpush1.bf16.msra.mxu0 %v12619_v0  ;;  %7555 = vmatpush1.bf16.msra.mxu1 %v12620_v30  ;;  %v12631_v30 = vld [vmem:[#allocation117_spill] sm:$0xff]  ;;  %v12639_v0 = vld [vmem:[#allocation123_spill] sm:$0xff] }
 0x7e9   :  { %7525 = vmatprep.subr.bf16.mxu0 %v12621_v33  ;;  %7557 = vmatprep.subr.bf16.mxu1 %v12622_v60  ;;  %v12632_v33 = vld [vmem:[#allocation118_spill] sm:$0xff]  ;;  %v12633_v60 = vld [vmem:[#allocation119_spill] sm:$0xff] }
 0x7ec   :  { %7527 = vmatpush1.bf16.msra.mxu0 %v12623_v20  ;;  %7559 = vmatpush1.bf16.msra.mxu1 %v12624_v24  ;;  %v12634_v20 = vld [vmem:[#allocation120_spill] sm:$0xff]  ;;  %v12635_v24 = vld [vmem:[#allocation121_spill] sm:$0xff] }
 0x7ed   :  { %7529 = vmatprep.subr.bf16.mxu0 %v12625_v12  ;;  %7561 = vmatprep.subr.bf16.mxu1 %v12626_v25  ;;  %v12636_v12 = vld [vmem:[#allocation122_spill] sm:$0xff]  ;;  %v12637_v25 = vld [vmem:[#allocation15_spill] sm:$0xff] }
 0x7f0   :  { %7531 = vmatpush1.bf16.msra.mxu0 %v12627_v15  ;;  %7563 = vmatpush1.bf16.msra.mxu1 %v12628_v51  ;;  %v12638_v15 = vld [vmem:[#allocation16_spill] sm:$0xff] }
 0x7f1   :  { %7533 = vmatprep.subr.bf16.mxu0 %v12629_v9  ;;  %7565 = vmatprep.subr.bf16.mxu1 %v12630_v37 }
 0x7f4   :  { %7535 = vmatpush1.bf16.msra.mxu0 %v12631_v30  ;;  %7567 = vmatpush1.bf16.msra.mxu1 %v12632_v33 }
 0x7f5   :  { %7537 = vmatprep.subr.bf16.mxu0 %v12633_v60  ;;  %7569 = vmatprep.subr.bf16.mxu1 %v12634_v20 }
 0x7f8   :  { %7539 = vmatpush1.bf16.msra.mxu0 %v12635_v24  ;;  %7571 = vmatpush1.bf16.msra.mxu1 %v12636_v12 }
 0x7f9   :  { %7573 = vmatprep.subr.bf16.mxu0 %v12637_v25  ;;  %7605 = vmatprep.subr.bf16.mxu1 %v12638_v15 }
 0x8ae   :  { %v2219_v51 = vpop.f32.mrb[12].mxu0  ;;  %v2290_v9 = vpop.f32.mrb[12].mxu1 }
 0x8af   :  { %v9308_v37 = vadd.f32 %v2219_v51, %v12639_v0  ;;  %v2221_v63 = vpop.f32.mrb[13].mxu0  ;;  %v2292_v30 = vpop.f32.mrb[13].mxu1  ;;  %v9310_v24 = vadd.f32 %v2290_v9, %v10445_v49 }
 0x8b0   :  { %v9309_v33 = vadd.f32 %v2221_v63, %v12511_v44  ;;  %v9311_v12 = vadd.f32 %v2292_v30, %v10448_v43 }
 0x8b1   :  { %v6753_v4 = vmul.f32 -1.442695, %v9308_v37  ;;  %v6755_v20 = vmul.f32 -1.442695, %v9310_v24 }
 0x8b2   :  { %v6754_v60 = vmul.f32 -1.442695, %v9309_v33 }
 0x8b3   :  { %9545 = vpow2.f32 %v6753_v4 }
 0x8b4   :  { %9547 = vpow2.f32 %v6754_v60 }
 0x8b5   :  { %9549 = vtanh.f32 %v9311_v12 }
 0x8b6   :  { %9551 = vpow2.f32 %v6755_v20  ;;  %v12644_v20 = vld [vmem:[#allocation49_spill] sm:$0xff] }
 0x8bd   :  { %v9546_v25 = vpop.eup %9545 }
 0x8be   :  { %v2304_v34 = vadd.f32 1.0, %v9546_v25  ;;  %v9548_v15 = vpop.eup %9547  ;;  %v12645_v25 = vld [vmem:[#allocation50_spill] sm:$0xff] }
 0x8bf   :  { %v2305_v51 = vadd.f32 1.0, %v9548_v15  ;;  %v9550_v0 = vpop.eup %9549  ;;  %v12646_v15 = vld [vmem:[#allocation51_spill] sm:$0xff] }
 0x8c0   :  { %9553 = vrcp.f32 %v2304_v34  ;;  %v9552_v56 = vpop.eup %9551  ;;  %v12642_v34 = vld [vmem:[#allocation47_spill] sm:$0xff] }
 0x8c1   :  { %9555 = vrcp.f32 %v2305_v51  ;;  %v2306_v4 = vadd.f32 1.0, %v9552_v56  ;;  %v12641_v56 = vld [vmem:[#allocation46_spill] sm:$0xff]  ;;  %v12647_v51 = vld [vmem:[#allocation52_spill] sm:$0xff] }
 0x8c3   :  { %9557 = vrcp.f32 %v2306_v4  ;;  %v12651_v4 = vld [vmem:[#allocation56_spill] sm:$0xff] }
 0x8ca   :  { %v9554_v63 = vpop.eup %9553 }
 0x8cb   :  { %v2315_v37 = vmul.f32 %v9554_v63, %v9550_v0  ;;  %v9556_v33 = vpop.eup %9555  ;;  %v12643_v0 = vld [vmem:[#allocation48_spill] sm:$0xff]  ;;  %v12648_v63 = vld [vmem:[#allocation53_spill] sm:$0xff] }
 0x8cc   :  { %v2314_v60 = vmul.f32 %v9556_v33, %v10720_v55  ;;  %v12640_v55 = vld [vmem:[#allocation45_spill] sm:$0xff]  ;;  %v12650_v33 = vld [vmem:[#allocation55_spill] sm:$0xff] }
 0x8cd   :  { %v9558_v30 = vpop.eup %9557 }
 0x8ce   :  { %v10848_v9 = vadd.f32 %v2315_v37, %v2314_v60  ;;  %v12649_v37 = vld [vmem:[#allocation54_spill] sm:$0xff] }
 0x8cf   :  { %v12653_v60 = vld [vmem:[#allocation58_spill] sm:$0xff] }
 0x8d0   :  { %9559 = vtanh.f32 %v10848_v9 }
 0x8da   :  { %v9560_v24 = vpop.eup %9559 }
 0x8db   :  { %v2318_v12 = vmul.f32 %v9560_v24, %v9558_v30  ;;  %v12654_v30 = vld [vmem:[#allocation59_spill] sm:$0xff]  ;;  %v12655_v24 = vld [vmem:[#allocation60_spill] sm:$0xff] }
 0x8dd   :  { %2320 = vst [vmem:[#allocation10 + $0xc] sm:$0xf] %v2318_v12  ;;  %2386 = vmatmul.mubr.f32.vlgmr.msra.gmra.mrb[16].mxu0 %v2318_v12  ;;  %2457 = vmatmul.mubr.f32.vlgmr.msra.gmra.mrb[16].mxu1 %v2318_v12  ;;  %v12656_v12 = vld [vmem:[#allocation61_spill] sm:$0xff] }
 0x8de   :  { %7575 = vmatpush1.bf16.msra.mxu0 %v10076_v10  ;;  %7607 = vmatpush1.bf16.msra.mxu1 %v10079_v14 }
 0x8df   :  { %7577 = vmatprep.subr.bf16.mxu0 %v10083_v18  ;;  %7609 = vmatprep.subr.bf16.mxu1 %v10085_v19 }
 0x8e0   :  { %2527 = vmatprep.mubr.f32.mxu0 %v12411_v31  ;;  %2598 = vmatprep.mubr.f32.mxu1 %v12411_v31 }
 0x8e2   :  { %7579 = vmatpush1.bf16.msra.mxu0 %v10088_v23  ;;  %7611 = vmatpush1.bf16.msra.mxu1 %v10092_v27 }
 0x8e3   :  { %7581 = vmatprep.subr.bf16.mxu0 %v10094_v28  ;;  %7613 = vmatprep.subr.bf16.mxu1 %v10096_v32 }
 0x8e6   :  { %7583 = vmatpush1.bf16.msra.mxu0 %v10099_v36  ;;  %7615 = vmatpush1.bf16.msra.mxu1 %v10103_v40 }
 0x8e7   :  { %7585 = vmatprep.subr.bf16.mxu0 %v10105_v41  ;;  %7617 = vmatprep.subr.bf16.mxu1 %v10108_v45 }
 0x8ea   :  { %7587 = vmatpush1.bf16.msra.mxu0 %v10111_v52  ;;  %7619 = vmatpush1.bf16.msra.mxu1 %v10115_v53 }
 0x8eb   :  { %7589 = vmatprep.subr.bf16.mxu0 %v10117_v54  ;;  %7621 = vmatprep.subr.bf16.mxu1 %v10120_v58 }
 0x8ee   :  { %7591 = vmatpush1.bf16.msra.mxu0 %v10123_v1  ;;  %7623 = vmatpush1.bf16.msra.mxu1 %v10127_v2 }
 0x8ef   :  { %7593 = vmatprep.subr.bf16.mxu0 %v10129_v3  ;;  %7625 = vmatprep.subr.bf16.mxu1 %v10132_v8 }
 0x8f2   :  { %7595 = vmatpush1.bf16.msra.mxu0 %v10135_v17  ;;  %7627 = vmatpush1.bf16.msra.mxu1 %v10139_v21 }
 0x8f3   :  { %7597 = vmatprep.subr.bf16.mxu0 %v10141_v22  ;;  %7629 = vmatprep.subr.bf16.mxu1 %v10147_v29 }
 0x8f6   :  { %7599 = vmatpush1.bf16.msra.mxu0 %v10153_v38  ;;  %7631 = vmatpush1.bf16.msra.mxu1 %v10157_v39 }
 0x8f7   :  { %7601 = vmatprep.subr.bf16.mxu0 %v10159_v42  ;;  %7633 = vmatprep.subr.bf16.mxu1 %v10162_v46 }
 0x8fa   :  { %7603 = vmatpush1.bf16.msra.mxu0 %v12640_v55  ;;  %7635 = vmatpush1.bf16.msra.mxu1 %v12641_v56 }
 0x8fb   :  { %7637 = vmatprep.subr.bf16.mxu0 %v12642_v34  ;;  %7669 = vmatprep.subr.bf16.mxu1 %v12643_v0 }
 0x8fd   :  { %2528 = vmatmul.mubr.f32.vlgmr.msra.gmra.mrb[18].mxu0 %v10805_v57  ;;  %2599 = vmatmul.mubr.f32.vlgmr.msra.gmra.mrb[18].mxu1 %v10805_v57  ;;  %v12652_v57 = vld [vmem:[#allocation57_spill] sm:$0xff] }
 0x8fe   :  { %7639 = vmatpush1.bf16.msra.mxu0 %v12644_v20  ;;  %7671 = vmatpush1.bf16.msra.mxu1 %v12645_v25 }
 0x8ff   :  { %7641 = vmatprep.subr.bf16.mxu0 %v12646_v15  ;;  %7673 = vmatprep.subr.bf16.mxu1 %v12647_v51  ;;  %v12657_v51 = vld [vmem:[#allocation62_spill] sm:$0xff]  ;;  %v12658_v15 = vld [vmem:[#allocation63_spill] sm:$0xff] }
 0x900   :  { %2697 = vmatprep.mubr.f32.mxu0 %v12411_v31  ;;  %2768 = vmatprep.mubr.f32.mxu1 %v12411_v31 }
 0x902   :  { %7643 = vmatpush1.bf16.msra.mxu0 %v12648_v63  ;;  %7675 = vmatpush1.bf16.msra.mxu1 %v12649_v37  ;;  %v12659_v63 = vld [vmem:[#allocation64_spill] sm:$0xff]  ;;  %v12660_v37 = vld [vmem:[#allocation65_spill] sm:$0xff] }
 0x903   :  { %7645 = vmatprep.subr.bf16.mxu0 %v12650_v33  ;;  %7677 = vmatprep.subr.bf16.mxu1 %v12651_v4  ;;  %v12661_v33 = vld [vmem:[#allocation66_spill] sm:$0xff]  ;;  %v12662_v4 = vld [vmem:[#allocation67_spill] sm:$0xff] }
 0x906   :  { %7647 = vmatpush1.bf16.msra.mxu0 %v12652_v57  ;;  %7679 = vmatpush1.bf16.msra.mxu1 %v12653_v60  ;;  %v12663_v57 = vld [vmem:[#allocation68_spill] sm:$0xff]  ;;  %v12664_v60 = vld [vmem:[#allocation69_spill] sm:$0xff] }
 0x907   :  { %7649 = vmatprep.subr.bf16.mxu0 %v12654_v30  ;;  %7681 = vmatprep.subr.bf16.mxu1 %v12655_v24  ;;  %v12665_v30 = vld [vmem:[#allocation70_spill] sm:$0xff]  ;;  %v12666_v24 = vld [vmem:[#allocation71_spill] sm:$0xff] }
 0x90a   :  { %7651 = vmatpush1.bf16.msra.mxu0 %v12656_v12  ;;  %7683 = vmatpush1.bf16.msra.mxu1 %v12657_v51  ;;  %v12667_v12 = vld [vmem:[#allocation72_spill] sm:$0xff]  ;;  %v12668_v51 = vld [vmem:[#allocation73_spill] sm:$0xff] }
 0x90b   :  { %7653 = vmatprep.subr.bf16.mxu0 %v12658_v15  ;;  %7685 = vmatprep.subr.bf16.mxu1 %v12659_v63  ;;  %v12669_v15 = vld [vmem:[#allocation74_spill] sm:$0xff]  ;;  %v12670_v63 = vld [vmem:[#allocation75_spill] sm:$0xff] }
 0x90e   :  { %7655 = vmatpush1.bf16.msra.mxu0 %v12660_v37  ;;  %7687 = vmatpush1.bf16.msra.mxu1 %v12661_v33  ;;  %v12671_v37 = vld [vmem:[#allocation76_spill] sm:$0xff]  ;;  %v12672_v33 = vld [vmem:[#allocation77_spill] sm:$0xff] }
 0x90f   :  { %7657 = vmatprep.subr.bf16.mxu0 %v12662_v4  ;;  %7689 = vmatprep.subr.bf16.mxu1 %v12663_v57  ;;  %v12673_v4 = vld [vmem:[#allocation78_spill] sm:$0xff]  ;;  %v12674_v57 = vld [vmem:[#allocation91_spill] sm:$0xff] }
 0x912   :  { %7659 = vmatpush1.bf16.msra.mxu0 %v12664_v60  ;;  %7691 = vmatpush1.bf16.msra.mxu1 %v12665_v30  ;;  %v12675_v60 = vld [vmem:[#allocation92_spill] sm:$0xff]  ;;  %v120_v30 = vpop.permute.xlu0 %119 }
 0x913   :  { %7661 = vmatprep.subr.bf16.mxu0 %v12666_v24  ;;  %7693 = vmatprep.subr.bf16.mxu1 %v12667_v12  ;;  %v12676_v24 = vld [vmem:[#allocation81_spill] sm:$0xff]  ;;  %v12677_v12 = vld [vmem:[#allocation82_spill] sm:$0xff] }
 0x914   :  { %v174_v25 = vmul.f32 %v12676_v24, %v120_v30  ;;  %v175_v20 = vmul.f32 %v12677_v12, %v120_v30 }
 0x916   :  { %7663 = vmatpush1.bf16.msra.mxu0 %v12668_v51  ;;  %7695 = vmatpush1.bf16.msra.mxu1 %v12669_v15  ;;  %v12678_v51 = vld [vmem:[#allocation84_spill] sm:$0xff] }
 0x917   :  { %7665 = vmatprep.subr.bf16.mxu0 %v12670_v63  ;;  %7697 = vmatprep.subr.bf16.mxu1 %v12671_v37  ;;  %v228_v0 = vadd.f32 %v12678_v51, %v174_v25  ;;  %v229_v63 = vadd.f32 %v12612_v35, %v175_v20 }
 0x91a   :  { %7667 = vmatpush1.bf16.msra.mxu0 %v12672_v33  ;;  %7699 = vmatpush1.bf16.msra.mxu1 %v12673_v4 }
 0x91b   :  { %7701 = vmatprep.subr.bf16.mxu0 %v12674_v57  ;;  %7733 = vmatprep.subr.bf16.mxu1 %v12675_v60  ;;  %v176_v57 = vmul.f32 %v12478_v61, %v120_v30  ;;  %v177_v60 = vmul.f32 %v10318_v16, %v120_v30 }
 0x91d   :  { %v230_v24 = vadd.f32 %v12479_v13, %v176_v57  ;;  %v231_v25 = vadd.f32 %v12480_v48, %v177_v60 }
 0x9d0   :  { %v2529_v15 = vpop.f32.mrb[18].mxu0  ;;  %v2600_v34 = vpop.f32.mrb[18].mxu1 }
 0x9d1   :  { %v2605_v37 = vadd.f32 %v2529_v15, %v228_v0  ;;  %v2531_v56 = vpop.f32.mrb[19].mxu0  ;;  %v2602_v33 = vpop.f32.mrb[19].mxu1  ;;  %v2607_v12 = vadd.f32 %v2600_v34, %v230_v24  ;;  %v12681_v24 = vld [vmem:[#allocation103_spill] sm:$0xff] }
 0x9d2   :  { %v2606_v55 = vadd.f32 %v2531_v56, %v229_v63  ;;  %v2608_v51 = vadd.f32 %v2602_v33, %v231_v25  ;;  %v12683_v25 = vld [vmem:[#allocation105_spill] sm:$0xff] }
 0x9d3   :  { %v6756_v4 = vmul.f32 -1.442695, %v2605_v37  ;;  %v6758_v42 = vmul.f32 -1.442695, %v2607_v12  ;;  %v12682_v12 = vld [vmem:[#allocation104_spill] sm:$0xff] }
 0x9d4   :  { %v6757_v46 = vmul.f32 -1.442695, %v2606_v55 }
 0x9d5   :  { %9561 = vpow2.f32 %v6756_v4 }
 0x9d6   :  { %9563 = vpow2.f32 %v6757_v46 }
 0x9d7   :  { %9565 = vtanh.f32 %v2608_v51 }
 0x9d8   :  { %9567 = vpow2.f32 %v6758_v42  ;;  %v12679_v42 = vld [vmem:[#allocation101_spill] sm:$0xff] }
 0x9df   :  { %v9562_v20 = vpop.eup %9561 }
 0x9e0   :  { %v2618_v0 = vadd.f32 1.0, %v9562_v20  ;;  %v9564_v15 = vpop.eup %9563  ;;  %v12684_v20 = vld [vmem:[#allocation106_spill] sm:$0xff] }
 0x9e1   :  { %v2619_v56 = vadd.f32 1.0, %v9564_v15  ;;  %v9566_v55 = vpop.eup %9565  ;;  %v12686_v15 = vld [vmem:[#allocation108_spill] sm:$0xff] }
 0x9e2   :  { %9569 = vrcp.f32 %v2618_v0  ;;  %v9568_v63 = vpop.eup %9567  ;;  %v12685_v0 = vld [vmem:[#allocation107_spill] sm:$0xff] }
 0x9e3   :  { %9571 = vrcp.f32 %v2619_v56  ;;  %v2620_v57 = vadd.f32 1.0, %v9568_v63  ;;  %v12687_v56 = vld [vmem:[#allocation109_spill] sm:$0xff]  ;;  %v12689_v63 = vld [vmem:[#allocation111_spill] sm:$0xff] }
 0x9e5   :  { %9573 = vrcp.f32 %v2620_v57  ;;  %v12693_v57 = vld [vmem:[#allocation115_spill] sm:$0xff] }
 0x9ec   :  { %v9570_v37 = vpop.eup %9569 }
 0x9ed   :  { %v2629_v4 = vmul.f32 %v9570_v37, %v9566_v55  ;;  %v9572_v30 = vpop.eup %9571  ;;  %v12688_v55 = vld [vmem:[#allocation110_spill] sm:$0xff]  ;;  %v12690_v37 = vld [vmem:[#allocation112_spill] sm:$0xff] }
 0x9ee   :  { %v2628_v46 = vmul.f32 %v9572_v30, %v10802_v47  ;;  %v12680_v47 = vld [vmem:[#allocation102_spill] sm:$0xff] }
 0x9ef   :  { %v9574_v33 = vpop.eup %9573  ;;  %v12692_v30 = vld [vmem:[#allocation114_spill] sm:$0xff] }
 0x9f0   :  { %v10930_v34 = vadd.f32 %v2629_v4, %v2628_v46  ;;  %v12691_v4 = vld [vmem:[#allocation113_spill] sm:$0xff]  ;;  %v12694_v46 = vld [vmem:[#allocation116_spill] sm:$0xff] }
 0x9f2   :  { %9575 = vtanh.f32 %v10930_v34 }
 0x9fc   :  { %v9576_v51 = vpop.eup %9575 }
 0x9fd   :  { %v10933_v60 = vmul.f32 %v9576_v51, %v9574_v33  ;;  %v12695_v33 = vld [vmem:[#allocation117_spill] sm:$0xff]  ;;  %v12696_v51 = vld [vmem:[#allocation118_spill] sm:$0xff] }
 0x9ff   :  { %2698 = vmatmul.mubr.f32.vlgmr.msra.gmra.mrb[16].mxu0 %v10933_v60  ;;  %2769 = vmatmul.mubr.f32.vlgmr.msra.gmra.mrb[16].mxu1 %v10933_v60 }
 0xa00   :  { %7703 = vmatpush1.bf16.msra.mxu0 %v12482_v6  ;;  %7735 = vmatpush1.bf16.msra.mxu1 %v12483_v7 }
 0xa01   :  { %7705 = vmatprep.subr.bf16.mxu0 %v12484_v62  ;;  %7737 = vmatprep.subr.bf16.mxu1 %v12485_v59 }
 0xa02   :  { %2865 = vmatprep.mubr.f32.mxu0 %v12411_v31  ;;  %2936 = vmatprep.mubr.f32.mxu1 %v12411_v31 }
 0xa04   :  { %7707 = vmatpush1.bf16.msra.mxu0 %v12547_v5  ;;  %7739 = vmatpush1.bf16.msra.mxu1 %v12548_v26 }
 0xa05   :  { %7709 = vmatprep.subr.bf16.mxu0 %v12613_v50  ;;  %7741 = vmatprep.subr.bf16.mxu1 %v12614_v11 }
 0xa08   :  { %7711 = vmatpush1.bf16.msra.mxu0 %v12679_v42  ;;  %7743 = vmatpush1.bf16.msra.mxu1 %v12680_v47 }
 0xa09   :  { %7713 = vmatprep.subr.bf16.mxu0 %v12681_v24  ;;  %7745 = vmatprep.subr.bf16.mxu1 %v12682_v12 }
 0xa0c   :  { %7715 = vmatpush1.bf16.msra.mxu0 %v12683_v25  ;;  %7747 = vmatpush1.bf16.msra.mxu1 %v12684_v20 }
 0xa0d   :  { %7717 = vmatprep.subr.bf16.mxu0 %v12685_v0  ;;  %7749 = vmatprep.subr.bf16.mxu1 %v12686_v15  ;;  %v12697_v15 = vld [vmem:[#allocation119_spill] sm:$0xff] }
 0xa0e   :  { %v12703_v0 = vld [vmem:[#allocation123_spill] sm:$0xff] }
 0xa10   :  { %7719 = vmatpush1.bf16.msra.mxu0 %v12687_v56  ;;  %7751 = vmatpush1.bf16.msra.mxu1 %v12688_v55  ;;  %v12698_v56 = vld [vmem:[#allocation120_spill] sm:$0xff]  ;;  %v12699_v55 = vld [vmem:[#allocation121_spill] sm:$0xff] }
 0xa11   :  { %7721 = vmatprep.subr.bf16.mxu0 %v12689_v63  ;;  %7753 = vmatprep.subr.bf16.mxu1 %v12690_v37  ;;  %v12700_v63 = vld [vmem:[#allocation122_spill] sm:$0xff]  ;;  %v12701_v37 = vld [vmem:[#allocation15_spill] sm:$0xff] }
 0xa14   :  { %7723 = vmatpush1.bf16.msra.mxu0 %v12691_v4  ;;  %7755 = vmatpush1.bf16.msra.mxu1 %v12692_v30  ;;  %v12702_v4 = vld [vmem:[#allocation16_spill] sm:$0xff] }
 0xa15   :  { %7725 = vmatprep.subr.bf16.mxu0 %v12693_v57  ;;  %7757 = vmatprep.subr.bf16.mxu1 %v12694_v46 }
 0xa18   :  { %7727 = vmatpush1.bf16.msra.mxu0 %v12695_v33  ;;  %7759 = vmatpush1.bf16.msra.mxu1 %v12696_v51 }
 0xa19   :  { %7729 = vmatprep.subr.bf16.mxu0 %v12697_v15  ;;  %7761 = vmatprep.subr.bf16.mxu1 %v12698_v56 }
 0xa1c   :  { %7731 = vmatpush1.bf16.msra.mxu0 %v12699_v55  ;;  %7763 = vmatpush1.bf16.msra.mxu1 %v12700_v63 }
 0xa1d   :  { %7765 = vmatprep.subr.bf16.mxu0 %v12701_v37  ;;  %7797 = vmatprep.subr.bf16.mxu1 %v12702_v4 }
 0xad2   :  { %v2699_v30 = vpop.f32.mrb[16].mxu0  ;;  %v2770_v57 = vpop.f32.mrb[16].mxu1 }
 0xad3   :  { %v9312_v46 = vadd.f32 %v2699_v30, %v12703_v0  ;;  %v2701_v20 = vpop.f32.mrb[17].mxu0  ;;  %v2772_v33 = vpop.f32.mrb[17].mxu1  ;;  %v9314_v55 = vadd.f32 %v2770_v57, %v10445_v49 }
 0xad4   :  { %v9313_v51 = vadd.f32 %v2701_v20, %v12511_v44  ;;  %v9315_v63 = vadd.f32 %v2772_v33, %v10448_v43  ;;  %v12710_v33 = vld [vmem:[#allocation49_spill] sm:$0xff] }
 0xad5   :  { %v6759_v25 = vmul.f32 -1.442695, %v9312_v46  ;;  %v6761_v56 = vmul.f32 -1.442695, %v9314_v55 }
 0xad6   :  { %v6760_v15 = vmul.f32 -1.442695, %v9313_v51 }
 0xad7   :  { %9577 = vpow2.f32 %v6759_v25 }
 0xad8   :  { %9579 = vpow2.f32 %v6760_v15 }
 0xad9   :  { %9581 = vtanh.f32 %v9315_v63 }
 0xada   :  { %9583 = vpow2.f32 %v6761_v56  ;;  %v12708_v56 = vld [vmem:[#allocation47_spill] sm:$0xff] }
 0xae1   :  { %v9578_v37 = vpop.eup %9577 }
 0xae2   :  { %v2784_v12 = vadd.f32 1.0, %v9578_v37  ;;  %v9580_v4 = vpop.eup %9579 }
 0xae3   :  { %v2785_v30 = vadd.f32 1.0, %v9580_v4  ;;  %v9582_v0 = vpop.eup %9581  ;;  %v12709_v4 = vld [vmem:[#allocation48_spill] sm:$0xff] }
 0xae4   :  { %9585 = vrcp.f32 %v2784_v12  ;;  %v9584_v24 = vpop.eup %9583  ;;  %v12706_v12 = vld [vmem:[#allocation45_spill] sm:$0xff] }
 0xae5   :  { %9587 = vrcp.f32 %v2785_v30  ;;  %v2786_v25 = vadd.f32 1.0, %v9584_v24  ;;  %v12705_v24 = vld [vmem:[#allocation44_spill] sm:$0xff]  ;;  %v12711_v30 = vld [vmem:[#allocation50_spill] sm:$0xff] }
 0xae7   :  { %9589 = vrcp.f32 %v2786_v25  ;;  %v12715_v25 = vld [vmem:[#allocation54_spill] sm:$0xff] }
 0xaee   :  { %v9586_v20 = vpop.eup %9585 }
 0xaef   :  { %v2795_v46 = vmul.f32 %v9586_v20, %v9582_v0  ;;  %v9588_v51 = vpop.eup %9587  ;;  %v12707_v0 = vld [vmem:[#allocation46_spill] sm:$0xff]  ;;  %v12712_v20 = vld [vmem:[#allocation51_spill] sm:$0xff] }
 0xaf0   :  { %v2794_v15 = vmul.f32 %v9588_v51, %v10848_v9  ;;  %v12704_v9 = vld [vmem:[#allocation43_spill] sm:$0xff]  ;;  %v12714_v51 = vld [vmem:[#allocation53_spill] sm:$0xff] }
 0xaf1   :  { %v9590_v55 = vpop.eup %9589 }
 0xaf2   :  { %v10976_v57 = vadd.f32 %v2795_v46, %v2794_v15  ;;  %v12713_v46 = vld [vmem:[#allocation52_spill] sm:$0xff]  ;;  %v12716_v15 = vld [vmem:[#allocation55_spill] sm:$0xff] }
 0xaf4   :  { %9591 = vtanh.f32 %v10976_v57 }
 0xafe   :  { %v9592_v63 = vpop.eup %9591 }
 0xaff   :  { %v2798_v37 = vmul.f32 %v9592_v63, %v9590_v55  ;;  %v12717_v55 = vld [vmem:[#allocation56_spill] sm:$0xff]  ;;  %v12719_v63 = vld [vmem:[#allocation58_spill] sm:$0xff] }
 0xb01   :  { %2800 = vst [vmem:[#allocation10 + $0x10] sm:$0xf] %v2798_v37  ;;  %2866 = vmatmul.mubr.f32.vlgmr.msra.gmra.mrb[20].mxu0 %v2798_v37  ;;  %2937 = vmatmul.mubr.f32.vlgmr.msra.gmra.mrb[20].mxu1 %v2798_v37  ;;  %v12720_v37 = vld [vmem:[#allocation59_spill] sm:$0xff] }
 0xb02   :  { %7767 = vmatpush1.bf16.msra.mxu0 %v10076_v10  ;;  %7799 = vmatpush1.bf16.msra.mxu1 %v10079_v14 }
 0xb03   :  { %7769 = vmatprep.subr.bf16.mxu0 %v10083_v18  ;;  %7801 = vmatprep.subr.bf16.mxu1 %v10085_v19 }
 0xb04   :  { %3007 = vmatprep.mubr.f32.mxu0 %v12411_v31  ;;  %3078 = vmatprep.mubr.f32.mxu1 %v12411_v31 }
 0xb06   :  { %7771 = vmatpush1.bf16.msra.mxu0 %v10088_v23  ;;  %7803 = vmatpush1.bf16.msra.mxu1 %v10092_v27 }
 0xb07   :  { %7773 = vmatprep.subr.bf16.mxu0 %v10094_v28  ;;  %7805 = vmatprep.subr.bf16.mxu1 %v10096_v32 }
 0xb0a   :  { %7775 = vmatpush1.bf16.msra.mxu0 %v10099_v36  ;;  %7807 = vmatpush1.bf16.msra.mxu1 %v10103_v40 }
 0xb0b   :  { %7777 = vmatprep.subr.bf16.mxu0 %v10105_v41  ;;  %7809 = vmatprep.subr.bf16.mxu1 %v10108_v45 }
 0xb0e   :  { %7779 = vmatpush1.bf16.msra.mxu0 %v10111_v52  ;;  %7811 = vmatpush1.bf16.msra.mxu1 %v10115_v53 }
 0xb0f   :  { %7781 = vmatprep.subr.bf16.mxu0 %v10117_v54  ;;  %7813 = vmatprep.subr.bf16.mxu1 %v10120_v58 }
 0xb12   :  { %7783 = vmatpush1.bf16.msra.mxu0 %v10123_v1  ;;  %7815 = vmatpush1.bf16.msra.mxu1 %v10127_v2 }
 0xb13   :  { %7785 = vmatprep.subr.bf16.mxu0 %v10129_v3  ;;  %7817 = vmatprep.subr.bf16.mxu1 %v10132_v8 }
 0xb16   :  { %7787 = vmatpush1.bf16.msra.mxu0 %v10135_v17  ;;  %7819 = vmatpush1.bf16.msra.mxu1 %v10139_v21 }
 0xb17   :  { %7789 = vmatprep.subr.bf16.mxu0 %v10141_v22  ;;  %7821 = vmatprep.subr.bf16.mxu1 %v10147_v29 }
 0xb1a   :  { %7791 = vmatpush1.bf16.msra.mxu0 %v10153_v38  ;;  %7823 = vmatpush1.bf16.msra.mxu1 %v10157_v39 }
 0xb1b   :  { %7793 = vmatprep.subr.bf16.mxu0 %v12704_v9  ;;  %7825 = vmatprep.subr.bf16.mxu1 %v12705_v24 }
 0xb1e   :  { %7795 = vmatpush1.bf16.msra.mxu0 %v12706_v12  ;;  %7827 = vmatpush1.bf16.msra.mxu1 %v12707_v0 }
 0xb1f   :  { %7829 = vmatprep.subr.bf16.mxu0 %v12708_v56  ;;  %7861 = vmatprep.subr.bf16.mxu1 %v12709_v4 }
 0xb21   :  { %3008 = vmatmul.mubr.f32.vlgmr.msra.gmra.mrb[22].mxu0 %v10933_v60  ;;  %3079 = vmatmul.mubr.f32.vlgmr.msra.gmra.mrb[22].mxu1 %v10933_v60  ;;  %v12718_v60 = vld [vmem:[#allocation57_spill] sm:$0xff] }
 0xb22   :  { %7831 = vmatpush1.bf16.msra.mxu0 %v12710_v33  ;;  %7863 = vmatpush1.bf16.msra.mxu1 %v12711_v30  ;;  %v12723_v30 = vld [vmem:[#allocation62_spill] sm:$0xff]  ;;  %v12724_v33 = vld [vmem:[#allocation63_spill] sm:$0xff] }
 0xb23   :  { %7833 = vmatprep.subr.bf16.mxu0 %v12712_v20  ;;  %7865 = vmatprep.subr.bf16.mxu1 %v12713_v46  ;;  %v12721_v20 = vld [vmem:[#allocation60_spill] sm:$0xff]  ;;  %v12722_v46 = vld [vmem:[#allocation61_spill] sm:$0xff] }
 0xb24   :  { %3177 = vmatprep.mubr.f32.mxu0 %v12411_v31  ;;  %3248 = vmatprep.mubr.f32.mxu1 %v12411_v31 }
 0xb26   :  { %7835 = vmatpush1.bf16.msra.mxu0 %v12714_v51  ;;  %7867 = vmatpush1.bf16.msra.mxu1 %v12715_v25  ;;  %v12725_v51 = vld [vmem:[#allocation64_spill] sm:$0xff]  ;;  %v12726_v25 = vld [vmem:[#allocation65_spill] sm:$0xff] }
 0xb27   :  { %7837 = vmatprep.subr.bf16.mxu0 %v12716_v15  ;;  %7869 = vmatprep.subr.bf16.mxu1 %v12717_v55  ;;  %v12727_v15 = vld [vmem:[#allocation66_spill] sm:$0xff]  ;;  %v12728_v55 = vld [vmem:[#allocation67_spill] sm:$0xff] }
 0xb2a   :  { %7839 = vmatpush1.bf16.msra.mxu0 %v12718_v60  ;;  %7871 = vmatpush1.bf16.msra.mxu1 %v12719_v63  ;;  %v12729_v60 = vld [vmem:[#allocation68_spill] sm:$0xff]  ;;  %v12730_v63 = vld [vmem:[#allocation69_spill] sm:$0xff] }
 0xb2b   :  { %7841 = vmatprep.subr.bf16.mxu0 %v12720_v37  ;;  %7873 = vmatprep.subr.bf16.mxu1 %v12721_v20  ;;  %v12731_v37 = vld [vmem:[#allocation70_spill] sm:$0xff]  ;;  %v12732_v20 = vld [vmem:[#allocation71_spill] sm:$0xff] }
 0xb2e   :  { %7843 = vmatpush1.bf16.msra.mxu0 %v12722_v46  ;;  %7875 = vmatpush1.bf16.msra.mxu1 %v12723_v30  ;;  %v12733_v46 = vld [vmem:[#allocation72_spill] sm:$0xff]  ;;  %v12734_v30 = vld [vmem:[#allocation73_spill] sm:$0xff] }
 0xb2f   :  { %7845 = vmatprep.subr.bf16.mxu0 %v12724_v33  ;;  %7877 = vmatprep.subr.bf16.mxu1 %v12725_v51  ;;  %v12735_v33 = vld [vmem:[#allocation74_spill] sm:$0xff]  ;;  %v12736_v51 = vld [vmem:[#allocation75_spill] sm:$0xff] }
 0xb32   :  { %7847 = vmatpush1.bf16.msra.mxu0 %v12726_v25  ;;  %7879 = vmatpush1.bf16.msra.mxu1 %v12727_v15  ;;  %v12737_v25 = vld [vmem:[#allocation76_spill] sm:$0xff]  ;;  %v12738_v15 = vld [vmem:[#allocation77_spill] sm:$0xff] }
 0xb33   :  { %7849 = vmatprep.subr.bf16.mxu0 %v12728_v55  ;;  %7881 = vmatprep.subr.bf16.mxu1 %v12729_v60  ;;  %v12739_v55 = vld [vmem:[#allocation78_spill] sm:$0xff]  ;;  %v12740_v60 = vld [vmem:[#allocation91_spill] sm:$0xff] }
 0xb36   :  { %7851 = vmatpush1.bf16.msra.mxu0 %v12730_v63  ;;  %7883 = vmatpush1.bf16.msra.mxu1 %v12731_v37  ;;  %v12741_v63 = vld [vmem:[#allocation92_spill] sm:$0xff]  ;;  %v125_v37 = vpop.permute.xlu1 %124 }
 0xb37   :  { %7853 = vmatprep.subr.bf16.mxu0 %v12732_v20  ;;  %7885 = vmatprep.subr.bf16.mxu1 %v12733_v46  ;;  %v12742_v20 = vld [vmem:[#allocation81_spill] sm:$0xff]  ;;  %v12743_v46 = vld [vmem:[#allocation82_spill] sm:$0xff] }
 0xb38   :  { %v178_v4 = vmul.f32 %v12742_v20, %v125_v37  ;;  %v179_v56 = vmul.f32 %v12743_v46, %v125_v37 }
 0xb3a   :  { %7855 = vmatpush1.bf16.msra.mxu0 %v12734_v30  ;;  %7887 = vmatpush1.bf16.msra.mxu1 %v12735_v33  ;;  %v12744_v30 = vld [vmem:[#allocation84_spill] sm:$0xff] }
 0xb3b   :  { %7857 = vmatprep.subr.bf16.mxu0 %v12736_v51  ;;  %7889 = vmatprep.subr.bf16.mxu1 %v12737_v25  ;;  %v232_v0 = vadd.f32 %v12744_v30, %v178_v4  ;;  %v233_v51 = vadd.f32 %v12612_v35, %v179_v56 }
 0xb3e   :  { %7859 = vmatpush1.bf16.msra.mxu0 %v12738_v15  ;;  %7891 = vmatpush1.bf16.msra.mxu1 %v12739_v55 }
 0xb3f   :  { %7893 = vmatprep.subr.bf16.mxu0 %v12740_v60  ;;  %7925 = vmatprep.subr.bf16.mxu1 %v12741_v63  ;;  %v180_v60 = vmul.f32 %v12478_v61, %v125_v37  ;;  %v181_v63 = vmul.f32 %v10318_v16, %v125_v37 }
 0xb41   :  { %v234_v20 = vadd.f32 %v12479_v13, %v180_v60  ;;  %v235_v4 = vadd.f32 %v12480_v48, %v181_v63  ;;  %v12748_v63 = vld [vmem:[#allocation106_spill] sm:$0xff] }
 0xbf4   :  { %v3009_v33 = vpop.f32.mrb[22].mxu0  ;;  %v3080_v12 = vpop.f32.mrb[22].mxu1 }
 0xbf5   :  { %v3085_v25 = vadd.f32 %v3009_v33, %v232_v0  ;;  %v3011_v24 = vpop.f32.mrb[23].mxu0  ;;  %v3082_v15 = vpop.f32.mrb[23].mxu1  ;;  %v3087_v46 = vadd.f32 %v3080_v12, %v234_v20 }
 0xbf6   :  { %v3086_v9 = vadd.f32 %v3011_v24, %v233_v51  ;;  %v3088_v30 = vadd.f32 %v3082_v15, %v235_v4  ;;  %v12747_v15 = vld [vmem:[#allocation105_spill] sm:$0xff]  ;;  %v12749_v4 = vld [vmem:[#allocation107_spill] sm:$0xff] }
 0xbf7   :  { %v6762_v55 = vmul.f32 -1.442695, %v3085_v25  ;;  %v6764_v38 = vmul.f32 -1.442695, %v3087_v46 }
 0xbf8   :  { %v6763_v39 = vmul.f32 -1.442695, %v3086_v9 }
 0xbf9   :  { %9593 = vpow2.f32 %v6762_v55 }
 0xbfa   :  { %9595 = vpow2.f32 %v6763_v39 }
 0xbfb   :  { %9597 = vtanh.f32 %v3088_v30 }
 0xbfc   :  { %9599 = vpow2.f32 %v6764_v38  ;;  %v12745_v38 = vld [vmem:[#allocation103_spill] sm:$0xff] }
 0xc03   :  { %v9594_v56 = vpop.eup %9593 }
 0xc04   :  { %v3098_v0 = vadd.f32 1.0, %v9594_v56  ;;  %v9596_v33 = vpop.eup %9595  ;;  %v12750_v56 = vld [vmem:[#allocation108_spill] sm:$0xff] }
 0xc05   :  { %v3099_v24 = vadd.f32 1.0, %v9596_v33  ;;  %v9598_v9 = vpop.eup %9597  ;;  %v12752_v33 = vld [vmem:[#allocation110_spill] sm:$0xff] }
 0xc06   :  { %9601 = vrcp.f32 %v3098_v0  ;;  %v9600_v51 = vpop.eup %9599  ;;  %v12751_v0 = vld [vmem:[#allocation109_spill] sm:$0xff] }
 0xc07   :  { %9603 = vrcp.f32 %v3099_v24  ;;  %v3100_v60 = vadd.f32 1.0, %v9600_v51  ;;  %v12753_v24 = vld [vmem:[#allocation111_spill] sm:$0xff]  ;;  %v12755_v51 = vld [vmem:[#allocation113_spill] sm:$0xff] }
 0xc09   :  { %9605 = vrcp.f32 %v3100_v60  ;;  %v12759_v60 = vld [vmem:[#allocation117_spill] sm:$0xff] }
 0xc10   :  { %v9602_v25 = vpop.eup %9601 }
 0xc11   :  { %v3109_v55 = vmul.f32 %v9602_v25, %v9598_v9  ;;  %v9604_v37 = vpop.eup %9603  ;;  %v12754_v9 = vld [vmem:[#allocation112_spill] sm:$0xff]  ;;  %v12756_v25 = vld [vmem:[#allocation114_spill] sm:$0xff] }
 0xc12   :  { %v3108_v39 = vmul.f32 %v9604_v37, %v10930_v34  ;;  %v12746_v34 = vld [vmem:[#allocation104_spill] sm:$0xff] }
 0xc13   :  { %v9606_v20 = vpop.eup %9605  ;;  %v12758_v37 = vld [vmem:[#allocation116_spill] sm:$0xff] }
 0xc14   :  { %v11058_v12 = vadd.f32 %v3109_v55, %v3108_v39  ;;  %v12757_v55 = vld [vmem:[#allocation115_spill] sm:$0xff]  ;;  %v12760_v39 = vld [vmem:[#allocation118_spill] sm:$0xff] }
 0xc16   :  { %9607 = vtanh.f32 %v11058_v12 }
 0xc20   :  { %v9608_v30 = vpop.eup %9607 }
 0xc21   :  { %v11061_v46 = vmul.f32 %v9608_v30, %v9606_v20  ;;  %v12761_v20 = vld [vmem:[#allocation119_spill] sm:$0xff]  ;;  %v12762_v30 = vld [vmem:[#allocation120_spill] sm:$0xff] }
 0xc23   :  { %3178 = vmatmul.mubr.f32.vlgmr.msra.gmra.mrb[20].mxu0 %v11061_v46  ;;  %3249 = vmatmul.mubr.f32.vlgmr.msra.gmra.mrb[20].mxu1 %v11061_v46 }
 0xc24   :  { %7895 = vmatpush1.bf16.msra.mxu0 %v12482_v6  ;;  %7927 = vmatpush1.bf16.msra.mxu1 %v12483_v7 }
 0xc25   :  { %7897 = vmatprep.subr.bf16.mxu0 %v12484_v62  ;;  %7929 = vmatprep.subr.bf16.mxu1 %v12485_v59 }
 0xc26   :  { %3345 = vmatprep.mubr.f32.mxu0 %v12411_v31  ;;  %3416 = vmatprep.mubr.f32.mxu1 %v12411_v31 }
 0xc28   :  { %7899 = vmatpush1.bf16.msra.mxu0 %v12547_v5  ;;  %7931 = vmatpush1.bf16.msra.mxu1 %v12548_v26 }
 0xc29   :  { %7901 = vmatprep.subr.bf16.mxu0 %v12613_v50  ;;  %7933 = vmatprep.subr.bf16.mxu1 %v12614_v11 }
 0xc2c   :  { %7903 = vmatpush1.bf16.msra.mxu0 %v12679_v42  ;;  %7935 = vmatpush1.bf16.msra.mxu1 %v12680_v47 }
 0xc2d   :  { %7905 = vmatprep.subr.bf16.mxu0 %v12745_v38  ;;  %7937 = vmatprep.subr.bf16.mxu1 %v12746_v34 }
 0xc30   :  { %7907 = vmatpush1.bf16.msra.mxu0 %v12747_v15  ;;  %7939 = vmatpush1.bf16.msra.mxu1 %v12748_v63 }
 0xc31   :  { %7909 = vmatprep.subr.bf16.mxu0 %v12749_v4  ;;  %7941 = vmatprep.subr.bf16.mxu1 %v12750_v56 }
 0xc34   :  { %7911 = vmatpush1.bf16.msra.mxu0 %v12751_v0  ;;  %7943 = vmatpush1.bf16.msra.mxu1 %v12752_v33  ;;  %v12763_v33 = vld [vmem:[#allocation121_spill] sm:$0xff]  ;;  %v12767_v0 = vld [vmem:[#allocation123_spill] sm:$0xff] }
 0xc35   :  { %7913 = vmatprep.subr.bf16.mxu0 %v12753_v24  ;;  %7945 = vmatprep.subr.bf16.mxu1 %v12754_v9  ;;  %v12764_v24 = vld [vmem:[#allocation122_spill] sm:$0xff]  ;;  %v12765_v9 = vld [vmem:[#allocation15_spill] sm:$0xff] }
 0xc38   :  { %7915 = vmatpush1.bf16.msra.mxu0 %v12755_v51  ;;  %7947 = vmatpush1.bf16.msra.mxu1 %v12756_v25  ;;  %v12766_v51 = vld [vmem:[#allocation16_spill] sm:$0xff] }
 0xc39   :  { %7917 = vmatprep.subr.bf16.mxu0 %v12757_v55  ;;  %7949 = vmatprep.subr.bf16.mxu1 %v12758_v37 }
 0xc3c   :  { %7919 = vmatpush1.bf16.msra.mxu0 %v12759_v60  ;;  %7951 = vmatpush1.bf16.msra.mxu1 %v12760_v39 }
 0xc3d   :  { %7921 = vmatprep.subr.bf16.mxu0 %v12761_v20  ;;  %7953 = vmatprep.subr.bf16.mxu1 %v12762_v30 }
 0xc40   :  { %7923 = vmatpush1.bf16.msra.mxu0 %v12763_v33  ;;  %7955 = vmatpush1.bf16.msra.mxu1 %v12764_v24 }
 0xc41   :  { %7957 = vmatprep.subr.bf16.mxu0 %v12765_v9  ;;  %7989 = vmatprep.subr.bf16.mxu1 %v12766_v51 }
 0xcf6   :  { %v3179_v25 = vpop.f32.mrb[20].mxu0  ;;  %v3250_v55 = vpop.f32.mrb[20].mxu1 }
 0xcf7   :  { %v9316_v37 = vadd.f32 %v3179_v25, %v12767_v0  ;;  %v3181_v56 = vpop.f32.mrb[21].mxu0  ;;  %v3252_v60 = vpop.f32.mrb[21].mxu1  ;;  %v9318_v33 = vadd.f32 %v3250_v55, %v10445_v49 }
 0xcf8   :  { %v9317_v39 = vadd.f32 %v3181_v56, %v12511_v44  ;;  %v9319_v24 = vadd.f32 %v3252_v60, %v10448_v43  ;;  %v12773_v60 = vld [vmem:[#allocation46_spill] sm:$0xff] }
 0xcf9   :  { %v6765_v4 = vmul.f32 -1.442695, %v9316_v37  ;;  %v6767_v30 = vmul.f32 -1.442695, %v9318_v33 }
 0xcfa   :  { %v6766_v20 = vmul.f32 -1.442695, %v9317_v39 }
 0xcfb   :  { %9609 = vpow2.f32 %v6765_v4 }
 0xcfc   :  { %9611 = vpow2.f32 %v6766_v20 }
 0xcfd   :  { %9613 = vtanh.f32 %v9319_v24 }
 0xcfe   :  { %9615 = vpow2.f32 %v6767_v30  ;;  %v12774_v30 = vld [vmem:[#allocation47_spill] sm:$0xff] }
 0xd05   :  { %v9610_v9 = vpop.eup %9609 }
 0xd06   :  { %v3264_v63 = vadd.f32 1.0, %v9610_v9  ;;  %v9612_v51 = vpop.eup %9611 }
 0xd07   :  { %v3265_v25 = vadd.f32 1.0, %v9612_v51  ;;  %v9614_v0 = vpop.eup %9613  ;;  %v12772_v51 = vld [vmem:[#allocation45_spill] sm:$0xff] }
 0xd08   :  { %9617 = vrcp.f32 %v3264_v63  ;;  %v9616_v15 = vpop.eup %9615  ;;  %v12770_v63 = vld [vmem:[#allocation43_spill] sm:$0xff] }
 0xd09   :  { %9619 = vrcp.f32 %v3265_v25  ;;  %v3266_v4 = vadd.f32 1.0, %v9616_v15  ;;  %v12769_v15 = vld [vmem:[#allocation42_spill] sm:$0xff]  ;;  %v12775_v25 = vld [vmem:[#allocation48_spill] sm:$0xff] }
 0xd0b   :  { %9621 = vrcp.f32 %v3266_v4  ;;  %v12779_v4 = vld [vmem:[#allocation52_spill] sm:$0xff] }
 0xd12   :  { %v9618_v56 = vpop.eup %9617 }
 0xd13   :  { %v3275_v37 = vmul.f32 %v9618_v56, %v9614_v0  ;;  %v9620_v39 = vpop.eup %9619  ;;  %v12771_v0 = vld [vmem:[#allocation44_spill] sm:$0xff]  ;;  %v12776_v56 = vld [vmem:[#allocation49_spill] sm:$0xff] }
 0xd14   :  { %v3274_v20 = vmul.f32 %v9620_v39, %v10976_v57  ;;  %v12768_v57 = vld [vmem:[#allocation41_spill] sm:$0xff]  ;;  %v12778_v39 = vld [vmem:[#allocation51_spill] sm:$0xff] }
 0xd15   :  { %v9622_v33 = vpop.eup %9621 }
 0xd16   :  { %v11104_v55 = vadd.f32 %v3275_v37, %v3274_v20  ;;  %v12777_v37 = vld [vmem:[#allocation50_spill] sm:$0xff]  ;;  %v12780_v20 = vld [vmem:[#allocation53_spill] sm:$0xff] }
 0xd18   :  { %9623 = vtanh.f32 %v11104_v55 }
 0xd22   :  { %v9624_v24 = vpop.eup %9623 }
 0xd23   :  { %v3278_v9 = vmul.f32 %v9624_v24, %v9622_v33  ;;  %v12781_v33 = vld [vmem:[#allocation54_spill] sm:$0xff]  ;;  %v12782_v24 = vld [vmem:[#allocation55_spill] sm:$0xff] }
 0xd25   :  { %3280 = vst [vmem:[#allocation10 + $0x14] sm:$0xf] %v3278_v9  ;;  %3346 = vmatmul.mubr.f32.vlgmr.msra.gmra.mrb[24].mxu0 %v3278_v9  ;;  %3417 = vmatmul.mubr.f32.vlgmr.msra.gmra.mrb[24].mxu1 %v3278_v9  ;;  %v12783_v9 = vld [vmem:[#allocation56_spill] sm:$0xff] }
 0xd26   :  { %7959 = vmatpush1.bf16.msra.mxu0 %v10076_v10  ;;  %7991 = vmatpush1.bf16.msra.mxu1 %v10079_v14 }
 0xd27   :  { %7961 = vmatprep.subr.bf16.mxu0 %v10083_v18  ;;  %7993 = vmatprep.subr.bf16.mxu1 %v10085_v19 }
 0xd28   :  { %3487 = vmatprep.mubr.f32.mxu0 %v12411_v31  ;;  %3558 = vmatprep.mubr.f32.mxu1 %v12411_v31 }
 0xd2a   :  { %7963 = vmatpush1.bf16.msra.mxu0 %v10088_v23  ;;  %7995 = vmatpush1.bf16.msra.mxu1 %v10092_v27 }
 0xd2b   :  { %7965 = vmatprep.subr.bf16.mxu0 %v10094_v28  ;;  %7997 = vmatprep.subr.bf16.mxu1 %v10096_v32 }
 0xd2e   :  { %7967 = vmatpush1.bf16.msra.mxu0 %v10099_v36  ;;  %7999 = vmatpush1.bf16.msra.mxu1 %v10103_v40 }
 0xd2f   :  { %7969 = vmatprep.subr.bf16.mxu0 %v10105_v41  ;;  %8001 = vmatprep.subr.bf16.mxu1 %v10108_v45 }
 0xd32   :  { %7971 = vmatpush1.bf16.msra.mxu0 %v10111_v52  ;;  %8003 = vmatpush1.bf16.msra.mxu1 %v10115_v53 }
 0xd33   :  { %7973 = vmatprep.subr.bf16.mxu0 %v10117_v54  ;;  %8005 = vmatprep.subr.bf16.mxu1 %v10120_v58 }
 0xd36   :  { %7975 = vmatpush1.bf16.msra.mxu0 %v10123_v1  ;;  %8007 = vmatpush1.bf16.msra.mxu1 %v10127_v2 }
 0xd37   :  { %7977 = vmatprep.subr.bf16.mxu0 %v10129_v3  ;;  %8009 = vmatprep.subr.bf16.mxu1 %v10132_v8 }
 0xd3a   :  { %7979 = vmatpush1.bf16.msra.mxu0 %v10135_v17  ;;  %8011 = vmatpush1.bf16.msra.mxu1 %v10139_v21 }
 0xd3b   :  { %7981 = vmatprep.subr.bf16.mxu0 %v10141_v22  ;;  %8013 = vmatprep.subr.bf16.mxu1 %v10147_v29 }
 0xd3e   :  { %7983 = vmatpush1.bf16.msra.mxu0 %v12768_v57  ;;  %8015 = vmatpush1.bf16.msra.mxu1 %v12769_v15 }
 0xd3f   :  { %7985 = vmatprep.subr.bf16.mxu0 %v12770_v63  ;;  %8017 = vmatprep.subr.bf16.mxu1 %v12771_v0 }
 0xd42   :  { %7987 = vmatpush1.bf16.msra.mxu0 %v12772_v51  ;;  %8019 = vmatpush1.bf16.msra.mxu1 %v12773_v60 }
 0xd43   :  { %8021 = vmatprep.subr.bf16.mxu0 %v12774_v30  ;;  %8053 = vmatprep.subr.bf16.mxu1 %v12775_v25  ;;  %v12789_v25 = vld [vmem:[#allocation62_spill] sm:$0xff]  ;;  %v12790_v30 = vld [vmem:[#allocation63_spill] sm:$0xff] }
 0xd45   :  { %3488 = vmatmul.mubr.f32.vlgmr.msra.gmra.mrb[26].mxu0 %v11061_v46  ;;  %3559 = vmatmul.mubr.f32.vlgmr.msra.gmra.mrb[26].mxu1 %v11061_v46  ;;  %v12784_v46 = vld [vmem:[#allocation57_spill] sm:$0xff] }
 0xd46   :  { %8023 = vmatpush1.bf16.msra.mxu0 %v12776_v56  ;;  %8055 = vmatpush1.bf16.msra.mxu1 %v12777_v37  ;;  %v12785_v56 = vld [vmem:[#allocation58_spill] sm:$0xff]  ;;  %v12786_v37 = vld [vmem:[#allocation59_spill] sm:$0xff] }
 0xd47   :  { %8025 = vmatprep.subr.bf16.mxu0 %v12778_v39  ;;  %8057 = vmatprep.subr.bf16.mxu1 %v12779_v4  ;;  %v12787_v39 = vld [vmem:[#allocation60_spill] sm:$0xff]  ;;  %v12788_v4 = vld [vmem:[#allocation61_spill] sm:$0xff] }
 0xd48   :  { %3657 = vmatprep.mubr.f32.mxu0 %v12411_v31  ;;  %3728 = vmatprep.mubr.f32.mxu1 %v12411_v31 }
 0xd4a   :  { %8027 = vmatpush1.bf16.msra.mxu0 %v12780_v20  ;;  %8059 = vmatpush1.bf16.msra.mxu1 %v12781_v33  ;;  %v12791_v20 = vld [vmem:[#allocation64_spill] sm:$0xff]  ;;  %v12792_v33 = vld [vmem:[#allocation65_spill] sm:$0xff] }
 0xd4b   :  { %8029 = vmatprep.subr.bf16.mxu0 %v12782_v24  ;;  %8061 = vmatprep.subr.bf16.mxu1 %v12783_v9  ;;  %v12793_v24 = vld [vmem:[#allocation66_spill] sm:$0xff]  ;;  %v12794_v9 = vld [vmem:[#allocation67_spill] sm:$0xff] }
 0xd4e   :  { %8031 = vmatpush1.bf16.msra.mxu0 %v12784_v46  ;;  %8063 = vmatpush1.bf16.msra.mxu1 %v12785_v56  ;;  %v12795_v46 = vld [vmem:[#allocation68_spill] sm:$0xff]  ;;  %v12796_v56 = vld [vmem:[#allocation69_spill] sm:$0xff] }
 0xd4f   :  { %8033 = vmatprep.subr.bf16.mxu0 %v12786_v37  ;;  %8065 = vmatprep.subr.bf16.mxu1 %v12787_v39  ;;  %v12797_v37 = vld [vmem:[#allocation70_spill] sm:$0xff]  ;;  %v12798_v39 = vld [vmem:[#allocation71_spill] sm:$0xff] }
 0xd52   :  { %8035 = vmatpush1.bf16.msra.mxu0 %v12788_v4  ;;  %8067 = vmatpush1.bf16.msra.mxu1 %v12789_v25  ;;  %v12799_v4 = vld [vmem:[#allocation72_spill] sm:$0xff]  ;;  %v12800_v25 = vld [vmem:[#allocation73_spill] sm:$0xff] }
 0xd53   :  { %8037 = vmatprep.subr.bf16.mxu0 %v12790_v30  ;;  %8069 = vmatprep.subr.bf16.mxu1 %v12791_v20  ;;  %v12801_v30 = vld [vmem:[#allocation74_spill] sm:$0xff]  ;;  %v12802_v20 = vld [vmem:[#allocation75_spill] sm:$0xff] }
 0xd56   :  { %8039 = vmatpush1.bf16.msra.mxu0 %v12792_v33  ;;  %8071 = vmatpush1.bf16.msra.mxu1 %v12793_v24  ;;  %v12803_v33 = vld [vmem:[#allocation76_spill] sm:$0xff]  ;;  %v12804_v24 = vld [vmem:[#allocation77_spill] sm:$0xff] }
 0xd57   :  { %8041 = vmatprep.subr.bf16.mxu0 %v12794_v9  ;;  %8073 = vmatprep.subr.bf16.mxu1 %v12795_v46  ;;  %v12805_v9 = vld [vmem:[#allocation78_spill] sm:$0xff]  ;;  %v12806_v46 = vld [vmem:[#allocation91_spill] sm:$0xff] }
 0xd5a   :  { %8043 = vmatpush1.bf16.msra.mxu0 %v12796_v56  ;;  %8075 = vmatpush1.bf16.msra.mxu1 %v12797_v37  ;;  %v12807_v56 = vld [vmem:[#allocation92_spill] sm:$0xff]  ;;  %v130_v37 = vpop.permute.xlu0 %129 }
 0xd5b   :  { %8045 = vmatprep.subr.bf16.mxu0 %v12798_v39  ;;  %8077 = vmatprep.subr.bf16.mxu1 %v12799_v4  ;;  %v12808_v39 = vld [vmem:[#allocation81_spill] sm:$0xff]  ;;  %v12809_v4 = vld [vmem:[#allocation82_spill] sm:$0xff] }
 0xd5c   :  { %v182_v60 = vmul.f32 %v12808_v39, %v130_v37  ;;  %v183_v51 = vmul.f32 %v12809_v4, %v130_v37 }
 0xd5e   :  { %8047 = vmatpush1.bf16.msra.mxu0 %v12800_v25  ;;  %8079 = vmatpush1.bf16.msra.mxu1 %v12801_v30  ;;  %v12810_v25 = vld [vmem:[#allocation84_spill] sm:$0xff] }
 0xd5f   :  { %8049 = vmatprep.subr.bf16.mxu0 %v12802_v20  ;;  %8081 = vmatprep.subr.bf16.mxu1 %v12803_v33  ;;  %v236_v0 = vadd.f32 %v12810_v25, %v182_v60  ;;  %v237_v20 = vadd.f32 %v12612_v35, %v183_v51 }
 0xd62   :  { %8051 = vmatpush1.bf16.msra.mxu0 %v12804_v24  ;;  %8083 = vmatpush1.bf16.msra.mxu1 %v12805_v9  ;;  %v184_v9 = vmul.f32 %v12478_v61, %v130_v37 }
 0xd63   :  { %8085 = vmatprep.subr.bf16.mxu0 %v12806_v46  ;;  %8117 = vmatprep.subr.bf16.mxu1 %v12807_v56  ;;  %v185_v56 = vmul.f32 %v10318_v16, %v130_v37 }
 0xd64   :  { %v238_v39 = vadd.f32 %v12479_v13, %v184_v9 }
 0xd65   :  { %v239_v60 = vadd.f32 %v12480_v48, %v185_v56 }
 0xe18   :  { %v3489_v30 = vpop.f32.mrb[26].mxu0  ;;  %v3560_v63 = vpop.f32.mrb[26].mxu1 }
 0xe19   :  { %v3565_v33 = vadd.f32 %v3489_v30, %v236_v0  ;;  %v3491_v15 = vpop.f32.mrb[27].mxu0  ;;  %v3562_v24 = vpop.f32.mrb[27].mxu1  ;;  %v3567_v4 = vadd.f32 %v3560_v63, %v238_v39 }
 0xe1a   :  { %v3566_v57 = vadd.f32 %v3491_v15, %v237_v20  ;;  %v3568_v25 = vadd.f32 %v3562_v24, %v239_v60  ;;  %v12814_v24 = vld [vmem:[#allocation108_spill] sm:$0xff]  ;;  %v12815_v60 = vld [vmem:[#allocation109_spill] sm:$0xff] }
 0xe1b   :  { %v6768_v46 = vmul.f32 -1.442695, %v3565_v33  ;;  %v6770_v22 = vmul.f32 -1.442695, %v3567_v4  ;;  %v12813_v4 = vld [vmem:[#allocation107_spill] sm:$0xff] }
 0xe1c   :  { %v6769_v29 = vmul.f32 -1.442695, %v3566_v57 }
 0xe1d   :  { %9625 = vpow2.f32 %v6768_v46 }
 0xe1e   :  { %9627 = vpow2.f32 %v6769_v29 }
 0xe1f   :  { %9629 = vtanh.f32 %v3568_v25 }
 0xe20   :  { %9631 = vpow2.f32 %v6770_v22  ;;  %v12811_v22 = vld [vmem:[#allocation105_spill] sm:$0xff] }
 0xe27   :  { %v9626_v51 = vpop.eup %9625 }
 0xe28   :  { %v3578_v0 = vadd.f32 1.0, %v9626_v51  ;;  %v9628_v30 = vpop.eup %9627  ;;  %v12816_v51 = vld [vmem:[#allocation110_spill] sm:$0xff] }
 0xe29   :  { %v3579_v15 = vadd.f32 1.0, %v9628_v30  ;;  %v9630_v57 = vpop.eup %9629  ;;  %v12818_v30 = vld [vmem:[#allocation112_spill] sm:$0xff] }
 0xe2a   :  { %9633 = vrcp.f32 %v3578_v0  ;;  %v9632_v20 = vpop.eup %9631  ;;  %v12817_v0 = vld [vmem:[#allocation111_spill] sm:$0xff] }
 0xe2b   :  { %9635 = vrcp.f32 %v3579_v15  ;;  %v3580_v9 = vadd.f32 1.0, %v9632_v20  ;;  %v12819_v15 = vld [vmem:[#allocation113_spill] sm:$0xff]  ;;  %v12821_v20 = vld [vmem:[#allocation115_spill] sm:$0xff] }
 0xe2d   :  { %9637 = vrcp.f32 %v3580_v9  ;;  %v12825_v9 = vld [vmem:[#allocation119_spill] sm:$0xff] }
 0xe34   :  { %v9634_v33 = vpop.eup %9633 }
 0xe35   :  { %v3589_v37 = vmul.f32 %v9634_v33, %v9630_v57  ;;  %v9636_v46 = vpop.eup %9635  ;;  %v12820_v57 = vld [vmem:[#allocation114_spill] sm:$0xff]  ;;  %v12822_v33 = vld [vmem:[#allocation116_spill] sm:$0xff] }
 0xe36   :  { %v3588_v29 = vmul.f32 %v9636_v46, %v11058_v12  ;;  %v12812_v12 = vld [vmem:[#allocation106_spill] sm:$0xff] }
 0xe37   :  { %v9638_v56 = vpop.eup %9637  ;;  %v12824_v46 = vld [vmem:[#allocation118_spill] sm:$0xff] }
 0xe38   :  { %v11186_v63 = vadd.f32 %v3589_v37, %v3588_v29  ;;  %v12823_v37 = vld [vmem:[#allocation117_spill] sm:$0xff]  ;;  %v12826_v29 = vld [vmem:[#allocation120_spill] sm:$0xff] }
 0xe3a   :  { %9639 = vtanh.f32 %v11186_v63 }
 0xe44   :  { %v9640_v25 = vpop.eup %9639 }
 0xe45   :  { %v11189_v39 = vmul.f32 %v9640_v25, %v9638_v56  ;;  %v12827_v56 = vld [vmem:[#allocation121_spill] sm:$0xff]  ;;  %v12828_v25 = vld [vmem:[#allocation122_spill] sm:$0xff] }
 0xe47   :  { %3658 = vmatmul.mubr.f32.vlgmr.msra.gmra.mrb[24].mxu0 %v11189_v39  ;;  %3729 = vmatmul.mubr.f32.vlgmr.msra.gmra.mrb[24].mxu1 %v11189_v39 }
 0xe48   :  { %8087 = vmatpush1.bf16.msra.mxu0 %v12482_v6  ;;  %8119 = vmatpush1.bf16.msra.mxu1 %v12483_v7 }
 0xe49   :  { %8089 = vmatprep.subr.bf16.mxu0 %v12484_v62  ;;  %8121 = vmatprep.subr.bf16.mxu1 %v12485_v59 }
 0xe4a   :  { %3825 = vmatprep.mubr.f32.mxu0 %v12411_v31  ;;  %3896 = vmatprep.mubr.f32.mxu1 %v12411_v31 }
 0xe4c   :  { %8091 = vmatpush1.bf16.msra.mxu0 %v12547_v5  ;;  %8123 = vmatpush1.bf16.msra.mxu1 %v12548_v26 }
 0xe4d   :  { %8093 = vmatprep.subr.bf16.mxu0 %v12613_v50  ;;  %8125 = vmatprep.subr.bf16.mxu1 %v12614_v11 }
 0xe50   :  { %8095 = vmatpush1.bf16.msra.mxu0 %v12679_v42  ;;  %8127 = vmatpush1.bf16.msra.mxu1 %v12680_v47 }
 0xe51   :  { %8097 = vmatprep.subr.bf16.mxu0 %v12745_v38  ;;  %8129 = vmatprep.subr.bf16.mxu1 %v12746_v34 }
 0xe54   :  { %8099 = vmatpush1.bf16.msra.mxu0 %v12811_v22  ;;  %8131 = vmatpush1.bf16.msra.mxu1 %v12812_v12 }
 0xe55   :  { %8101 = vmatprep.subr.bf16.mxu0 %v12813_v4  ;;  %8133 = vmatprep.subr.bf16.mxu1 %v12814_v24 }
 0xe58   :  { %8103 = vmatpush1.bf16.msra.mxu0 %v12815_v60  ;;  %8135 = vmatpush1.bf16.msra.mxu1 %v12816_v51 }
 0xe59   :  { %8105 = vmatprep.subr.bf16.mxu0 %v12817_v0  ;;  %8137 = vmatprep.subr.bf16.mxu1 %v12818_v30  ;;  %v12829_v30 = vld [vmem:[#allocation15_spill] sm:$0xff] }
 0xe5a   :  { %v12831_v0 = vld [vmem:[#allocation123_spill] sm:$0xff] }
 0xe5c   :  { %8107 = vmatpush1.bf16.msra.mxu0 %v12819_v15  ;;  %8139 = vmatpush1.bf16.msra.mxu1 %v12820_v57  ;;  %v12830_v15 = vld [vmem:[#allocation16_spill] sm:$0xff] }
 0xe5d   :  { %8109 = vmatprep.subr.bf16.mxu0 %v12821_v20  ;;  %8141 = vmatprep.subr.bf16.mxu1 %v12822_v33 }
 0xe60   :  { %8111 = vmatpush1.bf16.msra.mxu0 %v12823_v37  ;;  %8143 = vmatpush1.bf16.msra.mxu1 %v12824_v46 }
 0xe61   :  { %8113 = vmatprep.subr.bf16.mxu0 %v12825_v9  ;;  %8145 = vmatprep.subr.bf16.mxu1 %v12826_v29 }
 0xe64   :  { %8115 = vmatpush1.bf16.msra.mxu0 %v12827_v56  ;;  %8147 = vmatpush1.bf16.msra.mxu1 %v12828_v25 }
 0xe65   :  { %8149 = vmatprep.subr.bf16.mxu0 %v12829_v30  ;;  %8181 = vmatprep.subr.bf16.mxu1 %v12830_v15 }
 0xf1a   :  { %v3659_v57 = vpop.f32.mrb[24].mxu0  ;;  %v3730_v20 = vpop.f32.mrb[24].mxu1 }
 0xf1b   :  { %v9320_v33 = vadd.f32 %v3659_v57, %v12831_v0  ;;  %v3661_v51 = vpop.f32.mrb[25].mxu0  ;;  %v3732_v37 = vpop.f32.mrb[25].mxu1  ;;  %v9322_v56 = vadd.f32 %v3730_v20, %v10445_v49 }
 0xf1c   :  { %v9321_v46 = vadd.f32 %v3661_v51, %v12511_v44  ;;  %v9323_v25 = vadd.f32 %v3732_v37, %v10448_v43 }
 0xf1d   :  { %v6771_v60 = vmul.f32 -1.442695, %v9320_v33  ;;  %v6773_v29 = vmul.f32 -1.442695, %v9322_v56 }
 0xf1e   :  { %v6772_v9 = vmul.f32 -1.442695, %v9321_v46 }
 0xf1f   :  { %9641 = vpow2.f32 %v6771_v60 }
 0xf20   :  { %9643 = vpow2.f32 %v6772_v9 }
 0xf21   :  { %9645 = vtanh.f32 %v9323_v25  ;;  %v12838_v25 = vld [vmem:[#allocation45_spill] sm:$0xff] }
 0xf22   :  { %9647 = vpow2.f32 %v6773_v29  ;;  %v12837_v29 = vld [vmem:[#allocation44_spill] sm:$0xff] }
 0xf29   :  { %v9642_v30 = vpop.eup %9641 }
 0xf2a   :  { %v3744_v24 = vadd.f32 1.0, %v9642_v30  ;;  %v9644_v15 = vpop.eup %9643 }
 0xf2b   :  { %v3745_v57 = vadd.f32 1.0, %v9644_v15  ;;  %v9646_v0 = vpop.eup %9645  ;;  %v12836_v15 = vld [vmem:[#allocation43_spill] sm:$0xff] }
 0xf2c   :  { %9649 = vrcp.f32 %v3744_v24  ;;  %v9648_v4 = vpop.eup %9647  ;;  %v12834_v24 = vld [vmem:[#allocation41_spill] sm:$0xff] }
 0xf2d   :  { %9651 = vrcp.f32 %v3745_v57  ;;  %v3746_v60 = vadd.f32 1.0, %v9648_v4  ;;  %v12833_v4 = vld [vmem:[#allocation40_spill] sm:$0xff]  ;;  %v12839_v57 = vld [vmem:[#allocation46_spill] sm:$0xff] }
 0xf2f   :  { %9653 = vrcp.f32 %v3746_v60  ;;  %v12843_v60 = vld [vmem:[#allocation50_spill] sm:$0xff] }
 0xf36   :  { %v9650_v51 = vpop.eup %9649 }
 0xf37   :  { %v3755_v33 = vmul.f32 %v9650_v51, %v9646_v0  ;;  %v9652_v46 = vpop.eup %9651  ;;  %v12835_v0 = vld [vmem:[#allocation42_spill] sm:$0xff]  ;;  %v12840_v51 = vld [vmem:[#allocation47_spill] sm:$0xff] }
 0xf38   :  { %v3754_v9 = vmul.f32 %v9652_v46, %v11104_v55  ;;  %v12832_v55 = vld [vmem:[#allocation39_spill] sm:$0xff]  ;;  %v12842_v46 = vld [vmem:[#allocation49_spill] sm:$0xff] }
 0xf39   :  { %v9654_v30 = vpop.eup %9653 }
 0xf3a   :  { %v11232_v20 = vadd.f32 %v3755_v33, %v3754_v9  ;;  %v12841_v33 = vld [vmem:[#allocation48_spill] sm:$0xff]  ;;  %v12844_v9 = vld [vmem:[#allocation51_spill] sm:$0xff] }
 0xf3c   :  { %9655 = vtanh.f32 %v11232_v20 }
 0xf46   :  { %v9656_v37 = vpop.eup %9655 }
 0xf47   :  { %v3758_v56 = vmul.f32 %v9656_v37, %v9654_v30  ;;  %v12845_v30 = vld [vmem:[#allocation52_spill] sm:$0xff]  ;;  %v12846_v37 = vld [vmem:[#allocation53_spill] sm:$0xff] }
 0xf49   :  { %3760 = vst [vmem:[#allocation10 + $0x18] sm:$0xf] %v3758_v56  ;;  %3826 = vmatmul.mubr.f32.vlgmr.msra.gmra.mrb[28].mxu0 %v3758_v56  ;;  %3897 = vmatmul.mubr.f32.vlgmr.msra.gmra.mrb[28].mxu1 %v3758_v56  ;;  %v12847_v56 = vld [vmem:[#allocation54_spill] sm:$0xff] }
 0xf4a   :  { %8151 = vmatpush1.bf16.msra.mxu0 %v10076_v10  ;;  %8183 = vmatpush1.bf16.msra.mxu1 %v10079_v14 }
 0xf4b   :  { %8153 = vmatprep.subr.bf16.mxu0 %v10083_v18  ;;  %8185 = vmatprep.subr.bf16.mxu1 %v10085_v19 }
 0xf4c   :  { %3967 = vmatprep.mubr.f32.mxu0 %v12411_v31  ;;  %4038 = vmatprep.mubr.f32.mxu1 %v12411_v31 }
 0xf4e   :  { %8155 = vmatpush1.bf16.msra.mxu0 %v10088_v23  ;;  %8187 = vmatpush1.bf16.msra.mxu1 %v10092_v27 }
 0xf4f   :  { %8157 = vmatprep.subr.bf16.mxu0 %v10094_v28  ;;  %8189 = vmatprep.subr.bf16.mxu1 %v10096_v32 }
 0xf52   :  { %8159 = vmatpush1.bf16.msra.mxu0 %v10099_v36  ;;  %8191 = vmatpush1.bf16.msra.mxu1 %v10103_v40 }
 0xf53   :  { %8161 = vmatprep.subr.bf16.mxu0 %v10105_v41  ;;  %8193 = vmatprep.subr.bf16.mxu1 %v10108_v45 }
 0xf56   :  { %8163 = vmatpush1.bf16.msra.mxu0 %v10111_v52  ;;  %8195 = vmatpush1.bf16.msra.mxu1 %v10115_v53 }
 0xf57   :  { %8165 = vmatprep.subr.bf16.mxu0 %v10117_v54  ;;  %8197 = vmatprep.subr.bf16.mxu1 %v10120_v58 }
 0xf5a   :  { %8167 = vmatpush1.bf16.msra.mxu0 %v10123_v1  ;;  %8199 = vmatpush1.bf16.msra.mxu1 %v10127_v2 }
 0xf5b   :  { %8169 = vmatprep.subr.bf16.mxu0 %v10129_v3  ;;  %8201 = vmatprep.subr.bf16.mxu1 %v10132_v8 }
 0xf5e   :  { %8171 = vmatpush1.bf16.msra.mxu0 %v10135_v17  ;;  %8203 = vmatpush1.bf16.msra.mxu1 %v10139_v21 }
 0xf5f   :  { %8173 = vmatprep.subr.bf16.mxu0 %v12832_v55  ;;  %8205 = vmatprep.subr.bf16.mxu1 %v12833_v4 }
 0xf62   :  { %8175 = vmatpush1.bf16.msra.mxu0 %v12834_v24  ;;  %8207 = vmatpush1.bf16.msra.mxu1 %v12835_v0 }
 0xf63   :  { %8177 = vmatprep.subr.bf16.mxu0 %v12836_v15  ;;  %8209 = vmatprep.subr.bf16.mxu1 %v12837_v29 }
 0xf66   :  { %8179 = vmatpush1.bf16.msra.mxu0 %v12838_v25  ;;  %8211 = vmatpush1.bf16.msra.mxu1 %v12839_v57  ;;  %v12855_v57 = vld [vmem:[#allocation62_spill] sm:$0xff]  ;;  %v12856_v25 = vld [vmem:[#allocation63_spill] sm:$0xff] }
 0xf67   :  { %8213 = vmatprep.subr.bf16.mxu0 %v12840_v51  ;;  %8245 = vmatprep.subr.bf16.mxu1 %v12841_v33  ;;  %v12848_v33 = vld [vmem:[#allocation55_spill] sm:$0xff]  ;;  %v12849_v51 = vld [vmem:[#allocation56_spill] sm:$0xff] }
 0xf69   :  { %3968 = vmatmul.mubr.f32.vlgmr.msra.gmra.mrb[30].mxu0 %v11189_v39  ;;  %4039 = vmatmul.mubr.f32.vlgmr.msra.gmra.mrb[30].mxu1 %v11189_v39  ;;  %v12850_v39 = vld [vmem:[#allocation57_spill] sm:$0xff] }
 0xf6a   :  { %8215 = vmatpush1.bf16.msra.mxu0 %v12842_v46  ;;  %8247 = vmatpush1.bf16.msra.mxu1 %v12843_v60  ;;  %v12851_v46 = vld [vmem:[#allocation58_spill] sm:$0xff]  ;;  %v12852_v60 = vld [vmem:[#allocation59_spill] sm:$0xff] }
 0xf6b   :  { %8217 = vmatprep.subr.bf16.mxu0 %v12844_v9  ;;  %8249 = vmatprep.subr.bf16.mxu1 %v12845_v30  ;;  %v12853_v9 = vld [vmem:[#allocation60_spill] sm:$0xff]  ;;  %v12854_v30 = vld [vmem:[#allocation61_spill] sm:$0xff] }
 0xf6c   :  { %4137 = vmatprep.mubr.f32.mxu0 %v12411_v31  ;;  %4208 = vmatprep.mubr.f32.mxu1 %v12411_v31 }
 0xf6e   :  { %8219 = vmatpush1.bf16.msra.mxu0 %v12846_v37  ;;  %8251 = vmatpush1.bf16.msra.mxu1 %v12847_v56  ;;  %v12857_v37 = vld [vmem:[#allocation64_spill] sm:$0xff]  ;;  %v12858_v56 = vld [vmem:[#allocation65_spill] sm:$0xff] }
 0xf6f   :  { %8221 = vmatprep.subr.bf16.mxu0 %v12848_v33  ;;  %8253 = vmatprep.subr.bf16.mxu1 %v12849_v51  ;;  %v12859_v33 = vld [vmem:[#allocation66_spill] sm:$0xff]  ;;  %v12860_v51 = vld [vmem:[#allocation67_spill] sm:$0xff] }
 0xf72   :  { %8223 = vmatpush1.bf16.msra.mxu0 %v12850_v39  ;;  %8255 = vmatpush1.bf16.msra.mxu1 %v12851_v46  ;;  %v12861_v39 = vld [vmem:[#allocation68_spill] sm:$0xff]  ;;  %v12862_v46 = vld [vmem:[#allocation69_spill] sm:$0xff] }
 0xf73   :  { %8225 = vmatprep.subr.bf16.mxu0 %v12852_v60  ;;  %8257 = vmatprep.subr.bf16.mxu1 %v12853_v9  ;;  %v12863_v60 = vld [vmem:[#allocation70_spill] sm:$0xff]  ;;  %v12864_v9 = vld [vmem:[#allocation71_spill] sm:$0xff] }
 0xf76   :  { %8227 = vmatpush1.bf16.msra.mxu0 %v12854_v30  ;;  %8259 = vmatpush1.bf16.msra.mxu1 %v12855_v57  ;;  %v12865_v30 = vld [vmem:[#allocation72_spill] sm:$0xff]  ;;  %v12866_v57 = vld [vmem:[#allocation73_spill] sm:$0xff] }
 0xf77   :  { %8229 = vmatprep.subr.bf16.mxu0 %v12856_v25  ;;  %8261 = vmatprep.subr.bf16.mxu1 %v12857_v37  ;;  %v12867_v25 = vld [vmem:[#allocation74_spill] sm:$0xff]  ;;  %v12868_v37 = vld [vmem:[#allocation75_spill] sm:$0xff] }
 0xf7a   :  { %8231 = vmatpush1.bf16.msra.mxu0 %v12858_v56  ;;  %8263 = vmatpush1.bf16.msra.mxu1 %v12859_v33  ;;  %v12869_v56 = vld [vmem:[#allocation76_spill] sm:$0xff]  ;;  %v12870_v33 = vld [vmem:[#allocation77_spill] sm:$0xff] }
 0xf7b   :  { %8233 = vmatprep.subr.bf16.mxu0 %v12860_v51  ;;  %8265 = vmatprep.subr.bf16.mxu1 %v12861_v39  ;;  %v12871_v51 = vld [vmem:[#allocation78_spill] sm:$0xff]  ;;  %v12872_v39 = vld [vmem:[#allocation91_spill] sm:$0xff] }
 0xf7e   :  { %8235 = vmatpush1.bf16.msra.mxu0 %v12862_v46  ;;  %8267 = vmatpush1.bf16.msra.mxu1 %v12863_v60  ;;  %v12873_v46 = vld [vmem:[#allocation92_spill] sm:$0xff]  ;;  %v135_v60 = vpop.permute.xlu1 %134 }
 0xf7f   :  { %8237 = vmatprep.subr.bf16.mxu0 %v12864_v9  ;;  %8269 = vmatprep.subr.bf16.mxu1 %v12865_v30  ;;  %v12874_v9 = vld [vmem:[#allocation81_spill] sm:$0xff]  ;;  %v12875_v30 = vld [vmem:[#allocation82_spill] sm:$0xff] }
 0xf80   :  { %v186_v29 = vmul.f32 %v12874_v9, %v135_v60  ;;  %v187_v15 = vmul.f32 %v12875_v30, %v135_v60 }
 0xf82   :  { %8239 = vmatpush1.bf16.msra.mxu0 %v12866_v57  ;;  %8271 = vmatpush1.bf16.msra.mxu1 %v12867_v25  ;;  %v12876_v57 = vld [vmem:[#allocation84_spill] sm:$0xff] }
 0xf83   :  { %8241 = vmatprep.subr.bf16.mxu0 %v12868_v37  ;;  %8273 = vmatprep.subr.bf16.mxu1 %v12869_v56  ;;  %v240_v0 = vadd.f32 %v12876_v57, %v186_v29  ;;  %v241_v37 = vadd.f32 %v12612_v35, %v187_v15 }
 0xf86   :  { %8243 = vmatpush1.bf16.msra.mxu0 %v12870_v33  ;;  %8275 = vmatpush1.bf16.msra.mxu1 %v12871_v51  ;;  %v188_v51 = vmul.f32 %v12478_v61, %v135_v60 }
 0xf87   :  { %8277 = vmatprep.subr.bf16.mxu0 %v12872_v39  ;;  %8309 = vmatprep.subr.bf16.mxu1 %v12873_v46  ;;  %v189_v46 = vmul.f32 %v10318_v16, %v135_v60 }
 0xf88   :  { %v242_v9 = vadd.f32 %v12479_v13, %v188_v51 }
 0xf89   :  { %v243_v29 = vadd.f32 %v12480_v48, %v189_v46  ;;  %v12879_v46 = vld [vmem:[#allocation109_spill] sm:$0xff] }
0x103c   :  { %v3969_v25 = vpop.f32.mrb[30].mxu0  ;;  %v4040_v24 = vpop.f32.mrb[30].mxu1 }
0x103d   :  { %v4045_v56 = vadd.f32 %v3969_v25, %v240_v0  ;;  %v3971_v4 = vpop.f32.mrb[31].mxu0  ;;  %v4042_v33 = vpop.f32.mrb[31].mxu1  ;;  %v4047_v30 = vadd.f32 %v4040_v24, %v242_v9  ;;  %v12883_v9 = vld [vmem:[#allocation113_spill] sm:$0xff] }
0x103e   :  { %v4046_v55 = vadd.f32 %v3971_v4, %v241_v37  ;;  %v4048_v57 = vadd.f32 %v4042_v33, %v243_v29  ;;  %v12880_v37 = vld [vmem:[#allocation110_spill] sm:$0xff]  ;;  %v12885_v29 = vld [vmem:[#allocation115_spill] sm:$0xff] }
0x103f   :  { %v6774_v39 = vmul.f32 -1.442695, %v4045_v56  ;;  %v6776_v17 = vmul.f32 -1.442695, %v4047_v30  ;;  %v12881_v56 = vld [vmem:[#allocation111_spill] sm:$0xff]  ;;  %v12884_v30 = vld [vmem:[#allocation114_spill] sm:$0xff] }
0x1040   :  { %v6775_v21 = vmul.f32 -1.442695, %v4046_v55 }
0x1041   :  { %9657 = vpow2.f32 %v6774_v39  ;;  %v12882_v39 = vld [vmem:[#allocation112_spill] sm:$0xff] }
0x1042   :  { %9659 = vpow2.f32 %v6775_v21 }
0x1043   :  { %9661 = vtanh.f32 %v4048_v57  ;;  %v12886_v57 = vld [vmem:[#allocation116_spill] sm:$0xff] }
0x1044   :  { %9663 = vpow2.f32 %v6776_v17  ;;  %v12877_v17 = vld [vmem:[#allocation107_spill] sm:$0xff] }
0x104b   :  { %v9658_v35 = vpop.eup %9657 }
0x104c   :  { %v4058_v0 = vadd.f32 1.0, %v9658_v35  ;;  %v9660_v15 = vpop.eup %9659  ;;  %v12887_v35 = vld [vmem:[#allocation117_spill] sm:$0xff] }
0x104d   :  { %v4059_v61 = vadd.f32 1.0, %v9660_v15  ;;  %v9662_v55 = vpop.eup %9661  ;;  %v12889_v15 = vld [vmem:[#allocation119_spill] sm:$0xff] }
0x104e   :  { %9665 = vrcp.f32 %v4058_v0  ;;  %v9664_v4 = vpop.eup %9663  ;;  %v12888_v0 = vld [vmem:[#allocation118_spill] sm:$0xff] }
0x104f   :  { %9667 = vrcp.f32 %v4059_v61  ;;  %v4060_v13 = vadd.f32 1.0, %v9664_v4  ;;  %v12890_v61 = vld [vmem:[#allocation120_spill] sm:$0xff]  ;;  %v12892_v4 = vld [vmem:[#allocation122_spill] sm:$0xff] }
0x1051   :  { %9669 = vrcp.f32 %v4060_v13 }
0x1058   :  { %v9666_v25 = vpop.eup %9665 }
0x1059   :  { %v4069_v16 = vmul.f32 %v9666_v25, %v9662_v55  ;;  %v9668_v60 = vpop.eup %9667  ;;  %v12891_v55 = vld [vmem:[#allocation121_spill] sm:$0xff]  ;;  %v481_v25 = vld [vmem:[#allocation8 + $0x8] sm:$0xff] }
0x105a   :  { %v4068_v21 = vmul.f32 %v9668_v60, %v11186_v63  ;;  %v12878_v63 = vld [vmem:[#allocation108_spill] sm:$0xff] }
0x105b   :  { %v9670_v48 = vpop.eup %9669  ;;  %v483_v60 = vld [vmem:[#allocation8 + $0x18] sm:$0xff] }
0x105c   :  { %v11314_v24 = vadd.f32 %v4069_v16, %v4068_v21  ;;  %v485_v16 = vld [vmem:[#allocation8 + $0x28] sm:$0xff]  ;;  %v487_v21 = vld [vmem:[#allocation8 + $0x38] sm:$0xff] }
0x105d   :  { %v11353_v13 = vpack.c.bf16 %v485_v16, %v481_v25 }
0x105e   :  { %9671 = vtanh.f32 %v11314_v24 }
0x105f   :  { %12893 = vst [vmem:[#allocation86_spill] sm:$0xff] %v11353_v13 }
0x1068   :  { %v9672_v51 = vpop.eup %9671 }
0x1069   :  { %v11317_v33 = vmul.f32 %v9672_v51, %v9670_v48  ;;  %v11355_v48 = vpack.c.bf16 %v487_v21, %v483_v60 }
0x106b   :  { %4138 = vmatmul.mubr.f32.vlgmr.msra.gmra.mrb[28].mxu0 %v11317_v33  ;;  %4209 = vmatmul.mubr.f32.vlgmr.msra.gmra.mrb[28].mxu1 %v11317_v33  ;;  %12894 = vst [vmem:[#allocation88_spill] sm:$0xff] %v11355_v48 }
0x106c   :  { %8279 = vmatpush1.bf16.msra.mxu0 %v12482_v6  ;;  %8311 = vmatpush1.bf16.msra.mxu1 %v12483_v7 }
0x106d   :  { %8281 = vmatprep.subr.bf16.mxu0 %v12484_v62  ;;  %8313 = vmatprep.subr.bf16.mxu1 %v12485_v59 }
0x106e   :  { %4305 = vmatprep.mubr.f32.mxu0 %v12411_v31  ;;  %4376 = vmatprep.mubr.f32.mxu1 %v12411_v31 }
0x1070   :  { %8283 = vmatpush1.bf16.msra.mxu0 %v12547_v5  ;;  %8315 = vmatpush1.bf16.msra.mxu1 %v12548_v26 }
0x1071   :  { %8285 = vmatprep.subr.bf16.mxu0 %v12613_v50  ;;  %8317 = vmatprep.subr.bf16.mxu1 %v12614_v11 }
0x1074   :  { %8287 = vmatpush1.bf16.msra.mxu0 %v12679_v42  ;;  %8319 = vmatpush1.bf16.msra.mxu1 %v12680_v47 }
0x1075   :  { %8289 = vmatprep.subr.bf16.mxu0 %v12745_v38  ;;  %8321 = vmatprep.subr.bf16.mxu1 %v12746_v34 }
0x1078   :  { %8291 = vmatpush1.bf16.msra.mxu0 %v12811_v22  ;;  %8323 = vmatpush1.bf16.msra.mxu1 %v12812_v12 }
0x1079   :  { %8293 = vmatprep.subr.bf16.mxu0 %v12877_v17  ;;  %8325 = vmatprep.subr.bf16.mxu1 %v12878_v63 }
0x107c   :  { %8295 = vmatpush1.bf16.msra.mxu0 %v12879_v46  ;;  %8327 = vmatpush1.bf16.msra.mxu1 %v12880_v37 }
0x107d   :  { %8297 = vmatprep.subr.bf16.mxu0 %v12881_v56  ;;  %8329 = vmatprep.subr.bf16.mxu1 %v12882_v39  ;;  %v499_v39 = vld [vmem:[#allocation8 + $0x98] sm:$0xff] }
0x107e   :  { %v503_v56 = vld [vmem:[#allocation8 + $0xb8] sm:$0xff] }
0x1080   :  { %8299 = vmatpush1.bf16.msra.mxu0 %v12883_v9  ;;  %8331 = vmatpush1.bf16.msra.mxu1 %v12884_v30  ;;  %v501_v9 = vld [vmem:[#allocation8 + $0xa8] sm:$0xff] }
0x1081   :  { %8301 = vmatprep.subr.bf16.mxu0 %v12885_v29  ;;  %8333 = vmatprep.subr.bf16.mxu1 %v12886_v57 }
0x1084   :  { %8303 = vmatpush1.bf16.msra.mxu0 %v12887_v35  ;;  %8335 = vmatpush1.bf16.msra.mxu1 %v12888_v0  ;;  %v12895_v0 = vld [vmem:[#allocation123_spill] sm:$0xff] }
0x1085   :  { %8305 = vmatprep.subr.bf16.mxu0 %v12889_v15  ;;  %8337 = vmatprep.subr.bf16.mxu1 %v12890_v61 }
0x1088   :  { %8307 = vmatpush1.bf16.msra.mxu0 %v12891_v55  ;;  %8339 = vmatpush1.bf16.msra.mxu1 %v12892_v4 }
0x1089   :  { %8341 = vmatprep.subr.bf16.mxu0 %v11353_v13  ;;  %8373 = vmatprep.subr.bf16.mxu1 %v11355_v48 }
0x113e   :  { %v4139_v51 = vpop.f32.mrb[28].mxu0  ;;  %v4210_v15 = vpop.f32.mrb[28].mxu1 }
0x113f   :  { %v9324_v61 = vadd.f32 %v4139_v51, %v12895_v0  ;;  %v4141_v35 = vpop.f32.mrb[29].mxu0  ;;  %v4212_v55 = vpop.f32.mrb[29].mxu1  ;;  %v9326_v25 = vadd.f32 %v4210_v15, %v10445_v49 }
0x1140   :  { %v9325_v4 = vadd.f32 %v4141_v35, %v12511_v44  ;;  %v9327_v16 = vadd.f32 %v4212_v55, %v10448_v43  ;;  %v480_v55 = vld [vmem:[#allocation8] sm:$0xff]  ;;  %v497_v44 = vld [vmem:[#allocation8 + $0x88] sm:$0xff] }
0x1141   :  { %v6777_v57 = vmul.f32 -1.442695, %v9324_v61  ;;  %v6779_v60 = vmul.f32 -1.442695, %v9326_v25  ;;  %v484_v25 = vld [vmem:[#allocation8 + $0x20] sm:$0xff] }
0x1142   :  { %v6778_v29 = vmul.f32 -1.442695, %v9325_v4 }
0x1143   :  { %9673 = vpow2.f32 %v6777_v57 }
0x1144   :  { %9675 = vpow2.f32 %v6778_v29 }
0x1145   :  { %9677 = vtanh.f32 %v9327_v16  ;;  %v482_v16 = vld [vmem:[#allocation8 + $0x10] sm:$0xff] }
0x1146   :  { %9679 = vpow2.f32 %v6779_v60  ;;  %v486_v60 = vld [vmem:[#allocation8 + $0x30] sm:$0xff] }
0x114d   :  { %v9674_v21 = vpop.eup %9673 }
0x114e   :  { %v4224_v13 = vadd.f32 1.0, %v9674_v21  ;;  %v9676_v48 = vpop.eup %9675  ;;  %v491_v21 = vld [vmem:[#allocation8 + $0x58] sm:$0xff] }
0x114f   :  { %v4225_v51 = vadd.f32 1.0, %v9676_v48  ;;  %v9678_v0 = vpop.eup %9677  ;;  %v493_v48 = vld [vmem:[#allocation8 + $0x68] sm:$0xff] }
0x1150   :  { %9681 = vrcp.f32 %v4224_v13  ;;  %v9680_v30 = vpop.eup %9679  ;;  %v489_v13 = vld [vmem:[#allocation8 + $0x48] sm:$0xff] }
0x1151   :  { %9683 = vrcp.f32 %v4225_v51  ;;  %v4226_v57 = vadd.f32 1.0, %v9680_v30  ;;  %v495_v51 = vld [vmem:[#allocation8 + $0x78] sm:$0xff]  ;;  %v11369_v30 = vpack.c.bf16 %v486_v60, %v482_v16  ;;  %v11388_v16 = vpack.c.bf16 %v501_v9, %v497_v44 }
0x1152   :  { %v11390_v60 = vpack.c.bf16 %v503_v56, %v499_v39  ;;  %v504_v56 = vld [vmem:[#allocation8 + $0xc0] sm:$0xff] }
0x1153   :  { %9685 = vrcp.f32 %v4226_v57  ;;  %12898 = vst [vmem:[#allocation93_spill] sm:$0xff] %v11369_v30  ;;  %v11375_v57 = vpack.c.bf16 %v495_v51, %v491_v21  ;;  %12903 = vst [vmem:[#allocation98_spill] sm:$0xff] %v11388_v16  ;;  %v505_v21 = vld [vmem:[#allocation8 + $0xc8] sm:$0xff]  ;;  %v508_v39 = vld [vmem:[#allocation8 + $0xe0] sm:$0xff] }
0x1154   :  { %12904 = vst [vmem:[#allocation85_spill] sm:$0xff] %v11390_v60  ;;  %v509_v51 = vld [vmem:[#allocation8 + $0xe8] sm:$0xff] }
0x1155   :  { %12900 = vst [vmem:[#allocation95_spill] sm:$0xff] %v11375_v57  ;;  %v11402_v9 = vpack.c.bf16 %v509_v51, %v505_v21  ;;  %v514_v21 = vld [vmem:[#allocation8 + $0x110] sm:$0xff] }
0x1156   :  { %v518_v51 = vld [vmem:[#allocation8 + $0x130] sm:$0xff] }
0x1157   :  { %12907 = vst [vmem:[#allocation101_spill] sm:$0xff] %v11402_v9 }
0x115a   :  { %v9682_v35 = vpop.eup %9681 }
0x115b   :  { %v4235_v61 = vmul.f32 %v9682_v35, %v9678_v0  ;;  %v9684_v4 = vpop.eup %9683  ;;  %v11367_v0 = vpack.c.bf16 %v484_v25, %v480_v55  ;;  %v492_v35 = vld [vmem:[#allocation8 + $0x60] sm:$0xff] }
0x115c   :  { %v4234_v29 = vmul.f32 %v9684_v4, %v11232_v20  ;;  %v488_v20 = vld [vmem:[#allocation8 + $0x40] sm:$0xff]  ;;  %v11373_v4 = vpack.c.bf16 %v493_v48, %v489_v13  ;;  %v498_v13 = vld [vmem:[#allocation8 + $0x90] sm:$0xff] }
0x115d   :  { %v9686_v43 = vpop.eup %9685  ;;  %12897 = vst [vmem:[#allocation90_spill] sm:$0xff] %v11367_v0  ;;  %v496_v55 = vld [vmem:[#allocation8 + $0x80] sm:$0xff]  ;;  %v502_v48 = vld [vmem:[#allocation8 + $0xb0] sm:$0xff] }
0x115e   :  { %v11364_v15 = vadd.f32 %v4235_v61, %v4234_v29  ;;  %12899 = vst [vmem:[#allocation94_spill] sm:$0xff] %v11373_v4  ;;  %v490_v29 = vld [vmem:[#allocation8 + $0x50] sm:$0xff]  ;;  %v500_v25 = vld [vmem:[#allocation8 + $0xa0] sm:$0xff]  ;;  %v11398_v44 = vpack.c.bf16 %v502_v48, %v498_v13 }
0x115f   :  { %v512_v13 = vld [vmem:[#allocation8 + $0x100] sm:$0xff] }
0x1160   :  { %12896 = vst [vmem:[#allocation89_spill] sm:$0xff] %v11364_v15  ;;  %9687 = vtanh.f32 %v11364_v15  ;;  %v494_v15 = vld [vmem:[#allocation8 + $0x70] sm:$0xff]  ;;  %12906 = vst [vmem:[#allocation100_spill] sm:$0xff] %v11398_v44  ;;  %v516_v48 = vld [vmem:[#allocation8 + $0x120] sm:$0xff] }
0x116a   :  { %v9688_v49 = vpop.eup %9687 }
0x116b   :  { %v11371_v61 = vmul.f32 %v9688_v49, %v9686_v43  ;;  %v11382_v43 = vpack.c.bf16 %v492_v35, %v488_v20  ;;  %v11384_v49 = vpack.c.bf16 %v494_v15, %v490_v29  ;;  %v11396_v15 = vpack.c.bf16 %v500_v25, %v496_v55  ;;  %v506_v35 = vld [vmem:[#allocation8 + $0xd0] sm:$0xff] }
0x116c   :  { %v510_v29 = vld [vmem:[#allocation8 + $0xf0] sm:$0xff]  ;;  %v11408_v55 = vpack.c.bf16 %v508_v39, %v504_v56  ;;  %v11420_v56 = vpack.c.bf16 %v516_v48, %v512_v13  ;;  %v11422_v39 = vpack.c.bf16 %v518_v51, %v514_v21  ;;  %v528_v21 = vld [vmem:[#allocation8 + $0x180] sm:$0xff] }
0x116d   :  { %4240 = vst [vmem:[#allocation10 + $0x1c] sm:$0xf] %v11371_v61  ;;  %4306 = vmatmul.mubr.f32.vlgmr.msra.gmra.mrb[32].mxu0 %v11371_v61  ;;  %4377 = vmatmul.mubr.f32.vlgmr.msra.gmra.mrb[32].mxu1 %v11371_v61  ;;  %12901 = vst [vmem:[#allocation96_spill] sm:$0xff] %v11382_v43  ;;  %v11410_v25 = vpack.c.bf16 %v510_v29, %v506_v35  ;;  %v520_v35 = vld [vmem:[#allocation8 + $0x140] sm:$0xff] }
0x116e   :  { %8343 = vmatpush1.bf16.msra.mxu0 %v11367_v0  ;;  %8375 = vmatpush1.bf16.msra.mxu1 %v11369_v30  ;;  %12902 = vst [vmem:[#allocation97_spill] sm:$0xff] %v11384_v49  ;;  %v507_v0 = vld [vmem:[#allocation8 + $0xd8] sm:$0xff]  ;;  %12905 = vst [vmem:[#allocation99_spill] sm:$0xff] %v11396_v15  ;;  %v524_v29 = vld [vmem:[#allocation8 + $0x160] sm:$0xff] }
0x116f   :  { %8345 = vmatprep.subr.bf16.mxu0 %v11373_v4  ;;  %8377 = vmatprep.subr.bf16.mxu1 %v11375_v57  ;;  %v511_v30 = vld [vmem:[#allocation8 + $0xf8] sm:$0xff]  ;;  %v513_v57 = vld [vmem:[#allocation8 + $0x108] sm:$0xff]  ;;  %12909 = vst [vmem:[#allocation103_spill] sm:$0xff] %v11408_v55  ;;  %12910 = vst [vmem:[#allocation104_spill] sm:$0xff] %v11410_v25  ;;  %v11432_v13 = vpack.c.bf16 %v524_v29, %v520_v35 }
0x1170   :  { %4447 = vmatprep.mubr.f32.mxu0 %v12411_v31  ;;  %4518 = vmatprep.mubr.f32.mxu1 %v12411_v31  ;;  %v11404_v20 = vpack.c.bf16 %v511_v30, %v507_v0  ;;  %v515_v4 = vld [vmem:[#allocation8 + $0x118] sm:$0xff]  ;;  %12913 = vst [vmem:[#allocation84_spill] sm:$0xff] %v11420_v56  ;;  %12914 = vst [vmem:[#allocation127_spill] sm:$0xff] %v11422_v39  ;;  %v532_v51 = vld [vmem:[#allocation8 + $0x1a0] sm:$0xff] }
0x1171   :  { %v11444_v35 = vpack.c.bf16 %v532_v51, %v528_v21 }
0x1172   :  { %8347 = vmatpush1.bf16.msra.mxu0 %v11382_v43  ;;  %8379 = vmatpush1.bf16.msra.mxu1 %v11384_v49  ;;  %12908 = vst [vmem:[#allocation102_spill] sm:$0xff] %v11404_v20  ;;  %v517_v43 = vld [vmem:[#allocation8 + $0x128] sm:$0xff]  ;;  %v519_v49 = vld [vmem:[#allocation8 + $0x138] sm:$0xff] }
0x1173   :  { %8349 = vmatprep.subr.bf16.mxu0 %v11388_v16  ;;  %8381 = vmatprep.subr.bf16.mxu1 %v11390_v60  ;;  %v11414_v0 = vpack.c.bf16 %v517_v43, %v513_v57  ;;  %v11416_v30 = vpack.c.bf16 %v519_v49, %v515_v4  ;;  %v521_v60 = vld [vmem:[#allocation8 + $0x148] sm:$0xff]  ;;  %v523_v16 = vld [vmem:[#allocation8 + $0x158] sm:$0xff]  ;;  %v522_v43 = vld [vmem:[#allocation8 + $0x150] sm:$0xff] }
0x1174   :  { %v526_v49 = vld [vmem:[#allocation8 + $0x170] sm:$0xff] }
0x1175   :  { %12911 = vst [vmem:[#allocation81_spill] sm:$0xff] %v11414_v0  ;;  %12912 = vst [vmem:[#allocation82_spill] sm:$0xff] %v11416_v30  ;;  %v11434_v48 = vpack.c.bf16 %v526_v49, %v522_v43  ;;  %v536_v43 = vld [vmem:[#allocation8 + $0x1c0] sm:$0xff]  ;;  %v542_v49 = vld [vmem:[#allocation8 + $0x1f0] sm:$0xff] }
0x1176   :  { %8351 = vmatpush1.bf16.msra.mxu0 %v11396_v15  ;;  %8383 = vmatpush1.bf16.msra.mxu1 %v11398_v44  ;;  %v525_v15 = vld [vmem:[#allocation8 + $0x168] sm:$0xff]  ;;  %v527_v44 = vld [vmem:[#allocation8 + $0x178] sm:$0xff] }
0x1177   :  { %8353 = vmatprep.subr.bf16.mxu0 %v11402_v9  ;;  %8385 = vmatprep.subr.bf16.mxu1 %v11404_v20  ;;  %v11426_v4 = vpack.c.bf16 %v525_v15, %v521_v60  ;;  %v11428_v57 = vpack.c.bf16 %v527_v44, %v523_v16  ;;  %v529_v20 = vld [vmem:[#allocation8 + $0x188] sm:$0xff]  ;;  %v531_v9 = vld [vmem:[#allocation8 + $0x198] sm:$0xff]  ;;  %v530_v15 = vld [vmem:[#allocation8 + $0x190] sm:$0xff] }
0x1178   :  { %v534_v44 = vld [vmem:[#allocation8 + $0x1b0] sm:$0xff] }
0x1179   :  { %v11446_v29 = vpack.c.bf16 %v534_v44, %v530_v15  ;;  %v12923_v15 = vld [vmem:[#allocation40_spill] sm:$0xff]  ;;  %v12924_v44 = vld [vmem:[#allocation41_spill] sm:$0xff] }
0x117a   :  { %8355 = vmatpush1.bf16.msra.mxu0 %v11408_v55  ;;  %8387 = vmatpush1.bf16.msra.mxu1 %v11410_v25  ;;  %v533_v55 = vld [vmem:[#allocation8 + $0x1a8] sm:$0xff]  ;;  %v535_v25 = vld [vmem:[#allocation8 + $0x1b8] sm:$0xff] }
0x117b   :  { %8357 = vmatprep.subr.bf16.mxu0 %v11414_v0  ;;  %8389 = vmatprep.subr.bf16.mxu1 %v11416_v30  ;;  %v11438_v16 = vpack.c.bf16 %v533_v55, %v529_v20  ;;  %v11440_v60 = vpack.c.bf16 %v535_v25, %v531_v9  ;;  %v537_v30 = vld [vmem:[#allocation8 + $0x1c8] sm:$0xff]  ;;  %v539_v0 = vld [vmem:[#allocation8 + $0x1d8] sm:$0xff]  ;;  %v540_v55 = vld [vmem:[#allocation8 + $0x1e0] sm:$0xff] }
0x117c   :  { %v538_v25 = vld [vmem:[#allocation8 + $0x1d0] sm:$0xff]  ;;  %v11456_v21 = vpack.c.bf16 %v540_v55, %v536_v43  ;;  %v12925_v43 = vld [vmem:[#allocation42_spill] sm:$0xff] }
0x117d   :  { %v11458_v51 = vpack.c.bf16 %v542_v49, %v538_v25  ;;  %v12926_v55 = vld [vmem:[#allocation43_spill] sm:$0xff]  ;;  %v12927_v25 = vld [vmem:[#allocation44_spill] sm:$0xff]  ;;  %v12928_v49 = vld [vmem:[#allocation45_spill] sm:$0xff] }
0x117e   :  { %8359 = vmatpush1.bf16.msra.mxu0 %v11420_v56  ;;  %8391 = vmatpush1.bf16.msra.mxu1 %v11422_v39  ;;  %v541_v56 = vld [vmem:[#allocation8 + $0x1e8] sm:$0xff]  ;;  %v543_v39 = vld [vmem:[#allocation8 + $0x1f8] sm:$0xff]  ;;  %12916 = vst [vmem:[#allocation129_spill] sm:$0xff] %v11456_v21 }
0x117f   :  { %8361 = vmatprep.subr.bf16.mxu0 %v11426_v4  ;;  %8393 = vmatprep.subr.bf16.mxu1 %v11428_v57  ;;  %v11450_v9 = vpack.c.bf16 %v541_v56, %v537_v30  ;;  %v11452_v20 = vpack.c.bf16 %v543_v39, %v539_v0  ;;  %12917 = vst [vmem:[#allocation130_spill] sm:$0xff] %v11458_v51  ;;  %v12918_v0 = vld [vmem:[#allocation15_spill] sm:$0xff]  ;;  %v12919_v30 = vld [vmem:[#allocation16_spill] sm:$0xff]  ;;  %v12921_v56 = vld [vmem:[#allocation38_spill] sm:$0xff] }
0x1180   :  { %v12922_v39 = vld [vmem:[#allocation39_spill] sm:$0xff] }
0x1181   :  { %12915 = vst [vmem:[#allocation128_spill] sm:$0xff] %v11452_v20 }
0x1182   :  { %8363 = vmatpush1.bf16.msra.mxu0 %v11432_v13  ;;  %8395 = vmatpush1.bf16.msra.mxu1 %v11434_v48 }
0x1183   :  { %8365 = vmatprep.subr.bf16.mxu0 %v11438_v16  ;;  %8397 = vmatprep.subr.bf16.mxu1 %v11440_v60 }
0x1186   :  { %8367 = vmatpush1.bf16.msra.mxu0 %v11444_v35  ;;  %8399 = vmatpush1.bf16.msra.mxu1 %v11446_v29 }
0x1187   :  { %8369 = vmatprep.subr.bf16.mxu0 %v11450_v9  ;;  %8401 = vmatprep.subr.bf16.mxu1 %v11452_v20 }
0x118a   :  { %8371 = vmatpush1.bf16.msra.mxu0 %v11456_v21  ;;  %8403 = vmatpush1.bf16.msra.mxu1 %v11458_v51 }
0x118b   :  { %8405 = vmatprep.subr.bf16.mxu0 %v12918_v0  ;;  %8437 = vmatprep.subr.bf16.mxu1 %v12919_v30 }
0x118d   :  { %4448 = vmatmul.mubr.f32.vlgmr.msra.gmra.mrb[34].mxu0 %v11371_v61  ;;  %4519 = vmatmul.mubr.f32.vlgmr.msra.gmra.mrb[34].mxu1 %v11371_v61  ;;  %v12920_v61 = vld [vmem:[#allocation37_spill] sm:$0xff] }
0x118e   :  { %8407 = vmatpush1.bf16.msra.mxu0 %v10076_v10  ;;  %8439 = vmatpush1.bf16.msra.mxu1 %v10079_v14 }
0x118f   :  { %8409 = vmatprep.subr.bf16.mxu0 %v10083_v18  ;;  %8441 = vmatprep.subr.bf16.mxu1 %v10085_v19 }
0x1190   :  { %4589 = vmatprep.mubr.f32.mxu0 %v12411_v31  ;;  %4660 = vmatprep.mubr.f32.mxu1 %v12411_v31 }
0x1192   :  { %8411 = vmatpush1.bf16.msra.mxu0 %v10088_v23  ;;  %8443 = vmatpush1.bf16.msra.mxu1 %v10092_v27 }
0x1193   :  { %8413 = vmatprep.subr.bf16.mxu0 %v10094_v28  ;;  %8445 = vmatprep.subr.bf16.mxu1 %v10096_v32 }
0x1196   :  { %8415 = vmatpush1.bf16.msra.mxu0 %v10099_v36  ;;  %8447 = vmatpush1.bf16.msra.mxu1 %v10103_v40 }
0x1197   :  { %8417 = vmatprep.subr.bf16.mxu0 %v10105_v41  ;;  %8449 = vmatprep.subr.bf16.mxu1 %v10108_v45 }
0x119a   :  { %8419 = vmatpush1.bf16.msra.mxu0 %v10111_v52  ;;  %8451 = vmatpush1.bf16.msra.mxu1 %v10115_v53 }
0x119b   :  { %8421 = vmatprep.subr.bf16.mxu0 %v10117_v54  ;;  %8453 = vmatprep.subr.bf16.mxu1 %v10120_v58 }
0x119e   :  { %8423 = vmatpush1.bf16.msra.mxu0 %v10123_v1  ;;  %8455 = vmatpush1.bf16.msra.mxu1 %v10127_v2  ;;  %v12967_v1 = vld [vmem:[#allocation83_spill] sm:$0xff] }
0x119f   :  { %8425 = vmatprep.subr.bf16.mxu0 %v10129_v3  ;;  %8457 = vmatprep.subr.bf16.mxu1 %v10132_v8  ;;  %v12929_v3 = vld [vmem:[#allocation46_spill] sm:$0xff]  ;;  %v12930_v8 = vld [vmem:[#allocation47_spill] sm:$0xff] }
0x11a2   :  { %8427 = vmatpush1.bf16.msra.mxu0 %v12920_v61  ;;  %8459 = vmatpush1.bf16.msra.mxu1 %v12921_v56  ;;  %v12931_v61 = vld [vmem:[#allocation48_spill] sm:$0xff] }
0x11a3   :  { %8429 = vmatprep.subr.bf16.mxu0 %v12922_v39  ;;  %8461 = vmatprep.subr.bf16.mxu1 %v12923_v15  ;;  %v12932_v15 = vld [vmem:[#allocation49_spill] sm:$0xff]  ;;  %v12946_v39 = vld [vmem:[#allocation63_spill] sm:$0xff] }
0x11a6   :  { %8431 = vmatpush1.bf16.msra.mxu0 %v12924_v44  ;;  %8463 = vmatpush1.bf16.msra.mxu1 %v12925_v43  ;;  %v12933_v44 = vld [vmem:[#allocation50_spill] sm:$0xff]  ;;  %v12934_v43 = vld [vmem:[#allocation51_spill] sm:$0xff] }
0x11a7   :  { %8433 = vmatprep.subr.bf16.mxu0 %v12926_v55  ;;  %8465 = vmatprep.subr.bf16.mxu1 %v12927_v25  ;;  %v12935_v55 = vld [vmem:[#allocation52_spill] sm:$0xff]  ;;  %v12945_v25 = vld [vmem:[#allocation62_spill] sm:$0xff] }
0x11aa   :  { %8435 = vmatpush1.bf16.msra.mxu0 %v12928_v49  ;;  %8467 = vmatpush1.bf16.msra.mxu1 %v12929_v3  ;;  %v12936_v3 = vld [vmem:[#allocation53_spill] sm:$0xff]  ;;  %v12939_v49 = vld [vmem:[#allocation56_spill] sm:$0xff] }
0x11ab   :  { %8469 = vmatprep.subr.bf16.mxu0 %v12930_v8  ;;  %8501 = vmatprep.subr.bf16.mxu1 %v12931_v61  ;;  %v12937_v8 = vld [vmem:[#allocation54_spill] sm:$0xff]  ;;  %v12938_v61 = vld [vmem:[#allocation55_spill] sm:$0xff] }
0x11ad   :  { %4590 = vmatmul.mubr.f32.vlgmr.msra.gmra.mrb[34].mxu0 %v11317_v33  ;;  %4661 = vmatmul.mubr.f32.vlgmr.msra.gmra.mrb[34].mxu1 %v11317_v33  ;;  %v12940_v33 = vld [vmem:[#allocation57_spill] sm:$0xff] }
0x11ae   :  { %8471 = vmatpush1.bf16.msra.mxu0 %v12932_v15  ;;  %8503 = vmatpush1.bf16.msra.mxu1 %v12933_v44  ;;  %v12941_v15 = vld [vmem:[#allocation58_spill] sm:$0xff]  ;;  %v12942_v44 = vld [vmem:[#allocation59_spill] sm:$0xff] }
0x11af   :  { %8473 = vmatprep.subr.bf16.mxu0 %v12934_v43  ;;  %8505 = vmatprep.subr.bf16.mxu1 %v12935_v55  ;;  %v12943_v43 = vld [vmem:[#allocation60_spill] sm:$0xff]  ;;  %v12944_v55 = vld [vmem:[#allocation61_spill] sm:$0xff] }
0x11b0   :  { %4755 = vmatprep.mubr.f32.mxu0 %v12411_v31  ;;  %4826 = vmatprep.mubr.f32.mxu1 %v12411_v31 }
0x11b2   :  { %8475 = vmatpush1.bf16.msra.mxu0 %v12936_v3  ;;  %8507 = vmatpush1.bf16.msra.mxu1 %v12937_v8  ;;  %v12947_v3 = vld [vmem:[#allocation64_spill] sm:$0xff]  ;;  %v12948_v8 = vld [vmem:[#allocation65_spill] sm:$0xff] }
0x11b3   :  { %8477 = vmatprep.subr.bf16.mxu0 %v12938_v61  ;;  %8509 = vmatprep.subr.bf16.mxu1 %v12939_v49  ;;  %v12949_v61 = vld [vmem:[#allocation66_spill] sm:$0xff]  ;;  %v12950_v49 = vld [vmem:[#allocation67_spill] sm:$0xff] }
0x11b6   :  { %8479 = vmatpush1.bf16.msra.mxu0 %v12940_v33  ;;  %8511 = vmatpush1.bf16.msra.mxu1 %v12941_v15  ;;  %v12951_v33 = vld [vmem:[#allocation68_spill] sm:$0xff]  ;;  %v12952_v15 = vld [vmem:[#allocation69_spill] sm:$0xff] }
0x11b7   :  { %8481 = vmatprep.subr.bf16.mxu0 %v12942_v44  ;;  %8513 = vmatprep.subr.bf16.mxu1 %v12943_v43  ;;  %v12953_v44 = vld [vmem:[#allocation70_spill] sm:$0xff]  ;;  %v12954_v43 = vld [vmem:[#allocation71_spill] sm:$0xff] }
0x11ba   :  { %8483 = vmatpush1.bf16.msra.mxu0 %v12944_v55  ;;  %8515 = vmatpush1.bf16.msra.mxu1 %v12945_v25  ;;  %v12955_v55 = vld [vmem:[#allocation72_spill] sm:$0xff]  ;;  %v12956_v25 = vld [vmem:[#allocation73_spill] sm:$0xff] }
0x11bb   :  { %8485 = vmatprep.subr.bf16.mxu0 %v12946_v39  ;;  %8517 = vmatprep.subr.bf16.mxu1 %v12947_v3  ;;  %v12957_v39 = vld [vmem:[#allocation74_spill] sm:$0xff]  ;;  %v12958_v3 = vld [vmem:[#allocation75_spill] sm:$0xff] }
0x11be   :  { %8487 = vmatpush1.bf16.msra.mxu0 %v12948_v8  ;;  %8519 = vmatpush1.bf16.msra.mxu1 %v12949_v61  ;;  %v12959_v8 = vld [vmem:[#allocation76_spill] sm:$0xff]  ;;  %v12960_v61 = vld [vmem:[#allocation77_spill] sm:$0xff] }
0x11bf   :  { %8489 = vmatprep.subr.bf16.mxu0 %v12950_v49  ;;  %8521 = vmatprep.subr.bf16.mxu1 %v12951_v33  ;;  %v12961_v49 = vld [vmem:[#allocation78_spill] sm:$0xff]  ;;  %v12962_v33 = vld [vmem:[#allocation91_spill] sm:$0xff] }
0x11c2   :  { %8491 = vmatpush1.bf16.msra.mxu0 %v12952_v15  ;;  %8523 = vmatpush1.bf16.msra.mxu1 %v12953_v44  ;;  %v12963_v15 = vld [vmem:[#allocation92_spill] sm:$0xff] }
0x11c3   :  { %8493 = vmatprep.subr.bf16.mxu0 %v12954_v43  ;;  %8525 = vmatprep.subr.bf16.mxu1 %v12955_v55  ;;  %v266_v55 = vld [vmem:[%s12055_s8] sm:$0xf]  ;;  %v12964_v43 = vld [vmem:[#allocation79_spill] sm:$0xff]  ;;  %s9943_s8 = smov [#allocation10]  }
0x11c4   :  { %v11550_v58 = vrot.slane %v266_v55, %v12967_v1  ;;  %s6718_s4 = sshll.u32 %s9943_s8, 4  ;;  %s6719_s4 = int_to_ptr.vmem [resolvable:$true] %s6718_s4 }
0x11c5   :  { %s9905_s10 = scalar_lea.vmem %s6719_s4, 768  ;;  %p9910_p5 = scmp.lt.s32.totalorder %s6719_s4, %s6719_s4 }
0x11c6   :  { %8495 = vmatpush1.bf16.msra.mxu0 %v12956_v25  ;;  %8527 = vmatpush1.bf16.msra.mxu1 %v12957_v39  ;;  %v11542_v25 = vrot.slane %v266_v55, %v12964_v43  ;;  %v12966_v39 = vld [vmem:[#allocation80_spill] sm:$0xff]  ;;  %v12968_v43 = vld [vmem:[#allocation87_spill] sm:$0xff]  ;;  %p9906_p4 = scmp.ne.s32.totalorder %s6719_s4, %s9905_s10  ;;  %p9911_p6 = scmp.lt.s32.totalorder %s9905_s10, %s9905_s10 }
0x11c7   :  { %8497 = vmatprep.subr.bf16.mxu0 %v12958_v3  ;;  %8529 = vmatprep.subr.bf16.mxu1 %v12959_v8  ;;  %v11545_v44 = vrot.slane %v266_v55, %v12966_v39  ;;  %v11553_v54 = vrot.slane %v266_v55, %v12968_v43 }
0x11c8   :  { %12965 = vst [vmem:[#allocation79_spill] sm:$0xff] %v11542_v25  ;;  %p9912_p7 = por %p9911_p6, %p9910_p5 }
0x11ca   :  { %8499 = vmatpush1.bf16.msra.mxu0 %v12960_v61  ;;  %8531 = vmatpush1.bf16.msra.mxu1 %v12961_v49  ;;  %p9913_p8 = pnand %p9912_p7, %p9906_p4 }
0x11cb   :  { %8533 = vmatprep.subr.bf16.mxu0 %v12962_v33  ;;  %8565 = vmatprep.subr.bf16.mxu1 %v12963_v15 }
0x1280   :  { %v4591_v3 = vpop.f32.mrb[34].mxu0  ;;  %v4662_v8 = vpop.f32.mrb[34].mxu1 }
0x1281   :  { %v9332_v61 = vadd.f32 %v4591_v3, %v11542_v25  ;;  %v4593_v56 = vpop.f32.mrb[35].mxu0  ;;  %v4664_v49 = vpop.f32.mrb[35].mxu1  ;;  %v9334_v39 = vadd.f32 %v4662_v8, %v11550_v58 }
0x1282   :  { %v9333_v33 = vadd.f32 %v4593_v56, %v11545_v44  ;;  %v9335_v53 = vadd.f32 %v4664_v49, %v11553_v54 }
0x1283   :  { %v6780_v2 = vmul.f32 -1.442695, %v9332_v61  ;;  %v6782_v52 = vmul.f32 -1.442695, %v9334_v39 }
0x1284   :  { %v6781_v15 = vmul.f32 -1.442695, %v9333_v33 }
0x1285   :  { %9689 = vpow2.f32 %v6780_v2 }
0x1286   :  { %9691 = vpow2.f32 %v6781_v15 }
0x1287   :  { %9693 = vtanh.f32 %v9335_v53 }
0x1288   :  { %9695 = vpow2.f32 %v6782_v52  ;;  %v12970_v52 = vld [vmem:[#allocation112_spill] sm:$0xff] }
0x128f   :  { %v9690_v3 = vpop.eup %9689 }
0x1290   :  { %v4676_v25 = vadd.f32 1.0, %v9690_v3  ;;  %v9692_v45 = vpop.eup %9691  ;;  %v12973_v3 = vld [vmem:[#allocation115_spill] sm:$0xff] }
0x1291   :  { %v4677_v61 = vadd.f32 1.0, %v9692_v45  ;;  %v9694_v2 = vpop.eup %9693  ;;  %v12969_v45 = vld [vmem:[#allocation111_spill] sm:$0xff] }
0x1292   :  { %9697 = vrcp.f32 %v4676_v25  ;;  %v9696_v1 = vpop.eup %9695  ;;  %v12972_v25 = vld [vmem:[#allocation114_spill] sm:$0xff] }
0x1293   :  { %9699 = vrcp.f32 %v4677_v61  ;;  %v4678_v55 = vadd.f32 1.0, %v9696_v1  ;;  %v12974_v61 = vld [vmem:[#allocation116_spill] sm:$0xff]  ;;  %v12976_v1 = vld [vmem:[#allocation118_spill] sm:$0xff] }
0x1295   :  { %9701 = vrcp.f32 %v4678_v55  ;;  %v12980_v55 = vld [vmem:[#allocation122_spill] sm:$0xff] }
0x129c   :  { %v9698_v56 = vpop.eup %9697 }
0x129d   :  { %v4687_v15 = vmul.f32 %v9698_v56, %v9694_v2  ;;  %v9700_v33 = vpop.eup %9699  ;;  %v12975_v2 = vld [vmem:[#allocation117_spill] sm:$0xff]  ;;  %v12977_v56 = vld [vmem:[#allocation119_spill] sm:$0xff] }
0x129e   :  { %v4686_v43 = vmul.f32 %v9700_v33, %v11314_v24  ;;  %v12971_v24 = vld [vmem:[#allocation113_spill] sm:$0xff] }
0x129f   :  { %v9702_v49 = vpop.eup %9701  ;;  %v12979_v33 = vld [vmem:[#allocation121_spill] sm:$0xff] }
0x12a0   :  { %v11558_v8 = vadd.f32 %v4687_v15, %v4686_v43  ;;  %v12978_v15 = vld [vmem:[#allocation120_spill] sm:$0xff]  ;;  %v12981_v43 = vld [vmem:[#allocation86_spill] sm:$0xff] }
0x12a2   :  { %9703 = vtanh.f32 %v11558_v8 }
0x12ac   :  { %v9704_v53 = vpop.eup %9703 }
0x12ad   :  { %v11561_v39 = vmul.f32 %v9704_v53, %v9702_v49  ;;  %v12982_v49 = vld [vmem:[#allocation88_spill] sm:$0xff] }
0x12af   :  { %4756 = vmatmul.mubr.f32.vlgmr.msra.gmra.mrb[32].mxu0 %v11561_v39  ;;  %4827 = vmatmul.mubr.f32.vlgmr.msra.gmra.mrb[32].mxu1 %v11561_v39 }
0x12b0   :  { %8535 = vmatpush1.bf16.msra.mxu0 %v12482_v6  ;;  %8567 = vmatpush1.bf16.msra.mxu1 %v12483_v7 }
0x12b1   :  { %8537 = vmatprep.subr.bf16.mxu0 %v12484_v62  ;;  %8569 = vmatprep.subr.bf16.mxu1 %v12485_v59 }
0x12b2   :  { %4923 = vmatprep.mubr.f32.mxu0 %v12411_v31  ;;  %4994 = vmatprep.mubr.f32.mxu1 %v12411_v31 }
0x12b4   :  { %8539 = vmatpush1.bf16.msra.mxu0 %v12547_v5  ;;  %8571 = vmatpush1.bf16.msra.mxu1 %v12548_v26 }
0x12b5   :  { %8541 = vmatprep.subr.bf16.mxu0 %v12613_v50  ;;  %8573 = vmatprep.subr.bf16.mxu1 %v12614_v11 }
0x12b8   :  { %8543 = vmatpush1.bf16.msra.mxu0 %v12679_v42  ;;  %8575 = vmatpush1.bf16.msra.mxu1 %v12680_v47 }
0x12b9   :  { %8545 = vmatprep.subr.bf16.mxu0 %v12745_v38  ;;  %8577 = vmatprep.subr.bf16.mxu1 %v12746_v34 }
0x12bc   :  { %8547 = vmatpush1.bf16.msra.mxu0 %v12811_v22  ;;  %8579 = vmatpush1.bf16.msra.mxu1 %v12812_v12 }
0x12bd   :  { %8549 = vmatprep.subr.bf16.mxu0 %v12877_v17  ;;  %8581 = vmatprep.subr.bf16.mxu1 %v12878_v63 }
0x12c0   :  { %8551 = vmatpush1.bf16.msra.mxu0 %v12879_v46  ;;  %8583 = vmatpush1.bf16.msra.mxu1 %v12880_v37  ;;  %v12986_v37 = vld [vmem:[#allocation126_spill] sm:$0xff] }
0x12c1   :  { %8553 = vmatprep.subr.bf16.mxu0 %v12969_v45  ;;  %8585 = vmatprep.subr.bf16.mxu1 %v12970_v52  ;;  %v12984_v52 = vld [vmem:[#allocation124_spill] sm:$0xff] }
0x12c4   :  { %8555 = vmatpush1.bf16.msra.mxu0 %v12971_v24  ;;  %8587 = vmatpush1.bf16.msra.mxu1 %v12972_v25  ;;  %v12983_v25 = vld [vmem:[#allocation123_spill] sm:$0xff] }
0x12c5   :  { %8557 = vmatprep.subr.bf16.mxu0 %v12973_v3  ;;  %8589 = vmatprep.subr.bf16.mxu1 %v12974_v61 }
0x12c8   :  { %8559 = vmatpush1.bf16.msra.mxu0 %v12975_v2  ;;  %8591 = vmatpush1.bf16.msra.mxu1 %v12976_v1 }
0x12c9   :  { %8561 = vmatprep.subr.bf16.mxu0 %v12977_v56  ;;  %8593 = vmatprep.subr.bf16.mxu1 %v12978_v15  ;;  %v12985_v15 = vld [vmem:[#allocation125_spill] sm:$0xff] }
0x12cc   :  { %8563 = vmatpush1.bf16.msra.mxu0 %v12979_v33  ;;  %8595 = vmatpush1.bf16.msra.mxu1 %v12980_v55 }
0x12cd   :  { %8597 = vmatprep.subr.bf16.mxu0 %v12981_v43  ;;  %8629 = vmatprep.subr.bf16.mxu1 %v12982_v49 }
0x1382   :  { %v4757_v53 = vpop.f32.mrb[32].mxu0  ;;  %v4828_v3 = vpop.f32.mrb[32].mxu1 }
0x1383   :  { %v9328_v61 = vadd.f32 %v4757_v53, %v12983_v25  ;;  %v4759_v24 = vpop.f32.mrb[33].mxu0  ;;  %v4830_v2 = vpop.f32.mrb[33].mxu1  ;;  %v9330_v33 = vadd.f32 %v4828_v3, %v12985_v15 }
0x1384   :  { %v9329_v1 = vadd.f32 %v4759_v24, %v12984_v52  ;;  %v9331_v55 = vadd.f32 %v4830_v2, %v12986_v37 }
0x1385   :  { %v6783_v45 = vmul.f32 -1.442695, %v9328_v61  ;;  %v6785_v46 = vmul.f32 -1.442695, %v9330_v33 }
0x1386   :  { %v6784_v56 = vmul.f32 -1.442695, %v9329_v1 }
0x1387   :  { %9705 = vpow2.f32 %v6783_v45 }
0x1388   :  { %9707 = vpow2.f32 %v6784_v56  ;;  %v12987_v56 = vld [vmem:[#allocation89_spill] sm:$0xff] }
0x1389   :  { %9709 = vtanh.f32 %v9331_v55 }
0x138a   :  { %9711 = vpow2.f32 %v6785_v46  ;;  %v12989_v46 = vld [vmem:[#allocation93_spill] sm:$0xff] }
0x1391   :  { %v9706_v43 = vpop.eup %9705 }
0x1392   :  { %v4842_v63 = vadd.f32 1.0, %v9706_v43  ;;  %v9708_v49 = vpop.eup %9707  ;;  %v12993_v43 = vld [vmem:[#allocation97_spill] sm:$0xff] }
0x1393   :  { %v4843_v53 = vadd.f32 1.0, %v9708_v49  ;;  %v9710_v25 = vpop.eup %9709  ;;  %v12994_v49 = vld [vmem:[#allocation98_spill] sm:$0xff] }
0x1394   :  { %9713 = vrcp.f32 %v4842_v63  ;;  %v9712_v17 = vpop.eup %9711  ;;  %v12988_v63 = vld [vmem:[#allocation90_spill] sm:$0xff] }
0x1395   :  { %9715 = vrcp.f32 %v4843_v53  ;;  %v4844_v45 = vadd.f32 1.0, %v9712_v17  ;;  %v12991_v17 = vld [vmem:[#allocation95_spill] sm:$0xff]  ;;  %v12995_v53 = vld [vmem:[#allocation85_spill] sm:$0xff] }
0x1397   :  { %9717 = vrcp.f32 %v4844_v45  ;;  %v12999_v45 = vld [vmem:[#allocation102_spill] sm:$0xff] }
0x139e   :  { %v9714_v24 = vpop.eup %9713 }
0x139f   :  { %v4853_v61 = vmul.f32 %v9714_v24, %v9710_v25  ;;  %v9716_v1 = vpop.eup %9715  ;;  %v12990_v25 = vld [vmem:[#allocation94_spill] sm:$0xff]  ;;  %v12996_v24 = vld [vmem:[#allocation99_spill] sm:$0xff] }
0x13a0   :  { %v4852_v52 = vmul.f32 %v9716_v1, %v12987_v56  ;;  %v12998_v1 = vld [vmem:[#allocation101_spill] sm:$0xff]  ;;  %v13000_v56 = vld [vmem:[#allocation103_spill] sm:$0xff] }
0x13a1   :  { %v9718_v2 = vpop.eup %9717 }
0x13a2   :  { %v11604_v3 = vadd.f32 %v4853_v61, %v4852_v52  ;;  %v12992_v52 = vld [vmem:[#allocation96_spill] sm:$0xff] }
0x13a3   :  { %v12997_v61 = vld [vmem:[#allocation100_spill] sm:$0xff] }
0x13a4   :  { %9719 = vtanh.f32 %v11604_v3 }
0x13ae   :  { %v9720_v33 = vpop.eup %9719 }
0x13af   :  { %v4856_v55 = vmul.f32 %v9720_v33, %v9718_v2  ;;  %v13001_v2 = vld [vmem:[#allocation104_spill] sm:$0xff]  ;;  %v13002_v33 = vld [vmem:[#allocation81_spill] sm:$0xff] }
0x13b1   :  { %4858 = vst [vmem:[#allocation10 + $0x20] sm:$0xf] %v4856_v55  ;;  %4924 = vmatmul.mubr.f32.vlgmr.msra.gmra.mrb[36].mxu0 %v4856_v55  ;;  %4995 = vmatmul.mubr.f32.vlgmr.msra.gmra.mrb[36].mxu1 %v4856_v55 }
0x13b2   :  { %8599 = vmatpush1.bf16.msra.mxu0 %v12988_v63  ;;  %8631 = vmatpush1.bf16.msra.mxu1 %v12989_v46 }
0x13b3   :  { %8601 = vmatprep.subr.bf16.mxu0 %v12990_v25  ;;  %8633 = vmatprep.subr.bf16.mxu1 %v12991_v17 }
0x13b4   :  { %5065 = vmatprep.mubr.f32.mxu0 %v12411_v31  ;;  %5136 = vmatprep.mubr.f32.mxu1 %v12411_v31 }
0x13b6   :  { %8603 = vmatpush1.bf16.msra.mxu0 %v12992_v52  ;;  %8635 = vmatpush1.bf16.msra.mxu1 %v12993_v43  ;;  %v13003_v52 = vld [vmem:[#allocation82_spill] sm:$0xff]  ;;  %v13004_v43 = vld [vmem:[#allocation84_spill] sm:$0xff] }
0x13b7   :  { %8605 = vmatprep.subr.bf16.mxu0 %v12994_v49  ;;  %8637 = vmatprep.subr.bf16.mxu1 %v12995_v53  ;;  %v13005_v49 = vld [vmem:[#allocation127_spill] sm:$0xff] }
0x13ba   :  { %8607 = vmatpush1.bf16.msra.mxu0 %v12996_v24  ;;  %8639 = vmatpush1.bf16.msra.mxu1 %v12997_v61 }
0x13bb   :  { %8609 = vmatprep.subr.bf16.mxu0 %v12998_v1  ;;  %8641 = vmatprep.subr.bf16.mxu1 %v12999_v45 }
0x13be   :  { %8611 = vmatpush1.bf16.msra.mxu0 %v13000_v56  ;;  %8643 = vmatpush1.bf16.msra.mxu1 %v13001_v2 }
0x13bf   :  { %8613 = vmatprep.subr.bf16.mxu0 %v13002_v33  ;;  %8645 = vmatprep.subr.bf16.mxu1 %v13003_v52 }
0x13c2   :  { %8615 = vmatpush1.bf16.msra.mxu0 %v13004_v43  ;;  %8647 = vmatpush1.bf16.msra.mxu1 %v13005_v49 }
0x13c3   :  { %8617 = vmatprep.subr.bf16.mxu0 %v11426_v4  ;;  %8649 = vmatprep.subr.bf16.mxu1 %v11428_v57 }
0x13c6   :  { %8619 = vmatpush1.bf16.msra.mxu0 %v11432_v13  ;;  %8651 = vmatpush1.bf16.msra.mxu1 %v11434_v48 }
0x13c7   :  { %8621 = vmatprep.subr.bf16.mxu0 %v11438_v16  ;;  %8653 = vmatprep.subr.bf16.mxu1 %v11440_v60 }
0x13ca   :  { %8623 = vmatpush1.bf16.msra.mxu0 %v11444_v35  ;;  %8655 = vmatpush1.bf16.msra.mxu1 %v11446_v29 }
0x13cb   :  { %8625 = vmatprep.subr.bf16.mxu0 %v11450_v9  ;;  %8657 = vmatprep.subr.bf16.mxu1 %v11452_v20 }
0x13ce   :  { %8627 = vmatpush1.bf16.msra.mxu0 %v11456_v21  ;;  %8659 = vmatpush1.bf16.msra.mxu1 %v11458_v51 }
0x13cf   :  { %8661 = vmatprep.subr.bf16.mxu0 %v12918_v0  ;;  %8693 = vmatprep.subr.bf16.mxu1 %v12919_v30 }
0x13d1   :  { %5066 = vmatmul.mubr.f32.vlgmr.msra.gmra.mrb[38].mxu0 %v4856_v55  ;;  %5137 = vmatmul.mubr.f32.vlgmr.msra.gmra.mrb[38].mxu1 %v4856_v55  ;;  %v13006_v55 = vld [vmem:[#allocation28_spill] sm:$0xff] }
0x13d2   :  { %8663 = vmatpush1.bf16.msra.mxu0 %v10076_v10  ;;  %8695 = vmatpush1.bf16.msra.mxu1 %v10079_v14  ;;  %v13009_v14 = vld [vmem:[#allocation31_spill] sm:$0xff] }
0x13d3   :  { %8665 = vmatprep.subr.bf16.mxu0 %v10083_v18  ;;  %8697 = vmatprep.subr.bf16.mxu1 %v10085_v19  ;;  %v13007_v19 = vld [vmem:[#allocation29_spill] sm:$0xff]  ;;  %v13008_v18 = vld [vmem:[#allocation30_spill] sm:$0xff] }
0x13d4   :  { %5207 = vmatprep.mubr.f32.mxu0 %v12411_v31  ;;  %5278 = vmatprep.mubr.f32.mxu1 %v12411_v31 }
0x13d6   :  { %8667 = vmatpush1.bf16.msra.mxu0 %v10088_v23  ;;  %8699 = vmatpush1.bf16.msra.mxu1 %v10092_v27  ;;  %v13010_v23 = vld [vmem:[#allocation32_spill] sm:$0xff]  ;;  %v13011_v27 = vld [vmem:[#allocation33_spill] sm:$0xff] }
0x13d7   :  { %8669 = vmatprep.subr.bf16.mxu0 %v10094_v28  ;;  %8701 = vmatprep.subr.bf16.mxu1 %v10096_v32  ;;  %v13012_v28 = vld [vmem:[#allocation34_spill] sm:$0xff]  ;;  %v13013_v32 = vld [vmem:[#allocation35_spill] sm:$0xff] }
0x13da   :  { %8671 = vmatpush1.bf16.msra.mxu0 %v10099_v36  ;;  %8703 = vmatpush1.bf16.msra.mxu1 %v10103_v40  ;;  %v13014_v36 = vld [vmem:[#allocation36_spill] sm:$0xff]  ;;  %v13015_v40 = vld [vmem:[#allocation37_spill] sm:$0xff] }
0x13db   :  { %8673 = vmatprep.subr.bf16.mxu0 %v10105_v41  ;;  %8705 = vmatprep.subr.bf16.mxu1 %v13006_v55  ;;  %v13016_v41 = vld [vmem:[#allocation38_spill] sm:$0xff]  ;;  %v13017_v55 = vld [vmem:[#allocation39_spill] sm:$0xff] }
0x13de   :  { %8675 = vmatpush1.bf16.msra.mxu0 %v13007_v19  ;;  %8707 = vmatpush1.bf16.msra.mxu1 %v13008_v18  ;;  %v13018_v19 = vld [vmem:[#allocation40_spill] sm:$0xff]  ;;  %v13019_v18 = vld [vmem:[#allocation41_spill] sm:$0xff] }
0x13df   :  { %8677 = vmatprep.subr.bf16.mxu0 %v13009_v14  ;;  %8709 = vmatprep.subr.bf16.mxu1 %v13010_v23  ;;  %v13020_v14 = vld [vmem:[#allocation42_spill] sm:$0xff]  ;;  %v13021_v23 = vld [vmem:[#allocation43_spill] sm:$0xff] }
0x13e2   :  { %8679 = vmatpush1.bf16.msra.mxu0 %v13011_v27  ;;  %8711 = vmatpush1.bf16.msra.mxu1 %v13012_v28  ;;  %v13022_v27 = vld [vmem:[#allocation44_spill] sm:$0xff]  ;;  %v13023_v28 = vld [vmem:[#allocation45_spill] sm:$0xff] }
0x13e3   :  { %8681 = vmatprep.subr.bf16.mxu0 %v13013_v32  ;;  %8713 = vmatprep.subr.bf16.mxu1 %v13014_v36  ;;  %v13024_v32 = vld [vmem:[#allocation46_spill] sm:$0xff]  ;;  %v13025_v36 = vld [vmem:[#allocation47_spill] sm:$0xff] }
0x13e6   :  { %8683 = vmatpush1.bf16.msra.mxu0 %v13015_v40  ;;  %8715 = vmatpush1.bf16.msra.mxu1 %v13016_v41  ;;  %v13026_v40 = vld [vmem:[#allocation48_spill] sm:$0xff]  ;;  %v13059_v41 = vld [vmem:[#allocation79_spill] sm:$0xff] }
0x13e7   :  { %8685 = vmatprep.subr.bf16.mxu0 %v13017_v55  ;;  %8717 = vmatprep.subr.bf16.mxu1 %v13018_v19  ;;  %v13027_v19 = vld [vmem:[#allocation49_spill] sm:$0xff]  ;;  %v13041_v55 = vld [vmem:[#allocation63_spill] sm:$0xff] }
0x13ea   :  { %8687 = vmatpush1.bf16.msra.mxu0 %v13019_v18  ;;  %8719 = vmatpush1.bf16.msra.mxu1 %v13020_v14  ;;  %v13028_v18 = vld [vmem:[#allocation50_spill] sm:$0xff]  ;;  %v13029_v14 = vld [vmem:[#allocation51_spill] sm:$0xff] }
0x13eb   :  { %8689 = vmatprep.subr.bf16.mxu0 %v13021_v23  ;;  %8721 = vmatprep.subr.bf16.mxu1 %v13022_v27  ;;  %v13030_v23 = vld [vmem:[#allocation52_spill] sm:$0xff]  ;;  %v13040_v27 = vld [vmem:[#allocation62_spill] sm:$0xff] }
0x13ee   :  { %8691 = vmatpush1.bf16.msra.mxu0 %v13023_v28  ;;  %8723 = vmatpush1.bf16.msra.mxu1 %v13024_v32  ;;  %v13031_v32 = vld [vmem:[#allocation53_spill] sm:$0xff]  ;;  %v13034_v28 = vld [vmem:[#allocation56_spill] sm:$0xff] }
0x13ef   :  { %8725 = vmatprep.subr.bf16.mxu0 %v13025_v36  ;;  %8757 = vmatprep.subr.bf16.mxu1 %v13026_v40  ;;  %v13032_v36 = vld [vmem:[#allocation54_spill] sm:$0xff]  ;;  %v13033_v40 = vld [vmem:[#allocation55_spill] sm:$0xff] }
0x13f1   :  { %5208 = vmatmul.mubr.f32.vlgmr.msra.gmra.mrb[38].mxu0 %v11561_v39  ;;  %5279 = vmatmul.mubr.f32.vlgmr.msra.gmra.mrb[38].mxu1 %v11561_v39  ;;  %v13035_v39 = vld [vmem:[#allocation57_spill] sm:$0xff] }
0x13f2   :  { %8727 = vmatpush1.bf16.msra.mxu0 %v13027_v19  ;;  %8759 = vmatpush1.bf16.msra.mxu1 %v13028_v18  ;;  %v13036_v19 = vld [vmem:[#allocation58_spill] sm:$0xff]  ;;  %v13037_v18 = vld [vmem:[#allocation59_spill] sm:$0xff] }
0x13f3   :  { %8729 = vmatprep.subr.bf16.mxu0 %v13029_v14  ;;  %8761 = vmatprep.subr.bf16.mxu1 %v13030_v23  ;;  %v13038_v14 = vld [vmem:[#allocation60_spill] sm:$0xff]  ;;  %v13039_v23 = vld [vmem:[#allocation61_spill] sm:$0xff] }
0x13f4   :  { %5373 = vmatprep.mubr.f32.mxu0 %v12411_v31  ;;  %5444 = vmatprep.mubr.f32.mxu1 %v12411_v31 }
0x13f6   :  { %8731 = vmatpush1.bf16.msra.mxu0 %v13031_v32  ;;  %8763 = vmatpush1.bf16.msra.mxu1 %v13032_v36  ;;  %v13042_v32 = vld [vmem:[#allocation64_spill] sm:$0xff]  ;;  %v13043_v36 = vld [vmem:[#allocation65_spill] sm:$0xff] }
0x13f7   :  { %8733 = vmatprep.subr.bf16.mxu0 %v13033_v40  ;;  %8765 = vmatprep.subr.bf16.mxu1 %v13034_v28  ;;  %v13044_v40 = vld [vmem:[#allocation66_spill] sm:$0xff]  ;;  %v13045_v28 = vld [vmem:[#allocation67_spill] sm:$0xff] }
0x13fa   :  { %8735 = vmatpush1.bf16.msra.mxu0 %v13035_v39  ;;  %8767 = vmatpush1.bf16.msra.mxu1 %v13036_v19  ;;  %v13046_v39 = vld [vmem:[#allocation68_spill] sm:$0xff]  ;;  %v13047_v19 = vld [vmem:[#allocation69_spill] sm:$0xff] }
0x13fb   :  { %8737 = vmatprep.subr.bf16.mxu0 %v13037_v18  ;;  %8769 = vmatprep.subr.bf16.mxu1 %v13038_v14  ;;  %v13048_v18 = vld [vmem:[#allocation70_spill] sm:$0xff]  ;;  %v13049_v14 = vld [vmem:[#allocation71_spill] sm:$0xff] }
0x13fe   :  { %8739 = vmatpush1.bf16.msra.mxu0 %v13039_v23  ;;  %8771 = vmatpush1.bf16.msra.mxu1 %v13040_v27  ;;  %v13050_v23 = vld [vmem:[#allocation72_spill] sm:$0xff]  ;;  %v13051_v27 = vld [vmem:[#allocation73_spill] sm:$0xff] }
0x13ff   :  { %8741 = vmatprep.subr.bf16.mxu0 %v13041_v55  ;;  %8773 = vmatprep.subr.bf16.mxu1 %v13042_v32  ;;  %v13052_v55 = vld [vmem:[#allocation74_spill] sm:$0xff]  ;;  %v13053_v32 = vld [vmem:[#allocation75_spill] sm:$0xff] }
0x1402   :  { %8743 = vmatpush1.bf16.msra.mxu0 %v13043_v36  ;;  %8775 = vmatpush1.bf16.msra.mxu1 %v13044_v40  ;;  %v13054_v36 = vld [vmem:[#allocation76_spill] sm:$0xff]  ;;  %v13055_v40 = vld [vmem:[#allocation77_spill] sm:$0xff] }
0x1403   :  { %8745 = vmatprep.subr.bf16.mxu0 %v13045_v28  ;;  %8777 = vmatprep.subr.bf16.mxu1 %v13046_v39  ;;  %v13056_v28 = vld [vmem:[#allocation78_spill] sm:$0xff]  ;;  %v13057_v39 = vld [vmem:[#allocation91_spill] sm:$0xff] }
0x1406   :  { %8747 = vmatpush1.bf16.msra.mxu0 %v13047_v19  ;;  %8779 = vmatpush1.bf16.msra.mxu1 %v13048_v18  ;;  %v13058_v19 = vld [vmem:[#allocation92_spill] sm:$0xff] }
0x1407   :  { %8749 = vmatprep.subr.bf16.mxu0 %v13049_v14  ;;  %8781 = vmatprep.subr.bf16.mxu1 %v13050_v23 }
0x140a   :  { %8751 = vmatpush1.bf16.msra.mxu0 %v13051_v27  ;;  %8783 = vmatpush1.bf16.msra.mxu1 %v13052_v55 }
0x140b   :  { %8753 = vmatprep.subr.bf16.mxu0 %v13053_v32  ;;  %8785 = vmatprep.subr.bf16.mxu1 %v13054_v36 }
0x140e   :  { %8755 = vmatpush1.bf16.msra.mxu0 %v13055_v40  ;;  %8787 = vmatpush1.bf16.msra.mxu1 %v13056_v28 }
0x140f   :  { %8789 = vmatprep.subr.bf16.mxu0 %v13057_v39  ;;  %8821 = vmatprep.subr.bf16.mxu1 %v13058_v19 }
0x14c4   :  { %v5209_v18 = vpop.f32.mrb[38].mxu0  ;;  %v5280_v14 = vpop.f32.mrb[38].mxu1 }
0x14c5   :  { %v9340_v23 = vadd.f32 %v5209_v18, %v13059_v41  ;;  %v5211_v10 = vpop.f32.mrb[39].mxu0  ;;  %v5282_v27 = vpop.f32.mrb[39].mxu1  ;;  %v9342_v40 = vadd.f32 %v5280_v14, %v11550_v58 }
0x14c6   :  { %v9341_v55 = vadd.f32 %v5211_v10, %v11545_v44  ;;  %v9343_v28 = vadd.f32 %v5282_v27, %v11553_v54 }
0x14c7   :  { %v6786_v30 = vmul.f32 -1.442695, %v9340_v23  ;;  %v6788_v36 = vmul.f32 -1.442695, %v9342_v40 }
0x14c8   :  { %v6787_v32 = vmul.f32 -1.442695, %v9341_v55 }
0x14c9   :  { %9721 = vpow2.f32 %v6786_v30 }
0x14ca   :  { %9723 = vpow2.f32 %v6787_v32 }
0x14cb   :  { %9725 = vtanh.f32 %v9343_v28 }
0x14cc   :  { %9727 = vpow2.f32 %v6788_v36  ;;  %v13061_v36 = vld [vmem:[#allocation108_spill] sm:$0xff] }
0x14d3   :  { %v9722_v39 = vpop.eup %9721 }
0x14d4   :  { %v5294_v0 = vadd.f32 1.0, %v9722_v39  ;;  %v9724_v19 = vpop.eup %9723  ;;  %v13066_v39 = vld [vmem:[#allocation113_spill] sm:$0xff] }
0x14d5   :  { %v5295_v18 = vadd.f32 1.0, %v9724_v19  ;;  %v9726_v41 = vpop.eup %9725  ;;  %v13060_v19 = vld [vmem:[#allocation107_spill] sm:$0xff] }
0x14d6   :  { %9729 = vrcp.f32 %v5294_v0  ;;  %v9728_v51 = vpop.eup %9727  ;;  %v13064_v0 = vld [vmem:[#allocation111_spill] sm:$0xff] }
0x14d7   :  { %9731 = vrcp.f32 %v5295_v18  ;;  %v5296_v30 = vadd.f32 1.0, %v9728_v51  ;;  %v13063_v51 = vld [vmem:[#allocation110_spill] sm:$0xff] }
0x14d8   :  { %v13067_v18 = vld [vmem:[#allocation114_spill] sm:$0xff] }
0x14d9   :  { %9733 = vrcp.f32 %v5296_v30  ;;  %v13071_v30 = vld [vmem:[#allocation118_spill] sm:$0xff] }
0x14e0   :  { %v9730_v10 = vpop.eup %9729 }
0x14e1   :  { %v5305_v23 = vmul.f32 %v9730_v10, %v9726_v41  ;;  %v9732_v55 = vpop.eup %9731  ;;  %v13062_v41 = vld [vmem:[#allocation109_spill] sm:$0xff]  ;;  %v13068_v10 = vld [vmem:[#allocation115_spill] sm:$0xff] }
0x14e2   :  { %v5304_v32 = vmul.f32 %v9732_v55, %v11558_v8  ;;  %v13065_v8 = vld [vmem:[#allocation112_spill] sm:$0xff]  ;;  %v13070_v55 = vld [vmem:[#allocation117_spill] sm:$0xff] }
0x14e3   :  { %v9734_v27 = vpop.eup %9733 }
0x14e4   :  { %v11716_v14 = vadd.f32 %v5305_v23, %v5304_v32  ;;  %v13069_v23 = vld [vmem:[#allocation116_spill] sm:$0xff]  ;;  %v13072_v32 = vld [vmem:[#allocation119_spill] sm:$0xff] }
0x14e6   :  { %9735 = vtanh.f32 %v11716_v14 }
0x14f0   :  { %v9736_v28 = vpop.eup %9735 }
0x14f1   :  { %v11719_v40 = vmul.f32 %v9736_v28, %v9734_v27  ;;  %v13073_v27 = vld [vmem:[#allocation120_spill] sm:$0xff]  ;;  %v13074_v28 = vld [vmem:[#allocation121_spill] sm:$0xff] }
0x14f3   :  { %5374 = vmatmul.mubr.f32.vlgmr.msra.gmra.mrb[36].mxu0 %v11719_v40  ;;  %5445 = vmatmul.mubr.f32.vlgmr.msra.gmra.mrb[36].mxu1 %v11719_v40 }
0x14f4   :  { %8791 = vmatpush1.bf16.msra.mxu0 %v12482_v6  ;;  %8823 = vmatpush1.bf16.msra.mxu1 %v12483_v7 }
0x14f5   :  { %8793 = vmatprep.subr.bf16.mxu0 %v12484_v62  ;;  %8825 = vmatprep.subr.bf16.mxu1 %v12485_v59 }
0x14f6   :  { %5541 = vmatprep.mubr.f32.mxu0 %v12411_v31  ;;  %5612 = vmatprep.mubr.f32.mxu1 %v12411_v31 }
0x14f8   :  { %8795 = vmatpush1.bf16.msra.mxu0 %v12547_v5  ;;  %8827 = vmatpush1.bf16.msra.mxu1 %v12548_v26 }
0x14f9   :  { %8797 = vmatprep.subr.bf16.mxu0 %v12613_v50  ;;  %8829 = vmatprep.subr.bf16.mxu1 %v12614_v11 }
0x14fc   :  { %8799 = vmatpush1.bf16.msra.mxu0 %v12679_v42  ;;  %8831 = vmatpush1.bf16.msra.mxu1 %v12680_v47 }
0x14fd   :  { %8801 = vmatprep.subr.bf16.mxu0 %v12745_v38  ;;  %8833 = vmatprep.subr.bf16.mxu1 %v12746_v34 }
0x1500   :  { %8803 = vmatpush1.bf16.msra.mxu0 %v12811_v22  ;;  %8835 = vmatpush1.bf16.msra.mxu1 %v12812_v12 }
0x1501   :  { %8805 = vmatprep.subr.bf16.mxu0 %v13060_v19  ;;  %8837 = vmatprep.subr.bf16.mxu1 %v13061_v36  ;;  %v13079_v36 = vld [vmem:[#allocation124_spill] sm:$0xff] }
0x1504   :  { %8807 = vmatpush1.bf16.msra.mxu0 %v13062_v41  ;;  %8839 = vmatpush1.bf16.msra.mxu1 %v13063_v51  ;;  %v13078_v51 = vld [vmem:[#allocation123_spill] sm:$0xff] }
0x1505   :  { %8809 = vmatprep.subr.bf16.mxu0 %v13064_v0  ;;  %8841 = vmatprep.subr.bf16.mxu1 %v13065_v8  ;;  %v13075_v0 = vld [vmem:[#allocation122_spill] sm:$0xff] }
0x1506   :  { %v13076_v8 = vld [vmem:[#allocation86_spill] sm:$0xff] }
0x1508   :  { %8811 = vmatpush1.bf16.msra.mxu0 %v13066_v39  ;;  %8843 = vmatpush1.bf16.msra.mxu1 %v13067_v18  ;;  %v13077_v39 = vld [vmem:[#allocation88_spill] sm:$0xff] }
0x1509   :  { %8813 = vmatprep.subr.bf16.mxu0 %v13068_v10  ;;  %8845 = vmatprep.subr.bf16.mxu1 %v13069_v23 }
0x150c   :  { %8815 = vmatpush1.bf16.msra.mxu0 %v13070_v55  ;;  %8847 = vmatpush1.bf16.msra.mxu1 %v13071_v30 }
0x150d   :  { %8817 = vmatprep.subr.bf16.mxu0 %v13072_v32  ;;  %8849 = vmatprep.subr.bf16.mxu1 %v13073_v27 }
0x1510   :  { %8819 = vmatpush1.bf16.msra.mxu0 %v13074_v28  ;;  %8851 = vmatpush1.bf16.msra.mxu1 %v13075_v0 }
0x1511   :  { %8853 = vmatprep.subr.bf16.mxu0 %v13076_v8  ;;  %8885 = vmatprep.subr.bf16.mxu1 %v13077_v39 }
0x15c6   :  { %v5375_v18 = vpop.f32.mrb[36].mxu0  ;;  %v5446_v10 = vpop.f32.mrb[36].mxu1 }
0x15c7   :  { %v9336_v23 = vadd.f32 %v5375_v18, %v13078_v51  ;;  %v5377_v41 = vpop.f32.mrb[37].mxu0  ;;  %v5448_v55 = vpop.f32.mrb[37].mxu1  ;;  %v9338_v28 = vadd.f32 %v5446_v10, %v12985_v15 }
0x15c8   :  { %v9337_v30 = vadd.f32 %v5377_v41, %v13079_v36  ;;  %v9339_v0 = vadd.f32 %v5448_v55, %v12986_v37 }
0x15c9   :  { %v6789_v19 = vmul.f32 -1.442695, %v9336_v23  ;;  %v6791_v27 = vmul.f32 -1.442695, %v9338_v28  ;;  %v13086_v28 = vld [vmem:[#allocation17_spill] sm:$0xff] }
0x15ca   :  { %v6790_v32 = vmul.f32 -1.442695, %v9337_v30 }
0x15cb   :  { %9737 = vpow2.f32 %v6789_v19 }
0x15cc   :  { %9739 = vpow2.f32 %v6790_v32 }
0x15cd   :  { %9741 = vtanh.f32 %v9339_v0 }
0x15ce   :  { %9743 = vpow2.f32 %v6791_v27  ;;  %v13085_v27 = vld [vmem:[#allocation16_spill] sm:$0xff] }
0x15d5   :  { %v9738_v8 = vpop.eup %9737 }
0x15d6   :  { %v5460_v12 = vadd.f32 1.0, %v9738_v8  ;;  %v9740_v39 = vpop.eup %9739 }
0x15d7   :  { %v5461_v18 = vadd.f32 1.0, %v9740_v39  ;;  %v9742_v51 = vpop.eup %9741  ;;  %v13084_v39 = vld [vmem:[#allocation15_spill] sm:$0xff] }
0x15d8   :  { %9745 = vrcp.f32 %v5460_v12  ;;  %v9744_v22 = vpop.eup %9743  ;;  %v13081_v12 = vld [vmem:[#allocation97_spill] sm:$0xff] }
0x15d9   :  { %9747 = vrcp.f32 %v5461_v18  ;;  %v5462_v19 = vadd.f32 1.0, %v9744_v22  ;;  %v13080_v22 = vld [vmem:[#allocation96_spill] sm:$0xff]  ;;  %v13087_v18 = vld [vmem:[#allocation18_spill] sm:$0xff] }
0x15db   :  { %9749 = vrcp.f32 %v5462_v19  ;;  %v13091_v19 = vld [vmem:[#allocation22_spill] sm:$0xff] }
0x15e2   :  { %v9746_v41 = vpop.eup %9745 }
0x15e3   :  { %v5471_v23 = vmul.f32 %v9746_v41, %v9742_v51  ;;  %v9748_v30 = vpop.eup %9747  ;;  %v13083_v51 = vld [vmem:[#allocation130_spill] sm:$0xff]  ;;  %v13088_v41 = vld [vmem:[#allocation19_spill] sm:$0xff] }
0x15e4   :  { %v5470_v32 = vmul.f32 %v9748_v30, %v11604_v3  ;;  %v13082_v3 = vld [vmem:[#allocation98_spill] sm:$0xff]  ;;  %v13090_v30 = vld [vmem:[#allocation21_spill] sm:$0xff] }
0x15e5   :  { %v9750_v8 = vpop.eup %9749 }
0x15e6   :  { %v11762_v10 = vadd.f32 %v5471_v23, %v5470_v32  ;;  %v13089_v23 = vld [vmem:[#allocation20_spill] sm:$0xff]  ;;  %v13092_v32 = vld [vmem:[#allocation23_spill] sm:$0xff] }
0x15e8   :  { %9751 = vtanh.f32 %v11762_v10 }
0x15f2   :  { %v9752_v0 = vpop.eup %9751 }
0x15f3   :  { %v5474_v55 = vmul.f32 %v9752_v0, %v9750_v8  ;;  %v13093_v8 = vld [vmem:[#allocation24_spill] sm:$0xff]  ;;  %v13094_v0 = vld [vmem:[#allocation25_spill] sm:$0xff] }
0x15f5   :  { %5476 = vst [vmem:[#allocation10 + $0x24] sm:$0xf] %v5474_v55  ;;  %5542 = vmatmul.mubr.f32.vlgmr.msra.gmra.mrb[40].mxu0 %v5474_v55  ;;  %5613 = vmatmul.mubr.f32.vlgmr.msra.gmra.mrb[40].mxu1 %v5474_v55 }
0x15f6   :  { %8855 = vmatpush1.bf16.msra.mxu0 %v12988_v63  ;;  %8887 = vmatpush1.bf16.msra.mxu1 %v12989_v46 }
0x15f7   :  { %8857 = vmatprep.subr.bf16.mxu0 %v12990_v25  ;;  %8889 = vmatprep.subr.bf16.mxu1 %v12991_v17 }
0x15f8   :  { %5683 = vmatprep.mubr.f32.mxu0 %v12411_v31  ;;  %5754 = vmatprep.mubr.f32.mxu1 %v12411_v31 }
0x15fa   :  { %8859 = vmatpush1.bf16.msra.mxu0 %v13080_v22  ;;  %8891 = vmatpush1.bf16.msra.mxu1 %v13081_v12 }
0x15fb   :  { %8861 = vmatprep.subr.bf16.mxu0 %v13082_v3  ;;  %8893 = vmatprep.subr.bf16.mxu1 %v12995_v53 }
0x15fe   :  { %8863 = vmatpush1.bf16.msra.mxu0 %v12996_v24  ;;  %8895 = vmatpush1.bf16.msra.mxu1 %v12997_v61 }
0x15ff   :  { %8865 = vmatprep.subr.bf16.mxu0 %v12998_v1  ;;  %8897 = vmatprep.subr.bf16.mxu1 %v12999_v45 }
0x1602   :  { %8867 = vmatpush1.bf16.msra.mxu0 %v13000_v56  ;;  %8899 = vmatpush1.bf16.msra.mxu1 %v13001_v2 }
0x1603   :  { %8869 = vmatprep.subr.bf16.mxu0 %v13002_v33  ;;  %8901 = vmatprep.subr.bf16.mxu1 %v13003_v52 }
0x1606   :  { %8871 = vmatpush1.bf16.msra.mxu0 %v13004_v43  ;;  %8903 = vmatpush1.bf16.msra.mxu1 %v13005_v49 }
0x1607   :  { %8873 = vmatprep.subr.bf16.mxu0 %v11426_v4  ;;  %8905 = vmatprep.subr.bf16.mxu1 %v11428_v57 }
0x160a   :  { %8875 = vmatpush1.bf16.msra.mxu0 %v11432_v13  ;;  %8907 = vmatpush1.bf16.msra.mxu1 %v11434_v48 }
0x160b   :  { %8877 = vmatprep.subr.bf16.mxu0 %v11438_v16  ;;  %8909 = vmatprep.subr.bf16.mxu1 %v11440_v60 }
0x160e   :  { %8879 = vmatpush1.bf16.msra.mxu0 %v11444_v35  ;;  %8911 = vmatpush1.bf16.msra.mxu1 %v11446_v29 }
0x160f   :  { %8881 = vmatprep.subr.bf16.mxu0 %v11450_v9  ;;  %8913 = vmatprep.subr.bf16.mxu1 %v11452_v20 }
0x1612   :  { %8883 = vmatpush1.bf16.msra.mxu0 %v11456_v21  ;;  %8915 = vmatpush1.bf16.msra.mxu1 %v13083_v51 }
0x1613   :  { %8917 = vmatprep.subr.bf16.mxu0 %v13084_v39  ;;  %8949 = vmatprep.subr.bf16.mxu1 %v13085_v27  ;;  %v13100_v27 = vld [vmem:[#allocation31_spill] sm:$0xff] }
0x1615   :  { %5684 = vmatmul.mubr.f32.vlgmr.msra.gmra.mrb[42].mxu0 %v5474_v55  ;;  %5755 = vmatmul.mubr.f32.vlgmr.msra.gmra.mrb[42].mxu1 %v5474_v55  ;;  %v13095_v55 = vld [vmem:[#allocation26_spill] sm:$0xff] }
0x1616   :  { %8919 = vmatpush1.bf16.msra.mxu0 %v13086_v28  ;;  %8951 = vmatpush1.bf16.msra.mxu1 %v13087_v18  ;;  %v13096_v18 = vld [vmem:[#allocation27_spill] sm:$0xff]  ;;  %v13099_v28 = vld [vmem:[#allocation30_spill] sm:$0xff] }
0x1617   :  { %8921 = vmatprep.subr.bf16.mxu0 %v13088_v41  ;;  %8953 = vmatprep.subr.bf16.mxu1 %v13089_v23  ;;  %v13097_v41 = vld [vmem:[#allocation28_spill] sm:$0xff]  ;;  %v13098_v23 = vld [vmem:[#allocation29_spill] sm:$0xff] }
0x1618   :  { %5825 = vmatprep.mubr.f32.mxu0 %v12411_v31  ;;  %5896 = vmatprep.mubr.f32.mxu1 %v12411_v31 }
0x161a   :  { %8923 = vmatpush1.bf16.msra.mxu0 %v13090_v30  ;;  %8955 = vmatpush1.bf16.msra.mxu1 %v13091_v19  ;;  %v13101_v30 = vld [vmem:[#allocation32_spill] sm:$0xff]  ;;  %v13102_v19 = vld [vmem:[#allocation33_spill] sm:$0xff] }
0x161b   :  { %8925 = vmatprep.subr.bf16.mxu0 %v13092_v32  ;;  %8957 = vmatprep.subr.bf16.mxu1 %v13093_v8  ;;  %v13103_v32 = vld [vmem:[#allocation34_spill] sm:$0xff]  ;;  %v13104_v8 = vld [vmem:[#allocation35_spill] sm:$0xff] }
0x161e   :  { %8927 = vmatpush1.bf16.msra.mxu0 %v13094_v0  ;;  %8959 = vmatpush1.bf16.msra.mxu1 %v13095_v55  ;;  %v13105_v0 = vld [vmem:[#allocation36_spill] sm:$0xff]  ;;  %v13106_v55 = vld [vmem:[#allocation37_spill] sm:$0xff] }
0x161f   :  { %8929 = vmatprep.subr.bf16.mxu0 %v13096_v18  ;;  %8961 = vmatprep.subr.bf16.mxu1 %v13097_v41  ;;  %v13107_v18 = vld [vmem:[#allocation38_spill] sm:$0xff]  ;;  %v13108_v41 = vld [vmem:[#allocation39_spill] sm:$0xff] }
0x1622   :  { %8931 = vmatpush1.bf16.msra.mxu0 %v13098_v23  ;;  %8963 = vmatpush1.bf16.msra.mxu1 %v13099_v28  ;;  %v13109_v23 = vld [vmem:[#allocation40_spill] sm:$0xff]  ;;  %v13110_v28 = vld [vmem:[#allocation41_spill] sm:$0xff] }
0x1623   :  { %8933 = vmatprep.subr.bf16.mxu0 %v13100_v27  ;;  %8965 = vmatprep.subr.bf16.mxu1 %v13101_v30  ;;  %v13111_v27 = vld [vmem:[#allocation42_spill] sm:$0xff]  ;;  %v13112_v30 = vld [vmem:[#allocation43_spill] sm:$0xff] }
0x1626   :  { %8935 = vmatpush1.bf16.msra.mxu0 %v13102_v19  ;;  %8967 = vmatpush1.bf16.msra.mxu1 %v13103_v32  ;;  %v13113_v19 = vld [vmem:[#allocation44_spill] sm:$0xff]  ;;  %v13114_v32 = vld [vmem:[#allocation45_spill] sm:$0xff] }
0x1627   :  { %8937 = vmatprep.subr.bf16.mxu0 %v13104_v8  ;;  %8969 = vmatprep.subr.bf16.mxu1 %v13105_v0  ;;  %v13115_v8 = vld [vmem:[#allocation46_spill] sm:$0xff]  ;;  %v13116_v0 = vld [vmem:[#allocation47_spill] sm:$0xff] }
0x162a   :  { %8939 = vmatpush1.bf16.msra.mxu0 %v13106_v55  ;;  %8971 = vmatpush1.bf16.msra.mxu1 %v13107_v18  ;;  %v13117_v55 = vld [vmem:[#allocation48_spill] sm:$0xff]  ;;  %v13150_v18 = vld [vmem:[#allocation79_spill] sm:$0xff] }
0x162b   :  { %8941 = vmatprep.subr.bf16.mxu0 %v13108_v41  ;;  %8973 = vmatprep.subr.bf16.mxu1 %v13109_v23  ;;  %v13118_v23 = vld [vmem:[#allocation49_spill] sm:$0xff]  ;;  %v13132_v41 = vld [vmem:[#allocation63_spill] sm:$0xff] }
0x162e   :  { %8943 = vmatpush1.bf16.msra.mxu0 %v13110_v28  ;;  %8975 = vmatpush1.bf16.msra.mxu1 %v13111_v27  ;;  %v13119_v28 = vld [vmem:[#allocation50_spill] sm:$0xff]  ;;  %v13120_v27 = vld [vmem:[#allocation51_spill] sm:$0xff] }
0x162f   :  { %8945 = vmatprep.subr.bf16.mxu0 %v13112_v30  ;;  %8977 = vmatprep.subr.bf16.mxu1 %v13113_v19  ;;  %v13121_v30 = vld [vmem:[#allocation52_spill] sm:$0xff]  ;;  %v13131_v19 = vld [vmem:[#allocation62_spill] sm:$0xff] }
0x1632   :  { %8947 = vmatpush1.bf16.msra.mxu0 %v13114_v32  ;;  %8979 = vmatpush1.bf16.msra.mxu1 %v13115_v8  ;;  %v13122_v8 = vld [vmem:[#allocation53_spill] sm:$0xff]  ;;  %v13125_v32 = vld [vmem:[#allocation56_spill] sm:$0xff] }
0x1633   :  { %8981 = vmatprep.subr.bf16.mxu0 %v13116_v0  ;;  %9013 = vmatprep.subr.bf16.mxu1 %v13117_v55  ;;  %v13123_v0 = vld [vmem:[#allocation54_spill] sm:$0xff]  ;;  %v13124_v55 = vld [vmem:[#allocation55_spill] sm:$0xff] }
0x1635   :  { %5826 = vmatmul.mubr.f32.vlgmr.msra.gmra.mrb[42].mxu0 %v11719_v40  ;;  %5897 = vmatmul.mubr.f32.vlgmr.msra.gmra.mrb[42].mxu1 %v11719_v40  ;;  %v13126_v40 = vld [vmem:[#allocation57_spill] sm:$0xff] }
0x1636   :  { %8983 = vmatpush1.bf16.msra.mxu0 %v13118_v23  ;;  %9015 = vmatpush1.bf16.msra.mxu1 %v13119_v28  ;;  %v13127_v23 = vld [vmem:[#allocation58_spill] sm:$0xff]  ;;  %v13128_v28 = vld [vmem:[#allocation59_spill] sm:$0xff] }
0x1637   :  { %8985 = vmatprep.subr.bf16.mxu0 %v13120_v27  ;;  %9017 = vmatprep.subr.bf16.mxu1 %v13121_v30  ;;  %v13129_v27 = vld [vmem:[#allocation60_spill] sm:$0xff]  ;;  %v13130_v30 = vld [vmem:[#allocation61_spill] sm:$0xff] }
0x1638   :  { %5991 = vmatprep.mubr.f32.mxu0 %v12411_v31  ;;  %6062 = vmatprep.mubr.f32.mxu1 %v12411_v31 }
0x163a   :  { %8987 = vmatpush1.bf16.msra.mxu0 %v13122_v8  ;;  %9019 = vmatpush1.bf16.msra.mxu1 %v13123_v0  ;;  %v13133_v8 = vld [vmem:[#allocation64_spill] sm:$0xff]  ;;  %v13134_v0 = vld [vmem:[#allocation65_spill] sm:$0xff] }
0x163b   :  { %8989 = vmatprep.subr.bf16.mxu0 %v13124_v55  ;;  %9021 = vmatprep.subr.bf16.mxu1 %v13125_v32  ;;  %v13135_v55 = vld [vmem:[#allocation66_spill] sm:$0xff]  ;;  %v13136_v32 = vld [vmem:[#allocation67_spill] sm:$0xff] }
0x163e   :  { %8991 = vmatpush1.bf16.msra.mxu0 %v13126_v40  ;;  %9023 = vmatpush1.bf16.msra.mxu1 %v13127_v23  ;;  %v13137_v40 = vld [vmem:[#allocation68_spill] sm:$0xff]  ;;  %v13138_v23 = vld [vmem:[#allocation69_spill] sm:$0xff] }
0x163f   :  { %8993 = vmatprep.subr.bf16.mxu0 %v13128_v28  ;;  %9025 = vmatprep.subr.bf16.mxu1 %v13129_v27  ;;  %v13139_v28 = vld [vmem:[#allocation70_spill] sm:$0xff]  ;;  %v13140_v27 = vld [vmem:[#allocation71_spill] sm:$0xff] }
0x1642   :  { %8995 = vmatpush1.bf16.msra.mxu0 %v13130_v30  ;;  %9027 = vmatpush1.bf16.msra.mxu1 %v13131_v19  ;;  %v13141_v30 = vld [vmem:[#allocation72_spill] sm:$0xff]  ;;  %v13142_v19 = vld [vmem:[#allocation73_spill] sm:$0xff] }
0x1643   :  { %8997 = vmatprep.subr.bf16.mxu0 %v13132_v41  ;;  %9029 = vmatprep.subr.bf16.mxu1 %v13133_v8  ;;  %v13143_v41 = vld [vmem:[#allocation74_spill] sm:$0xff]  ;;  %v13144_v8 = vld [vmem:[#allocation75_spill] sm:$0xff] }
0x1646   :  { %8999 = vmatpush1.bf16.msra.mxu0 %v13134_v0  ;;  %9031 = vmatpush1.bf16.msra.mxu1 %v13135_v55  ;;  %v13145_v0 = vld [vmem:[#allocation76_spill] sm:$0xff]  ;;  %v13146_v55 = vld [vmem:[#allocation77_spill] sm:$0xff] }
0x1647   :  { %9001 = vmatprep.subr.bf16.mxu0 %v13136_v32  ;;  %9033 = vmatprep.subr.bf16.mxu1 %v13137_v40  ;;  %v13147_v32 = vld [vmem:[#allocation78_spill] sm:$0xff]  ;;  %v13148_v40 = vld [vmem:[#allocation91_spill] sm:$0xff] }
0x164a   :  { %9003 = vmatpush1.bf16.msra.mxu0 %v13138_v23  ;;  %9035 = vmatpush1.bf16.msra.mxu1 %v13139_v28  ;;  %v13149_v23 = vld [vmem:[#allocation92_spill] sm:$0xff] }
0x164b   :  { %9005 = vmatprep.subr.bf16.mxu0 %v13140_v27  ;;  %9037 = vmatprep.subr.bf16.mxu1 %v13141_v30 }
0x164e   :  { %9007 = vmatpush1.bf16.msra.mxu0 %v13142_v19  ;;  %9039 = vmatpush1.bf16.msra.mxu1 %v13143_v41 }
0x164f   :  { %9009 = vmatprep.subr.bf16.mxu0 %v13144_v8  ;;  %9041 = vmatprep.subr.bf16.mxu1 %v13145_v0 }
0x1652   :  { %9011 = vmatpush1.bf16.msra.mxu0 %v13146_v55  ;;  %9043 = vmatpush1.bf16.msra.mxu1 %v13147_v32 }
0x1653   :  { %9045 = vmatprep.subr.bf16.mxu0 %v13148_v40  ;;  %9077 = vmatprep.subr.bf16.mxu1 %v13149_v23 }
0x1708   :  { %v5827_v28 = vpop.f32.mrb[42].mxu0  ;;  %v5898_v27 = vpop.f32.mrb[42].mxu1 }
0x1709   :  { %v9348_v30 = vadd.f32 %v5827_v28, %v13150_v18  ;;  %v5829_v39 = vpop.f32.mrb[43].mxu0  ;;  %v5900_v19 = vpop.f32.mrb[43].mxu1  ;;  %v9350_v55 = vadd.f32 %v5898_v27, %v11550_v58 }
0x170a   :  { %v9349_v41 = vadd.f32 %v5829_v39, %v11545_v44  ;;  %v9351_v32 = vadd.f32 %v5900_v19, %v11553_v54 }
0x170b   :  { %v6792_v51 = vmul.f32 -1.442695, %v9348_v30  ;;  %v6794_v0 = vmul.f32 -1.442695, %v9350_v55 }
0x170c   :  { %v6793_v8 = vmul.f32 -1.442695, %v9349_v41 }
0x170d   :  { %9753 = vpow2.f32 %v6792_v51 }
0x170e   :  { %9755 = vpow2.f32 %v6793_v8 }
0x170f   :  { %9757 = vtanh.f32 %v9351_v32 }
0x1710   :  { %9759 = vpow2.f32 %v6794_v0  ;;  %v13167_v0 = vld [vmem:[#allocation121_spill] sm:$0xff] }
0x1717   :  { %v9754_v40 = vpop.eup %9753 }
0x1718   :  { %v5912_v21 = vadd.f32 1.0, %v9754_v40  ;;  %v9756_v23 = vpop.eup %9755  ;;  %v13168_v40 = vld [vmem:[#allocation122_spill] sm:$0xff] }
0x1719   :  { %v5913_v28 = vadd.f32 1.0, %v9756_v23  ;;  %v9758_v18 = vpop.eup %9757  ;;  %v13169_v23 = vld [vmem:[#allocation86_spill] sm:$0xff] }
0x171a   :  { %9761 = vrcp.f32 %v5912_v21  ;;  %v9760_v20 = vpop.eup %9759  ;;  %v13164_v21 = vld [vmem:[#allocation118_spill] sm:$0xff] }
0x171b   :  { %9763 = vrcp.f32 %v5913_v28  ;;  %v5914_v51 = vadd.f32 1.0, %v9760_v20  ;;  %v13163_v20 = vld [vmem:[#allocation117_spill] sm:$0xff]  ;;  %v13170_v28 = vld [vmem:[#allocation88_spill] sm:$0xff] }
0x171d   :  { %9765 = vrcp.f32 %v5914_v51 }
0x1724   :  { %v9762_v39 = vpop.eup %9761 }
0x1725   :  { %v5923_v30 = vmul.f32 %v9762_v39, %v9758_v18  ;;  %v9764_v41 = vpop.eup %9763  ;;  %v13166_v18 = vld [vmem:[#allocation120_spill] sm:$0xff] }
0x1726   :  { %v5922_v8 = vmul.f32 %v9764_v41, %v11716_v14  ;;  %v13165_v14 = vld [vmem:[#allocation119_spill] sm:$0xff] }
0x1727   :  { %v9766_v19 = vpop.eup %9765  ;;  %v13171_v41 = vld [vmem:[#allocation123_spill] sm:$0xff] }
0x1728   :  { %v11874_v27 = vadd.f32 %v5923_v30, %v5922_v8 }
0x172a   :  { %9767 = vtanh.f32 %v11874_v27 }
0x1734   :  { %v9768_v32 = vpop.eup %9767 }
0x1735   :  { %v11877_v55 = vmul.f32 %v9768_v32, %v9766_v19 }
0x1737   :  { %5992 = vmatmul.mubr.f32.vlgmr.msra.gmra.mrb[40].mxu0 %v11877_v55  ;;  %6063 = vmatmul.mubr.f32.vlgmr.msra.gmra.mrb[40].mxu1 %v11877_v55 }
0x1738   :  { %9047 = vmatpush1.bf16.msra.mxu0 %v12482_v6  ;;  %9079 = vmatpush1.bf16.msra.mxu1 %v12483_v7  ;;  %v13151_v6 = vld [vmem:[#allocation105_spill] sm:$0xff]  ;;  %v13152_v7 = vld [vmem:[#allocation106_spill] sm:$0xff] }
0x1739   :  { %9049 = vmatprep.subr.bf16.mxu0 %v12484_v62  ;;  %9081 = vmatprep.subr.bf16.mxu1 %v12485_v59  ;;  %v13153_v62 = vld [vmem:[#allocation107_spill] sm:$0xff]  ;;  %v13154_v59 = vld [vmem:[#allocation108_spill] sm:$0xff] }
0x173a   :  { %6159 = vmatprep.mubr.f32.mxu0 %v12411_v31  ;;  %6230 = vmatprep.mubr.f32.mxu1 %v12411_v31 }
0x173c   :  { %9051 = vmatpush1.bf16.msra.mxu0 %v12547_v5  ;;  %9083 = vmatpush1.bf16.msra.mxu1 %v12548_v26  ;;  %v13155_v5 = vld [vmem:[#allocation109_spill] sm:$0xff]  ;;  %v13156_v26 = vld [vmem:[#allocation110_spill] sm:$0xff] }
0x173d   :  { %9053 = vmatprep.subr.bf16.mxu0 %v12613_v50  ;;  %9085 = vmatprep.subr.bf16.mxu1 %v12614_v11  ;;  %v13157_v50 = vld [vmem:[#allocation111_spill] sm:$0xff]  ;;  %v13158_v11 = vld [vmem:[#allocation112_spill] sm:$0xff] }
0x1740   :  { %9055 = vmatpush1.bf16.msra.mxu0 %v12679_v42  ;;  %9087 = vmatpush1.bf16.msra.mxu1 %v12680_v47  ;;  %v13159_v42 = vld [vmem:[#allocation113_spill] sm:$0xff]  ;;  %v13160_v47 = vld [vmem:[#allocation114_spill] sm:$0xff] }
0x1741   :  { %9057 = vmatprep.subr.bf16.mxu0 %v12745_v38  ;;  %9089 = vmatprep.subr.bf16.mxu1 %v12746_v34  ;;  %v13161_v38 = vld [vmem:[#allocation115_spill] sm:$0xff]  ;;  %v13162_v34 = vld [vmem:[#allocation116_spill] sm:$0xff] }
0x1744   :  { %9059 = vmatpush1.bf16.msra.mxu0 %v13151_v6  ;;  %9091 = vmatpush1.bf16.msra.mxu1 %v13152_v7 }
0x1745   :  { %9061 = vmatprep.subr.bf16.mxu0 %v13153_v62  ;;  %9093 = vmatprep.subr.bf16.mxu1 %v13154_v59 }
0x1748   :  { %9063 = vmatpush1.bf16.msra.mxu0 %v13155_v5  ;;  %9095 = vmatpush1.bf16.msra.mxu1 %v13156_v26 }
0x1749   :  { %9065 = vmatprep.subr.bf16.mxu0 %v13157_v50  ;;  %9097 = vmatprep.subr.bf16.mxu1 %v13158_v11 }
0x174c   :  { %9067 = vmatpush1.bf16.msra.mxu0 %v13159_v42  ;;  %9099 = vmatpush1.bf16.msra.mxu1 %v13160_v47 }
0x174d   :  { %9069 = vmatprep.subr.bf16.mxu0 %v13161_v38  ;;  %9101 = vmatprep.subr.bf16.mxu1 %v13162_v34 }
0x1750   :  { %9071 = vmatpush1.bf16.msra.mxu0 %v13163_v20  ;;  %9103 = vmatpush1.bf16.msra.mxu1 %v13164_v21 }
0x1751   :  { %9073 = vmatprep.subr.bf16.mxu0 %v13165_v14  ;;  %9105 = vmatprep.subr.bf16.mxu1 %v13166_v18 }
0x1754   :  { %9075 = vmatpush1.bf16.msra.mxu0 %v13167_v0  ;;  %9107 = vmatpush1.bf16.msra.mxu1 %v13168_v40 }
0x1755   :  { %9109 = vmatprep.subr.bf16.mxu0 %v13169_v23  ;;  %9141 = vmatprep.subr.bf16.mxu1 %v13170_v28 }
0x180a   :  { %v5993_v39 = vpop.f32.mrb[40].mxu0  ;;  %v6064_v30 = vpop.f32.mrb[40].mxu1 }
0x180b   :  { %v9344_v51 = vadd.f32 %v5993_v39, %v13171_v41  ;;  %v5995_v8 = vpop.f32.mrb[41].mxu0  ;;  %v6066_v19 = vpop.f32.mrb[41].mxu1  ;;  %v9346_v62 = vadd.f32 %v6064_v30, %v12985_v15  ;;  %v13200_v39 = vld [vmem:[#allocation40_spill] sm:$0xff]  ;;  %v13201_v30 = vld [vmem:[#allocation41_spill] sm:$0xff] }
0x180c   :  { %v9345_v32 = vadd.f32 %v5995_v8, %v13079_v36  ;;  %v9347_v59 = vadd.f32 %v6066_v19, %v12986_v37  ;;  %v13203_v8 = vld [vmem:[#allocation43_spill] sm:$0xff]  ;;  %v13204_v19 = vld [vmem:[#allocation44_spill] sm:$0xff] }
0x180d   :  { %v6795_v6 = vmul.f32 -1.442695, %v9344_v51  ;;  %v6797_v5 = vmul.f32 -1.442695, %v9346_v62  ;;  %v13202_v51 = vld [vmem:[#allocation42_spill] sm:$0xff]  ;;  %v13208_v62 = vld [vmem:[#allocation48_spill] sm:$0xff] }
0x180e   :  { %v6796_v7 = vmul.f32 -1.442695, %v9345_v32  ;;  %v13205_v32 = vld [vmem:[#allocation45_spill] sm:$0xff] }
0x180f   :  { %9769 = vpow2.f32 %v6795_v6  ;;  %v13206_v6 = vld [vmem:[#allocation46_spill] sm:$0xff] }
0x1810   :  { %9771 = vpow2.f32 %v6796_v7  ;;  %v13207_v7 = vld [vmem:[#allocation47_spill] sm:$0xff] }
0x1811   :  { %9773 = vtanh.f32 %v9347_v59  ;;  %v13209_v59 = vld [vmem:[#allocation49_spill] sm:$0xff] }
0x1812   :  { %9775 = vpow2.f32 %v6797_v5  ;;  %v13210_v5 = vld [vmem:[#allocation50_spill] sm:$0xff] }
0x1819   :  { %v9770_v26 = vpop.eup %9769 }
0x181a   :  { %v6078_v50 = vadd.f32 1.0, %v9770_v26  ;;  %v9772_v11 = vpop.eup %9771  ;;  %v13211_v26 = vld [vmem:[#allocation51_spill] sm:$0xff] }
0x181b   :  { %v6079_v42 = vadd.f32 1.0, %v9772_v11  ;;  %v9774_v47 = vpop.eup %9773  ;;  %v13213_v11 = vld [vmem:[#allocation53_spill] sm:$0xff] }
0x181c   :  { %9777 = vrcp.f32 %v6078_v50  ;;  %v9776_v38 = vpop.eup %9775  ;;  %v13212_v50 = vld [vmem:[#allocation52_spill] sm:$0xff] }
0x181d   :  { %9779 = vrcp.f32 %v6079_v42  ;;  %v6080_v14 = vadd.f32 1.0, %v9776_v38  ;;  %v13214_v42 = vld [vmem:[#allocation54_spill] sm:$0xff]  ;;  %v13216_v38 = vld [vmem:[#allocation56_spill] sm:$0xff] }
0x181f   :  { %9781 = vrcp.f32 %v6080_v14  ;;  %v13221_v14 = vld [vmem:[#allocation61_spill] sm:$0xff] }
0x1826   :  { %v9778_v34 = vpop.eup %9777 }
0x1827   :  { %v6089_v20 = vmul.f32 %v9778_v34, %v9774_v47  ;;  %v9780_v21 = vpop.eup %9779  ;;  %v13215_v47 = vld [vmem:[#allocation55_spill] sm:$0xff]  ;;  %v13218_v34 = vld [vmem:[#allocation58_spill] sm:$0xff] }
0x1828   :  { %v6088_v18 = vmul.f32 %v9780_v21, %v11762_v10  ;;  %v13196_v10 = vld [vmem:[#allocation36_spill] sm:$0xff] }
0x1829   :  { %v9782_v40 = vpop.eup %9781  ;;  %v13220_v21 = vld [vmem:[#allocation60_spill] sm:$0xff] }
0x182a   :  { %v11920_v0 = vadd.f32 %v6089_v20, %v6088_v18  ;;  %v13219_v20 = vld [vmem:[#allocation59_spill] sm:$0xff]  ;;  %v13222_v18 = vld [vmem:[#allocation62_spill] sm:$0xff] }
0x182c   :  { %9783 = vtanh.f32 %v11920_v0 }
0x1836   :  { %v9784_v23 = vpop.eup %9783 }
0x1837   :  { %v6092_v28 = vmul.f32 %v9784_v23, %v9782_v40  ;;  %v13224_v40 = vld [vmem:[#allocation64_spill] sm:$0xff]  ;;  %v13225_v23 = vld [vmem:[#allocation65_spill] sm:$0xff] }
0x1839   :  { %6094 = vst [vmem:[#allocation10 + $0x28] sm:$0xf] %v6092_v28  ;;  %6160 = vmatmul.mubr.f32.vlgmr.msra.gmra.mrb[44].mxu0 %v6092_v28  ;;  %6231 = vmatmul.mubr.f32.vlgmr.msra.gmra.mrb[44].mxu1 %v6092_v28 }
0x183a   :  { %9111 = vmatpush1.bf16.msra.mxu0 %v12988_v63  ;;  %9143 = vmatpush1.bf16.msra.mxu1 %v12989_v46  ;;  %v13172_v63 = vld [vmem:[#allocation128_spill] sm:$0xff]  ;;  %v13173_v46 = vld [vmem:[#allocation129_spill] sm:$0xff] }
0x183b   :  { %9113 = vmatprep.subr.bf16.mxu0 %v12990_v25  ;;  %9145 = vmatprep.subr.bf16.mxu1 %v12991_v17  ;;  %v13183_v25 = vld [vmem:[#allocation23_spill] sm:$0xff]  ;;  %v13184_v17 = vld [vmem:[#allocation24_spill] sm:$0xff] }
0x183c   :  { %6301 = vmatprep.mubr.f32.mxu0 %v12411_v31  ;;  %6372 = vmatprep.mubr.f32.mxu1 %v12411_v31 }
0x183e   :  { %9115 = vmatpush1.bf16.msra.mxu0 %v13080_v22  ;;  %9147 = vmatpush1.bf16.msra.mxu1 %v13081_v12  ;;  %v13197_v22 = vld [vmem:[#allocation37_spill] sm:$0xff]  ;;  %v13198_v12 = vld [vmem:[#allocation38_spill] sm:$0xff] }
0x183f   :  { %9117 = vmatprep.subr.bf16.mxu0 %v13082_v3  ;;  %9149 = vmatprep.subr.bf16.mxu1 %v12995_v53  ;;  %v13188_v53 = vld [vmem:[#allocation28_spill] sm:$0xff]  ;;  %v13199_v3 = vld [vmem:[#allocation39_spill] sm:$0xff] }
0x1842   :  { %9119 = vmatpush1.bf16.msra.mxu0 %v12996_v24  ;;  %9151 = vmatpush1.bf16.msra.mxu1 %v12997_v61  ;;  %v13189_v24 = vld [vmem:[#allocation29_spill] sm:$0xff]  ;;  %v13190_v61 = vld [vmem:[#allocation30_spill] sm:$0xff] }
0x1843   :  { %9121 = vmatprep.subr.bf16.mxu0 %v12998_v1  ;;  %9153 = vmatprep.subr.bf16.mxu1 %v12999_v45  ;;  %v13191_v1 = vld [vmem:[#allocation31_spill] sm:$0xff]  ;;  %v13192_v45 = vld [vmem:[#allocation32_spill] sm:$0xff] }
0x1846   :  { %9123 = vmatpush1.bf16.msra.mxu0 %v13000_v56  ;;  %9155 = vmatpush1.bf16.msra.mxu1 %v13001_v2  ;;  %v13193_v56 = vld [vmem:[#allocation33_spill] sm:$0xff]  ;;  %v13194_v2 = vld [vmem:[#allocation34_spill] sm:$0xff] }
0x1847   :  { %9125 = vmatprep.subr.bf16.mxu0 %v13002_v33  ;;  %9157 = vmatprep.subr.bf16.mxu1 %v13003_v52  ;;  %v13185_v52 = vld [vmem:[#allocation25_spill] sm:$0xff]  ;;  %v13195_v33 = vld [vmem:[#allocation35_spill] sm:$0xff] }
0x184a   :  { %9127 = vmatpush1.bf16.msra.mxu0 %v13004_v43  ;;  %9159 = vmatpush1.bf16.msra.mxu1 %v13005_v49  ;;  %v13186_v43 = vld [vmem:[#allocation26_spill] sm:$0xff]  ;;  %v13187_v49 = vld [vmem:[#allocation27_spill] sm:$0xff] }
0x184b   :  { %9129 = vmatprep.subr.bf16.mxu0 %v11426_v4  ;;  %9161 = vmatprep.subr.bf16.mxu1 %v11428_v57  ;;  %v13174_v4 = vld [vmem:[#allocation130_spill] sm:$0xff]  ;;  %v13175_v57 = vld [vmem:[#allocation15_spill] sm:$0xff] }
0x184e   :  { %9131 = vmatpush1.bf16.msra.mxu0 %v11432_v13  ;;  %9163 = vmatpush1.bf16.msra.mxu1 %v11434_v48  ;;  %v13176_v13 = vld [vmem:[#allocation16_spill] sm:$0xff]  ;;  %v13177_v48 = vld [vmem:[#allocation17_spill] sm:$0xff] }
0x184f   :  { %9133 = vmatprep.subr.bf16.mxu0 %v11438_v16  ;;  %9165 = vmatprep.subr.bf16.mxu1 %v11440_v60  ;;  %v13178_v16 = vld [vmem:[#allocation18_spill] sm:$0xff]  ;;  %v13179_v60 = vld [vmem:[#allocation19_spill] sm:$0xff] }
0x1852   :  { %9135 = vmatpush1.bf16.msra.mxu0 %v11444_v35  ;;  %9167 = vmatpush1.bf16.msra.mxu1 %v11446_v29  ;;  %v13180_v35 = vld [vmem:[#allocation20_spill] sm:$0xff]  ;;  %v13181_v29 = vld [vmem:[#allocation21_spill] sm:$0xff] }
0x1853   :  { %9137 = vmatprep.subr.bf16.mxu0 %v11450_v9  ;;  %9169 = vmatprep.subr.bf16.mxu1 %v13172_v63  ;;  %v13182_v9 = vld [vmem:[#allocation22_spill] sm:$0xff]  ;;  %v13227_v63 = vld [vmem:[#allocation67_spill] sm:$0xff] }
0x1856   :  { %9139 = vmatpush1.bf16.msra.mxu0 %v13173_v46  ;;  %9171 = vmatpush1.bf16.msra.mxu1 %v13174_v4  ;;  %v13228_v46 = vld [vmem:[#allocation68_spill] sm:$0xff]  ;;  %v13229_v4 = vld [vmem:[#allocation69_spill] sm:$0xff] }
0x1857   :  { %9173 = vmatprep.subr.bf16.mxu0 %v13175_v57  ;;  %9205 = vmatprep.subr.bf16.mxu1 %v13176_v13  ;;  %v13230_v57 = vld [vmem:[#allocation70_spill] sm:$0xff]  ;;  %v13231_v13 = vld [vmem:[#allocation71_spill] sm:$0xff] }
0x1859   :  { %6302 = vmatmul.mubr.f32.vlgmr.msra.gmra.mrb[46].mxu0 %v6092_v28  ;;  %6373 = vmatmul.mubr.f32.vlgmr.msra.gmra.mrb[46].mxu1 %v6092_v28  ;;  %v13226_v28 = vld [vmem:[#allocation66_spill] sm:$0xff] }
0x185a   :  { %9175 = vmatpush1.bf16.msra.mxu0 %v13177_v48  ;;  %9207 = vmatpush1.bf16.msra.mxu1 %v13178_v16  ;;  %v13232_v48 = vld [vmem:[#allocation72_spill] sm:$0xff]  ;;  %v13233_v16 = vld [vmem:[#allocation73_spill] sm:$0xff] }
0x185b   :  { %9177 = vmatprep.subr.bf16.mxu0 %v13179_v60  ;;  %9209 = vmatprep.subr.bf16.mxu1 %v13180_v35  ;;  %v13234_v60 = vld [vmem:[#allocation74_spill] sm:$0xff]  ;;  %v13235_v35 = vld [vmem:[#allocation75_spill] sm:$0xff] }
0x185c   :  { %6443 = vmatprep.mubr.f32.mxu0 %v12411_v31  ;;  %6514 = vmatprep.mubr.f32.mxu1 %v12411_v31 }
0x185e   :  { %9179 = vmatpush1.bf16.msra.mxu0 %v13181_v29  ;;  %9211 = vmatpush1.bf16.msra.mxu1 %v13182_v9  ;;  %v13236_v29 = vld [vmem:[#allocation76_spill] sm:$0xff]  ;;  %v13237_v9 = vld [vmem:[#allocation77_spill] sm:$0xff] }
0x185f   :  { %9181 = vmatprep.subr.bf16.mxu0 %v13183_v25  ;;  %9213 = vmatprep.subr.bf16.mxu1 %v13184_v17  ;;  %v13238_v25 = vld [vmem:[#allocation78_spill] sm:$0xff] }
0x1862   :  { %9183 = vmatpush1.bf16.msra.mxu0 %v13185_v52  ;;  %9215 = vmatpush1.bf16.msra.mxu1 %v13186_v43  ;;  %v13239_v43 = vld [vmem:[#allocation79_spill] sm:$0xff] }
0x1863   :  { %9185 = vmatprep.subr.bf16.mxu0 %v13187_v49  ;;  %9217 = vmatprep.subr.bf16.mxu1 %v13188_v53 }
0x1866   :  { %9187 = vmatpush1.bf16.msra.mxu0 %v13189_v24  ;;  %9219 = vmatpush1.bf16.msra.mxu1 %v13190_v61 }
0x1867   :  { %9189 = vmatprep.subr.bf16.mxu0 %v13191_v1  ;;  %9221 = vmatprep.subr.bf16.mxu1 %v13192_v45 }
0x186a   :  { %9191 = vmatpush1.bf16.msra.mxu0 %v13193_v56  ;;  %9223 = vmatpush1.bf16.msra.mxu1 %v13194_v2 }
0x186b   :  { %9193 = vmatprep.subr.bf16.mxu0 %v13195_v33  ;;  %9225 = vmatprep.subr.bf16.mxu1 %v13196_v10 }
0x186e   :  { %9195 = vmatpush1.bf16.msra.mxu0 %v13197_v22  ;;  %9227 = vmatpush1.bf16.msra.mxu1 %v13198_v12 }
0x186f   :  { %9197 = vmatprep.subr.bf16.mxu0 %v13199_v3  ;;  %9229 = vmatprep.subr.bf16.mxu1 %v13200_v39 }
0x1872   :  { %9199 = vmatpush1.bf16.msra.mxu0 %v13201_v30  ;;  %9231 = vmatpush1.bf16.msra.mxu1 %v13202_v51 }
0x1873   :  { %9201 = vmatprep.subr.bf16.mxu0 %v13203_v8  ;;  %9233 = vmatprep.subr.bf16.mxu1 %v13204_v19 }
0x1876   :  { %9203 = vmatpush1.bf16.msra.mxu0 %v13205_v32  ;;  %9235 = vmatpush1.bf16.msra.mxu1 %v13206_v6 }
0x1877   :  { %9237 = vmatprep.subr.bf16.mxu0 %v13207_v7  ;;  %9269 = vmatprep.subr.bf16.mxu1 %v13208_v62 }
0x1879   :  { %6444 = vmatmul.mubr.f32.vlgmr.msra.gmra.mrb[46].mxu0 %v11877_v55  ;;  %6515 = vmatmul.mubr.f32.vlgmr.msra.gmra.mrb[46].mxu1 %v11877_v55  ;;  %v13217_v55 = vld [vmem:[#allocation57_spill] sm:$0xff] }
0x187a   :  { %9239 = vmatpush1.bf16.msra.mxu0 %v13209_v59  ;;  %9271 = vmatpush1.bf16.msra.mxu1 %v13210_v5 }
0x187b   :  { %9241 = vmatprep.subr.bf16.mxu0 %v13211_v26  ;;  %9273 = vmatprep.subr.bf16.mxu1 %v13212_v50 }
0x187c   :  { %6609 = vmatprep.mubr.f32.mxu0 %v12411_v31  ;;  %6680 = vmatprep.mubr.f32.mxu1 %v12411_v31  ;;  %v13223_v31 = vld [vmem:[#allocation63_spill] sm:$0xff] }
0x187e   :  { %9243 = vmatpush1.bf16.msra.mxu0 %v13213_v11  ;;  %9275 = vmatpush1.bf16.msra.mxu1 %v13214_v42 }
0x187f   :  { %9245 = vmatprep.subr.bf16.mxu0 %v13215_v47  ;;  %9277 = vmatprep.subr.bf16.mxu1 %v13216_v38 }
0x1882   :  { %9247 = vmatpush1.bf16.msra.mxu0 %v13217_v55  ;;  %9279 = vmatpush1.bf16.msra.mxu1 %v13218_v34 }
0x1883   :  { %9249 = vmatprep.subr.bf16.mxu0 %v13219_v20  ;;  %9281 = vmatprep.subr.bf16.mxu1 %v13220_v21 }
0x1886   :  { %9251 = vmatpush1.bf16.msra.mxu0 %v13221_v14  ;;  %9283 = vmatpush1.bf16.msra.mxu1 %v13222_v18 }
0x1887   :  { %9253 = vmatprep.subr.bf16.mxu0 %v13223_v31  ;;  %9285 = vmatprep.subr.bf16.mxu1 %v13224_v40 }
0x188a   :  { %9255 = vmatpush1.bf16.msra.mxu0 %v13225_v23  ;;  %9287 = vmatpush1.bf16.msra.mxu1 %v13226_v28 }
0x188b   :  { %9257 = vmatprep.subr.bf16.mxu0 %v13227_v63  ;;  %9289 = vmatprep.subr.bf16.mxu1 %v13228_v46 }
0x188e   :  { %9259 = vmatpush1.bf16.msra.mxu0 %v13229_v4  ;;  %9291 = vmatpush1.bf16.msra.mxu1 %v13230_v57 }
0x188f   :  { %9261 = vmatprep.subr.bf16.mxu0 %v13231_v13  ;;  %9293 = vmatprep.subr.bf16.mxu1 %v13232_v48 }
0x1892   :  { %9263 = vmatpush1.bf16.msra.mxu0 %v13233_v16  ;;  %9295 = vmatpush1.bf16.msra.mxu1 %v13234_v60 }
0x1893   :  { %9265 = vmatprep.subr.bf16.mxu0 %v13235_v35  ;;  %9297 = vmatprep.subr.bf16.mxu1 %v13236_v29 }
0x1896   :  { %9267 = vmatpush1.bf16.msra.mxu0 %v13237_v9  ;;  %9299 = vmatpush1.bf16.msra.mxu1 %v13238_v25 }
0x194c   :  { %v6445_v17 = vpop.f32.mrb[46].mxu0  ;;  %v6516_v52 = vpop.f32.mrb[46].mxu1 }
0x194d   :  { %v9356_v49 = vadd.f32 %v6445_v17, %v13239_v43  ;;  %v6447_v53 = vpop.f32.mrb[47].mxu0  ;;  %v6518_v24 = vpop.f32.mrb[47].mxu1  ;;  %v9358_v56 = vadd.f32 %v6516_v52, %v11550_v58 }
0x194e   :  { %v9357_v61 = vadd.f32 %v6447_v53, %v11545_v44  ;;  %v9359_v2 = vadd.f32 %v6518_v24, %v11553_v54 }
0x194f   :  { %v6798_v1 = vmul.f32 -1.442695, %v9356_v49  ;;  %v6800_v33 = vmul.f32 -1.442695, %v9358_v56 }
0x1950   :  { %v6799_v45 = vmul.f32 -1.442695, %v9357_v61 }
0x1951   :  { %9785 = vpow2.f32 %v6798_v1 }
0x1952   :  { %9787 = vpow2.f32 %v6799_v45 }
0x1953   :  { %9789 = vtanh.f32 %v9359_v2 }
0x1954   :  { %9791 = vpow2.f32 %v6800_v33 }
0x195b   :  { %v9786_v10 = vpop.eup %9785 }
0x195c   :  { %v6530_v22 = vadd.f32 1.0, %v9786_v10  ;;  %v9788_v12 = vpop.eup %9787 }
0x195d   :  { %v6531_v3 = vadd.f32 1.0, %v9788_v12  ;;  %v9790_v39 = vpop.eup %9789 }
0x195e   :  { %9793 = vrcp.f32 %v6530_v22  ;;  %v9792_v30 = vpop.eup %9791 }
0x195f   :  { %9795 = vrcp.f32 %v6531_v3  ;;  %v6532_v19 = vadd.f32 1.0, %v9792_v30 }
0x1961   :  { %9797 = vrcp.f32 %v6532_v19 }
0x1968   :  { %v9794_v44 = vpop.eup %9793 }
0x1969   :  { %v6541_v51 = vmul.f32 %v9794_v44, %v9790_v39  ;;  %v9796_v8 = vpop.eup %9795 }
0x196a   :  { %v6540_v32 = vmul.f32 %v9796_v8, %v11874_v27 }
0x196b   :  { %v9798_v54 = vpop.eup %9797 }
0x196c   :  { %v6542_v58 = vadd.f32 %v6541_v51, %v6540_v32 }
0x196e   :  { %9799 = vtanh.f32 %v6542_v58 }
0x1978   :  { %v9800_v6 = vpop.eup %9799 }
0x1979   :  { %v6544_v7 = vmul.f32 %v9800_v6, %v9798_v54 }
0x197b   :  { %6610 = vmatmul.mubr.f32.vlgmr.msra.gmra.mrb[44].mxu0 %v6544_v7  ;;  %6681 = vmatmul.mubr.f32.vlgmr.msra.gmra.mrb[44].mxu1 %v6544_v7 }
0x1a4e   :  { %v6611_v62 = vpop.f32.mrb[44].mxu0  ;;  %v6682_v59 = vpop.f32.mrb[44].mxu1 }
0x1a4f   :  { %v9352_v5 = vadd.f32 %v6611_v62, %v13171_v41  ;;  %v6613_v26 = vpop.f32.mrb[45].mxu0  ;;  %v6684_v50 = vpop.f32.mrb[45].mxu1  ;;  %v9354_v27 = vadd.f32 %v6682_v59, %v12985_v15 }
0x1a50   :  { %v9353_v11 = vadd.f32 %v6613_v26, %v13079_v36  ;;  %v9355_v38 = vadd.f32 %v6684_v50, %v12986_v37 }
0x1a51   :  { %v6801_v42 = vmul.f32 -1.442695, %v9352_v5  ;;  %v6803_v55 = vmul.f32 -1.442695, %v9354_v27 }
0x1a52   :  { %v6802_v47 = vmul.f32 -1.442695, %v9353_v11 }
0x1a53   :  { %9801 = vpow2.f32 %v6801_v42 }
0x1a54   :  { %9803 = vpow2.f32 %v6802_v47 }
0x1a55   :  { %9805 = vtanh.f32 %v9355_v38 }
0x1a56   :  { %9807 = vpow2.f32 %v6803_v55 }
0x1a5d   :  { %v9802_v34 = vpop.eup %9801 }
0x1a5e   :  { %v6696_v20 = vadd.f32 1.0, %v9802_v34  ;;  %v9804_v21 = vpop.eup %9803 }
0x1a5f   :  { %v6697_v41 = vadd.f32 1.0, %v9804_v21  ;;  %v9806_v14 = vpop.eup %9805 }
0x1a60   :  { %9809 = vrcp.f32 %v6696_v20  ;;  %v9808_v18 = vpop.eup %9807 }
0x1a61   :  { %9811 = vrcp.f32 %v6697_v41  ;;  %v6698_v23 = vadd.f32 1.0, %v9808_v18 }
0x1a63   :  { %9813 = vrcp.f32 %v6698_v23 }
0x1a6a   :  { %v9810_v36 = vpop.eup %9809 }
0x1a6b   :  { %v6707_v31 = vmul.f32 %v9810_v36, %v9806_v14  ;;  %v9812_v40 = vpop.eup %9811 }
0x1a6c   :  { %v6706_v28 = vmul.f32 %v9812_v40, %v11920_v0 }
0x1a6d   :  { %v9814_v37 = vpop.eup %9813 }
0x1a6e   :  { %v6708_v15 = vadd.f32 %v6707_v31, %v6706_v28 }
0x1a70   :  { %9815 = vtanh.f32 %v6708_v15 }
0x1a7a   :  { %v9816_v63 = vpop.eup %9815 }
0x1a7b   :  { %v6710_v46 = vmul.f32 %v9816_v63, %v9814_v37 }
0x1a7d   :  { %6712 = vst [vmem:[#allocation10 + $0x2c] sm:$0xf] %v6710_v46 }
0x1a7e   :  { %9916 = shalt.err (!%p9913_p8)
}
0x1a7f   :  { %s9917_s15 = scalar_lea.hbm %s12056_s9, 768 }
0x1a80   :  { %p9918_p9 = scmp.ne.s32.totalorder %s12056_s9, %s9917_s15  ;;  %p9921_p10 = scmp.lt.u32.totalorder %s9917_s15, %s12056_s9 }
0x1a82   :  { %p9923_p11 = pnand %p9921_p10, %p9918_p9 }
0x1a84   :  { %9926 = shalt.err (!%p9923_p11)
}
0x1a85   :  { %s9944_s17 = smov 64   ;;  %s9945_s18 = smov 4  }
0x1a86   :  { %6724 = dma.vmem_to_hbm [thread:$0]  %s6719_s4, 768, %s12056_s9, [#allocation4], %s9944_s17, %s9944_s17, %s9945_s18  }
0x1a87   :  { %9933 = dma.done.wait [#allocation4], 768  }
0x1a88   :  { %9934 = vsyncadd [#allocation4], 4294966528 }
0x1a89   :  { %6728 = vsyncpa [#allocation3], 1 }
0x1a8a   :  { %6729 = vsyncpa [#allocation6], 1 }
0x1a8b   :  { %6730 = vsyncpa [#allocation9], 1 }
0x1a8c   :  { %6731 = vsyncpa [#allocation4], 1 }

</bundles_post_ra>
